<compile_context>
chip_gen: v7x
topology: tpu7x:2x2x1
jax: 0.10.0
libtpu: 0.0.40
codegen_flags: <defaults>
</compile_context>

<pallas_src>
import functools

import jax
import jax.numpy as jnp
from jax.experimental import pallas as pl
from jax.experimental.pallas import tpu as pltpu

EPS = 1e-6            # matches utils.basic.reduce_masked_mean
LANES = 128
SUBLANES = 8
ROW_QUANTUM = 32      # block_rows multiple of 32: valid tiling for f32/bf16/int8
MIN_PALLAS_ELEMS = ROW_QUANTUM * LANES   # below this, plain JAX is faster


def _hw_tuning():
    """(max_block_rows, vmem_limit_bytes) — generation aware."""
    try:
        vmem_cap = pltpu.get_tpu_info().vmem_capacity_bytes
    except Exception:
        vmem_cap = 64 * 1024 * 1024
    if vmem_cap >= 100 * 1024 * 1024:        # v5e / v6e: 128 MiB physical VMEM
        return 8192, 80 * 1024 * 1024
    return 4096, 40 * 1024 * 1024            # v7x: only 64 MiB physical VMEM


def _simple_loss_kernel(pw_ref, yp_ref, yt_ref, v_ref, num_ref, den_ref, *,
                        rows, block_rows, needs_mask):
    i = pl.program_id(0)

    @pl.when(i == 0)
    def _():
        num_ref[...] = jnp.zeros_like(num_ref)
        den_ref[...] = jnp.zeros_like(den_ref)

    pw = pw_ref[0]                       # runtime pos_weight (SMEM scalar)
    x = yp_ref[...].astype(jnp.float32)  # cast AFTER the load: HBM stays narrow
    y = yt_ref[...].astype(jnp.float32)
    v = v_ref[...].astype(jnp.float32)

    # Numerically stable BCE-with-logits (PyTorch semantics; pos_weight scales
    # the positive/target term):
    #   loss = (1 - y) * x + (1 + (pw - 1) * y) * softplus(-x)
    softplus_neg_x = jnp.maximum(-x, 0.0) + jnp.log1p(jnp.exp(-jnp.abs(x)))
    loss = (1.0 - y) * x + (1.0 + (pw - 1.0) * y) * softplus_neg_x

    num_term = loss * v
    den_term = v
    if needs_mask:
        # Ragged last block: rows beyond the true row count hold unspecified
        # data (possibly Inf/NaN), so mask BOTH terms, not just `valid`.
        row_ids = jax.lax.broadcasted_iota(jnp.int32, (block_rows, LANES), 0)
        in_bounds = (i * block_rows + row_ids) < rows
        num_term = jnp.where(in_bounds, num_term, 0.0)
        den_term = jnp.where(in_bounds, den_term, 0.0)

    # Fold (block_rows, 128) -> (8, 128) with pure VPU adds; the scalar
    # reduction happens once in the wrapper epilogue.
    groups = block_rows // SUBLANES
    num_ref[...] += jnp.sum(num_term.reshape(groups, SUBLANES, LANES), axis=0)
    den_ref[...] += jnp.sum(den_term.reshape(groups, SUBLANES, LANES), axis=0)


def _loss_jax(ypred, ytgt, valid, pos_weight):
    """Plain-JAX formula (reference + tiny-input fast path)."""
    x = jnp.asarray(ypred, jnp.float32)
    y = jnp.asarray(ytgt, jnp.float32)
    v = jnp.asarray(valid, jnp.float32)
    pw = jnp.asarray(pos_weight, jnp.float32)
    sp = jnp.maximum(-x, 0.0) + jnp.log1p(jnp.exp(-jnp.abs(x)))
    loss = (1.0 - y) * x + (1.0 + (pw - 1.0) * y) * sp
    return jnp.sum(loss * v) / (jnp.sum(v) + EPS)


def simple_loss(ypred, ytgt, valid, pos_weight):
    """Reproduces SimpleLoss.forward(ypred, ytgt, valid) -> scalar loss."""
    ypred = jnp.asarray(ypred)
    ytgt = jnp.asarray(ytgt)
    valid = jnp.asarray(valid)

    total = ypred.size
    if total < MIN_PALLAS_ELEMS:
        # Pallas launch overhead dominates for tiny tensors.
        return _loss_jax(ypred, ytgt, valid, pos_weight)

    pw = jnp.asarray(pos_weight, jnp.float32).reshape(1)

    rem = total % LANES
    if rem == 0:
        # Common case: pure metadata reshape, no extra HBM copy.
        def prep(a):
            return a.reshape(-1, LANES)
    else:
        # Rare fallback: pad the flat view to a lane multiple (costs one copy).
        # Padded logits are finite zeros and padded valid is 0 -> contribute 0.
        pad = LANES - rem

        def prep(a):
            return jnp.pad(a.reshape(-1), (0, pad)).reshape(-1, LANES)

    yp2, yt2, v2 = prep(ypred), prep(ytgt), prep(valid)
    rows = yp2.shape[0]

    max_block_rows, vmem_limit = _hw_tuning()
    block_rows = min(max_block_rows, (rows // ROW_QUANTUM) * ROW_QUANTUM)
    nblocks = -(-rows // block_rows)
    needs_mask = (rows % block_rows) != 0

    row_spec = pl.BlockSpec((block_rows, LANES), lambda i: (i, 0))
    acc_spec = pl.BlockSpec((SUBLANES, LANES), lambda i: (0, 0))

    kernel = functools.partial(_simple_loss_kernel, rows=rows,
                               block_rows=block_rows, needs_mask=needs_mask)

    num_out, den_out = pl.pallas_call(
        kernel,
        out_shape=(
            jax.ShapeDtypeStruct((SUBLANES, LANES), jnp.float32),
            jax.ShapeDtypeStruct((SUBLANES, LANES), jnp.float32),
        ),
        grid_spec=pltpu.PrefetchScalarGridSpec(
            num_scalar_prefetch=0,
            grid=(nblocks,),
            in_specs=[
                pl.BlockSpec(memory_space=pltpu.MemorySpace.SMEM),  # pos_weight
                row_spec,   # ypred (native dtype)
                row_spec,   # ytgt  (native dtype)
                row_spec,   # valid (native dtype)
            ],
            out_specs=[acc_spec, acc_spec],
        ),
        compiler_params=pltpu.CompilerParams(
            dimension_semantics=("arbitrary",),
            vmem_limit_bytes=vmem_limit),
    )(pw, yp2, yt2, v2)

    numer = jnp.sum(num_out)
    denom = jnp.sum(den_out)
    return numer / (denom + EPS)


if __name__ == "__main__":
    key = jax.random.PRNGKey(0)
    k1, k2, k3 = jax.random.split(key, 3)

    # BEV-style single-channel segmentation logits (simplebev uses 200x200 BEV
    # grids). 2*1*200*200 = 80000 elements = 625 lane-rows -> exercises the
    # zero-copy reshape, the narrow-dtype targets/mask, and the ragged-last-
    # block in-kernel masking.
    B, C, H, W = 2, 1, 200, 200
    pos_weight = 2.13   # deterministic "parameter" from __init__

    ypred = jax.random.normal(k1, (B, C, H, W), dtype=jnp.float32)
    ytgt = (jax.random.uniform(k2, (B, C, H, W)) > 0.5).astype(jnp.bfloat16)
    valid = (jax.random.uniform(k3, (B, C, H, W)) > 0.3).astype(jnp.bfloat16)

    out = simple_loss(ypred, ytgt, valid, pos_weight)
    out = jax.block_until_ready(out)

    ref = _loss_jax(ypred, ytgt, valid, pos_weight)
    assert jnp.allclose(out, ref, rtol=1e-4, atol=1e-5), (out, ref)

    print("KERNEL_OK")
</pallas_src>

<mosaic_0001>
module attributes {stable_mosaic.version = 11 : i64} {
  func.func @_simple_loss_kernel(%arg0: i32, %arg1: memref<1xf32, #tpu.memory_space<smem>>, %arg2: memref<608x128xf32, #tpu.memory_space<vmem>>, %arg3: memref<608x128xbf16, #tpu.memory_space<vmem>>, %arg4: memref<608x128xbf16, #tpu.memory_space<vmem>>, %arg5: memref<8x128xf32, #tpu.memory_space<vmem>>, %arg6: memref<8x128xf32, #tpu.memory_space<vmem>>) attributes {dimension_semantics = [#tpu.dimension_semantics<arbitrary>], iteration_bounds = array<i64: 2>, scalar_prefetch = 0 : i64, scratch_operands = 0 : i64, tpu.core_type = #tpu.core_type<tc>, window_params = [{transform_indices = @transform_0, window_bounds = array<i64: 1>}, {transform_indices = @transform_1, window_bounds = array<i64: 608, 128>}, {transform_indices = @transform_2, window_bounds = array<i64: 608, 128>}, {transform_indices = @transform_3, window_bounds = array<i64: 608, 128>}, {pipeline_mode = #tpu.pipeline_mode<synchronous>, transform_indices = @transform_4, window_bounds = array<i64: 8, 128>}, {pipeline_mode = #tpu.pipeline_mode<synchronous>, transform_indices = @transform_5, window_bounds = array<i64: 8, 128>}]} {
    %c0_i32 = arith.constant 0 : i32
    %0 = arith.cmpi eq, %arg0, %c0_i32 : i32
    %1 = arith.extui %0 : i1 to i32
    %c0_i32_0 = arith.constant 0 : i32
    %2 = arith.cmpi ne, %1, %c0_i32_0 : i32
    scf.if %2 {
      %cst_24 = arith.constant 0.000000e+00 : f32
      %50 = vector.broadcast %cst_24 : f32 to vector<8x128xf32>
      %c0_25 = arith.constant 0 : index
      %c0_26 = arith.constant 0 : index
      %51 = vector.load %arg5[%c0_25, %c0_26] : memref<8x128xf32, #tpu.memory_space<vmem>>, vector<8x128xf32>
      tpu.vector_store %arg5[%c0_25, %c0_26], %50 {strides = array<i32>} : memref<8x128xf32, #tpu.memory_space<vmem>>, vector<8x128xf32>,
      %cst_27 = arith.constant 0.000000e+00 : f32
      %52 = vector.broadcast %cst_27 : f32 to vector<8x128xf32>
      %c0_28 = arith.constant 0 : index
      %c0_29 = arith.constant 0 : index
      %53 = vector.load %arg6[%c0_28, %c0_29] : memref<8x128xf32, #tpu.memory_space<vmem>>, vector<8x128xf32>
      tpu.vector_store %arg6[%c0_28, %c0_29], %52 {strides = array<i32>} : memref<8x128xf32, #tpu.memory_space<vmem>>, vector<8x128xf32>,
    } else {
    }
    %c0 = arith.constant 0 : index
    %3 = memref.load %arg1[%c0] : memref<1xf32, #tpu.memory_space<smem>>
    %c0_1 = arith.constant 0 : index
    %c0_2 = arith.constant 0 : index
    %4 = vector.load %arg2[%c0_1, %c0_2] : memref<608x128xf32, #tpu.memory_space<vmem>>, vector<608x128xf32>
    %c0_3 = arith.constant 0 : index
    %c0_4 = arith.constant 0 : index
    %5 = vector.load %arg3[%c0_3, %c0_4] : memref<608x128xbf16, #tpu.memory_space<vmem>>, vector<608x128xbf16>
    %6 = arith.extf %5 : vector<608x128xbf16> to vector<608x128xf32>
    %c0_5 = arith.constant 0 : index
    %c0_6 = arith.constant 0 : index
    %7 = vector.load %arg4[%c0_5, %c0_6] : memref<608x128xbf16, #tpu.memory_space<vmem>>, vector<608x128xbf16>
    %8 = arith.extf %7 : vector<608x128xbf16> to vector<608x128xf32>
    %cst = arith.constant 0.000000e+00 : f32
    %9 = vector.broadcast %cst : f32 to vector<608x128xf32>
    %10 = arith.subf %9, %4 : vector<608x128xf32>
    %cst_7 = arith.constant 0.000000e+00 : f32
    %11 = vector.broadcast %cst_7 : f32 to vector<608x128xf32>
    %12 = arith.maximumf %10, %11 : vector<608x128xf32>
    %13 = math.absf %4 : vector<608x128xf32>
    %cst_8 = arith.constant 0.000000e+00 : f32
    %14 = vector.broadcast %cst_8 : f32 to vector<608x128xf32>
    %15 = arith.subf %14, %13 : vector<608x128xf32>
    %16 = math.exp %15 : vector<608x128xf32>
    %17 = math.log1p %16 : vector<608x128xf32>
    %18 = arith.addf %12, %17 : vector<608x128xf32>
    %cst_9 = arith.constant 1.000000e+00 : f32
    %19 = vector.broadcast %cst_9 : f32 to vector<608x128xf32>
    %20 = arith.subf %19, %6 : vector<608x128xf32>
    %21 = arith.mulf %20, %4 : vector<608x128xf32>
    %cst_10 = arith.constant 1.000000e+00 : f32
    %22 = arith.subf %3, %cst_10 : f32
    %23 = vector.broadcast %22 : f32 to vector<608x128xf32>
    %24 = arith.mulf %23, %6 : vector<608x128xf32>
    %cst_11 = arith.constant 1.000000e+00 : f32
    %25 = vector.broadcast %cst_11 : f32 to vector<608x128xf32>
    %26 = arith.addf %25, %24 : vector<608x128xf32>
    %27 = arith.mulf %26, %18 : vector<608x128xf32>
    %28 = arith.addf %21, %27 : vector<608x128xf32>
    %29 = arith.mulf %28, %8 : vector<608x128xf32>
    %30 = tpu.iota {dimensions = array<i32: 0>} : vector<608x128xi32>
    %c608_i32 = arith.constant 608 : i32
    %31 = arith.muli %arg0, %c608_i32 : i32
    %32 = vector.broadcast %31 : i32 to vector<608x128xi32>
    %33 = arith.addi %32, %30 : vector<608x128xi32>
    %c625_i32 = arith.constant 625 : i32
    %34 = vector.broadcast %c625_i32 : i32 to vector<608x128xi32>
    %35 = arith.cmpi slt, %33, %34 : vector<608x128xi32>
    %cst_12 = arith.constant 0.000000e+00 : f32
    %36 = vector.broadcast %cst_12 : f32 to vector<608x128xf32>
    %37 = arith.select %35, %29, %36 : vector<608x128xi1>, vector<608x128xf32>
    %cst_13 = arith.constant 0.000000e+00 : f32
    %38 = vector.broadcast %cst_13 : f32 to vector<608x128xf32>
    %39 = arith.select %35, %8, %38 : vector<608x128xi1>, vector<608x128xf32>
    %c0_14 = arith.constant 0 : index
    %c0_15 = arith.constant 0 : index
    %40 = vector.load %arg5[%c0_14, %c0_15] : memref<8x128xf32, #tpu.memory_space<vmem>>, vector<8x128xf32>
    %41 = vector.shape_cast %37 : vector<608x128xf32> to vector<76x8x128xf32>
    %cst_16 = arith.constant dense<0.000000e+00> : vector<8x128xf32>
    %42 = vector.multi_reduction <add>, %41, %cst_16 [0] : vector<76x8x128xf32> to vector<8x128xf32>
    %43 = arith.addf %40, %42 : vector<8x128xf32>
    %c0_17 = arith.constant 0 : index
    %c0_18 = arith.constant 0 : index
    %44 = vector.load %arg5[%c0_17, %c0_18] : memref<8x128xf32, #tpu.memory_space<vmem>>, vector<8x128xf32>
    tpu.vector_store %arg5[%c0_17, %c0_18], %43 {strides = array<i32>} : memref<8x128xf32, #tpu.memory_space<vmem>>, vector<8x128xf32>,
    %c0_19 = arith.constant 0 : index
    %c0_20 = arith.constant 0 : index
    %45 = vector.load %arg6[%c0_19, %c0_20] : memref<8x128xf32, #tpu.memory_space<vmem>>, vector<8x128xf32>
    %46 = vector.shape_cast %39 : vector<608x128xf32> to vector<76x8x128xf32>
    %cst_21 = arith.constant dense<0.000000e+00> : vector<8x128xf32>
    %47 = vector.multi_reduction <add>, %46, %cst_21 [0] : vector<76x8x128xf32> to vector<8x128xf32>
    %48 = arith.addf %45, %47 : vector<8x128xf32>
    %c0_22 = arith.constant 0 : index
    %c0_23 = arith.constant 0 : index
    %49 = vector.load %arg6[%c0_22, %c0_23] : memref<8x128xf32, #tpu.memory_space<vmem>>, vector<8x128xf32>
    tpu.vector_store %arg6[%c0_22, %c0_23], %48 {strides = array<i32>} : memref<8x128xf32, #tpu.memory_space<vmem>>, vector<8x128xf32>,
    return
  }
  func.func @transform_0(%arg0: i32) -> i32 {
    %c0_i32 = arith.constant 0 : i32
    %c0_i32_0 = arith.constant 0 : i32
    return %c0_i32 : i32
  }
  func.func @transform_1(%arg0: i32) -> (i32, i32) {
    %c0_i32 = arith.constant 0 : i32
    %c0_i32_0 = arith.constant 0 : i32
    return %arg0, %c0_i32 : i32, i32
  }
  func.func @transform_2(%arg0: i32) -> (i32, i32) {
    %c0_i32 = arith.constant 0 : i32
    %c0_i32_0 = arith.constant 0 : i32
    return %arg0, %c0_i32 : i32, i32
  }
  func.func @transform_3(%arg0: i32) -> (i32, i32) {
    %c0_i32 = arith.constant 0 : i32
    %c0_i32_0 = arith.constant 0 : i32
    return %arg0, %c0_i32 : i32, i32
  }
  func.func @transform_4(%arg0: i32) -> (i32, i32) {
    %c0_i32 = arith.constant 0 : i32
    %c0_i32_0 = arith.constant 0 : i32
    %c0_i32_1 = arith.constant 0 : i32
    return %c0_i32, %c0_i32_0 : i32, i32
  }
  func.func @transform_5(%arg0: i32) -> (i32, i32) {
    %c0_i32 = arith.constant 0 : i32
    %c0_i32_0 = arith.constant 0 : i32
    %c0_i32_1 = arith.constant 0 : i32
    return %c0_i32, %c0_i32_0 : i32, i32
  }
}

</mosaic_0001>

<bundles_post_ra>
// kernel: tpu_custom_call.1
= control target key start
LH: loop header
LB: loop body
LE: loop exit
PB: predicated region body
PF: predicated region fallthrough
CT: control target
= control target key end

     0   :  { %s10776_s0 = inlined_call_operand.<no memory space> [shape: f32[1], index: 0, kind: input, shape index: {}]   ;;  %s10777_s1 = inlined_call_operand.hbm [shape: f32[625,128], index: 1, kind: input, shape index: {}]   ;;  %s10778_s2 = inlined_call_operand.hbm [shape: bf16[625,128], index: 2, kind: input, shape index: {}]   ;;  %s10779_s3 = inlined_call_operand.hbm [shape: bf16[625,128], index: 3, kind: input, shape index: {}]   ;;  %s10780_s4 = inlined_call_operand.hbm [shape: f32[8,128], index: 4, kind: output, shape index: {0}]   ;;  %s10781_s5 = inlined_call_operand.hbm [shape: f32[8,128], index: 5, kind: output, shape index: {1}]  }
   0x1   :  { %11 = sst [smem:[#allocation2]] %s10776_s0 }
   0x2   :  { %12 = vsyncpa [#allocation4], 0 }
   0x3   :  { %14 = vsyncpa [#allocation4 + $0x1], 0 }
   0x4   :  { %15 = vsyncpa [#allocation7], 0 }
   0x5   :  { %17 = vsyncpa [#allocation7 + $0x1], 0 }
   0x6   :  { %18 = vsyncpa [#allocation5], 0 }
   0x7   :  { %19 = vsyncpa [#allocation11], 0  ;;  %s4217_s20 = smov 0   ;;  %s4219_s21 = smov 0  }
   0x8   :  { %s4221_s22 = smov 0   ;;  %s4223_s23 = smov 0  }
   0x9 LB: > { %s4236_s0 = sadd.s32 4294967295, %s4170_s23   ;;  %s4239_s24 = sadd.s32 1, %s4170_s23   ;;  %s4170_s23 = sphi %s4223_s23, %s14064_s23   ;;  %s4166_s22 = sphi %s4221_s22, %s14063_s22   ;;  %s4162_s21 = sphi %s4219_s21, %s14062_s21   ;;  %s4158_s20 = sphi %s4217_s20, %s14061_s20  }
   0xa   : > { %s50_s25 = ssub.s32 %s4170_s23, %s4239_s24  ;;  %s53_s26 = sadd.s32 1, %s4166_s22 }
   0xb   : > { %p51_p0 = scmp.eq.s32.totalorder %s50_s25, 0  ;;  %p60_p1 = scmp.ne.s32.totalorder %s4166_s22, %s4162_s21 }
   0xc   : > { %p61_p2 = scmp.eq.s32.totalorder %s4170_s23, 0  ;;  %p66_p3 = scmp.ne.s32.totalorder %s4162_s21, %s4158_s20 }
   0xd   : > { %s4249_s27 = scalar_select %p51_p0, %s4166_s22, %s53_s26  }
   0xe   : > { %p4251_p4 = por %p61_p2, %p60_p1  ;;  %p67_p5 = scmp.eq.s32.totalorder %s4236_s0, 0 }
   0xf   : > { %p3141_p7 = scmp.ge.s32.totalorder %s4170_s23, 2 }
  0x10   : > { %p4256_p6 = por %p67_p5, %p66_p3 }
  0x11   : > { %183 = sbr.rel (%p3141_p7) target bundleno = 129 (0x81), region = 20 }
  0x18   : > { %186 = sbr.rel (!%p4251_p4) target bundleno = 59 (0x3b), region = 24  ;;  %s187_s30 = sand.u32 (%p4251_p4), 1, %s4166_s22  }
  0x19   : > { %s192_s6 = smul.u32 (%p4251_p4), 76, %s4170_s23  ;;  %s4268_s11 = scalar_lea.sflag (%p4251_p4), [#allocation4], %s187_s30 }
  0x1a   : > { %s3547_s7 = smul.u32 (%p4251_p4), 608, %s187_s30 }
  0x1b   : > { %s193_s8 = ssub.s32 (%p4251_p4), 79, %s192_s6 }
  0x1c   : > { %p194_p8 = scmp.lt.s32.totalorder (%p4251_p4), %s193_s8, 76  ;;  %s191_s12 = scalar_lea.vmem (%p4251_p4), [#allocation3], %s3547_s7 }
  0x1f   : > { %s14066_s8 = smov (!%p194_p8, %s193_s8), 76 }
  0x20   : > { %s4265_s9 = sshll.u32 %s14066_s8, 7 }
  0x21   : > { %s198_s10 = ssub.s32 9728, %s4265_s9 }
  0x22   : > { %199 = vsyncadd %s4268_s11, %s198_s10  ;;  %p3143_p9 = scmp.ne.s32.totalorder %s4265_s9, 0  ;;  %s3166_s13 = smul.u32 9728, %s4170_s23 }
  0x23   : > { %s204_s14 = sshll.u32 %s191_s12, 4  ;;  %s3992_s25 = scalar_lea.hbm %s10777_s1, 10112  ;;  %s4278_s14 = int_to_ptr.vmem [resolvable:$true] %s204_s14 }
  0x24   : > { %s4276_s17 = scalar_lea.hbm %s10777_s1, %s3166_s13 }
  0x25   : > { %s3988_s18 = scalar_lea.hbm %s4276_s17, %s4265_s9  ;;  %p3993_p13 = scmp.lt.u32.totalorder %s4276_s17, %s10777_s1 }
  0x26   : > { %p3989_p10 = scmp.ne.s32.totalorder %s4276_s17, %s3988_s18  ;;  %p3994_p0 = scmp.lt.u32.totalorder %s3992_s25, %s3988_s18 }
  0x27   : > { %p3996_p2 = scmp.lt.u32.totalorder %s3988_s18, %s4276_s17 }
  0x28   : > { %p3990_p11 = pnand %p3989_p10, %p3143_p9  ;;  %p3995_p1 = por %p3994_p0, %p3993_p13 }
  0x2a   : > { %p3991_p12 = pneg %p3990_p11  ;;  %p3997_p3 = por %p3996_p2, %p3995_p1 }
  0x2c   : > { %p3998_p5 = pnand %p3997_p3, %p3991_p12 }
  0x2e   : > { %4001 = shalt.err (!%p3998_p5)
}
  0x2f   : > { %s4002_s6 = scalar_lea.vmem %s4278_s14, %s4265_s9  ;;  %s4172_s7 = smov [#allocation3]  }
  0x30   : > { %p4003_p7 = scmp.ne.s32.totalorder %s4278_s14, %s4002_s6  ;;  %s4006_s8 = sshll.u32 %s4172_s7, 4  ;;  %s4007_s8 = int_to_ptr.vmem [resolvable:$false] %s4006_s8 }
  0x31   : > { %s4008_s10 = scalar_lea.vmem %s4007_s8, 19456  ;;  %p4009_p11 = scmp.lt.s32.totalorder %s4278_s14, %s4007_s8 }
  0x32   : > { %p4004_p8 = pnand %p4003_p7, %p3143_p9  ;;  %p4010_p13 = scmp.lt.s32.totalorder %s4008_s10, %s4002_s6 }
  0x34   : > { %p4005_p10 = pneg %p4004_p8  ;;  %p4011_p0 = por %p4010_p13, %p4009_p11 }
  0x36   : > { %p4012_p1 = pnand %p4011_p0, %p4005_p10 }
  0x38   : > { %4015 = shalt.err (!%p4012_p1)
}
  0x39   : > { %s4173_s12 = smov 128   ;;  %s4174_s13 = smov 8  }
  0x3a   : > { %210 = dma.hbm_to_vmem [thread:$0]  (%p3143_p9), %s4276_s17, %s4265_s9, %s4278_s14, %s4268_s11, %s4173_s12, %s4173_s12, %s4174_s13  }
  0x3b PF: > { %213 = sbr.rel (!%p4251_p4) target bundleno = 94 (0x5e), region = 28  ;;  %s214_s15 = sand.u32 (%p4251_p4), 1, %s4170_s23  }
  0x3c   : > { %s216_s16 = sand.u32 (%p4251_p4), 1, %s4166_s22   ;;  %s219_s19 = smul.u32 (%p4251_p4), 76, %s4170_s23 }
  0x3d   : > { %s3548_s18 = smul.u32 (%p4251_p4), 304, %s216_s16  ;;  %s4313_s30 = scalar_lea.sflag (%p4251_p4), [#allocation7], %s214_s15 }
  0x3e   : > { %s220_s20 = ssub.s32 (%p4251_p4), 79, %s219_s19 }
  0x3f   : > { %p221_p12 = scmp.lt.s32.totalorder (%p4251_p4), %s220_s20, 76  ;;  %s218_s9 = scalar_lea.vmem (%p4251_p4), [#allocation6], %s3548_s18 }
  0x42   : > { %s14068_s20 = smov (!%p221_p12, %s220_s20), 76 }
  0x43   : > { %s4310_s25 = sshll.u32 %s14068_s20, 6 }
  0x44   : > { %s225_s26 = ssub.s32 4864, %s4310_s25 }
  0x45   : > { %226 = vsyncadd %s4313_s30, %s225_s26  ;;  %p3148_p9 = scmp.ne.s32.totalorder %s4310_s25, 0  ;;  %s3167_s11 = smul.u32 4864, %s4170_s23 }
  0x46   : > { %s231_s14 = sshll.u32 %s218_s9, 4  ;;  %s4020_s13 = scalar_lea.hbm %s10778_s2, 5056  ;;  %s4323_s14 = int_to_ptr.vmem [resolvable:$true] %s231_s14 }
  0x47   : > { %s4321_s7 = scalar_lea.hbm %s10778_s2, %s3167_s11 }
  0x48   : > { %s4016_s8 = scalar_lea.hbm %s4321_s7, %s4310_s25  ;;  %p4021_p7 = scmp.lt.u32.totalorder %s4321_s7, %s10778_s2 }
  0x49   : > { %p4017_p2 = scmp.ne.s32.totalorder %s4321_s7, %s4016_s8  ;;  %p4022_p8 = scmp.lt.u32.totalorder %s4020_s13, %s4016_s8 }
  0x4a   : > { %p4024_p11 = scmp.lt.u32.totalorder %s4016_s8, %s4321_s7 }
  0x4b   : > { %p4018_p3 = pnand %p4017_p2, %p3148_p9  ;;  %p4023_p10 = por %p4022_p8, %p4021_p7 }
  0x4d   : > { %p4019_p5 = pneg %p4018_p3  ;;  %p4025_p13 = por %p4024_p11, %p4023_p10 }
  0x4f   : > { %p4026_p0 = pnand %p4025_p13, %p4019_p5 }
  0x51   : > { %4029 = shalt.err (!%p4026_p0)
}
  0x52   : > { %s4030_s18 = scalar_lea.vmem %s4323_s14, %s4310_s25  ;;  %s4175_s19 = smov [#allocation6]  }
  0x53   : > { %p4031_p1 = scmp.ne.s32.totalorder %s4323_s14, %s4030_s18  ;;  %s4034_s20 = sshll.u32 %s4175_s19, 4  ;;  %s4035_s20 = int_to_ptr.vmem [resolvable:$false] %s4034_s20 }
  0x54   : > { %s4036_s26 = scalar_lea.vmem %s4035_s20, 9728  ;;  %p4037_p3 = scmp.lt.s32.totalorder %s4323_s14, %s4035_s20 }
  0x55   : > { %p4032_p12 = pnand %p4031_p1, %p3148_p9  ;;  %p4038_p7 = scmp.lt.s32.totalorder %s4036_s26, %s4030_s18 }
  0x57   : > { %p4033_p2 = pneg %p4032_p12  ;;  %p4039_p8 = por %p4038_p7, %p4037_p3 }
  0x59   : > { %p4040_p10 = pnand %p4039_p8, %p4033_p2 }
  0x5b   : > { %4043 = shalt.err (!%p4040_p10)
}
  0x5c   : > { %s4176_s9 = smov 64   ;;  %s4177_s11 = smov 4  }
  0x5d   : > { %237 = dma.hbm_to_vmem [thread:$0]  (%p3148_p9), %s4321_s7, %s4310_s25, %s4323_s14, %s4313_s30, %s4176_s9, %s4176_s9, %s4177_s11  }
  0x5e PF: > { %240 = sbr.rel (!%p4251_p4) target bundleno = 129 (0x81), region = 32  ;;  %s241_s17 = sand.u32 (%p4251_p4), 1, %s4170_s23  }
  0x5f   : > { %s243_s6 = sand.u32 (%p4251_p4), 1, %s4166_s22   ;;  %s246_s10 = smul.u32 (%p4251_p4), 76, %s4170_s23 }
  0x60   : > { %s3549_s8 = smul.u32 (%p4251_p4), 304, %s243_s6  ;;  %s4358_s16 = scalar_lea.sflag (%p4251_p4), [#allocation7], %s241_s17 }
  0x61   : > { %s247_s12 = ssub.s32 (%p4251_p4), 79, %s246_s10 }
  0x62   : > { %p248_p5 = scmp.lt.s32.totalorder (%p4251_p4), %s247_s12, 76  ;;  %s245_s25 = scalar_lea.vmem (%p4251_p4), [#allocation8], %s3549_s8 }
  0x65   : > { %s14070_s12 = smov (!%p248_p5, %s247_s12), 76 }
  0x66   : > { %s4355_s13 = sshll.u32 %s14070_s12, 6 }
  0x67   : > { %s252_s15 = ssub.s32 4864, %s4355_s13 }
  0x68   : > { %253 = vsyncadd %s4358_s16, %s252_s15  ;;  %p3153_p4 = scmp.ne.s32.totalorder %s4355_s13, 0  ;;  %s3168_s28 = smul.u32 4864, %s4170_s23 }
  0x69   : > { %s258_s30 = sshll.u32 %s245_s25, 4  ;;  %s4048_s9 = scalar_lea.hbm %s10779_s3, 5056  ;;  %s4368_s30 = int_to_ptr.vmem [resolvable:$true] %s258_s30 }
  0x6a   : > { %s4366_s18 = scalar_lea.hbm %s10779_s3, %s3168_s28 }
  0x6b   : > { %s4044_s19 = scalar_lea.hbm %s4366_s18, %s4355_s13  ;;  %p4049_p0 = scmp.lt.u32.totalorder %s4366_s18, %s10779_s3 }
  0x6c   : > { %p4045_p9 = scmp.ne.s32.totalorder %s4366_s18, %s4044_s19  ;;  %p4050_p1 = scmp.lt.u32.totalorder %s4048_s9, %s4044_s19 }
  0x6d   : > { %p4052_p2 = scmp.lt.u32.totalorder %s4044_s19, %s4366_s18 }
  0x6e   : > { %p4046_p11 = pnand %p4045_p9, %p3153_p4  ;;  %p4051_p12 = por %p4050_p1, %p4049_p0 }
  0x70   : > { %p4047_p13 = pneg %p4046_p11  ;;  %p4053_p3 = por %p4052_p2, %p4051_p12 }
  0x72   : > { %p4054_p7 = pnand %p4053_p3, %p4047_p13 }
  0x74   : > { %4057 = shalt.err (!%p4054_p7)
}
  0x75   : > { %s4058_s6 = scalar_lea.vmem %s4368_s30, %s4355_s13  ;;  %s4178_s8 = smov [#allocation8]  }
  0x76   : > { %p4059_p8 = scmp.ne.s32.totalorder %s4368_s30, %s4058_s6  ;;  %s4062_s10 = sshll.u32 %s4178_s8, 4  ;;  %s4063_s10 = int_to_ptr.vmem [resolvable:$false] %s4062_s10 }
  0x77   : > { %s4064_s12 = scalar_lea.vmem %s4063_s10, 9728  ;;  %p4065_p9 = scmp.lt.s32.totalorder %s4368_s30, %s4063_s10 }
  0x78   : > { %p4060_p10 = pnand %p4059_p8, %p3153_p4  ;;  %p4066_p11 = scmp.lt.s32.totalorder %s4064_s12, %s4058_s6 }
  0x7a   : > { %p4061_p5 = pneg %p4060_p10  ;;  %p4067_p0 = por %p4066_p11, %p4065_p9 }
  0x7c   : > { %p4068_p1 = pnand %p4067_p0, %p4061_p5 }
  0x7e   : > { %4071 = shalt.err (!%p4068_p1)
}
  0x7f   : > { %s4179_s15 = smov 64   ;;  %s4180_s25 = smov 4  }
  0x80   : > { %264 = dma.hbm_to_vmem [thread:$0]  (%p3153_p4), %s4366_s18, %s4355_s13, %s4368_s30, %s4358_s16, %s4179_s15, %s4179_s15, %s4180_s25  }
  0x81 PF: > { %p3157_p13 = scmp.ge.s32.totalorder %s4170_s23, 1  ;;  %p266_p12 = scmp.lt.s32.totalorder %s4170_s23, 3 }
  0x83   : > { %p267_p2 = pnand %p3157_p13, %p266_p12 }
  0x85   : > { %270 = sbr.rel (%p267_p2) target bundleno = 1153 (0x481), region = 36 }
  0x8c   : > { %s272_s28 = sand.u32 1, %s4162_s21  }
  0x8d   : > { %s3550_s14 = smul.u32 608, %s272_s28  ;;  %s273_s7 = scalar_lea.sflag [#allocation4], %s272_s28 }
  0x8f   : > { %s4398_s19 = scalar_lea.vmem [#allocation3], %s3550_s14 }
  0x90   : > { %4141 = dma.done.wait (%p4256_p6), %s273_s7, 9728  }
  0x91   : > { %4143 = vsyncadd (%p4256_p6), %s273_s7, 4294957568  ;;  %s281_s13 = sand.u32 1, %s4236_s0   ;;  %s3551_s16 = smul.u32 304, %s272_s28 }
  0x92   : > { %s282_s30 = scalar_lea.sflag [#allocation7], %s281_s13 }
  0x93   : > { %s4405_s23 = scalar_lea.vmem [#allocation6], %s3551_s16 }
  0x94   : > { %4145 = dma.done.wait (%p4256_p6), %s282_s30, 9728  }
  0x95   : > { %4147 = vsyncadd (%p4256_p6), %s282_s30, 4294957568  ;;  %s4411_s18 = scalar_lea.vmem [#allocation8], %s3551_s16  ;;  %p3158_p4 = scmp.ne.s32.totalorder %s4236_s0, 0 }
  0x96   : > { %v4181_v0 = vmov (!%p3158_p4), 0.0  }
  0x97   : > { %344 = sbr.rel (%p3158_p4) target bundleno = 158 (0x9e), region = 52  ;;  %345 = vst [vmem:[#allocation9] sm:$0xff] (!%p3158_p4), %v4181_v0  ;;  %346 = vst [vmem:[#allocation10] sm:$0xff] (!%p3158_p4), %v4181_v0 }
  0x9e PF: > { %v4415_v1 = vld [vmem:[%s4398_s19] sm:$0xff]  ;;  %v4418_v2 = vld [vmem:[%s4398_s19 + $0x8] sm:$0xff]  ;;  %v4421_v3 = vld [vmem:[%s4398_s19 + $0x10] sm:$0xff]  ;;  %s8418_s29 = sld [smem:[#allocation2]]  ;;  %s2555_s26 = smul.u32 608, %s4236_s0 }
  0x9f   : > { %v4424_v4 = vld [vmem:[%s4398_s19 + $0x18] sm:$0xff]  ;;  %v4427_v5 = vld [vmem:[%s4398_s19 + $0x20] sm:$0xff]  ;;  %v4430_v6 = vld [vmem:[%s4398_s19 + $0x28] sm:$0xff]  ;;  %s4182_s9 = smov [#allocation9]   ;;  %s4183_s17 = smov [#allocation10]  }
  0xa0   : > { %v4433_v7 = vld [vmem:[%s4398_s19 + $0x30] sm:$0xff]  ;;  %v4436_v8 = vld [vmem:[%s4398_s19 + $0x38] sm:$0xff]  ;;  %v4439_v9 = vld [vmem:[%s4398_s19 + $0x40] sm:$0xff]  ;;  %s3024_s11 = sshll.u32 %s4182_s9, 4  ;;  %s3035_s6 = sshll.u32 %s4183_s17, 4  ;;  %s3025_s11 = int_to_ptr.vmem [resolvable:$true] %s3024_s11  ;;  %s10712_s6 = int_to_ptr.vmem [resolvable:$true] %s3035_s6 }
  0xa1   : > { %v4442_v10 = vld [vmem:[%s4398_s19 + $0x48] sm:$0xff]  ;;  %v4445_v11 = vld [vmem:[%s4398_s19 + $0x50] sm:$0xff]  ;;  %v4448_v12 = vld [vmem:[%s4398_s19 + $0x58] sm:$0xff]  ;;  %p3563_p6 = scmp.eq.s32.totalorder %s4236_s0, 1  ;;  %s4072_s8 = scalar_lea.vmem %s3025_s11, 128 }
  0xa2   : > { %v4454_v16 = vld [vmem:[%s4398_s19 + $0x60] sm:$0xff]  ;;  %v4457_v17 = vld [vmem:[%s4398_s19 + $0x68] sm:$0xff]  ;;  %v4460_v18 = vld [vmem:[%s4398_s19 + $0x70] sm:$0xff]  ;;  %p4073_p3 = scmp.ne.s32.totalorder %s3025_s11, %s4072_s8  ;;  %p4079_p10 = scmp.lt.s32.totalorder %s3025_s11, %s3025_s11 }
  0xa3   : > { %v4466_v22 = vld [vmem:[%s4398_s19 + $0x78] sm:$0xff]  ;;  %v4469_v23 = vld [vmem:[%s4398_s19 + $0x80] sm:$0xff]  ;;  %v4472_v24 = vld [vmem:[%s4398_s19 + $0x88] sm:$0xff]  ;;  %p4080_p5 = scmp.lt.s32.totalorder %s4072_s8, %s4072_s8 }
  0xa4   : > { %v4478_v28 = vld [vmem:[%s4398_s19 + $0x90] sm:$0xff]  ;;  %v4481_v29 = vld [vmem:[%s4398_s19 + $0x98] sm:$0xff]  ;;  %v4484_v30 = vld [vmem:[%s4398_s19 + $0xa0] sm:$0xff]  ;;  %s3159_s20 = sadd.f32 -1.0, %s8418_s29  ;;  %p4074_p7 = pnand %p4073_p3, %p3563_p6 }
  0xa5   : > { %v4490_v34 = vld [vmem:[%s4398_s19 + $0xa8] sm:$0xff]  ;;  %v4493_v35 = vld [vmem:[%s4398_s19 + $0xb0] sm:$0xff]  ;;  %v4496_v36 = vld [vmem:[%s4398_s19 + $0xb8] sm:$0xff]  ;;  %p4081_p9 = por %p4080_p5, %p4079_p10 }
  0xa6   : > { %v4502_v40 = vld [vmem:[%s4398_s19 + $0xc0] sm:$0xff]  ;;  %v4505_v41 = vld [vmem:[%s4398_s19 + $0xc8] sm:$0xff]  ;;  %v4508_v42 = vld [vmem:[%s4398_s19 + $0xd0] sm:$0xff]  ;;  %p4075_p8 = pneg %p4074_p7 }
  0xa7   : > { %v4514_v46 = vld [vmem:[%s4398_s19 + $0xd8] sm:$0xff]  ;;  %v4517_v47 = vld [vmem:[%s4398_s19 + $0xe0] sm:$0xff]  ;;  %v4520_v48 = vld [vmem:[%s4398_s19 + $0xe8] sm:$0xff] }
  0xa8   : > { %v4526_v52 = vld [vmem:[%s4398_s19 + $0xf0] sm:$0xff]  ;;  %v4529_v53 = vld [vmem:[%s4398_s19 + $0xf8] sm:$0xff]  ;;  %v4532_v54 = vld [vmem:[%s4398_s19 + $0x100] sm:$0xff]  ;;  %p4082_p11 = pnand %p4081_p9, %p4075_p8 }
  0xa9   : > { %v4538_v58 = vld [vmem:[%s4398_s19 + $0x108] sm:$0xff]  ;;  %v4541_v59 = vld [vmem:[%s4398_s19 + $0x110] sm:$0xff]  ;;  %v4544_v60 = vld [vmem:[%s4398_s19 + $0x118] sm:$0xff] }
  0xaa   : > { %11442 = vst [vmem:[#allocation16_spill] sm:$0xff] %v4544_v60  ;;  %v4550_v0 = vld [vmem:[%s4398_s19 + $0x120] sm:$0xff]  ;;  %v4553_v56 = vld [vmem:[%s4398_s19 + $0x128] sm:$0xff]  ;;  %v4556_v57 = vld [vmem:[%s4398_s19 + $0x130] sm:$0xff] }
  0xab   : > { %11443 = vst [vmem:[#allocation17_spill] sm:$0xff] %v4550_v0  ;;  %11444 = vst [vmem:[#allocation18_spill] sm:$0xff] %v4553_v56  ;;  %v4562_v50 = vld [vmem:[%s4398_s19 + $0x138] sm:$0xff]  ;;  %v4565_v62 = vld [vmem:[%s4398_s19 + $0x140] sm:$0xff] }
  0xac   : > { %11445 = vst [vmem:[#allocation19_spill] sm:$0xff] %v4556_v57  ;;  %11446 = vst [vmem:[#allocation20_spill] sm:$0xff] %v4562_v50  ;;  %v4568_v63 = vld [vmem:[%s4398_s19 + $0x148] sm:$0xff]  ;;  %v4574_v44 = vld [vmem:[%s4398_s19 + $0x150] sm:$0xff] }
  0xad   : > { %11447 = vst [vmem:[#allocation21_spill] sm:$0xff] %v4565_v62  ;;  %11448 = vst [vmem:[#allocation22_spill] sm:$0xff] %v4568_v63  ;;  %v4577_v51 = vld [vmem:[%s4398_s19 + $0x158] sm:$0xff]  ;;  %v4580_v61 = vld [vmem:[%s4398_s19 + $0x160] sm:$0xff] }
  0xae   : > { %11449 = vst [vmem:[#allocation23_spill] sm:$0xff] %v4574_v44  ;;  %11450 = vst [vmem:[#allocation24_spill] sm:$0xff] %v4577_v51  ;;  %v4586_v38 = vld [vmem:[%s4398_s19 + $0x168] sm:$0xff]  ;;  %v4589_v45 = vld [vmem:[%s4398_s19 + $0x170] sm:$0xff] }
  0xaf   : > { %11451 = vst [vmem:[#allocation25_spill] sm:$0xff] %v4580_v61  ;;  %11452 = vst [vmem:[#allocation26_spill] sm:$0xff] %v4586_v38  ;;  %v4592_v55 = vld [vmem:[%s4398_s19 + $0x178] sm:$0xff]  ;;  %v4598_v32 = vld [vmem:[%s4398_s19 + $0x180] sm:$0xff] }
  0xb0   : > { %11453 = vst [vmem:[#allocation27_spill] sm:$0xff] %v4589_v45  ;;  %11454 = vst [vmem:[#allocation28_spill] sm:$0xff] %v4592_v55  ;;  %v4601_v39 = vld [vmem:[%s4398_s19 + $0x188] sm:$0xff]  ;;  %v4604_v49 = vld [vmem:[%s4398_s19 + $0x190] sm:$0xff] }
  0xb1   : > { %11455 = vst [vmem:[#allocation29_spill] sm:$0xff] %v4598_v32  ;;  %11456 = vst [vmem:[#allocation30_spill] sm:$0xff] %v4601_v39  ;;  %v4610_v26 = vld [vmem:[%s4398_s19 + $0x198] sm:$0xff]  ;;  %v4613_v33 = vld [vmem:[%s4398_s19 + $0x1a0] sm:$0xff] }
  0xb2   : > { %11457 = vst [vmem:[#allocation31_spill] sm:$0xff] %v4604_v49  ;;  %11458 = vst [vmem:[#allocation32_spill] sm:$0xff] %v4610_v26  ;;  %v4616_v43 = vld [vmem:[%s4398_s19 + $0x1a8] sm:$0xff]  ;;  %v4622_v20 = vld [vmem:[%s4398_s19 + $0x1b0] sm:$0xff] }
  0xb3   : > { %11459 = vst [vmem:[#allocation33_spill] sm:$0xff] %v4613_v33  ;;  %11460 = vst [vmem:[#allocation34_spill] sm:$0xff] %v4616_v43  ;;  %v4625_v27 = vld [vmem:[%s4398_s19 + $0x1b8] sm:$0xff]  ;;  %v4628_v37 = vld [vmem:[%s4398_s19 + $0x1c0] sm:$0xff] }
  0xb4   : > { %11461 = vst [vmem:[#allocation35_spill] sm:$0xff] %v4622_v20  ;;  %11462 = vst [vmem:[#allocation36_spill] sm:$0xff] %v4625_v27  ;;  %v4634_v14 = vld [vmem:[%s4398_s19 + $0x1c8] sm:$0xff]  ;;  %v4637_v21 = vld [vmem:[%s4398_s19 + $0x1d0] sm:$0xff] }
  0xb5   : > { %11463 = vst [vmem:[#allocation37_spill] sm:$0xff] %v4628_v37  ;;  %11464 = vst [vmem:[#allocation38_spill] sm:$0xff] %v4634_v14  ;;  %v4640_v31 = vld [vmem:[%s4398_s19 + $0x1d8] sm:$0xff]  ;;  %v4646_v38 = vld [vmem:[%s4398_s19 + $0x1e0] sm:$0xff] }
  0xb6   : > { %11465 = vst [vmem:[#allocation39_spill] sm:$0xff] %v4637_v21  ;;  %11466 = vst [vmem:[#allocation40_spill] sm:$0xff] %v4640_v31  ;;  %v4649_v15 = vld [vmem:[%s4398_s19 + $0x1e8] sm:$0xff]  ;;  %v4652_v25 = vld [vmem:[%s4398_s19 + $0x1f0] sm:$0xff] }
  0xb7   : > { %11467 = vst [vmem:[#allocation41_spill] sm:$0xff] %v4646_v38  ;;  %11468 = vst [vmem:[#allocation42_spill] sm:$0xff] %v4649_v15  ;;  %v4658_v32 = vld [vmem:[%s4398_s19 + $0x1f8] sm:$0xff]  ;;  %v4661_v61 = vld [vmem:[%s4398_s19 + $0x200] sm:$0xff] }
  0xb8   : > { %11469 = vst [vmem:[#allocation43_spill] sm:$0xff] %v4652_v25  ;;  %11470 = vst [vmem:[#allocation44_spill] sm:$0xff] %v4658_v32  ;;  %v4664_v19 = vld [vmem:[%s4398_s19 + $0x208] sm:$0xff]  ;;  %v4670_v26 = vld [vmem:[%s4398_s19 + $0x210] sm:$0xff] }
  0xb9   : > { %11471 = vst [vmem:[#allocation45_spill] sm:$0xff] %v4661_v61  ;;  %11472 = vst [vmem:[#allocation46_spill] sm:$0xff] %v4664_v19  ;;  %v4673_v45 = vld [vmem:[%s4398_s19 + $0x218] sm:$0xff]  ;;  %v4676_v13 = vld [vmem:[%s4398_s19 + $0x220] sm:$0xff] }
  0xba   : > { %11473 = vst [vmem:[#allocation47_spill] sm:$0xff] %v4670_v26  ;;  %11474 = vst [vmem:[#allocation48_spill] sm:$0xff] %v4673_v45  ;;  %v4682_v20 = vld [vmem:[%s4398_s19 + $0x228] sm:$0xff]  ;;  %v4685_v39 = vld [vmem:[%s4398_s19 + $0x230] sm:$0xff] }
  0xbb   : > { %11475 = vst [vmem:[#allocation49_spill] sm:$0xff] %v4676_v13  ;;  %11476 = vst [vmem:[#allocation50_spill] sm:$0xff] %v4682_v20  ;;  %v4688_v55 = vld [vmem:[%s4398_s19 + $0x238] sm:$0xff]  ;;  %v4694_v14 = vld [vmem:[%s4398_s19 + $0x240] sm:$0xff] }
  0xbc   : > { %11477 = vst [vmem:[#allocation51_spill] sm:$0xff] %v4694_v14  ;;  %v4697_v33 = vld [vmem:[%s4398_s19 + $0x248] sm:$0xff]  ;;  %v4700_v21 = vld [vmem:[%s4405_s23] sm:$0xff]   ;;  %v4712_v27 = vld [vmem:[%s4405_s23 + $0x10] sm:$0xff]  }
  0xbd   : > { %11478 = vst [vmem:[#allocation52_spill] sm:$0xff] %v4697_v33  ;;  %11479 = vst [vmem:[#allocation53_spill] sm:$0xff] %v4700_v21  ;;  %v4706_v37 = vld [vmem:[%s4398_s19 + $0x250] sm:$0xff]  ;;  %v4709_v38 = vld [vmem:[%s4405_s23 + $0x8] sm:$0xff]  }
  0xbe   : > { %11480 = vst [vmem:[#allocation54_spill] sm:$0xff] %v4706_v37  ;;  %11481 = vst [vmem:[#allocation55_spill] sm:$0xff] %v4709_v38  ;;  %v4718_v44 = vld [vmem:[%s4405_s23 + $0x18] sm:$0xff]   ;;  %v4721_v31 = vld [vmem:[%s4405_s23 + $0x20] sm:$0xff]  }
  0xbf   : > { %11482 = vst [vmem:[#allocation56_spill] sm:$0xff] %v4712_v27  ;;  %11483 = vst [vmem:[#allocation57_spill] sm:$0xff] %v4718_v44  ;;  %v4730_v15 = vld [vmem:[%s4405_s23 + $0x28] sm:$0xff]   ;;  %v4733_v13 = vld [vmem:[%s4405_s23 + $0x30] sm:$0xff]  }
  0xc0   : > { %11484 = vst [vmem:[#allocation58_spill] sm:$0xff] %v4721_v31  ;;  %11485 = vst [vmem:[#allocation59_spill] sm:$0xff] %v4730_v15  ;;  %v4742_v25 = vld [vmem:[%s4405_s23 + $0x38] sm:$0xff]   ;;  %v4745_v21 = vld [vmem:[%s4405_s23 + $0x40] sm:$0xff]  }
  0xc1   : > { %11486 = vst [vmem:[#allocation60_spill] sm:$0xff] %v4733_v13  ;;  %11487 = vst [vmem:[#allocation61_spill] sm:$0xff] %v4742_v25  ;;  %v4752_v19 = vld [vmem:[%s4405_s23 + $0x48] sm:$0xff]   ;;  %v4755_v38 = vld [vmem:[%s4405_s23 + $0x50] sm:$0xff]  }
  0xc2   : > { %11488 = vst [vmem:[#allocation62_spill] sm:$0xff] %v4745_v21  ;;  %11489 = vst [vmem:[#allocation63_spill] sm:$0xff] %v4752_v19  ;;  %v4762_v45 = vld [vmem:[%s4405_s23 + $0x58] sm:$0xff]   ;;  %v4765_v44 = vld [vmem:[%s4405_s23 + $0x60] sm:$0xff]  }
  0xc3   : > { %11490 = vst [vmem:[#allocation64_spill] sm:$0xff] %v4755_v38  ;;  %11491 = vst [vmem:[#allocation65_spill] sm:$0xff] %v4762_v45  ;;  %v4772_v43 = vld [vmem:[%s4405_s23 + $0x68] sm:$0xff]   ;;  %v4775_v15 = vld [vmem:[%s4405_s23 + $0x70] sm:$0xff]  }
  0xc4   : > { %11492 = vst [vmem:[#allocation66_spill] sm:$0xff] %v4765_v44  ;;  %11493 = vst [vmem:[#allocation67_spill] sm:$0xff] %v4772_v43  ;;  %v4782_v49 = vld [vmem:[%s4405_s23 + $0x78] sm:$0xff]   ;;  %v4785_v25 = vld [vmem:[%s4405_s23 + $0x80] sm:$0xff]  }
  0xc5   : > { %11494 = vst [vmem:[#allocation68_spill] sm:$0xff] %v4775_v15  ;;  %11495 = vst [vmem:[#allocation69_spill] sm:$0xff] %v4782_v49  ;;  %v4792_v14 = vld [vmem:[%s4405_s23 + $0x88] sm:$0xff]   ;;  %v4795_v19 = vld [vmem:[%s4405_s23 + $0x90] sm:$0xff]  }
  0xc6   : > { %11496 = vst [vmem:[#allocation70_spill] sm:$0xff] %v4785_v25  ;;  %11497 = vst [vmem:[#allocation71_spill] sm:$0xff] %v4792_v14  ;;  %v4802_v61 = vld [vmem:[%s4405_s23 + $0x98] sm:$0xff]   ;;  %v4805_v45 = vld [vmem:[%s4405_s23 + $0xa0] sm:$0xff]  }
  0xc7   : > { %11498 = vst [vmem:[#allocation72_spill] sm:$0xff] %v4795_v19  ;;  %11499 = vst [vmem:[#allocation73_spill] sm:$0xff] %v4802_v61  ;;  %v4812_v51 = vld [vmem:[%s4405_s23 + $0xa8] sm:$0xff]   ;;  %v4815_v43 = vld [vmem:[%s4405_s23 + $0xb0] sm:$0xff]  }
  0xc8   : > { %11500 = vst [vmem:[#allocation74_spill] sm:$0xff] %v4805_v45  ;;  %11501 = vst [vmem:[#allocation75_spill] sm:$0xff] %v4812_v51  ;;  %v4822_v27 = vld [vmem:[%s4405_s23 + $0xb8] sm:$0xff]   ;;  %v4825_v49 = vld [vmem:[%s4405_s23 + $0xc0] sm:$0xff]  }
  0xc9   : > { %11502 = vst [vmem:[#allocation76_spill] sm:$0xff] %v4815_v43  ;;  %11503 = vst [vmem:[#allocation77_spill] sm:$0xff] %v4822_v27  ;;  %v4832_v31 = vld [vmem:[%s4405_s23 + $0xc8] sm:$0xff]   ;;  %v4835_v14 = vld [vmem:[%s4405_s23 + $0xd0] sm:$0xff]  }
  0xca   : > { %11504 = vst [vmem:[#allocation78_spill] sm:$0xff] %v4825_v49  ;;  %11505 = vst [vmem:[#allocation79_spill] sm:$0xff] %v4832_v31  ;;  %v4842_v13 = vld [vmem:[%s4405_s23 + $0xd8] sm:$0xff]   ;;  %v4845_v61 = vld [vmem:[%s4405_s23 + $0xe0] sm:$0xff]  }
  0xcb   : > { %11506 = vst [vmem:[#allocation80_spill] sm:$0xff] %v4835_v14  ;;  %11507 = vst [vmem:[#allocation81_spill] sm:$0xff] %v4842_v13  ;;  %v4852_v21 = vld [vmem:[%s4405_s23 + $0xe8] sm:$0xff]   ;;  %v4855_v51 = vld [vmem:[%s4405_s23 + $0xf0] sm:$0xff]  }
  0xcc   : > { %11508 = vst [vmem:[#allocation82_spill] sm:$0xff] %v4845_v61  ;;  %11509 = vst [vmem:[#allocation83_spill] sm:$0xff] %v4852_v21  ;;  %v4862_v38 = vld [vmem:[%s4405_s23 + $0xf8] sm:$0xff]   ;;  %v4865_v27 = vld [vmem:[%s4405_s23 + $0x100] sm:$0xff]  }
  0xcd   : > { %11510 = vst [vmem:[#allocation84_spill] sm:$0xff] %v4855_v51  ;;  %11511 = vst [vmem:[#allocation85_spill] sm:$0xff] %v4862_v38  ;;  %v4872_v44 = vld [vmem:[%s4405_s23 + $0x108] sm:$0xff]   ;;  %v4875_v31 = vld [vmem:[%s4405_s23 + $0x110] sm:$0xff]  }
  0xce   : > { %11512 = vst [vmem:[#allocation86_spill] sm:$0xff] %v4865_v27  ;;  %11513 = vst [vmem:[#allocation87_spill] sm:$0xff] %v4872_v44  ;;  %v4882_v15 = vld [vmem:[%s4405_s23 + $0x118] sm:$0xff]   ;;  %v4885_v13 = vld [vmem:[%s4405_s23 + $0x120] sm:$0xff]  }
  0xcf   : > { %11514 = vst [vmem:[#allocation88_spill] sm:$0xff] %v4875_v31  ;;  %11515 = vst [vmem:[#allocation89_spill] sm:$0xff] %v4882_v15  ;;  %v4892_v25 = vld [vmem:[%s4405_s23 + $0x128] sm:$0xff]   ;;  %v4895_v21 = vld [vmem:[%s4411_s18] sm:$0xff]  }
  0xd0   : > { %11516 = vst [vmem:[#allocation90_spill] sm:$0xff] %v4885_v13  ;;  %11517 = vst [vmem:[#allocation91_spill] sm:$0xff] %v4892_v25  ;;  %v4902_v19 = vld [vmem:[%s4411_s18 + $0x8] sm:$0xff]   ;;  %v4905_v38 = vld [vmem:[%s4411_s18 + $0x10] sm:$0xff]  }
  0xd1   : > { %11518 = vst [vmem:[#allocation92_spill] sm:$0xff] %v4895_v21  ;;  %11519 = vst [vmem:[#allocation93_spill] sm:$0xff] %v4902_v19  ;;  %v4912_v45 = vld [vmem:[%s4411_s18 + $0x18] sm:$0xff]   ;;  %v4915_v44 = vld [vmem:[%s4411_s18 + $0x20] sm:$0xff]  }
  0xd2   : > { %11520 = vst [vmem:[#allocation94_spill] sm:$0xff] %v4905_v38  ;;  %11521 = vst [vmem:[#allocation95_spill] sm:$0xff] %v4912_v45  ;;  %v4922_v43 = vld [vmem:[%s4411_s18 + $0x28] sm:$0xff]   ;;  %v4925_v15 = vld [vmem:[%s4411_s18 + $0x30] sm:$0xff]  }
  0xd3   : > { %11522 = vst [vmem:[#allocation96_spill] sm:$0xff] %v4915_v44  ;;  %11523 = vst [vmem:[#allocation97_spill] sm:$0xff] %v4922_v43  ;;  %v4932_v49 = vld [vmem:[%s4411_s18 + $0x38] sm:$0xff]   ;;  %v4935_v25 = vld [vmem:[%s4411_s18 + $0x40] sm:$0xff]   ;;  %v11553_v44 = vsub.f32 0.0, %v4427_v5 }
  0xd4   : > { %11524 = vst [vmem:[#allocation98_spill] sm:$0xff] %v4925_v15  ;;  %11525 = vst [vmem:[#allocation99_spill] sm:$0xff] %v4932_v49  ;;  %v4942_v14 = vld [vmem:[%s4411_s18 + $0x48] sm:$0xff]   ;;  %v4945_v19 = vld [vmem:[%s4411_s18 + $0x50] sm:$0xff]   ;;  %v11549_v15 = vsub.f32 0.0, %v4421_v3 }
  0xd5   : > { %11526 = vst [vmem:[#allocation100_spill] sm:$0xff] %v4935_v25  ;;  %11527 = vst [vmem:[#allocation101_spill] sm:$0xff] %v4942_v14  ;;  %v4952_v61 = vld [vmem:[%s4411_s18 + $0x58] sm:$0xff]   ;;  %v4955_v45 = vld [vmem:[%s4411_s18 + $0x60] sm:$0xff]   ;;  %v11545_v25 = vsub.f32 0.0, %v4415_v1 }
  0xd6   : > { %11528 = vst [vmem:[#allocation102_spill] sm:$0xff] %v4945_v19  ;;  %11529 = vst [vmem:[#allocation103_spill] sm:$0xff] %v4952_v61  ;;  %v4962_v51 = vld [vmem:[%s4411_s18 + $0x68] sm:$0xff]   ;;  %v4965_v43 = vld [vmem:[%s4411_s18 + $0x70] sm:$0xff]   ;;  %v11547_v19 = vsub.f32 0.0, %v4418_v2 }
  0xd7   : > { %11530 = vst [vmem:[#allocation104_spill] sm:$0xff] %v4955_v45  ;;  %11531 = vst [vmem:[#allocation105_spill] sm:$0xff] %v4962_v51  ;;  %v4972_v27 = vld [vmem:[%s4411_s18 + $0x78] sm:$0xff]   ;;  %v4975_v49 = vld [vmem:[%s4411_s18 + $0x80] sm:$0xff]   ;;  %v5048_v45 = vmax.f32 %v11549_v15, 0.0 }
  0xd8   : > { %11532 = vst [vmem:[#allocation106_spill] sm:$0xff] %v4965_v43  ;;  %11533 = vst [vmem:[#allocation107_spill] sm:$0xff] %v4972_v27  ;;  %v4982_v31 = vld [vmem:[%s4411_s18 + $0x88] sm:$0xff]   ;;  %v4985_v14 = vld [vmem:[%s4411_s18 + $0x90] sm:$0xff]   ;;  %v11555_v43 = vsub.f32 0.0, %v4430_v6 }
  0xd9   : > { %11534 = vst [vmem:[#allocation108_spill] sm:$0xff] %v4975_v49  ;;  %11535 = vst [vmem:[#allocation109_spill] sm:$0xff] %v4982_v31  ;;  %v4992_v13 = vld [vmem:[%s4411_s18 + $0x98] sm:$0xff]   ;;  %v4995_v61 = vld [vmem:[%s4411_s18 + $0xa0] sm:$0xff]   ;;  %v11551_v49 = vsub.f32 0.0, %v4424_v4  ;;  %v11565_v31 = vsub.f32 0.0, %v4445_v11 }
  0xda   : > { %11536 = vst [vmem:[#allocation110_spill] sm:$0xff] %v4985_v14  ;;  %11537 = vst [vmem:[#allocation111_spill] sm:$0xff] %v4992_v13  ;;  %v5002_v37 = vld [vmem:[%s4411_s18 + $0xa8] sm:$0xff]   ;;  %v5005_v21 = vld [vmem:[%s4411_s18 + $0xb0] sm:$0xff]   ;;  %v11563_v13 = vsub.f32 0.0, %v4442_v10 }
  0xdb   : > { %11538 = vst [vmem:[#allocation112_spill] sm:$0xff] %v4995_v61  ;;  %11539 = vst [vmem:[#allocation113_spill] sm:$0xff] %v5002_v37  ;;  %v5012_v51 = vld [vmem:[%s4411_s18 + $0xb8] sm:$0xff]   ;;  %v5015_v38 = vld [vmem:[%s4411_s18 + $0xc0] sm:$0xff]   ;;  %v5040_v37 = vmax.f32 %v11545_v25, 0.0  ;;  %v5052_v27 = vmax.f32 %v11551_v49, 0.0 }
  0xdc   : > { %11540 = vst [vmem:[#allocation114_spill] sm:$0xff] %v5005_v21  ;;  %11541 = vst [vmem:[#allocation115_spill] sm:$0xff] %v5012_v51  ;;  %v5022_v33 = vld [vmem:[%s4411_s18 + $0xc8] sm:$0xff]   ;;  %v5044_v21 = vmax.f32 %v11547_v19, 0.0  ;;  %v5056_v61 = vmax.f32 %v11553_v44, 0.0  ;;  %v5060_v25 = vmax.f32 %v11555_v43, 0.0 }
  0xdd   : > { %11542 = vst [vmem:[#allocation116_spill] sm:$0xff] %v5015_v38  ;;  %11543 = vst [vmem:[#allocation117_spill] sm:$0xff] %v5022_v33  ;;  %v5029_v14 = vld [vmem:[%s4398_s19 + $0x258] sm:$0xff]  ;;  %v11557_v33 = vsub.f32 0.0, %v4433_v7  ;;  %v11559_v38 = vsub.f32 0.0, %v4436_v8  ;;  %v11561_v51 = vsub.f32 0.0, %v4439_v9 }
  0xde   : > { %11544 = vst [vmem:[#allocation118_spill] sm:$0xff] %v5029_v14  ;;  %11546 = vst [vmem:[#allocation119_spill] sm:$0xff] %v5040_v37  ;;  %v5076_v44 = vmax.f32 %v11563_v13, 0.0  ;;  %v5080_v43 = vmax.f32 %v11565_v31, 0.0 }
  0xdf   : > { %11548 = vst [vmem:[#allocation120_spill] sm:$0xff] %v5044_v21  ;;  %11550 = vst [vmem:[#allocation121_spill] sm:$0xff] %v5048_v45  ;;  %v5064_v19 = vmax.f32 %v11557_v33, 0.0  ;;  %v5068_v15 = vmax.f32 %v11559_v38, 0.0  ;;  %v5072_v49 = vmax.f32 %v11561_v51, 0.0 }
  0xe0   : > { %11552 = vst [vmem:[#allocation122_spill] sm:$0xff] %v5052_v27  ;;  %11554 = vst [vmem:[#allocation123_spill] sm:$0xff] %v5056_v61 }
  0xe1   : > { %11556 = vst [vmem:[#allocation124_spill] sm:$0xff] %v5060_v25  ;;  %11558 = vst [vmem:[#allocation125_spill] sm:$0xff] %v5064_v19  ;;  %v11567_v25 = vsub.f32 0.0, %v4448_v12  ;;  %v11569_v19 = vsub.f32 0.0, %v4454_v16 }
  0xe2   : > { %11560 = vst [vmem:[#allocation126_spill] sm:$0xff] %v5068_v15  ;;  %11562 = vst [vmem:[#allocation127_spill] sm:$0xff] %v5072_v49  ;;  %v11571_v15 = vsub.f32 0.0, %v4457_v17  ;;  %v11573_v49 = vsub.f32 0.0, %v4460_v18 }
  0xe3   : > { %11564 = vst [vmem:[#allocation128_spill] sm:$0xff] %v5076_v44  ;;  %11566 = vst [vmem:[#allocation129_spill] sm:$0xff] %v5080_v43  ;;  %v5084_v33 = vmax.f32 %v11567_v25, 0.0  ;;  %v5088_v38 = vmax.f32 %v11569_v19, 0.0  ;;  %v11575_v44 = vsub.f32 0.0, %v4466_v22  ;;  %v11577_v43 = vsub.f32 0.0, %v4469_v23 }
  0xe4   : > { %v5092_v51 = vmax.f32 %v11571_v15, 0.0  ;;  %v5096_v13 = vmax.f32 %v11573_v49, 0.0 }
  0xe5   : > { %11568 = vst [vmem:[#allocation130_spill] sm:$0xff] %v5084_v33  ;;  %11570 = vst [vmem:[#allocation131_spill] sm:$0xff] %v5088_v38  ;;  %v5100_v31 = vmax.f32 %v11575_v44, 0.0  ;;  %v5104_v25 = vmax.f32 %v11577_v43, 0.0  ;;  %v11579_v33 = vsub.f32 0.0, %v4472_v24  ;;  %v11581_v38 = vsub.f32 0.0, %v4478_v28 }
  0xe6   : > { %11572 = vst [vmem:[#allocation132_spill] sm:$0xff] %v5092_v51  ;;  %11574 = vst [vmem:[#allocation133_spill] sm:$0xff] %v5096_v13  ;;  %v11583_v51 = vsub.f32 0.0, %v4481_v29  ;;  %v11585_v13 = vsub.f32 0.0, %v4484_v30 }
  0xe7   : > { %11576 = vst [vmem:[#allocation134_spill] sm:$0xff] %v5100_v31  ;;  %11578 = vst [vmem:[#allocation135_spill] sm:$0xff] %v5104_v25  ;;  %v5108_v19 = vmax.f32 %v11579_v33, 0.0  ;;  %v5112_v15 = vmax.f32 %v11581_v38, 0.0  ;;  %v11587_v31 = vsub.f32 0.0, %v4490_v34  ;;  %v11589_v25 = vsub.f32 0.0, %v4493_v35 }
  0xe8   : > { %v5116_v49 = vmax.f32 %v11583_v51, 0.0  ;;  %v5120_v44 = vmax.f32 %v11585_v13, 0.0 }
  0xe9   : > { %11580 = vst [vmem:[#allocation136_spill] sm:$0xff] %v5108_v19  ;;  %11582 = vst [vmem:[#allocation137_spill] sm:$0xff] %v5112_v15  ;;  %v5124_v43 = vmax.f32 %v11587_v31, 0.0  ;;  %v5128_v33 = vmax.f32 %v11589_v25, 0.0  ;;  %v11591_v19 = vsub.f32 0.0, %v4496_v36  ;;  %v11593_v15 = vsub.f32 0.0, %v4502_v40 }
  0xea   : > { %11584 = vst [vmem:[#allocation138_spill] sm:$0xff] %v5116_v49  ;;  %11586 = vst [vmem:[#allocation139_spill] sm:$0xff] %v5120_v44  ;;  %v11595_v49 = vsub.f32 0.0, %v4505_v41  ;;  %v11597_v44 = vsub.f32 0.0, %v4508_v42 }
  0xeb   : > { %11588 = vst [vmem:[#allocation140_spill] sm:$0xff] %v5124_v43  ;;  %11590 = vst [vmem:[#allocation141_spill] sm:$0xff] %v5128_v33  ;;  %v5132_v38 = vmax.f32 %v11591_v19, 0.0  ;;  %v5136_v51 = vmax.f32 %v11593_v15, 0.0  ;;  %v11599_v43 = vsub.f32 0.0, %v4514_v46  ;;  %v11601_v33 = vsub.f32 0.0, %v4517_v47 }
  0xec   : > { %v5140_v13 = vmax.f32 %v11595_v49, 0.0  ;;  %v5144_v31 = vmax.f32 %v11597_v44, 0.0 }
  0xed   : > { %11592 = vst [vmem:[#allocation142_spill] sm:$0xff] %v5132_v38  ;;  %11594 = vst [vmem:[#allocation143_spill] sm:$0xff] %v5136_v51  ;;  %v5148_v25 = vmax.f32 %v11599_v43, 0.0  ;;  %v5152_v19 = vmax.f32 %v11601_v33, 0.0  ;;  %v11603_v38 = vsub.f32 0.0, %v4520_v48  ;;  %v11605_v51 = vsub.f32 0.0, %v4526_v52 }
  0xee   : > { %11596 = vst [vmem:[#allocation144_spill] sm:$0xff] %v5140_v13  ;;  %11598 = vst [vmem:[#allocation145_spill] sm:$0xff] %v5144_v31  ;;  %v11607_v13 = vsub.f32 0.0, %v4529_v53  ;;  %v11609_v31 = vsub.f32 0.0, %v4532_v54 }
  0xef   : > { %11600 = vst [vmem:[#allocation146_spill] sm:$0xff] %v5148_v25  ;;  %11602 = vst [vmem:[#allocation147_spill] sm:$0xff] %v5152_v19  ;;  %v5156_v15 = vmax.f32 %v11603_v38, 0.0  ;;  %v5160_v49 = vmax.f32 %v11605_v51, 0.0  ;;  %v11611_v25 = vsub.f32 0.0, %v4538_v58  ;;  %v11613_v19 = vsub.f32 0.0, %v4541_v59 }
  0xf0   : > { %v5164_v44 = vmax.f32 %v11607_v13, 0.0  ;;  %v5168_v43 = vmax.f32 %v11609_v31, 0.0 }
  0xf1   : > { %11604 = vst [vmem:[#allocation148_spill] sm:$0xff] %v5156_v15  ;;  %11606 = vst [vmem:[#allocation149_spill] sm:$0xff] %v5160_v49  ;;  %v5172_v33 = vmax.f32 %v11611_v25, 0.0  ;;  %v5176_v38 = vmax.f32 %v11613_v19, 0.0  ;;  %v11615_v15 = vsub.f32 0.0, %v4544_v60  ;;  %v11617_v49 = vsub.f32 0.0, %v4550_v0 }
  0xf2   : > { %11608 = vst [vmem:[#allocation150_spill] sm:$0xff] %v5164_v44  ;;  %11610 = vst [vmem:[#allocation151_spill] sm:$0xff] %v5168_v43  ;;  %v11619_v44 = vsub.f32 0.0, %v4553_v56  ;;  %v11621_v43 = vsub.f32 0.0, %v4556_v57  ;;  %v11764_v0 = vand.u32 2147483647, %v4421_v3 }
  0xf3   : > { %11612 = vst [vmem:[#allocation152_spill] sm:$0xff] %v5172_v33  ;;  %11614 = vst [vmem:[#allocation153_spill] sm:$0xff] %v5176_v38  ;;  %v5180_v51 = vmax.f32 %v11615_v15, 0.0  ;;  %v5184_v13 = vmax.f32 %v11617_v49, 0.0  ;;  %v11623_v33 = vsub.f32 0.0, %v4562_v50  ;;  %v11625_v38 = vsub.f32 0.0, %v4565_v62 }
  0xf4   : > { %v5188_v31 = vmax.f32 %v11619_v44, 0.0  ;;  %v5192_v25 = vmax.f32 %v11621_v43, 0.0  ;;  %v11762_v62 = vand.u32 2147483647, %v4415_v1  ;;  %v11769_v1 = vand.u32 2147483647, %v4436_v8 }
  0xf5   : > { %11616 = vst [vmem:[#allocation154_spill] sm:$0xff] %v5180_v51  ;;  %11618 = vst [vmem:[#allocation155_spill] sm:$0xff] %v5184_v13  ;;  %v5196_v19 = vmax.f32 %v11623_v33, 0.0  ;;  %v5200_v15 = vmax.f32 %v11625_v38, 0.0  ;;  %v11627_v51 = vsub.f32 0.0, %v4568_v63  ;;  %v11629_v13 = vld [vmem:[#allocation23_spill] sm:$0xff] }
  0xf6   : > { %11620 = vst [vmem:[#allocation156_spill] sm:$0xff] %v5188_v31  ;;  %11622 = vst [vmem:[#allocation157_spill] sm:$0xff] %v5192_v25  ;;  %v11630_v61 = vsub.f32 0.0, %v11629_v13  ;;  %v11632_v31 = vld [vmem:[#allocation24_spill] sm:$0xff]  ;;  %v11635_v25 = vld [vmem:[#allocation25_spill] sm:$0xff]  ;;  %v956_v50 = vsub.f32 0.0, %v11762_v62 }
  0xf7   : > { %11624 = vst [vmem:[#allocation158_spill] sm:$0xff] %v5196_v19  ;;  %11626 = vst [vmem:[#allocation159_spill] sm:$0xff] %v5200_v15  ;;  %v5204_v49 = vmax.f32 %v11627_v51, 0.0  ;;  %v11633_v27 = vsub.f32 0.0, %v11632_v31  ;;  %v11636_v45 = vsub.f32 0.0, %v11635_v25  ;;  %v11638_v19 = vld [vmem:[#allocation26_spill] sm:$0xff] }
  0xf8   : > { %v5208_v44 = vmax.f32 %v11630_v61, 0.0  ;;  %v11639_v21 = vsub.f32 0.0, %v11638_v19  ;;  %v11641_v15 = vld [vmem:[#allocation27_spill] sm:$0xff]  ;;  %v11763_v63 = vand.u32 2147483647, %v4418_v2  ;;  %v963_v62 = vsub.f32 0.0, %v11769_v1 }
  0xf9   : > { %11628 = vst [vmem:[#allocation160_spill] sm:$0xff] %v5204_v49  ;;  %v5212_v43 = vmax.f32 %v11633_v27, 0.0  ;;  %v5216_v33 = vmax.f32 %v11636_v45, 0.0  ;;  %v11642_v37 = vsub.f32 0.0, %v11641_v15  ;;  %v11644_v49 = vld [vmem:[#allocation28_spill] sm:$0xff] }
  0xfa   : > { %11631 = vst [vmem:[#allocation161_spill] sm:$0xff] %v5208_v44  ;;  %v5220_v38 = vmax.f32 %v11639_v21, 0.0  ;;  %v11645_v14 = vsub.f32 0.0, %v11644_v49  ;;  %v11647_v44 = vld [vmem:[#allocation29_spill] sm:$0xff]  ;;  %v957_v13 = vsub.f32 0.0, %v11763_v63 }
  0xfb   : > { %11634 = vst [vmem:[#allocation162_spill] sm:$0xff] %v5212_v43  ;;  %11637 = vst [vmem:[#allocation163_spill] sm:$0xff] %v5216_v33  ;;  %v5224_v51 = vmax.f32 %v11642_v37, 0.0  ;;  %v11648_v31 = vsub.f32 0.0, %v11647_v44  ;;  %v11650_v43 = vld [vmem:[#allocation30_spill] sm:$0xff]  ;;  %v11653_v33 = vld [vmem:[#allocation31_spill] sm:$0xff] }
  0xfc   : > { %11640 = vst [vmem:[#allocation164_spill] sm:$0xff] %v5220_v38  ;;  %v5228_v61 = vmax.f32 %v11645_v14, 0.0  ;;  %v11651_v25 = vsub.f32 0.0, %v11650_v43  ;;  %v11654_v19 = vsub.f32 0.0, %v11653_v33  ;;  %v11656_v38 = vld [vmem:[#allocation32_spill] sm:$0xff]  ;;  %v11659_v49 = vld [vmem:[#allocation33_spill] sm:$0xff] }
  0xfd   : > { %11643 = vst [vmem:[#allocation165_spill] sm:$0xff] %v5224_v51  ;;  %v5232_v27 = vmax.f32 %v11648_v31, 0.0  ;;  %v11657_v37 = vsub.f32 0.0, %v11656_v38  ;;  %v11660_v14 = vsub.f32 0.0, %v11659_v49  ;;  %v11662_v44 = vld [vmem:[#allocation34_spill] sm:$0xff]  ;;  %v11665_v43 = vld [vmem:[#allocation35_spill] sm:$0xff] }
  0xfe   : > { %11646 = vst [vmem:[#allocation166_spill] sm:$0xff] %v5228_v61  ;;  %v5236_v45 = vmax.f32 %v11651_v25, 0.0  ;;  %v5240_v21 = vmax.f32 %v11654_v19, 0.0  ;;  %v11663_v31 = vsub.f32 0.0, %v11662_v44  ;;  %v11666_v25 = vsub.f32 0.0, %v11665_v43  ;;  %v11668_v33 = vld [vmem:[#allocation36_spill] sm:$0xff] }
  0xff   : > { %11649 = vst [vmem:[#allocation167_spill] sm:$0xff] %v5232_v27  ;;  %v5244_v51 = vmax.f32 %v11657_v37, 0.0  ;;  %v5248_v61 = vmax.f32 %v11660_v14, 0.0  ;;  %v11669_v15 = vsub.f32 0.0, %v11668_v33  ;;  %v11674_v49 = vld [vmem:[#allocation38_spill] sm:$0xff]  ;;  %v11677_v44 = vld [vmem:[#allocation39_spill] sm:$0xff] }
 0x100   : > { %11652 = vst [vmem:[#allocation168_spill] sm:$0xff] %v5236_v45  ;;  %11655 = vst [vmem:[#allocation169_spill] sm:$0xff] %v5240_v21  ;;  %v5252_v27 = vmax.f32 %v11663_v31, 0.0  ;;  %v5256_v45 = vmax.f32 %v11666_v25, 0.0  ;;  %v11671_v21 = vld [vmem:[#allocation37_spill] sm:$0xff]  ;;  %v11675_v14 = vsub.f32 0.0, %v11674_v49 }
 0x101   : > { %11658 = vst [vmem:[#allocation170_spill] sm:$0xff] %v5244_v51  ;;  %11661 = vst [vmem:[#allocation171_spill] sm:$0xff] %v5248_v61  ;;  %v5260_v19 = vmax.f32 %v11669_v15, 0.0  ;;  %v11672_v37 = vsub.f32 0.0, %v11671_v21  ;;  %v11678_v31 = vsub.f32 0.0, %v11677_v44  ;;  %v11680_v43 = vld [vmem:[#allocation40_spill] sm:$0xff] }
 0x102   : > { %11664 = vst [vmem:[#allocation172_spill] sm:$0xff] %v5252_v27  ;;  %11667 = vst [vmem:[#allocation173_spill] sm:$0xff] %v5256_v45  ;;  %v5268_v61 = vmax.f32 %v11675_v14, 0.0  ;;  %v11681_v25 = vsub.f32 0.0, %v11680_v43  ;;  %v11683_v33 = vld [vmem:[#allocation41_spill] sm:$0xff]  ;;  %v11689_v49 = vld [vmem:[#allocation43_spill] sm:$0xff] }
 0x103   : > { %11670 = vst [vmem:[#allocation174_spill] sm:$0xff] %v5260_v19  ;;  %v5264_v51 = vmax.f32 %v11672_v37, 0.0  ;;  %v5272_v27 = vmax.f32 %v11678_v31, 0.0  ;;  %v11684_v38 = vsub.f32 0.0, %v11683_v33  ;;  %v11686_v19 = vld [vmem:[#allocation42_spill] sm:$0xff]  ;;  %v11690_v14 = vsub.f32 0.0, %v11689_v49 }
 0x104   : > { %11676 = vst [vmem:[#allocation175_spill] sm:$0xff] %v5268_v61  ;;  %v5276_v45 = vmax.f32 %v11681_v25, 0.0  ;;  %v11687_v37 = vsub.f32 0.0, %v11686_v19  ;;  %v11692_v31 = vsub.f32 0.0, %v4658_v32  ;;  %v11694_v43 = vld [vmem:[#allocation45_spill] sm:$0xff]  ;;  %v5299_v33 = vld [vmem:[%s4411_s18 + $0xd0] sm:$0xff]  }
 0x105   : > { %11673 = vst [vmem:[#allocation37_spill] sm:$0xff] %v5264_v51  ;;  %11679 = vst [vmem:[#allocation176_spill] sm:$0xff] %v5272_v27  ;;  %v5280_v15 = vmax.f32 %v11684_v38, 0.0  ;;  %v5288_v61 = vmax.f32 %v11690_v14, 0.0  ;;  %v11695_v25 = vsub.f32 0.0, %v11694_v43  ;;  %v11698_v38 = vld [vmem:[#allocation46_spill] sm:$0xff] }
 0x106   : > { %11682 = vst [vmem:[#allocation177_spill] sm:$0xff] %v5276_v45  ;;  %v5284_v51 = vmax.f32 %v11687_v37, 0.0  ;;  %v5292_v27 = vmax.f32 %v11692_v31, 0.0  ;;  %11697 = vst [vmem:[#allocation182_spill] sm:$0xff] %v5299_v33  ;;  %v11701_v37 = vsub.f32 0.0, %v4670_v26  ;;  %v11703_v14 = vld [vmem:[#allocation48_spill] sm:$0xff] }
 0x107   : > { %11685 = vst [vmem:[#allocation178_spill] sm:$0xff] %v5280_v15  ;;  %11691 = vst [vmem:[#allocation180_spill] sm:$0xff] %v5288_v61  ;;  %v5296_v45 = vmax.f32 %v11695_v25, 0.0  ;;  %v11699_v15 = vsub.f32 0.0, %v11698_v38  ;;  %v11704_v61 = vsub.f32 0.0, %v11703_v14  ;;  %v11706_v31 = vld [vmem:[#allocation49_spill] sm:$0xff] }
 0x108   : > { %11688 = vst [vmem:[#allocation179_spill] sm:$0xff] %v5284_v51  ;;  %11693 = vst [vmem:[#allocation181_spill] sm:$0xff] %v5292_v27  ;;  %v5307_v51 = vmax.f32 %v11701_v37, 0.0  ;;  %v11707_v27 = vsub.f32 0.0, %v11706_v31  ;;  %v5318_v25 = vld [vmem:[%s4411_s18 + $0xd8] sm:$0xff]   ;;  %v11714_v37 = vsub.f32 0.0, %v4688_v55 }
 0x109   : > { %11696 = vst [vmem:[#allocation45_spill] sm:$0xff] %v5296_v45  ;;  %v5303_v44 = vmax.f32 %v11699_v15, 0.0  ;;  %v5311_v49 = vmax.f32 %v11704_v61, 0.0  ;;  %11709 = vst [vmem:[#allocation187_spill] sm:$0xff] %v5318_v25  ;;  %v11710_v45 = vsub.f32 0.0, %v4682_v20  ;;  %v11712_v15 = vsub.f32 0.0, %v4685_v39 }
 0x10a   : > { %11702 = vst [vmem:[#allocation184_spill] sm:$0xff] %v5307_v51  ;;  %v5315_v32 = vmax.f32 %v11707_v27, 0.0  ;;  %v5330_v51 = vmax.f32 %v11714_v37, 0.0  ;;  %v11716_v61 = vld [vmem:[#allocation51_spill] sm:$0xff]  ;;  %v5337_v27 = vld [vmem:[%s4411_s18 + $0xe0] sm:$0xff]  }
 0x10b   : > { %11700 = vst [vmem:[#allocation183_spill] sm:$0xff] %v5303_v44  ;;  %11705 = vst [vmem:[#allocation185_spill] sm:$0xff] %v5311_v49  ;;  %v5322_v38 = vmax.f32 %v11710_v45, 0.0  ;;  %v5326_v44 = vmax.f32 %v11712_v15, 0.0  ;;  %v11717_v49 = vsub.f32 0.0, %v11716_v61  ;;  %v11723_v45 = vld [vmem:[#allocation54_spill] sm:$0xff] }
 0x10c   : > { %11708 = vst [vmem:[#allocation186_spill] sm:$0xff] %v5315_v32  ;;  %11715 = vst [vmem:[#allocation190_spill] sm:$0xff] %v5330_v51  ;;  %v11720_v32 = vld [vmem:[#allocation52_spill] sm:$0xff]  ;;  %v5421_v37 = vld [vmem:[%s4411_s18 + $0x118] sm:$0xff]   ;;  %v11770_v2 = vand.u32 2147483647, %v4439_v9 }
 0x10d   : > { %11711 = vst [vmem:[#allocation188_spill] sm:$0xff] %v5322_v38  ;;  %11713 = vst [vmem:[#allocation189_spill] sm:$0xff] %v5326_v44  ;;  %v5334_v31 = vmax.f32 %v11717_v49, 0.0  ;;  %v11721_v14 = vsub.f32 0.0, %v11720_v32  ;;  %v11724_v38 = vsub.f32 0.0, %v11723_v45  ;;  %v5377_v44 = vld [vmem:[%s4411_s18 + $0xf8] sm:$0xff]  }
 0x10e   : > { %11719 = vst [vmem:[#allocation191_spill] sm:$0xff] %v5337_v27  ;;  %11728 = vst [vmem:[#allocation195_spill] sm:$0xff] %v5377_v44  ;;  %v5399_v49 = vld [vmem:[%s4411_s18 + $0x108] sm:$0xff]   ;;  %v5410_v51 = vld [vmem:[%s4411_s18 + $0x110] sm:$0xff]   ;;  %v11765_v27 = vand.u32 2147483647, %v4424_v4 }
 0x10f   : > { %11718 = vst [vmem:[#allocation51_spill] sm:$0xff] %v5334_v31  ;;  %v5341_v26 = vmax.f32 %v11721_v14, 0.0  ;;  %v5345_v20 = vmax.f32 %v11724_v38, 0.0  ;;  %v5366_v14 = vld [vmem:[%s4411_s18 + $0xf0] sm:$0xff]   ;;  %v5388_v31 = vld [vmem:[%s4411_s18 + $0x100] sm:$0xff]   ;;  %11730 = vst [vmem:[#allocation197_spill] sm:$0xff] %v5399_v49 }
 0x110   : > { %11727 = vst [vmem:[#allocation194_spill] sm:$0xff] %v5366_v14  ;;  %11729 = vst [vmem:[#allocation196_spill] sm:$0xff] %v5388_v31  ;;  %v5432_v15 = vld [vmem:[%s4411_s18 + $0x120] sm:$0xff]   ;;  %v11739_v44 = vld [vmem:[#allocation29_spill] sm:$0xff]  ;;  %v959_v56 = vsub.f32 0.0, %v11765_v27  ;;  %v964_v63 = vsub.f32 0.0, %v11770_v2 }
 0x111   : > { %11722 = vst [vmem:[#allocation192_spill] sm:$0xff] %v5341_v26  ;;  %11725 = vst [vmem:[#allocation54_spill] sm:$0xff] %v5345_v20  ;;  %v5355_v26 = vld [vmem:[%s4411_s18 + $0xe8] sm:$0xff]   ;;  %v11745_v20 = vld [vmem:[#allocation34_spill] sm:$0xff]  ;;  %v11766_v32 = vand.u32 2147483647, %v4427_v5 }
 0x112   : > { %11726 = vst [vmem:[#allocation193_spill] sm:$0xff] %v5355_v26  ;;  %11731 = vst [vmem:[#allocation198_spill] sm:$0xff] %v5410_v51  ;;  %v5443_v38 = vld [vmem:[%s4411_s18 + $0x128] sm:$0xff]   ;;  %v11750_v25 = vld [vmem:[#allocation40_spill] sm:$0xff]  ;;  %v11768_v49 = vand.u32 2147483647, %v4433_v7 }
 0x113   : > { %11732 = vst [vmem:[#allocation199_spill] sm:$0xff] %v5421_v37  ;;  %11737 = vst [vmem:[#allocation200_spill] sm:$0xff] %v5432_v15  ;;  %v11752_v33 = vld [vmem:[#allocation43_spill] sm:$0xff]  ;;  %v11753_v31 = vld [vmem:[#allocation44_spill] sm:$0xff]  ;;  %v11771_v3 = vand.u32 2147483647, %v4442_v10 }
 0x114   : > { %11744 = vst [vmem:[#allocation29_spill] sm:$0xff] %v5443_v38  ;;  %v11754_v14 = vld [vmem:[#allocation46_spill] sm:$0xff]  ;;  %v11756_v37 = vld [vmem:[#allocation48_spill] sm:$0xff]  ;;  %v11757_v51 = vld [vmem:[#allocation49_spill] sm:$0xff]  ;;  %v958_v38 = vsub.f32 0.0, %v11764_v0 }
 0x115   : > { %v11758_v19 = vld [vmem:[#allocation50_spill] sm:$0xff]  ;;  %v965_v0 = vsub.f32 0.0, %v11771_v3  ;;  %v11772_v4 = vand.u32 2147483647, %v4445_v11  ;;  %v11773_v5 = vand.u32 2147483647, %v4448_v12 }
 0x116   : > { %v11759_v15 = vld [vmem:[#allocation118_spill] sm:$0xff]  ;;  %v11775_v7 = vand.u32 2147483647, %v4457_v17  ;;  %v11776_v8 = vand.u32 2147483647, %v4460_v18 }
 0x117   : > { %v11760_v57 = vsub.f32 0.0, %v11759_v15  ;;  %v962_v15 = vsub.f32 0.0, %v11768_v49  ;;  %v966_v27 = vsub.f32 0.0, %v11772_v4  ;;  %v11777_v9 = vand.u32 2147483647, %v4466_v22 }
 0x118   : > { %v969_v49 = vsub.f32 0.0, %v11775_v7  ;;  %v970_v1 = vsub.f32 0.0, %v11776_v8  ;;  %v11778_v10 = vand.u32 2147483647, %v4469_v23  ;;  %v11779_v12 = vand.u32 2147483647, %v4472_v24 }
 0x119   : > { %v5474_v26 = vmax.f32 %v11760_v57, 0.0  ;;  %v960_v57 = vsub.f32 0.0, %v11766_v32  ;;  %v967_v32 = vsub.f32 0.0, %v11773_v5  ;;  %v5510_v2 = vsub.f32 0.0, %v11777_v9 }
 0x11a   : > { %v5514_v11 = vsub.f32 0.0, %v11778_v10  ;;  %v5518_v3 = vsub.f32 0.0, %v11779_v12  ;;  %v11781_v17 = vand.u32 2147483647, %v4481_v29  ;;  %v1032_v5 = vmul.f32 1.442695, %v956_v50 }
 0x11b   : > { %11761 = vst [vmem:[#allocation34_spill] sm:$0xff] %v5474_v26  ;;  %v11767_v26 = vand.u32 2147483647, %v4430_v6  ;;  %v11774_v6 = vand.u32 2147483647, %v4454_v16 }
 0x11c   : > { %v11780_v16 = vand.u32 2147483647, %v4478_v28  ;;  %v5526_v18 = vsub.f32 0.0, %v11781_v17  ;;  %v11782_v22 = vand.u32 2147483647, %v4484_v30  ;;  %3608 = vpow2.f32 %v1032_v5  ;;  %v11797_v5 = vld [vmem:[#allocation16_spill] sm:$0xff] }
 0x11d   : > { %v961_v60 = vsub.f32 0.0, %v11767_v26  ;;  %v968_v26 = vsub.f32 0.0, %v11774_v6  ;;  %v11783_v23 = vand.u32 2147483647, %v4490_v34  ;;  %v11784_v24 = vand.u32 2147483647, %v4493_v35 }
 0x11e   : > { %v5522_v4 = vsub.f32 0.0, %v11780_v16  ;;  %v5530_v6 = vsub.f32 0.0, %v11782_v22  ;;  %v1034_v28 = vmul.f32 1.442695, %v957_v13  ;;  %v11785_v9 = vand.u32 2147483647, %v4496_v36 }
 0x11f   : > { %v5534_v7 = vsub.f32 0.0, %v11783_v23  ;;  %v5538_v8 = vsub.f32 0.0, %v11784_v24  ;;  %v11786_v29 = vand.u32 2147483647, %v4502_v40  ;;  %v11787_v30 = vand.u32 2147483647, %v4505_v41 }
 0x120   : > { %v5542_v10 = vsub.f32 0.0, %v11785_v9  ;;  %v1036_v34 = vmul.f32 1.442695, %v958_v38  ;;  %v11788_v16 = vand.u32 2147483647, %v4508_v42  ;;  %3610 = vpow2.f32 %v1034_v28  ;;  %v11801_v28 = vld [vmem:[#allocation18_spill] sm:$0xff] }
 0x121   : > { %v5546_v50 = vsub.f32 0.0, %v11786_v29  ;;  %v5550_v12 = vsub.f32 0.0, %v11787_v30  ;;  %v11789_v35 = vand.u32 2147483647, %v4514_v46  ;;  %v11790_v36 = vand.u32 2147483647, %v4517_v47 }
 0x122   : > { %v5554_v17 = vsub.f32 0.0, %v11788_v16  ;;  %v1038_v40 = vmul.f32 1.442695, %v959_v56  ;;  %v11791_v23 = vand.u32 2147483647, %v4520_v48  ;;  %3612 = vpow2.f32 %v1036_v34  ;;  %v11805_v34 = vld [vmem:[#allocation20_spill] sm:$0xff] }
 0x123   : > { %v5558_v13 = vsub.f32 0.0, %v11789_v35  ;;  %v5562_v22 = vsub.f32 0.0, %v11790_v36  ;;  %v11792_v41 = vand.u32 2147483647, %v4526_v52  ;;  %v1040_v42 = vmul.f32 1.442695, %v960_v57 }
 0x124   : > { %v5566_v24 = vsub.f32 0.0, %v11791_v23  ;;  %v11793_v9 = vand.u32 2147483647, %v4529_v53  ;;  %v11794_v29 = vand.u32 2147483647, %v4532_v54  ;;  %v11799_v36 = vld [vmem:[#allocation17_spill] sm:$0xff]  ;;  %3614 = vpow2.f32 %v1038_v40 }
 0x125   : > { %v5570_v38 = vsub.f32 0.0, %v11792_v41  ;;  %v1042_v56 = vmul.f32 1.442695, %v961_v60  ;;  %v11795_v48 = vand.u32 2147483647, %v4538_v58  ;;  %3616 = vpow2.f32 %v1040_v42  ;;  %v11810_v40 = vld [vmem:[#allocation22_spill] sm:$0xff] }
 0x126   : > { %v5574_v46 = vsub.f32 0.0, %v11793_v9  ;;  %v5578_v47 = vsub.f32 0.0, %v11794_v29  ;;  %v11796_v52 = vand.u32 2147483647, %v4541_v59  ;;  %v1044_v57 = vmul.f32 1.442695, %v962_v15 }
 0x127   : > { %v5582_v30 = vsub.f32 0.0, %v11795_v48  ;;  %v11798_v53 = vand.u32 2147483647, %v11797_v5  ;;  %v11800_v54 = vand.u32 2147483647, %v11799_v36  ;;  %v11803_v9 = vld [vmem:[#allocation19_spill] sm:$0xff]  ;;  %3618 = vpow2.f32 %v1042_v56 }
 0x128   : > { %v5586_v16 = vsub.f32 0.0, %v11796_v52  ;;  %v1046_v60 = vmul.f32 1.442695, %v963_v62  ;;  %v11802_v58 = vand.u32 2147483647, %v11801_v28  ;;  %v11808_v5 = vld [vmem:[#allocation21_spill] sm:$0xff]  ;;  %3620 = vpow2.f32 %v1044_v57 }
 0x129   : > { %v5590_v35 = vsub.f32 0.0, %v11798_v53  ;;  %v5594_v23 = vsub.f32 0.0, %v11800_v54  ;;  %v11804_v59 = vand.u32 2147483647, %v11803_v9  ;;  %v1048_v15 = vmul.f32 1.442695, %v964_v63 }
 0x12a   : > { %v5598_v41 = vsub.f32 0.0, %v11802_v58  ;;  %v11806_v48 = vand.u32 2147483647, %v11805_v34  ;;  %v11809_v53 = vand.u32 2147483647, %v11808_v5  ;;  %v11813_v58 = vld [vmem:[#allocation23_spill] sm:$0xff]  ;;  %3622 = vpow2.f32 %v1046_v60  ;;  %v5644_v60 = vpop.eup %3608 }
 0x12b   : > { %v5602_v29 = vsub.f32 0.0, %v11804_v59  ;;  %v1050_v62 = vmul.f32 1.442695, %v965_v0  ;;  %v11811_v54 = vand.u32 2147483647, %v11810_v40  ;;  %v11815_v42 = vld [vmem:[#allocation24_spill] sm:$0xff]  ;;  %3624 = vpow2.f32 %v1048_v15 }
 0x12c   : > { %v5606_v52 = vsub.f32 0.0, %v11806_v48  ;;  %v5610_v36 = vsub.f32 0.0, %v11809_v53  ;;  %v11814_v9 = vand.u32 2147483647, %v11813_v58  ;;  %v1052_v63 = vmul.f32 1.442695, %v966_v27 }
 0x12d   : > { %v5614_v28 = vsub.f32 0.0, %v11811_v54  ;;  %v11816_v34 = vand.u32 2147483647, %v11815_v42  ;;  %v1054_v0 = vmul.f32 1.442695, %v967_v32  ;;  %v11819_v56 = vld [vmem:[#allocation26_spill] sm:$0xff]  ;;  %3626 = vpow2.f32 %v1050_v62 }
 0x12e   : > { %11807 = vst [vmem:[#allocation40_spill] sm:$0xff] %v5606_v52  ;;  %v5618_v59 = vsub.f32 0.0, %v11814_v9  ;;  %v11817_v52 = vld [vmem:[#allocation25_spill] sm:$0xff]  ;;  %v11820_v40 = vand.u32 2147483647, %v11819_v56  ;;  %v11824_v57 = vld [vmem:[#allocation28_spill] sm:$0xff]  ;;  %3628 = vpow2.f32 %v1052_v63 }
 0x12f   : > { %11812 = vst [vmem:[#allocation43_spill] sm:$0xff] %v5614_v28  ;;  %v5622_v48 = vsub.f32 0.0, %v11816_v34  ;;  %v11818_v5 = vand.u32 2147483647, %v11817_v52  ;;  %v11822_v28 = vld [vmem:[#allocation27_spill] sm:$0xff]  ;;  %11828 = vst [vmem:[#allocation48_spill] sm:$0xff] %v5644_v60  ;;  %3630 = vpow2.f32 %v1054_v0 }
 0x130   : > { %v5630_v54 = vsub.f32 0.0, %v11820_v40  ;;  %v11823_v58 = vand.u32 2147483647, %v11822_v28  ;;  %v1056_v27 = vmul.f32 1.442695, %v968_v26  ;;  %v11829_v56 = vld [vmem:[#allocation30_spill] sm:$0xff] }
 0x131   : > { %v5626_v53 = vsub.f32 0.0, %v11818_v5  ;;  %v11825_v42 = vand.u32 2147483647, %v11824_v57  ;;  %v11826_v52 = vand.u32 2147483647, %v11739_v44  ;;  %v11831_v28 = vld [vmem:[#allocation31_spill] sm:$0xff]  ;;  %v5654_v57 = vpop.eup %3610 }
 0x132   : > { %11821 = vst [vmem:[#allocation44_spill] sm:$0xff] %v5630_v54  ;;  %v5634_v9 = vsub.f32 0.0, %v11823_v58  ;;  %v1058_v32 = vmul.f32 1.442695, %v969_v49  ;;  %v11830_v40 = vand.u32 2147483647, %v11829_v56  ;;  %3632 = vpow2.f32 %v1056_v27 }
 0x133   : > { %v5638_v34 = vsub.f32 0.0, %v11825_v42  ;;  %v5642_v5 = vsub.f32 0.0, %v11826_v52  ;;  %v11832_v58 = vand.u32 2147483647, %v11831_v28  ;;  %v1060_v26 = vmul.f32 1.442695, %v970_v1 }
 0x134   : > { %v5648_v54 = vsub.f32 0.0, %v11830_v40  ;;  %11833 = vst [vmem:[#allocation49_spill] sm:$0xff] %v5654_v57  ;;  %v11834_v42 = vld [vmem:[#allocation32_spill] sm:$0xff]  ;;  %v11836_v62 = vld [vmem:[#allocation33_spill] sm:$0xff]  ;;  %v1062_v56 = vmul.f32 1.442695, %v5510_v2  ;;  %v5665_v40 = vpop.eup %3612  ;;  %3634 = vpow2.f32 %v1058_v32 }
 0x135   : > { %11827 = vst [vmem:[#allocation46_spill] sm:$0xff] %v5642_v5  ;;  %v5652_v15 = vsub.f32 0.0, %v11832_v58  ;;  %v11835_v44 = vand.u32 2147483647, %v11834_v42  ;;  %v11837_v49 = vand.u32 2147483647, %v11836_v62  ;;  %3636 = vpow2.f32 %v1060_v26 }
 0x136   : > { %11838 = vst [vmem:[#allocation50_spill] sm:$0xff] %v5665_v40  ;;  %v11839_v28 = vand.u32 2147483647, %v11745_v20  ;;  %v11840_v1 = vld [vmem:[#allocation35_spill] sm:$0xff]  ;;  %v1064_v42 = vmul.f32 1.442695, %v5514_v11  ;;  %3638 = vpow2.f32 %v1062_v56 }
 0x137   : > { %v5658_v52 = vsub.f32 0.0, %v11835_v44  ;;  %v5662_v5 = vsub.f32 0.0, %v11837_v49  ;;  %v11841_v63 = vand.u32 2147483647, %v11840_v1  ;;  %v5676_v44 = vpop.eup %3614  ;;  %v11843_v62 = vld [vmem:[#allocation36_spill] sm:$0xff]  ;;  %v11847_v1 = vld [vmem:[#allocation38_spill] sm:$0xff] }
 0x138   : > { %v5669_v58 = vsub.f32 0.0, %v11839_v28  ;;  %11842 = vst [vmem:[#allocation16_spill] sm:$0xff] %v5676_v44  ;;  %v11844_v49 = vand.u32 2147483647, %v11843_v62  ;;  %v11845_v2 = vand.u32 2147483647, %v11671_v21  ;;  %v5687_v28 = vpop.eup %3616  ;;  %3640 = vpow2.f32 %v1064_v42 }
 0x139   : > { %v5673_v57 = vsub.f32 0.0, %v11841_v63  ;;  %v1066_v20 = vmul.f32 1.442695, %v5518_v3  ;;  %11846 = vst [vmem:[#allocation17_spill] sm:$0xff] %v5687_v28  ;;  %v11848_v63 = vand.u32 2147483647, %v11847_v1 }
 0x13a   : > { %v5680_v0 = vsub.f32 0.0, %v11844_v49  ;;  %v5684_v40 = vsub.f32 0.0, %v11845_v2  ;;  %v11849_v11 = vld [vmem:[#allocation39_spill] sm:$0xff]  ;;  %v1068_v62 = vmul.f32 1.442695, %v5522_v4  ;;  %v5698_v49 = vpop.eup %3618  ;;  %v11853_v3 = vld [vmem:[#allocation41_spill] sm:$0xff] }
 0x13b   : > { %v5691_v27 = vsub.f32 0.0, %v11848_v63  ;;  %v11850_v60 = vand.u32 2147483647, %v11849_v11  ;;  %11851 = vst [vmem:[#allocation18_spill] sm:$0xff] %v5698_v49  ;;  %v11852_v21 = vand.u32 2147483647, %v11750_v25  ;;  %v5709_v63 = vpop.eup %3620  ;;  %3642 = vpow2.f32 %v1066_v20 }
 0x13c   : > { %v11854_v2 = vand.u32 2147483647, %v11853_v3  ;;  %v1070_v1 = vmul.f32 1.442695, %v5526_v18  ;;  %v11857_v4 = vand.u32 2147483647, %v11752_v33  ;;  %3644 = vpow2.f32 %v1068_v62 }
 0x13d   : > { %v5695_v44 = vsub.f32 0.0, %v11850_v60  ;;  %v5702_v32 = vsub.f32 0.0, %v11852_v21  ;;  %v11855_v60 = vld [vmem:[#allocation42_spill] sm:$0xff]  ;;  %v1072_v25 = vmul.f32 1.442695, %v5530_v6  ;;  %v5720_v21 = vpop.eup %3622  ;;  %v11862_v6 = vld [vmem:[#allocation47_spill] sm:$0xff] }
 0x13e   : > { %v5706_v28 = vsub.f32 0.0, %v11854_v2  ;;  %v11856_v11 = vand.u32 2147483647, %v11855_v60  ;;  %v5717_v49 = vsub.f32 0.0, %v11857_v4  ;;  %11858 = vst [vmem:[#allocation19_spill] sm:$0xff] %v5720_v21  ;;  %3646 = vpow2.f32 %v1070_v1 }
 0x13f   : > { %v11859_v3 = vand.u32 2147483647, %v11753_v31  ;;  %v11860_v18 = vand.u32 2147483647, %v11694_v43  ;;  %v1074_v60 = vmul.f32 1.442695, %v5534_v7  ;;  %3648 = vpow2.f32 %v1072_v25 }
 0x140   : > { %v5713_v26 = vsub.f32 0.0, %v11856_v11  ;;  %v5731_v11 = vpop.eup %3624  ;;  %v11861_v33 = vand.u32 2147483647, %v11754_v14  ;;  %v11863_v4 = vand.u32 2147483647, %v11862_v6 }
 0x141   : > { %v5724_v56 = vsub.f32 0.0, %v11859_v3  ;;  %v5728_v2 = vsub.f32 0.0, %v11860_v18  ;;  %v1076_v31 = vmul.f32 1.442695, %v5538_v8  ;;  %v5742_v3 = vpop.eup %3626  ;;  %v11864_v43 = vand.u32 2147483647, %v11756_v37 }
 0x142   : > { %v5735_v42 = vsub.f32 0.0, %v11861_v33  ;;  %v5739_v21 = vsub.f32 0.0, %v11863_v4  ;;  %v11865_v7 = vand.u32 2147483647, %v11757_v51  ;;  %v1078_v14 = vmul.f32 1.442695, %v5542_v10  ;;  %v5753_v33 = vpop.eup %3628 }
 0x143   : > { %v5746_v20 = vsub.f32 0.0, %v11864_v43  ;;  %v11866_v6 = vand.u32 2147483647, %v11758_v19  ;;  %v11867_v8 = vand.u32 2147483647, %v4685_v39  ;;  %v5764_v43 = vpop.eup %3630  ;;  %3650 = vpow2.f32 %v1074_v60  ;;  %v11871_v39 = vld [vmem:[#allocation52_spill] sm:$0xff] }
 0x144   : > { %v5750_v18 = vsub.f32 0.0, %v11865_v7  ;;  %v1080_v37 = vmul.f32 1.442695, %v5546_v50  ;;  %11868 = vst [vmem:[#allocation20_spill] sm:$0xff] %v5764_v43  ;;  %v11869_v51 = vand.u32 2147483647, %v4688_v55  ;;  %3652 = vpow2.f32 %v1076_v31 }
 0x145   : > { %v5757_v62 = vsub.f32 0.0, %v11866_v6  ;;  %v5761_v4 = vsub.f32 0.0, %v11867_v8  ;;  %v11870_v10 = vand.u32 2147483647, %v11716_v61  ;;  %v1082_v19 = vmul.f32 1.442695, %v5550_v12  ;;  %v5775_v6 = vpop.eup %3632 }
 0x146   : > { %v5768_v1 = vsub.f32 0.0, %v11869_v51  ;;  %v11872_v8 = vand.u32 2147483647, %v11871_v39  ;;  %v11873_v50 = vand.u32 2147483647, %v11723_v45  ;;  %v5786_v51 = vpop.eup %3634  ;;  %v11874_v61 = vld [vmem:[#allocation118_spill] sm:$0xff]  ;;  %3654 = vpow2.f32 %v1078_v14 }
 0x147   : > { %v5772_v7 = vsub.f32 0.0, %v11870_v10  ;;  %v1084_v55 = vmul.f32 1.442695, %v5554_v17  ;;  %v11875_v10 = vand.u32 2147483647, %v11874_v61  ;;  %3656 = vpow2.f32 %v1080_v37 }
 0x148   : > { %v5779_v25 = vsub.f32 0.0, %v11872_v8  ;;  %v5783_v43 = vsub.f32 0.0, %v11873_v50  ;;  %v1086_v12 = vmul.f32 1.442695, %v5558_v13  ;;  %v1088_v39 = vmul.f32 1.442695, %v5562_v22  ;;  %v5794_v8 = vpop.eup %3636 }
 0x149   : > { %v5790_v60 = vsub.f32 0.0, %v11875_v10  ;;  %v1090_v45 = vmul.f32 1.442695, %v5566_v24  ;;  %v1092_v31 = vmul.f32 1.442695, %v5570_v38  ;;  %v5799_v50 = vpop.eup %3638  ;;  %3658 = vpow2.f32 %v1082_v19  ;;  %v11877_v19 = vld [vmem:[#allocation40_spill] sm:$0xff] }
 0x14a   : > { %v1094_v17 = vmul.f32 1.442695, %v5574_v46  ;;  %11876 = vst [vmem:[#allocation21_spill] sm:$0xff] %v5799_v50  ;;  %v1096_v61 = vmul.f32 1.442695, %v5578_v47  ;;  %v5804_v10 = vpop.eup %3640  ;;  %3660 = vpow2.f32 %v1084_v55 }
 0x14b   : > { %v1098_v14 = vmul.f32 1.442695, %v5582_v30  ;;  %v1100_v13 = vmul.f32 1.442695, %v5586_v16  ;;  %v1102_v22 = vmul.f32 1.442695, %v5590_v35  ;;  %v5809_v37 = vpop.eup %3642  ;;  %3662 = vpow2.f32 %v1086_v12 }
 0x14c   : > { %v1104_v24 = vmul.f32 1.442695, %v5594_v23  ;;  %v1106_v38 = vmul.f32 1.442695, %v5598_v41  ;;  %v1108_v46 = vmul.f32 1.442695, %v5602_v29  ;;  %v5814_v50 = vpop.eup %3644  ;;  %3664 = vpow2.f32 %v1088_v39 }
 0x14d   : > { %v1110_v47 = vmul.f32 1.442695, %v11877_v19  ;;  %v1112_v30 = vmul.f32 1.442695, %v5610_v36  ;;  %v11878_v16 = vld [vmem:[#allocation43_spill] sm:$0xff]  ;;  %v5825_v41 = vpop.eup %3646  ;;  %3666 = vpow2.f32 %v1090_v45  ;;  %v11879_v12 = vld [vmem:[#allocation44_spill] sm:$0xff] }
 0x14e   : > { %v5817_v55 = vmul.f32 1.442695, %v11878_v16  ;;  %v5820_v35 = vmul.f32 1.442695, %v5618_v59  ;;  %v5823_v23 = vmul.f32 1.442695, %v5622_v48  ;;  %v5836_v19 = vpop.eup %3648  ;;  %3668 = vpow2.f32 %v1092_v31 }
 0x14f   : > { %v5828_v29 = vmul.f32 1.442695, %v5626_v53  ;;  %v5831_v36 = vmul.f32 1.442695, %v11879_v12  ;;  %v5834_v39 = vmul.f32 1.442695, %v5634_v9  ;;  %v5847_v53 = vpop.eup %3650  ;;  %3670 = vpow2.f32 %v1094_v17 }
 0x150   : > { %v5839_v59 = vmul.f32 1.442695, %v5638_v34  ;;  %v11880_v48 = vld [vmem:[#allocation46_spill] sm:$0xff]  ;;  %v5845_v45 = vmul.f32 1.442695, %v5648_v54  ;;  %11881 = vst [vmem:[#allocation22_spill] sm:$0xff] %v5847_v53  ;;  %v5858_v34 = vpop.eup %3652  ;;  %3672 = vpow2.f32 %v1096_v61 }
 0x151   : > { %v5842_v16 = vmul.f32 1.442695, %v11880_v48  ;;  %v5850_v12 = vmul.f32 1.442695, %v5652_v15  ;;  %v5853_v9 = vmul.f32 1.442695, %v5658_v52  ;;  %v5869_v15 = vpop.eup %3654  ;;  %3674 = vpow2.f32 %v1098_v14 }
 0x152   : > { %v5856_v31 = vmul.f32 1.442695, %v5662_v5  ;;  %11882 = vst [vmem:[#allocation23_spill] sm:$0xff] %v5858_v34  ;;  %v5861_v48 = vmul.f32 1.442695, %v5669_v58  ;;  %11883 = vst [vmem:[#allocation24_spill] sm:$0xff] %v5869_v15  ;;  %v5880_v58 = vpop.eup %3656  ;;  %3676 = vpow2.f32 %v1100_v13 }
 0x153   : > { %v5864_v54 = vmul.f32 1.442695, %v5673_v57  ;;  %v5867_v17 = vmul.f32 1.442695, %v5680_v0  ;;  %v5872_v52 = vmul.f32 1.442695, %v5684_v40  ;;  %v5891_v40 = vpop.eup %3658  ;;  %3678 = vpow2.f32 %v1102_v22 }
 0x154   : > { %v5875_v5 = vmul.f32 1.442695, %v5691_v27  ;;  %v5878_v61 = vmul.f32 1.442695, %v5695_v44  ;;  %11884 = vst [vmem:[#allocation25_spill] sm:$0xff] %v5880_v58  ;;  %11885 = vst [vmem:[#allocation26_spill] sm:$0xff] %v5891_v40  ;;  %3680 = vpow2.f32 %v1104_v24 }
 0x155   : > { %v5883_v57 = vmul.f32 1.442695, %v5702_v32  ;;  %v5886_v0 = vmul.f32 1.442695, %v5706_v28  ;;  %v5889_v14 = vmul.f32 1.442695, %v5713_v26  ;;  %v5902_v32 = vpop.eup %3660  ;;  %3682 = vpow2.f32 %v1106_v38 }
 0x156   : > { %v5894_v27 = vmul.f32 1.442695, %v5717_v49  ;;  %v5897_v44 = vmul.f32 1.442695, %v5724_v56  ;;  %v5900_v13 = vmul.f32 1.442695, %v5728_v2  ;;  %v5911_v58 = vpop.eup %3662  ;;  %3684 = vpow2.f32 %v1108_v46 }
 0x157   : > { %11886 = vst [vmem:[#allocation27_spill] sm:$0xff] %v5902_v32  ;;  %v5905_v28 = vmul.f32 1.442695, %v5735_v42  ;;  %v5908_v26 = vmul.f32 1.442695, %v5739_v21  ;;  %v11887_v40 = vld [vmem:[#allocation48_spill] sm:$0xff]  ;;  %v5920_v24 = vpop.eup %3664  ;;  %3686 = vpow2.f32 %v1110_v47 }
 0x158   : > { %v1187_v22 = vmul.f32 -0.5, %v11887_v40  ;;  %11888 = vst [vmem:[#allocation28_spill] sm:$0xff] %v5911_v58  ;;  %v5914_v49 = vmul.f32 1.442695, %v5746_v20  ;;  %v5917_v56 = vmul.f32 1.442695, %v5750_v18  ;;  %v5929_v38 = vpop.eup %3666  ;;  %3688 = vpow2.f32 %v1112_v30 }
 0x159   : > { %v11889_v2 = vld [vmem:[#allocation49_spill] sm:$0xff]  ;;  %11890 = vst [vmem:[#allocation30_spill] sm:$0xff] %v5920_v24  ;;  %v5923_v42 = vmul.f32 1.442695, %v5757_v62  ;;  %v5926_v21 = vmul.f32 1.442695, %v5761_v4  ;;  %v5940_v46 = vpop.eup %3668  ;;  %3690 = vpow2.f32 %v5817_v55 }
 0x15a   : > { %v1196_v32 = vmul.f32 -0.5, %v11889_v2  ;;  %v11891_v15 = vld [vmem:[#allocation50_spill] sm:$0xff]  ;;  %11892 = vst [vmem:[#allocation31_spill] sm:$0xff] %v5929_v38  ;;  %v5932_v20 = vmul.f32 1.442695, %v5768_v1  ;;  %11894 = vst [vmem:[#allocation33_spill] sm:$0xff] %v5940_v46  ;;  %v5948_v47 = vpop.eup %3670  ;;  %3692 = vpow2.f32 %v5820_v35 }
 0x15b   : > { %v1205_v58 = vmul.f32 -0.5, %v11891_v15  ;;  %v5935_v18 = vmul.f32 1.442695, %v5772_v7  ;;  %v5938_v24 = vmul.f32 1.442695, %v5779_v25  ;;  %v1188_v38 = vadd.f32 1.0, %v1187_v22  ;;  %v5955_v34 = vpop.eup %3672 }
 0x15c   : > { %v5943_v62 = vmul.f32 1.442695, %v5783_v43  ;;  %v5946_v4 = vmul.f32 1.442695, %v5790_v60  ;;  %11895 = vst [vmem:[#allocation35_spill] sm:$0xff] %v5948_v47  ;;  %v5952_v1 = vadd.f32 1.0, %v11887_v40  ;;  %v5960_v22 = vpop.eup %3674  ;;  %3694 = vpow2.f32 %v5823_v23 }
 0x15d   : > { %11893 = vst [vmem:[#allocation32_spill] sm:$0xff] %v5938_v24  ;;  %v1197_v7 = vadd.f32 1.0, %v1196_v32  ;;  %v11896_v25 = vld [vmem:[#allocation16_spill] sm:$0xff]  ;;  %11897 = vst [vmem:[#allocation36_spill] sm:$0xff] %v5955_v34  ;;  %v1206_v30 = vadd.f32 1.0, %v1205_v58  ;;  %v11898_v60 = vld [vmem:[#allocation17_spill] sm:$0xff]  ;;  %v5970_v34 = vpop.eup %3676  ;;  %3696 = vpow2.f32 %v5828_v29  ;;  %v5974_v35 = vmul.f32 %v11887_v40, %v1188_v38 }
 0x15e   : > { %v1214_v24 = vmul.f32 -0.5, %v11896_v25  ;;  %v1223_v46 = vmul.f32 -0.5, %v11898_v60  ;;  %11899 = vst [vmem:[#allocation38_spill] sm:$0xff] %v5960_v22  ;;  %v5964_v55 = vadd.f32 1.0, %v11889_v2  ;;  %v5968_v47 = vadd.f32 1.0, %v11891_v15  ;;  %11902 = vst [vmem:[#allocation42_spill] sm:$0xff] %v5970_v34  ;;  %v5978_v23 = vpop.eup %3678 }
 0x15f   : > { %11903 = vst [vmem:[#allocation47_spill] sm:$0xff] %v5974_v35  ;;  %v11904_v43 = vld [vmem:[#allocation18_spill] sm:$0xff]  ;;  %11905 = vst [vmem:[#allocation52_spill] sm:$0xff] %v5978_v23  ;;  %3698 = vpow2.f32 %v5831_v36  ;;  %v5982_v32 = vmul.f32 %v11889_v2, %v1197_v7  ;;  %v5991_v29 = vmul.f32 %v11891_v15, %v1206_v30  ;;  %v1241_v58 = vmul.f32 -0.5, %v5709_v63 }
 0x160   : > { %11900 = vst [vmem:[#allocation39_spill] sm:$0xff] %v5964_v55  ;;  %11901 = vst [vmem:[#allocation41_spill] sm:$0xff] %v5968_v47  ;;  %v1232_v22 = vmul.f32 -0.5, %v11904_v43  ;;  %v5985_v47 = vadd.f32 1.0, %v11896_v25  ;;  %v1215_v34 = vadd.f32 1.0, %v1214_v24  ;;  %v5987_v55 = vpop.eup %3680  ;;  %3700 = vpow2.f32 %v5834_v39  ;;  %v11910_v24 = vld [vmem:[#allocation19_spill] sm:$0xff] }
 0x161   : > { %11906 = vst [vmem:[#allocation118_spill] sm:$0xff] %v5982_v32  ;;  %11907 = vst [vmem:[#allocation40_spill] sm:$0xff] %v5987_v55  ;;  %v1224_v38 = vadd.f32 1.0, %v1223_v46  ;;  %v5994_v23 = vpop.eup %3682  ;;  %3702 = vpow2.f32 %v5839_v59  ;;  %v5999_v7 = vadd.f32 1.0, %v11898_v60  ;;  %v1250_v32 = vmul.f32 -0.5, %v11910_v24  ;;  %v12495_v35 = vld [vmem:[#allocation134_spill] sm:$0xff] }
 0x162   : > { %11908 = vst [vmem:[#allocation43_spill] sm:$0xff] %v5991_v29  ;;  %11909 = vst [vmem:[#allocation44_spill] sm:$0xff] %v5994_v23  ;;  %v6002_v55 = vpop.eup %3684  ;;  %3704 = vpow2.f32 %v5842_v16  ;;  %v1233_v46 = vadd.f32 1.0, %v1232_v22  ;;  %v1259_v30 = vmul.f32 -0.5, %v5731_v11  ;;  %v6011_v59 = vmul.f32 %v11896_v25, %v1215_v34 }
 0x163   : > { %11911 = vst [vmem:[#allocation46_spill] sm:$0xff] %v6002_v55  ;;  %v6007_v29 = vpop.eup %3686  ;;  %3706 = vpow2.f32 %v5845_v45  ;;  %v6014_v36 = vadd.f32 1.0, %v11904_v43  ;;  %v6021_v16 = vmul.f32 %v11898_v60, %v1224_v38  ;;  %v6024_v22 = vadd.f32 1.0, %v5709_v63 }
 0x164   : > { %11912 = vst [vmem:[#allocation48_spill] sm:$0xff] %v6007_v29  ;;  %11913 = vst [vmem:[#allocation49_spill] sm:$0xff] %v6011_v59  ;;  %v6017_v55 = vpop.eup %3688  ;;  %3708 = vpow2.f32 %v5850_v12  ;;  %v1242_v39 = vadd.f32 1.0, %v1241_v58  ;;  %v1251_v29 = vadd.f32 1.0, %v1250_v32  ;;  %v1268_v23 = vmul.f32 -0.5, %v5742_v3 }
 0x165   : > { %11914 = vst [vmem:[#allocation50_spill] sm:$0xff] %v6017_v55  ;;  %v6026_v45 = vpop.eup %3690  ;;  %3710 = vpow2.f32 %v5853_v9  ;;  %v6035_v12 = vmul.f32 %v11904_v43, %v1233_v46  ;;  %v1260_v38 = vadd.f32 1.0, %v1259_v30  ;;  %v1277_v55 = vmul.f32 -0.5, %v5753_v33  ;;  %v11921_v30 = vld [vmem:[#allocation20_spill] sm:$0xff] }
 0x166   : > { %11915 = vst [vmem:[#allocation16_spill] sm:$0xff] %v6026_v45  ;;  %v6031_v59 = vpop.eup %3692  ;;  %3712 = vpow2.f32 %v5856_v31  ;;  %v6042_v9 = vadd.f32 1.0, %v11910_v24  ;;  %v6046_v34 = vadd.f32 1.0, %v5731_v11  ;;  %v6052_v31 = vmul.f32 %v5709_v63, %v1242_v39 }
 0x167   : > { %11916 = vst [vmem:[#allocation17_spill] sm:$0xff] %v6031_v59  ;;  %11917 = vst [vmem:[#allocation18_spill] sm:$0xff] %v6035_v12  ;;  %v6038_v58 = vpop.eup %3694  ;;  %3714 = vpow2.f32 %v5861_v48  ;;  %v6060_v32 = vmul.f32 %v11910_v24, %v1251_v29  ;;  %v6063_v45 = vadd.f32 1.0, %v5742_v3  ;;  %v1278_v39 = vadd.f32 1.0, %v1277_v55 }
 0x168   : > { %11918 = vst [vmem:[#allocation19_spill] sm:$0xff] %v6038_v58  ;;  %v6048_v59 = vpop.eup %3696  ;;  %3716 = vpow2.f32 %v5864_v54  ;;  %11920 = vst [vmem:[#allocation202_spill] sm:$0xff] %v6052_v31  ;;  %v1286_v58 = vmul.f32 -0.5, %v11921_v30  ;;  %v6069_v54 = vmul.f32 %v5731_v11, %v1260_v38  ;;  %v1295_v46 = vmul.f32 -0.5, %v5775_v6 }
 0x169   : > { %11919 = vst [vmem:[#allocation201_spill] sm:$0xff] %v6048_v59  ;;  %v6056_v48 = vpop.eup %3698  ;;  %3718 = vpow2.f32 %v5867_v17  ;;  %11923 = vst [vmem:[#allocation203_spill] sm:$0xff] %v6060_v32  ;;  %v1269_v59 = vadd.f32 1.0, %v1268_v23  ;;  %v6077_v29 = vadd.f32 1.0, %v5753_v33  ;;  %v1304_v23 = vmul.f32 -0.5, %v5786_v51 }
 0x16a   : > { %11922 = vst [vmem:[#allocation20_spill] sm:$0xff] %v6056_v48  ;;  %v6065_v12 = vpop.eup %3700  ;;  %3720 = vpow2.f32 %v5872_v52  ;;  %11925 = vst [vmem:[#allocation205_spill] sm:$0xff] %v6069_v54  ;;  %v1287_v55 = vadd.f32 1.0, %v1286_v58  ;;  %v1313_v38 = vmul.f32 -0.5, %v5794_v8  ;;  %v6092_v17 = vadd.f32 1.0, %v11921_v30 }
 0x16b   : > { %11924 = vst [vmem:[#allocation204_spill] sm:$0xff] %v6065_v12  ;;  %v6072_v48 = vpop.eup %3702  ;;  %3722 = vpow2.f32 %v5875_v5  ;;  %v6089_v5 = vmul.f32 %v5742_v3, %v1269_v59  ;;  %v6102_v58 = vadd.f32 1.0, %v5775_v6  ;;  %v1296_v52 = vadd.f32 1.0, %v1295_v46 }
 0x16c   : > { %11926 = vst [vmem:[#allocation206_spill] sm:$0xff] %v6072_v48  ;;  %v6080_v12 = vpop.eup %3704  ;;  %3724 = vpow2.f32 %v5878_v61  ;;  %v6099_v61 = vmul.f32 %v5753_v33, %v1278_v39  ;;  %v1314_v39 = vadd.f32 1.0, %v1313_v38  ;;  %v6124_v59 = vadd.f32 1.0, %v5794_v8 }
 0x16d   : > { %11927 = vst [vmem:[#allocation207_spill] sm:$0xff] %v6080_v12  ;;  %v6085_v54 = vpop.eup %3706  ;;  %3726 = vpow2.f32 %v5883_v57  ;;  %11929 = vst [vmem:[#allocation209_spill] sm:$0xff] %v6089_v5  ;;  %v11933_v5 = vld [vmem:[#allocation21_spill] sm:$0xff]  ;;  %v1340_v38 = vmul.f32 -0.5, %v5809_v37 }
 0x16e   : > { %11928 = vst [vmem:[#allocation208_spill] sm:$0xff] %v6085_v54  ;;  %v6095_v12 = vpop.eup %3708  ;;  %3728 = vpow2.f32 %v5886_v0  ;;  %11931 = vst [vmem:[#allocation211_spill] sm:$0xff] %v6099_v61  ;;  %v1305_v54 = vadd.f32 1.0, %v1304_v23  ;;  %v1322_v48 = vmul.f32 -0.5, %v11933_v5  ;;  %v6113_v0 = vmul.f32 %v11921_v30, %v1287_v55 }
 0x16f   : > { %11930 = vst [vmem:[#allocation210_spill] sm:$0xff] %v6095_v12  ;;  %v6104_v57 = vpop.eup %3710  ;;  %3730 = vpow2.f32 %v5889_v14  ;;  %v1331_v12 = vmul.f32 -0.5, %v5804_v10  ;;  %v6120_v14 = vadd.f32 1.0, %v5786_v51  ;;  %v1349_v55 = vmul.f32 -0.5, %v5814_v50 }
 0x170   : > { %11932 = vst [vmem:[#allocation212_spill] sm:$0xff] %v6104_v57  ;;  %v6109_v32 = vpop.eup %3712  ;;  %3732 = vpow2.f32 %v5894_v27  ;;  %11935 = vst [vmem:[#allocation213_spill] sm:$0xff] %v6113_v0  ;;  %v6130_v27 = vmul.f32 %v5775_v6, %v1296_v52  ;;  %v6138_v23 = vmul.f32 %v5786_v51, %v1305_v54  ;;  %v6155_v54 = vadd.f32 1.0, %v5804_v10 }
 0x171   : > { %11934 = vst [vmem:[#allocation21_spill] sm:$0xff] %v6109_v32  ;;  %v6116_v46 = vpop.eup %3714  ;;  %3734 = vpow2.f32 %v5897_v44  ;;  %v1332_v52 = vadd.f32 1.0, %v1331_v12  ;;  %v1341_v12 = vadd.f32 1.0, %v1340_v38  ;;  %v6180_v38 = vadd.f32 1.0, %v5814_v50 }
 0x172   : > { %11936 = vst [vmem:[#allocation214_spill] sm:$0xff] %v6116_v46  ;;  %v6126_v32 = vpop.eup %3716  ;;  %3736 = vpow2.f32 %v5900_v13  ;;  %11938 = vst [vmem:[#allocation216_spill] sm:$0xff] %v6130_v27  ;;  %v6141_v46 = vadd.f32 1.0, %v11933_v5  ;;  %v6147_v13 = vmul.f32 %v5794_v8, %v1314_v39  ;;  %v1367_v39 = vmul.f32 -0.5, %v5836_v19 }
 0x173   : > { %11937 = vst [vmem:[#allocation215_spill] sm:$0xff] %v6126_v32  ;;  %v6134_v44 = vpop.eup %3718  ;;  %3738 = vpow2.f32 %v5905_v28  ;;  %11940 = vst [vmem:[#allocation218_spill] sm:$0xff] %v6138_v23  ;;  %v1323_v32 = vadd.f32 1.0, %v1322_v48  ;;  %v1358_v48 = vmul.f32 -0.5, %v5825_v41  ;;  %v6170_v28 = vadd.f32 1.0, %v5809_v37 }
 0x174   : > { %11939 = vst [vmem:[#allocation217_spill] sm:$0xff] %v6134_v44  ;;  %v6143_v57 = vpop.eup %3720  ;;  %3740 = vpow2.f32 %v5908_v26  ;;  %11942 = vst [vmem:[#allocation220_spill] sm:$0xff] %v6147_v13  ;;  %v1350_v26 = vadd.f32 1.0, %v1349_v55 }
 0x175   : > { %11941 = vst [vmem:[#allocation219_spill] sm:$0xff] %v6143_v57  ;;  %v6150_v44 = vpop.eup %3722  ;;  %3742 = vpow2.f32 %v5914_v49  ;;  %v6167_v49 = vmul.f32 %v11933_v5, %v1323_v32  ;;  %v6202_v32 = vadd.f32 1.0, %v5836_v19 }
 0x176   : > { %11943 = vst [vmem:[#allocation221_spill] sm:$0xff] %v6150_v44  ;;  %v6158_v57 = vpop.eup %3724  ;;  %3744 = vpow2.f32 %v5917_v56  ;;  %v6177_v56 = vmul.f32 %v5804_v10, %v1332_v52  ;;  %v1376_v44 = vmul.f32 -0.5, %v5847_v53  ;;  %v1368_v52 = vadd.f32 1.0, %v1367_v39  ;;  %v11957_v39 = vld [vmem:[#allocation24_spill] sm:$0xff] }
 0x177   : > { %11944 = vst [vmem:[#allocation222_spill] sm:$0xff] %v6158_v57  ;;  %v6163_v13 = vpop.eup %3726  ;;  %3746 = vpow2.f32 %v5923_v42  ;;  %11946 = vst [vmem:[#allocation224_spill] sm:$0xff] %v6167_v49 }
 0x178   : > { %11945 = vst [vmem:[#allocation223_spill] sm:$0xff] %v6163_v13  ;;  %v6173_v57 = vpop.eup %3728  ;;  %3748 = vpow2.f32 %v5926_v21  ;;  %11948 = vst [vmem:[#allocation226_spill] sm:$0xff] %v6177_v56  ;;  %v1359_v13 = vadd.f32 1.0, %v1358_v48  ;;  %v6191_v21 = vmul.f32 %v5809_v37, %v1341_v12  ;;  %v11962_v12 = vld [vmem:[#allocation25_spill] sm:$0xff] }
 0x179   : > { %11947 = vst [vmem:[#allocation225_spill] sm:$0xff] %v6173_v57  ;;  %v6182_v42 = vpop.eup %3730  ;;  %3750 = vpow2.f32 %v5932_v20  ;;  %v11952_v57 = vld [vmem:[#allocation23_spill] sm:$0xff]  ;;  %v6198_v20 = vadd.f32 1.0, %v5825_v41 }
 0x17a   : > { %11949 = vst [vmem:[#allocation227_spill] sm:$0xff] %v6182_v42  ;;  %v6187_v49 = vpop.eup %3732  ;;  %3752 = vpow2.f32 %v5935_v18  ;;  %11951 = vst [vmem:[#allocation229_spill] sm:$0xff] %v6191_v21  ;;  %v1385_v56 = vmul.f32 -0.5, %v11952_v57  ;;  %v11954_v42 = vld [vmem:[#allocation32_spill] sm:$0xff]  ;;  %v6208_v18 = vmul.f32 %v5814_v50, %v1350_v26  ;;  %v6216_v48 = vmul.f32 %v5825_v41, %v1359_v13 }
 0x17b   : > { %11950 = vst [vmem:[#allocation228_spill] sm:$0xff] %v6187_v49  ;;  %v6194_v55 = vpop.eup %3734  ;;  %3754 = vpow2.f32 %v11954_v42  ;;  %v6219_v21 = vadd.f32 1.0, %v5847_v53  ;;  %v6248_v13 = vadd.f32 1.0, %v11957_v39 }
 0x17c   : > { %11953 = vst [vmem:[#allocation230_spill] sm:$0xff] %v6194_v55  ;;  %v6204_v49 = vpop.eup %3736  ;;  %3756 = vpow2.f32 %v5943_v62  ;;  %11956 = vst [vmem:[#allocation231_spill] sm:$0xff] %v6208_v18  ;;  %v1394_v55 = vmul.f32 -0.5, %v11957_v39  ;;  %v6225_v62 = vmul.f32 %v5836_v19, %v1368_v52  ;;  %v1386_v26 = vadd.f32 1.0, %v1385_v56 }
 0x17d   : > { %11955 = vst [vmem:[#allocation32_spill] sm:$0xff] %v6204_v49  ;;  %v6212_v42 = vpop.eup %3738  ;;  %3758 = vpow2.f32 %v5946_v4  ;;  %11959 = vst [vmem:[#allocation233_spill] sm:$0xff] %v6216_v48  ;;  %v1377_v49 = vadd.f32 1.0, %v1376_v44  ;;  %v1403_v18 = vmul.f32 -0.5, %v11962_v12  ;;  %v11964_v4 = vld [vmem:[#allocation39_spill] sm:$0xff]  ;;  %v6233_v48 = vadd.f32 1.0, %v11952_v57 }
 0x17e   : > { %11958 = vst [vmem:[#allocation232_spill] sm:$0xff] %v6212_v42  ;;  %v6221_v23 = vpop.eup %3740  ;;  %3760 = vlog2.f32 %v5952_v1  ;;  %11961 = vst [vmem:[#allocation235_spill] sm:$0xff] %v6225_v62  ;;  %v11965_v44 = vld [vmem:[#allocation26_spill] sm:$0xff]  ;;  %v11967_v1 = vld [vmem:[#allocation41_spill] sm:$0xff]  ;;  %v1395_v56 = vadd.f32 1.0, %v1394_v55  ;;  %v6255_v55 = vmul.f32 %v11952_v57, %v1386_v26  ;;  %v12006_v57 = vmov 0 }
 0x17f   : > { %11960 = vst [vmem:[#allocation234_spill] sm:$0xff] %v6221_v23  ;;  %v6228_v42 = vpop.eup %3742  ;;  %3762 = vlog2.f32 %v11964_v4  ;;  %v1412_v27 = vmul.f32 -0.5, %v11965_v44  ;;  %v11968_v62 = vld [vmem:[#allocation27_spill] sm:$0xff]  ;;  %v6245_v4 = vmul.f32 %v5847_v53, %v1377_v49  ;;  %v1404_v52 = vadd.f32 1.0, %v1403_v18 }
 0x180   : > { %11963 = vst [vmem:[#allocation236_spill] sm:$0xff] %v6228_v42  ;;  %v6236_v23 = vpop.eup %3744  ;;  %3764 = vlog2.f32 %v11967_v1  ;;  %v1421_v0 = vmul.f32 -0.5, %v11968_v62  ;;  %11972 = vst [vmem:[#allocation239_spill] sm:$0xff] %v6255_v55  ;;  %v6258_v1 = vadd.f32 1.0, %v11962_v12  ;;  %v6280_v49 = vadd.f32 1.0, %v11968_v62 }
 0x181   : > { %11966 = vst [vmem:[#allocation39_spill] sm:$0xff] %v6236_v23  ;;  %v6241_v61 = vpop.eup %3746  ;;  %3766 = vlog2.f32 %v5985_v47  ;;  %11970 = vst [vmem:[#allocation237_spill] sm:$0xff] %v6245_v4  ;;  %v11974_v4 = vld [vmem:[#allocation28_spill] sm:$0xff] }
 0x182   : > { %11969 = vst [vmem:[#allocation41_spill] sm:$0xff] %v6241_v61  ;;  %v6251_v23 = vpop.eup %3748  ;;  %3768 = vlog2.f32 %v5999_v7  ;;  %v1413_v61 = vadd.f32 1.0, %v1412_v27  ;;  %v1430_v42 = vmul.f32 -0.5, %v11974_v4  ;;  %v6269_v7 = vmul.f32 %v11957_v39, %v1395_v56 }
 0x183   : > { %11971 = vst [vmem:[#allocation238_spill] sm:$0xff] %v6251_v23  ;;  %v6260_v47 = vpop.eup %3750  ;;  %3770 = vlog2.f32 %v6014_v36  ;;  %v1422_v26 = vadd.f32 1.0, %v1421_v0  ;;  %v11977_v23 = vld [vmem:[#allocation30_spill] sm:$0xff]  ;;  %v6276_v36 = vadd.f32 1.0, %v11965_v44  ;;  %v11983_v56 = vand.u32 2147483647, %v11889_v2 }
 0x184   : > { %11973 = vst [vmem:[#allocation240_spill] sm:$0xff] %v6260_v47  ;;  %v6265_v53 = vpop.eup %3752  ;;  %3772 = vlog2.f32 %v6024_v22  ;;  %11976 = vst [vmem:[#allocation242_spill] sm:$0xff] %v6269_v7  ;;  %v1439_v55 = vmul.f32 -0.5, %v11977_v23  ;;  %v11980_v22 = vand.u32 2147483647, %v11887_v40  ;;  %v6298_v27 = vmul.f32 %v11962_v12, %v1404_v52 }
 0x185   : > { %11975 = vst [vmem:[#allocation241_spill] sm:$0xff] %v6265_v53  ;;  %v6272_v18 = vpop.eup %3754  ;;  %3774 = vlog2.f32 %v6042_v9  ;;  %vm6292_vm1 = vcmp.lt.f32.partialorder %v11983_v56, 0.0004427343  ;;  %v11984_v9 = vmov 0  ;;  %v6309_v2 = vadd.f32 1.0, %v11974_v4 }
 0x186   : > { %11978 = vst [vmem:[#allocation30_spill] sm:$0xff] %v6272_v18  ;;  %v6282_v53 = vpop.eup %3756  ;;  %vm6286_vm0 = vcmp.lt.f32.partialorder %v11980_v22, 0.0004427343  ;;  %v11985_v9 = vsel %vm6292_vm1, 4294967295, %v11984_v9  ;;  %3776 = vlog2.f32 %v6046_v34  ;;  %11987 = vst [vmem:[#allocation245_spill] sm:$0xff] %v6298_v27  ;;  %v6306_v22 = vmul.f32 %v11965_v44, %v1413_v61 }
 0x187   : > { %11979 = vst [vmem:[#allocation243_spill] sm:$0xff] %v6282_v53  ;;  %11986 = vst [vmem:[#allocation244_spill] sm:$0xff] %v11985_v9  ;;  %v11988_v53 = vld [vmem:[#allocation31_spill] sm:$0xff]  ;;  %v6302_v40 = vpop.eup %3758  ;;  %3778 = vlog2.f32 %v6063_v45  ;;  %v1431_v56 = vadd.f32 1.0, %v1430_v42  ;;  %v11991_v34 = vand.u32 2147483647, %v11891_v15  ;;  %v6319_v18 = vmul.f32 %v11968_v62, %v1422_v26 }
 0x188   : > { %v1448_v47 = vmul.f32 -0.5, %v11988_v53  ;;  %11989 = vst [vmem:[#allocation31_spill] sm:$0xff] %v6302_v40  ;;  %11990 = vst [vmem:[#allocation246_spill] sm:$0xff] %v6306_v22  ;;  %v3761_v7 = vpop.eup %3760  ;;  %v11992_v52 = vmov 0  ;;  %3780 = vlog2.f32 %v6077_v29  ;;  %v1440_v45 = vadd.f32 1.0, %v1439_v55  ;;  %v11995_v40 = vld [vmem:[#allocation33_spill] sm:$0xff] }
 0x189   : > { %vm6313_vm2 = vcmp.lt.f32.partialorder %v11991_v34, 0.0004427343  ;;  %11994 = vst [vmem:[#allocation247_spill] sm:$0xff] %v6319_v18  ;;  %v1457_v61 = vmul.f32 -0.5, %v11995_v40  ;;  %v3763_v22 = vpop.eup %3762  ;;  %v11996_v27 = vand.u32 2147483647, %v11896_v25  ;;  %3782 = vlog2.f32 %v6092_v17 }
 0x18a   : > { %v11993_v52 = vsel %vm6313_vm2, 4294967295, %v11992_v52  ;;  %v11997_v42 = vmov 0  ;;  %v6331_v34 = vadd.f32 1.0, %v11977_v23  ;;  %v11999_v29 = vld [vmem:[#allocation35_spill] sm:$0xff]  ;;  %v3765_v18 = vpop.eup %3764  ;;  %3784 = vlog2.f32 %v6102_v58  ;;  %v12000_v25 = vld [vmem:[#allocation36_spill] sm:$0xff] }
 0x18b   : > { %vm6324_vm3 = vcmp.lt.f32.partialorder %v11996_v27, 0.0004427343  ;;  %v1466_v26 = vmul.f32 -0.5, %v11999_v29  ;;  %v1449_v62 = vadd.f32 1.0, %v1448_v47  ;;  %v1475_v27 = vmul.f32 -0.5, %v12000_v25  ;;  %v3767_v44 = vpop.eup %3766 }
 0x18c   : > { %v11998_v42 = vsel %vm6324_vm3, 4294967295, %v11997_v42  ;;  %v12001_v12 = vand.u32 2147483647, %v11898_v60  ;;  %v12002_v17 = vmov 0  ;;  %3786 = vlog2.f32 %v6120_v14  ;;  %v3769_v47 = vpop.eup %3768 }
 0x18d   : > { %v6345_v15 = vmul.f32 %v11974_v4, %v1431_v56  ;;  %v6348_v39 = vadd.f32 1.0, %v11988_v53  ;;  %v12005_v55 = vand.u32 2147483647, %v11904_v43  ;;  %v12008_v60 = vand.u32 2147483647, %v5709_v63  ;;  %v3771_v43 = vpop.eup %3770 }
 0x18e   : > { %vm6339_vm4 = vcmp.lt.f32.partialorder %v12001_v12, 0.0004427343  ;;  %v12009_v12 = vmov 0  ;;  %3788 = vlog2.f32 %v6124_v59  ;;  %v6365_v14 = vmul.f32 %v11977_v23, %v1440_v45 }
 0x18f   : > { %v12003_v17 = vsel %vm6339_vm4, 4294967295, %v12002_v17  ;;  %12004 = vst [vmem:[#allocation33_spill] sm:$0xff] %v6345_v15  ;;  %vm6353_vm5 = vcmp.lt.f32.partialorder %v12005_v55, 0.0004427343  ;;  %vm6359_vm6 = vcmp.lt.f32.partialorder %v12008_v60, 0.0004427343  ;;  %3790 = vlog2.f32 %v6141_v46  ;;  %v3773_v60 = vpop.eup %3772 }
 0x190   : > { %v12007_v57 = vsel %vm6353_vm5, 4294967295, %v12006_v57  ;;  %v12010_v12 = vsel %vm6359_vm6, 4294967295, %v12009_v12  ;;  %12012 = vst [vmem:[#allocation36_spill] sm:$0xff] %v6365_v14  ;;  %v6368_v56 = vadd.f32 1.0, %v11995_v40  ;;  %v1458_v58 = vadd.f32 1.0, %v1457_v61  ;;  %v3775_v61 = vpop.eup %3774 }
 0x191   : > { %12011 = vst [vmem:[#allocation35_spill] sm:$0xff] %v12010_v12  ;;  %v6370_v55 = vmul.f32 0.6931472, %v3761_v7  ;;  %v6372_v15 = vmul.f32 0.6931472, %v3763_v22  ;;  %v1467_v63 = vadd.f32 1.0, %v1466_v26  ;;  %3792 = vlog2.f32 %v6155_v54 }
 0x192   : > { %v12015_v4 = vand.u32 2147483647, %v11910_v24  ;;  %v12016_v59 = vmov 0  ;;  %v12019_v45 = vand.u32 2147483647, %v5731_v11  ;;  %v12020_v14 = vmov 0 }
 0x193   : > { %12013 = vst [vmem:[#allocation248_spill] sm:$0xff] %v6370_v55  ;;  %12014 = vst [vmem:[#allocation249_spill] sm:$0xff] %v6372_v15  ;;  %v12023_v7 = vand.u32 2147483647, %v5742_v3  ;;  %v12024_v22 = vmov 0  ;;  %v6395_v24 = vmul.f32 %v11988_v53, %v1449_v62  ;;  %3794 = vlog2.f32 %v6170_v28  ;;  %v3777_v62 = vpop.eup %3776 }
 0x194   : > { %vm6377_vm7 = vcmp.lt.f32.partialorder %v12015_v4, 0.0004427343  ;;  %vm6383_vm8 = vcmp.lt.f32.partialorder %v12019_v45, 0.0004427343  ;;  %v1476_v4 = vadd.f32 1.0, %v1475_v27  ;;  %v12029_v45 = vmov 0  ;;  %v3779_v27 = vpop.eup %3778 }
 0x195   : > { %v12017_v59 = vsel %vm6377_vm7, 4294967295, %v12016_v59  ;;  %v12021_v14 = vsel %vm6383_vm8, 4294967295, %v12020_v14  ;;  %vm6389_vm9 = vcmp.lt.f32.partialorder %v12023_v7, 0.0004427343  ;;  %12027 = vst [vmem:[#allocation253_spill] sm:$0xff] %v6395_v24  ;;  %v6408_v3 = vadd.f32 1.0, %v11999_v29  ;;  %v3781_v55 = vpop.eup %3780 }
 0x196   : > { %12018 = vst [vmem:[#allocation250_spill] sm:$0xff] %v12017_v59  ;;  %12022 = vst [vmem:[#allocation251_spill] sm:$0xff] %v12021_v14  ;;  %v12025_v22 = vsel %vm6389_vm9, 4294967295, %v12024_v22  ;;  %v6398_v11 = vmul.f32 0.6931472, %v3765_v18  ;;  %3796 = vlog2.f32 %v6180_v38  ;;  %v6415_v18 = vmul.f32 %v11995_v40, %v1458_v58 }
 0x197   : > { %12026 = vst [vmem:[#allocation252_spill] sm:$0xff] %v12025_v22  ;;  %v12028_v26 = vand.u32 2147483647, %v5753_v33  ;;  %v6411_v7 = vmul.f32 0.6931472, %v3767_v44  ;;  %v6418_v33 = vadd.f32 1.0, %v12000_v25  ;;  %3798 = vlog2.f32 %v6198_v20 }
 0x198   : > { %12033 = vst [vmem:[#allocation256_spill] sm:$0xff] %v6415_v18  ;;  %v12035_v54 = vand.u32 2147483647, %v11921_v30  ;;  %v12036_v38 = vmov 0  ;;  %v12039_v58 = vand.u32 2147483647, %v5775_v6  ;;  %v6442_v28 = vmul.f32 %v11999_v29, %v1467_v63  ;;  %v3783_v6 = vpop.eup %3782 }
 0x199   : > { %vm6402_vm10 = vcmp.lt.f32.partialorder %v12028_v26, 0.0004427343  ;;  %12032 = vst [vmem:[#allocation255_spill] sm:$0xff] %v6411_v7  ;;  %v12040_v46 = vmov 0  ;;  %v6444_v9 = vmul.f32 0.6931472, %v3769_v47  ;;  %3800 = vlog2.f32 %v6202_v32  ;;  %v3785_v47 = vpop.eup %3784 }
 0x19a   : > { %v12030_v45 = vsel %vm6402_vm10, 4294967295, %v12029_v45  ;;  %vm6430_vm11 = vcmp.lt.f32.partialorder %v12035_v54, 0.0004427343  ;;  %vm6436_vm12 = vcmp.lt.f32.partialorder %v12039_v58, 0.0004427343  ;;  %12043 = vst [vmem:[#allocation259_spill] sm:$0xff] %v6442_v28  ;;  %v6448_v30 = vmul.f32 %v12000_v25, %v1476_v4  ;;  %v3787_v4 = vpop.eup %3786 }
 0x19b   : > { %12031 = vst [vmem:[#allocation254_spill] sm:$0xff] %v12030_v45  ;;  %v12037_v38 = vsel %vm6430_vm11, 4294967295, %v12036_v38  ;;  %v12041_v46 = vsel %vm6436_vm12, 4294967295, %v12040_v46  ;;  %v12045_v54 = vld [vmem:[#allocation38_spill] sm:$0xff]  ;;  %v12046_v58 = vld [vmem:[#allocation43_spill] sm:$0xff]  ;;  %3802 = vlog2.f32 %v6219_v21  ;;  %v12064_v32 = vmov 0 }
 0x19c   : > { %12038 = vst [vmem:[#allocation257_spill] sm:$0xff] %v12037_v38  ;;  %12042 = vst [vmem:[#allocation258_spill] sm:$0xff] %v12041_v46  ;;  %v1484_v44 = vmul.f32 -0.5, %v12045_v54  ;;  %v6455_v20 = vmul.f32 0.6931472, %v3771_v43  ;;  %v12054_v43 = vmov 0  ;;  %3804 = vlog2.f32 %v6233_v48 }
 0x19d   : > { %12044 = vst [vmem:[#allocation260_spill] sm:$0xff] %v6448_v30  ;;  %v6457_v63 = vmul.f32 0.6931472, %v3773_v60  ;;  %v12050_v26 = vand.u32 2147483647, %v5786_v51  ;;  %v12057_v60 = vmov 0  ;;  %3806 = vlog2.f32 %v6248_v13 }
 0x19e   : > { %12047 = vst [vmem:[#allocation38_spill] sm:$0xff] %v6455_v20  ;;  %v12053_v15 = vand.u32 2147483647, %v5794_v8  ;;  %v12056_v21 = vand.u32 2147483647, %v11933_v5  ;;  %v3789_v5 = vpop.eup %3788  ;;  %3808 = vlog2.f32 %v6258_v1  ;;  %v12067_v13 = vld [vmem:[#allocation18_spill] sm:$0xff] }
 0x19f   : > { %12048 = vst [vmem:[#allocation43_spill] sm:$0xff] %v6457_v63  ;;  %vm6466_vm13 = vcmp.lt.f32.partialorder %v12050_v26, 0.0004427343  ;;  %v6485_v26 = vadd.f32 1.0, %v12045_v54  ;;  %v6487_v7 = vmul.f32 0.6931472, %v3775_v61  ;;  %3810 = vlog2.f32 %v6276_v36 }
 0x1a0   : > { %vm6472_vm14 = vcmp.lt.f32.partialorder %v12053_v15, 0.0004427343  ;;  %vm6478_vm15 = vcmp.lt.f32.partialorder %v12056_v21, 0.0004427343  ;;  %v6489_v8 = vmul.f32 0.6931472, %v3777_v62  ;;  %v3791_v62 = vpop.eup %3790  ;;  %3812 = vlog2.f32 %v6280_v49 }
 0x1a1   : > { %v12055_v43 = vsel %vm6472_vm14, 4294967295, %v12054_v43  ;;  %v12058_v60 = vsel %vm6478_vm15, 4294967295, %v12057_v60  ;;  %12059 = vst [vmem:[#allocation261_spill] sm:$0xff] %v6487_v7  ;;  %v6491_v15 = vmul.f32 0.6931472, %v3779_v27  ;;  %v1485_v61 = vadd.f32 1.0, %v1484_v44  ;;  %v3793_v48 = vpop.eup %3792 }
 0x1a2   : > { %12060 = vst [vmem:[#allocation262_spill] sm:$0xff] %v6489_v8  ;;  %v6498_v21 = vmul.f32 0.6931472, %v3781_v55  ;;  %v12063_v51 = vand.u32 2147483647, %v5804_v10  ;;  %v12073_v44 = vmov 0  ;;  %v3795_v63 = vpop.eup %3794  ;;  %3814 = vlog2.f32 %v6309_v2 }
 0x1a3   : > { %12061 = vst [vmem:[#allocation263_spill] sm:$0xff] %v6491_v15  ;;  %v12068_v10 = vand.u32 2147483647, %v5809_v37  ;;  %v12072_v1 = vand.u32 2147483647, %v5814_v50  ;;  %v12078_v37 = vld [vmem:[#allocation42_spill] sm:$0xff]  ;;  %3816 = vlog2.f32 %v6331_v34 }
 0x1a4   : > { %12062 = vst [vmem:[#allocation264_spill] sm:$0xff] %v6498_v21  ;;  %vm6502_vm3 = vcmp.lt.f32.partialorder %v12063_v51, 0.0004427343  ;;  %v12069_v51 = vmov 0  ;;  %v6529_v20 = vmul.f32 0.6931472, %v3783_v6  ;;  %3818 = vlog2.f32 %v6348_v39 }
 0x1a5   : > { %v12065_v32 = vsel %vm6502_vm3, 4294967295, %v12064_v32  ;;  %vm6517_vm4 = vcmp.lt.f32.partialorder %v12068_v10, 0.0004427343  ;;  %vm6523_vm2 = vcmp.lt.f32.partialorder %v12072_v1, 0.0004427343  ;;  %v1493_v10 = vmul.f32 -0.5, %v12078_v37 }
 0x1a6   : > { %12066 = vst [vmem:[#allocation265_spill] sm:$0xff] %v12065_v32  ;;  %v12070_v51 = vsel %vm6517_vm4, 4294967295, %v12069_v51  ;;  %v12074_v44 = vsel %vm6523_vm2, 4294967295, %v12073_v44  ;;  %12076 = vst [vmem:[#allocation267_spill] sm:$0xff] %v6529_v20  ;;  %v6531_v55 = vmul.f32 0.6931472, %v3785_v47  ;;  %v3797_v47 = vpop.eup %3796  ;;  %3820 = vlog2.f32 %v6368_v56 }
 0x1a7   : > { %12071 = vst [vmem:[#allocation18_spill] sm:$0xff] %v12070_v51  ;;  %12075 = vst [vmem:[#allocation266_spill] sm:$0xff] %v12074_v44  ;;  %v12082_v49 = vand.u32 2147483647, %v5825_v41  ;;  %v12083_v27 = vmov 0  ;;  %v12086_v1 = vmov 0  ;;  %3822 = vlog2.f32 %v6408_v3 }
 0x1a8   : > { %12077 = vst [vmem:[#allocation268_spill] sm:$0xff] %v6531_v55  ;;  %v12085_v12 = vand.u32 2147483647, %v5836_v19  ;;  %v12088_v7 = vld [vmem:[#allocation22_spill] sm:$0xff]  ;;  %v12090_v36 = vmov 0  ;;  %v6572_v19 = vmul.f32 %v12045_v54, %v1485_v61  ;;  %v12097_v2 = vld [vmem:[#allocation23_spill] sm:$0xff]  ;;  %3824 = vlog2.f32 %v6418_v33 }
 0x1a9   : > { %vm6549_vm6 = vcmp.lt.f32.partialorder %v12082_v49, 0.0004427343  ;;  %v12089_v14 = vand.u32 2147483647, %v12088_v7  ;;  %v3799_v7 = vpop.eup %3798  ;;  %v6577_v15 = vmul.f32 0.6931472, %v3789_v5  ;;  %3826 = vlog2.f32 %v6485_v26 }
 0x1aa   : > { %v12084_v27 = vsel %vm6549_vm6, 4294967295, %v12083_v27  ;;  %vm6555_vm5 = vcmp.lt.f32.partialorder %v12085_v12, 0.0004427343  ;;  %12094 = vst [vmem:[#allocation22_spill] sm:$0xff] %v6572_v19  ;;  %v1490_v12 = vadd.f32 1.0, %v12078_v37  ;;  %v12099_v8 = vmov 0  ;;  %v3801_v34 = vpop.eup %3800 }
 0x1ab   : > { %v12087_v1 = vsel %vm6555_vm5, 4294967295, %v12086_v1  ;;  %vm6561_vm8 = vcmp.lt.f32.partialorder %v12089_v14, 0.0004427343  ;;  %v6575_v14 = vmul.f32 0.6931472, %v3787_v4  ;;  %12095 = vst [vmem:[#allocation269_spill] sm:$0xff] %v6577_v15 }
 0x1ac   : > { %v12091_v36 = vsel %vm6561_vm8, 4294967295, %v12090_v36  ;;  %v6579_v6 = vmul.f32 0.6931472, %v3791_v62  ;;  %v12098_v22 = vand.u32 2147483647, %v12097_v2  ;;  %v12104_v62 = vld [vmem:[#allocation24_spill] sm:$0xff]  ;;  %v3803_v2 = vpop.eup %3802  ;;  %3828 = vlog2.f32 %v1490_v12 }
 0x1ad   : > { %12092 = vst [vmem:[#allocation42_spill] sm:$0xff] %v12091_v36  ;;  %v12105_v21 = vand.u32 2147483647, %v12104_v62  ;;  %v1494_v39 = vadd.f32 1.0, %v1493_v10  ;;  %v6603_v41 = vmul.f32 0.6931472, %v3793_v48  ;;  %v3805_v55 = vpop.eup %3804 }
 0x1ae   : > { %12096 = vst [vmem:[#allocation270_spill] sm:$0xff] %v6579_v6  ;;  %vm6583_vm9 = vcmp.lt.f32.partialorder %v12098_v22, 0.0004427343  ;;  %v12106_v22 = vmov 0  ;;  %v12110_v45 = vld [vmem:[#allocation25_spill] sm:$0xff]  ;;  %v12112_v49 = vmov 0  ;;  %v3807_v3 = vpop.eup %3806 }
 0x1af   : > { %v12100_v8 = vsel %vm6583_vm9, 4294967295, %v12099_v8  ;;  %vm6598_vm10 = vcmp.lt.f32.partialorder %v12105_v21, 0.0004427343  ;;  %12109 = vst [vmem:[#allocation271_spill] sm:$0xff] %v6603_v41  ;;  %v12111_v38 = vand.u32 2147483647, %v12110_v45 }
 0x1b0   : > { %12101 = vst [vmem:[#allocation23_spill] sm:$0xff] %v12100_v8  ;;  %v12107_v22 = vsel %vm6598_vm10, 4294967295, %v12106_v22  ;;  %v1496_v62 = vand.u32 2147483647, %v12078_v37  ;;  %v12115_v21 = vld [vmem:[#allocation52_spill] sm:$0xff]  ;;  %v12118_v10 = vld [vmem:[#allocation26_spill] sm:$0xff] }
 0x1b1   : > { %12108 = vst [vmem:[#allocation24_spill] sm:$0xff] %v12107_v22  ;;  %vm6607_vm11 = vcmp.lt.f32.partialorder %v12111_v38, 0.0004427343  ;;  %v1502_v5 = vmul.f32 -0.5, %v12115_v21  ;;  %v6614_v4 = vmul.f32 0.6931472, %v3795_v63 }
 0x1b2   : > { %v12113_v49 = vsel %vm6607_vm11, 4294967295, %v12112_v49  ;;  %v6616_v56 = vmul.f32 0.6931472, %v3797_v47  ;;  %v12119_v48 = vand.u32 2147483647, %v12118_v10  ;;  %v12120_v46 = vmov 0  ;;  %v3809_v47 = vpop.eup %3808 }
 0x1b3   : > { %12114 = vst [vmem:[#allocation25_spill] sm:$0xff] %v12113_v49  ;;  %12116 = vst [vmem:[#allocation52_spill] sm:$0xff] %v6614_v4  ;;  %v1499_v45 = vadd.f32 1.0, %v12115_v21  ;;  %v12123_v38 = vld [vmem:[#allocation218_spill] sm:$0xff]  ;;  %v12126_v61 = vld [vmem:[#allocation27_spill] sm:$0xff]  ;;  %v12132_v20 = vmov 0 }
 0x1b4   : > { %12117 = vst [vmem:[#allocation272_spill] sm:$0xff] %v6616_v56  ;;  %vm6620_vm12 = vcmp.lt.f32.partialorder %v12119_v48, 0.0004427343  ;;  %v12127_v33 = vand.u32 2147483647, %v12126_v61  ;;  %v12130_v50 = vld [vmem:[#allocation28_spill] sm:$0xff]  ;;  %v6658_v61 = vmul.f32 %v12078_v37, %v1494_v39 }
 0x1b5   : > { %v12121_v46 = vsel %vm6620_vm12, 4294967295, %v12120_v46  ;;  %v12131_v59 = vand.u32 2147483647, %v12130_v50  ;;  %v6651_v15 = vmul.f32 0.6931472, %v3799_v7  ;;  %v1503_v37 = vadd.f32 1.0, %v1502_v5 }
 0x1b6   : > { %12122 = vst [vmem:[#allocation26_spill] sm:$0xff] %v12121_v46  ;;  %vm6640_vm7 = vcmp.lt.f32.partialorder %v12127_v33, 0.0004427343  ;;  %v6653_v63 = vmul.f32 0.6931472, %v3801_v34  ;;  %12137 = vst [vmem:[#allocation273_spill] sm:$0xff] %v6658_v61  ;;  %v3811_v33 = vpop.eup %3810  ;;  %3830 = vlog2.f32 %v1499_v45 }
 0x1b7   : > { %vm6646_vm1 = vcmp.lt.f32.partialorder %v12131_v59, 0.0004427343  ;;  %12134 = vst [vmem:[#allocation218_spill] sm:$0xff] %v6651_v15  ;;  %v6655_v48 = vmul.f32 0.6931472, %v3803_v2  ;;  %v12145_v39 = vld [vmem:[#allocation40_spill] sm:$0xff]  ;;  %v3813_v10 = vpop.eup %3812 }
 0x1b8   : > { %v12133_v20 = vsel %vm6646_vm1, 4294967295, %v12132_v20  ;;  %12135 = vst [vmem:[#allocation27_spill] sm:$0xff] %v6653_v63  ;;  %v12139_v50 = vand.u32 2147483647, %v11977_v23  ;;  %v12142_v7 = vand.u32 2147483647, %v11988_v53  ;;  %v3815_v5 = vpop.eup %3814 }
 0x1b9   : > { %12136 = vst [vmem:[#allocation28_spill] sm:$0xff] %v6655_v48  ;;  %v1508_v2 = vadd.f32 1.0, %v12145_v39  ;;  %v6685_v53 = vmul.f32 0.6931472, %v3805_v55  ;;  %v12150_v12 = vmov 0  ;;  %v1511_v23 = vmul.f32 -0.5, %v12145_v39  ;;  %v3817_v44 = vpop.eup %3816 }
 0x1ba   : > { %vm6666_vm15 = vcmp.lt.f32.partialorder %v12139_v50, 0.0004427343  ;;  %vm6672_vm14 = vcmp.lt.f32.partialorder %v12142_v7, 0.0004427343  ;;  %v12149_v7 = vand.u32 2147483647, %v11995_v40  ;;  %v3819_v45 = vpop.eup %3818 }
 0x1bb   : > { %12148 = vst [vmem:[#allocation40_spill] sm:$0xff] %v6685_v53  ;;  %v6693_v41 = vmul.f32 0.6931472, %v3807_v3  ;;  %v1505_v51 = vand.u32 2147483647, %v12115_v21  ;;  %v12154_v4 = vld [vmem:[#allocation44_spill] sm:$0xff]  ;;  %3832 = vlog2.f32 %v1508_v2 }
 0x1bc   : > { %vm6689_vm3 = vcmp.lt.f32.partialorder %v12149_v7, 0.0004427343  ;;  %v1517_v32 = vadd.f32 1.0, %v12154_v4  ;;  %v12155_v55 = vld [vmem:[#allocation233_spill] sm:$0xff]  ;;  %v6710_v56 = vmul.f32 0.6931472, %v3809_v47 }
 0x1bd   : > { %v12151_v12 = vsel %vm6689_vm3, 4294967295, %v12150_v12  ;;  %12153 = vst [vmem:[#allocation275_spill] sm:$0xff] %v6693_v41  ;;  %v12159_v50 = vand.u32 2147483647, %v11999_v29  ;;  %v12160_v6 = vmov 0  ;;  %v12164_v15 = vmov 0 }
 0x1be   : > { %12152 = vst [vmem:[#allocation274_spill] sm:$0xff] %v12151_v12  ;;  %12158 = vst [vmem:[#allocation44_spill] sm:$0xff] %v6710_v56  ;;  %v12163_v40 = vand.u32 2147483647, %v12000_v25  ;;  %v6724_v63 = vmul.f32 0.6931472, %v3811_v33  ;;  %v6733_v29 = vmul.f32 %v12115_v21, %v1503_v37  ;;  %v3821_v25 = vpop.eup %3820  ;;  %3834 = vlog2.f32 %v1517_v32 }
 0x1bf   : > { %vm6714_vm2 = vcmp.lt.f32.partialorder %v12159_v50, 0.0004427343  ;;  %v12168_v36 = vand.u32 2147483647, %v12045_v54  ;;  %v12169_v47 = vmov 0  ;;  %v1520_v50 = vmul.f32 -0.5, %v12154_v4  ;;  %v3823_v3 = vpop.eup %3822 }
 0x1c0   : > { %v12161_v6 = vsel %vm6714_vm2, 4294967295, %v12160_v6  ;;  %vm6720_vm6 = vcmp.lt.f32.partialorder %v12163_v40, 0.0004427343  ;;  %12167 = vst [vmem:[#allocation277_spill] sm:$0xff] %v6724_v63  ;;  %12172 = vst [vmem:[#allocation279_spill] sm:$0xff] %v6733_v29  ;;  %v12176_v54 = vld [vmem:[#allocation46_spill] sm:$0xff] }
 0x1c1   : > { %12162 = vst [vmem:[#allocation233_spill] sm:$0xff] %v12161_v6  ;;  %v12165_v15 = vsel %vm6720_vm6, 4294967295, %v12164_v15  ;;  %vm6728_vm8 = vcmp.lt.f32.partialorder %v12168_v36, 0.0004427343  ;;  %v6740_v33 = vmul.f32 0.6931472, %v3813_v10  ;;  %v3825_v10 = vpop.eup %3824 }
 0x1c2   : > { %12166 = vst [vmem:[#allocation276_spill] sm:$0xff] %v12165_v15  ;;  %v12170_v47 = vsel %vm6728_vm8, 4294967295, %v12169_v47  ;;  %v6742_v48 = vmul.f32 0.6931472, %v3815_v5  ;;  %v1526_v36 = vadd.f32 1.0, %v12176_v54  ;;  %v12178_v37 = vmov 0 }
 0x1c3   : > { %12171 = vst [vmem:[#allocation278_spill] sm:$0xff] %v12170_v47  ;;  %12174 = vst [vmem:[#allocation280_spill] sm:$0xff] %v6740_v33  ;;  %vm6749_vm5 = vcmp.lt.f32.partialorder %v1496_v62, 0.0004427343  ;;  %v1512_v2 = vadd.f32 1.0, %v1511_v23  ;;  %v12184_v21 = vmov 0  ;;  %v3827_v23 = vpop.eup %3826 }
 0x1c4   : > { %12175 = vst [vmem:[#allocation281_spill] sm:$0xff] %v6742_v48  ;;  %v12179_v37 = vsel %vm6749_vm5, 4294967295, %v12178_v37  ;;  %v1514_v8 = vand.u32 2147483647, %v12145_v39  ;;  %v6758_v53 = vmul.f32 0.6931472, %v3817_v44  ;;  %3836 = vlog2.f32 %v1526_v36  ;;  %v3829_v46 = vpop.eup %3828 }
 0x1c5   : > { %12180 = vst [vmem:[#allocation46_spill] sm:$0xff] %v12179_v37  ;;  %v6760_v40 = vmul.f32 0.6931472, %v3819_v45  ;;  %vm6762_vm9 = vcmp.lt.f32.partialorder %v1505_v51, 0.0004427343  ;;  %v1529_v62 = vmul.f32 -0.5, %v12176_v54  ;;  %v3831_v33 = vpop.eup %3830 }
 0x1c6   : > { %12182 = vst [vmem:[#allocation282_spill] sm:$0xff] %v6758_v53  ;;  %v12185_v21 = vsel %vm6762_vm9, 4294967295, %v12184_v21  ;;  %v12187_v41 = vld [vmem:[#allocation246_spill] sm:$0xff]  ;;  %v6771_v7 = vmul.f32 0.6931472, %v3821_v25  ;;  %v1521_v49 = vadd.f32 1.0, %v1520_v50  ;;  %v6788_v50 = vmul.f32 %v12145_v39, %v1512_v2 }
 0x1c7   : > { %12183 = vst [vmem:[#allocation283_spill] sm:$0xff] %v6760_v40  ;;  %12186 = vst [vmem:[#allocation284_spill] sm:$0xff] %v12185_v21  ;;  %v1523_v44 = vand.u32 2147483647, %v12154_v4  ;;  %v12189_v45 = vld [vmem:[#allocation247_spill] sm:$0xff]  ;;  %v12190_v59 = vld [vmem:[#allocation33_spill] sm:$0xff]  ;;  %v3833_v40 = vpop.eup %3832 }
 0x1c8   : > { %12188 = vst [vmem:[#allocation246_spill] sm:$0xff] %v6771_v7  ;;  %v12191_v5 = vld [vmem:[#allocation48_spill] sm:$0xff]  ;;  %v6783_v32 = vmul.f32 0.6931472, %v3823_v3  ;;  %v6785_v25 = vmul.f32 0.6931472, %v3825_v10  ;;  %v6810_v2 = vmul.f32 %v12154_v4, %v1521_v49 }
 0x1c9   : > { %v1535_v22 = vadd.f32 1.0, %v12191_v5  ;;  %12194 = vst [vmem:[#allocation48_spill] sm:$0xff] %v6788_v50  ;;  %vm6790_vm12 = vcmp.lt.f32.partialorder %v1514_v8, 0.0004427343  ;;  %v12195_v63 = vmov 0  ;;  %v1538_v51 = vmul.f32 -0.5, %v12191_v5 }
 0x1ca   : > { %12192 = vst [vmem:[#allocation247_spill] sm:$0xff] %v6783_v32  ;;  %12193 = vst [vmem:[#allocation33_spill] sm:$0xff] %v6785_v25  ;;  %v12196_v63 = vsel %vm6790_vm12, 4294967295, %v12195_v63  ;;  %v6803_v10 = vmul.f32 0.6931472, %v3827_v23  ;;  %v1530_v39 = vadd.f32 1.0, %v1529_v62  ;;  %v3835_v32 = vpop.eup %3834 }
 0x1cb   : > { %12197 = vst [vmem:[#allocation285_spill] sm:$0xff] %v12196_v63  ;;  %12200 = vst [vmem:[#allocation287_spill] sm:$0xff] %v6810_v2  ;;  %vm6812_vm1 = vcmp.lt.f32.partialorder %v1523_v44, 0.0004427343  ;;  %v12201_v48 = vmov 0  ;;  %v12204_v36 = vld [vmem:[#allocation50_spill] sm:$0xff]  ;;  %3838 = vlog2.f32 %v1535_v22 }
 0x1cc   : > { %12199 = vst [vmem:[#allocation286_spill] sm:$0xff] %v6803_v10  ;;  %v12202_v48 = vsel %vm6812_vm1, 4294967295, %v12201_v48  ;;  %v1544_v53 = vadd.f32 1.0, %v12204_v36  ;;  %v6817_v56 = vmul.f32 0.6931472, %v3829_v46  ;;  %v12206_v62 = vld [vmem:[#allocation16_spill] sm:$0xff]  ;;  %v6836_v8 = vmul.f32 %v12176_v54, %v1530_v39 }
 0x1cd   : > { %12203 = vst [vmem:[#allocation288_spill] sm:$0xff] %v12202_v48  ;;  %v1532_v23 = vand.u32 2147483647, %v12176_v54  ;;  %v1553_v3 = vadd.f32 1.0, %v12206_v62  ;;  %v6829_v44 = vmul.f32 0.6931472, %v3831_v33 }
 0x1ce   : > { %12205 = vst [vmem:[#allocation50_spill] sm:$0xff] %v6817_v56  ;;  %v1539_v46 = vadd.f32 1.0, %v1538_v51  ;;  %12208 = vst [vmem:[#allocation289_spill] sm:$0xff] %v6836_v8  ;;  %v1547_v7 = vmul.f32 -0.5, %v12204_v36  ;;  %v12209_v6 = vld [vmem:[#allocation17_spill] sm:$0xff]  ;;  %3840 = vlog2.f32 %v1544_v53  ;;  %v1556_v33 = vmul.f32 -0.5, %v12206_v62  ;;  %v3837_v22 = vpop.eup %3836 }
 0x1cf   : > { %12207 = vst [vmem:[#allocation16_spill] sm:$0xff] %v6829_v44  ;;  %v1562_v49 = vadd.f32 1.0, %v12209_v6  ;;  %v1541_v28 = vand.u32 2147483647, %v12191_v5  ;;  %v12210_v4 = vld [vmem:[#allocation19_spill] sm:$0xff]  ;;  %v12212_v54 = vmov 0  ;;  %3842 = vlog2.f32 %v1553_v3 }
 0x1d0   : > { %v1571_v51 = vadd.f32 1.0, %v12210_v4  ;;  %v6847_v10 = vmul.f32 0.6931472, %v3833_v40  ;;  %vm6849_vm8 = vcmp.lt.f32.partialorder %v1532_v23, 0.0004427343  ;;  %v6858_v39 = vmul.f32 %v12191_v5, %v1539_v46  ;;  %v12217_v56 = vld [vmem:[#allocation201_spill] sm:$0xff] }
 0x1d1   : > { %v12213_v54 = vsel %vm6849_vm8, 4294967295, %v12212_v54  ;;  %v1550_v19 = vand.u32 2147483647, %v12204_v36  ;;  %v1565_v37 = vmul.f32 -0.5, %v12209_v6  ;;  %v6862_v40 = vmul.f32 0.6931472, %v3835_v32 }
 0x1d2   : > { %12211 = vst [vmem:[#allocation17_spill] sm:$0xff] %v6847_v10  ;;  %12214 = vst [vmem:[#allocation19_spill] sm:$0xff] %v12213_v54  ;;  %v1548_v23 = vadd.f32 1.0, %v1547_v7  ;;  %3844 = vlog2.f32 %v1562_v49  ;;  %v1580_v61 = vadd.f32 1.0, %v12217_v56  ;;  %vm6865_vm5 = vcmp.lt.f32.partialorder %v1541_v28, 0.0004427343 }
 0x1d3   : > { %12215 = vst [vmem:[#allocation290_spill] sm:$0xff] %v6858_v39  ;;  %12216 = vst [vmem:[#allocation291_spill] sm:$0xff] %v6862_v40  ;;  %v12218_v3 = vmov 0  ;;  %v1557_v21 = vadd.f32 1.0, %v1556_v33  ;;  %v1559_v53 = vand.u32 2147483647, %v12206_v62  ;;  %3846 = vlog2.f32 %v1571_v51 }
 0x1d4   : > { %v12219_v3 = vsel %vm6865_vm5, 4294967295, %v12218_v3  ;;  %v1568_v32 = vand.u32 2147483647, %v12209_v6  ;;  %v1574_v7 = vmul.f32 -0.5, %v12210_v4  ;;  %v12221_v49 = vld [vmem:[#allocation20_spill] sm:$0xff]  ;;  %v12223_v28 = vmov 0 }
 0x1d5   : > { %12220 = vst [vmem:[#allocation201_spill] sm:$0xff] %v12219_v3  ;;  %v1589_v46 = vadd.f32 1.0, %v12221_v49  ;;  %v6877_v44 = vmul.f32 0.6931472, %v3837_v22  ;;  %vm6879_vm9 = vcmp.lt.f32.partialorder %v1550_v19, 0.0004427343  ;;  %v3839_v29 = vpop.eup %3838  ;;  %v6889_v10 = vmul.f32 %v12204_v36, %v1548_v23 }
 0x1d6   : > { %v12224_v28 = vsel %vm6879_vm9, 4294967295, %v12223_v28  ;;  %v1566_v33 = vadd.f32 1.0, %v1565_v37  ;;  %v1583_v51 = vmul.f32 -0.5, %v12217_v56  ;;  %3848 = vlog2.f32 %v1580_v61  ;;  %v12227_v50 = vld [vmem:[#allocation204_spill] sm:$0xff]  ;;  %v12237_v2 = vld [vmem:[#allocation206_spill] sm:$0xff]  ;;  %v12415_v0 = vld [vmem:[#allocation249_spill] sm:$0xff] }
 0x1d7   : > { %12222 = vst [vmem:[#allocation20_spill] sm:$0xff] %v6877_v44  ;;  %12225 = vst [vmem:[#allocation292_spill] sm:$0xff] %v12224_v28  ;;  %v1598_v22 = vadd.f32 1.0, %v12227_v50  ;;  %v6893_v19 = vmul.f32 %v12206_v62, %v1557_v21  ;;  %vm6895_vm12 = vcmp.lt.f32.partialorder %v1559_v53, 0.0004427343  ;;  %v12229_v63 = vmov 0 }
 0x1d8   : > { %12226 = vst [vmem:[#allocation293_spill] sm:$0xff] %v6889_v10  ;;  %v12230_v63 = vsel %vm6895_vm12, 4294967295, %v12229_v63  ;;  %v1577_v37 = vand.u32 2147483647, %v12210_v4  ;;  %v1592_v47 = vmul.f32 -0.5, %v12221_v49  ;;  %v12232_v48 = vmov 0  ;;  %v3841_v23 = vpop.eup %3840 }
 0x1d9   : > { %12228 = vst [vmem:[#allocation204_spill] sm:$0xff] %v6893_v19  ;;  %12231 = vst [vmem:[#allocation294_spill] sm:$0xff] %v12230_v63  ;;  %vm6901_vm6 = vcmp.lt.f32.partialorder %v1568_v32, 0.0004427343  ;;  %v1575_v36 = vadd.f32 1.0, %v1574_v7  ;;  %3850 = vlog2.f32 %v1589_v46  ;;  %v6913_v53 = vmul.f32 %v12209_v6, %v1566_v33  ;;  %v3843_v32 = vpop.eup %3842  ;;  %v12241_v21 = vld [vmem:[#allocation207_spill] sm:$0xff] }
 0x1da   : > { %v12233_v48 = vsel %vm6901_vm6, 4294967295, %v12232_v48  ;;  %v1586_v61 = vand.u32 2147483647, %v12217_v56  ;;  %v6910_v62 = vmul.f32 0.6931472, %v3839_v29  ;;  %v1584_v5 = vadd.f32 1.0, %v1583_v51 }
 0x1db   : > { %12234 = vst [vmem:[#allocation295_spill] sm:$0xff] %v12233_v48  ;;  %12236 = vst [vmem:[#allocation297_spill] sm:$0xff] %v6913_v53  ;;  %v1595_v40 = vand.u32 2147483647, %v12221_v49  ;;  %3852 = vlog2.f32 %v1598_v22  ;;  %v1601_v7 = vmul.f32 -0.5, %v12227_v50  ;;  %v1607_v46 = vadd.f32 1.0, %v12237_v2 }
 0x1dc   : > { %12235 = vst [vmem:[#allocation296_spill] sm:$0xff] %v6910_v62  ;;  %vm6918_vm1 = vcmp.lt.f32.partialorder %v1577_v37, 0.0004427343  ;;  %v12238_v25 = vmov 0  ;;  %v1593_v54 = vadd.f32 1.0, %v1592_v47  ;;  %v1610_v29 = vmul.f32 -0.5, %v12237_v2  ;;  %v3845_v6 = vpop.eup %3844 }
 0x1dd   : > { %v12239_v25 = vsel %vm6918_vm1, 4294967295, %v12238_v25  ;;  %v1616_v44 = vadd.f32 1.0, %v12241_v21  ;;  %v6924_v33 = vmul.f32 0.6931472, %v3841_v23  ;;  %v6927_v51 = vmul.f32 %v12210_v4, %v1575_v36  ;;  %v3847_v8 = vpop.eup %3846  ;;  %v12249_v15 = vld [vmem:[#allocation208_spill] sm:$0xff]  ;;  %v12272_v53 = vld [vmem:[#allocation214_spill] sm:$0xff] }
 0x1de   : > { %12240 = vst [vmem:[#allocation206_spill] sm:$0xff] %v12239_v25  ;;  %vm6929_vm8 = vcmp.lt.f32.partialorder %v1586_v61, 0.0004427343  ;;  %v12244_v22 = vmov 0  ;;  %v1604_v37 = vand.u32 2147483647, %v12227_v50  ;;  %v6941_v23 = vmul.f32 %v12217_v56, %v1584_v5 }
 0x1df   : > { %12242 = vst [vmem:[#allocation207_spill] sm:$0xff] %v6924_v33  ;;  %12243 = vst [vmem:[#allocation298_spill] sm:$0xff] %v6927_v51  ;;  %v12245_v22 = vsel %vm6929_vm8, 4294967295, %v12244_v22  ;;  %v6938_v30 = vmul.f32 0.6931472, %v3843_v32  ;;  %v1625_v4 = vadd.f32 1.0, %v12249_v15  ;;  %3854 = vlog2.f32 %v1607_v46 }
 0x1e0   : > { %12246 = vst [vmem:[#allocation299_spill] sm:$0xff] %v12245_v22  ;;  %12248 = vst [vmem:[#allocation301_spill] sm:$0xff] %v6941_v23  ;;  %vm6944_vm2 = vcmp.lt.f32.partialorder %v1595_v40, 0.0004427343  ;;  %v12250_v36 = vmov 0  ;;  %v1602_v61 = vadd.f32 1.0, %v1601_v7  ;;  %v6952_v3 = vmul.f32 %v12221_v49, %v1593_v54  ;;  %v3849_v47 = vpop.eup %3848 }
 0x1e1   : > { %12247 = vst [vmem:[#allocation300_spill] sm:$0xff] %v6938_v30  ;;  %v12251_v36 = vsel %vm6944_vm2, 4294967295, %v12250_v36  ;;  %v1619_v18 = vmul.f32 -0.5, %v12241_v21  ;;  %v6949_v12 = vmul.f32 0.6931472, %v3845_v6  ;;  %v1611_v32 = vadd.f32 1.0, %v1610_v29 }
 0x1e2   : > { %12252 = vst [vmem:[#allocation208_spill] sm:$0xff] %v12251_v36  ;;  %12254 = vst [vmem:[#allocation303_spill] sm:$0xff] %v6952_v3  ;;  %3856 = vlog2.f32 %v1616_v44  ;;  %v6958_v40 = vmul.f32 0.6931472, %v3847_v8  ;;  %vm6960_vm5 = vcmp.lt.f32.partialorder %v1604_v37, 0.0004427343  ;;  %v6973_v29 = vmul.f32 %v12227_v50, %v1602_v61 }
 0x1e3   : > { %12253 = vst [vmem:[#allocation302_spill] sm:$0xff] %v6949_v12  ;;  %v12256_v5 = vmov 0  ;;  %v1613_v7 = vand.u32 2147483647, %v12237_v2  ;;  %v12259_v46 = vld [vmem:[#allocation210_spill] sm:$0xff]  ;;  %3858 = vlog2.f32 %v1625_v4  ;;  %v1628_v49 = vmul.f32 -0.5, %v12249_v15  ;;  %v3851_v8 = vpop.eup %3850 }
 0x1e4   : > { %12255 = vst [vmem:[#allocation304_spill] sm:$0xff] %v6958_v40  ;;  %v12257_v5 = vsel %vm6960_vm5, 4294967295, %v12256_v5  ;;  %v1634_v6 = vadd.f32 1.0, %v12259_v46  ;;  %v1622_v54 = vand.u32 2147483647, %v12241_v21  ;;  %12260 = vst [vmem:[#allocation210_spill] sm:$0xff] %v6973_v29  ;;  %v6984_v4 = vmul.f32 %v12237_v2, %v1611_v32 }
 0x1e5   : > { %12258 = vst [vmem:[#allocation305_spill] sm:$0xff] %v12257_v5  ;;  %v1620_v37 = vadd.f32 1.0, %v1619_v18  ;;  %v1637_v56 = vmul.f32 -0.5, %v12259_v46  ;;  %v12261_v33 = vld [vmem:[#allocation212_spill] sm:$0xff]  ;;  %v6981_v44 = vmul.f32 0.6931472, %v3849_v47  ;;  %v3853_v19 = vpop.eup %3852 }
 0x1e6   : > { %v1643_v10 = vadd.f32 1.0, %v12261_v33  ;;  %12263 = vst [vmem:[#allocation306_spill] sm:$0xff] %v6984_v4  ;;  %v1631_v30 = vand.u32 2147483647, %v12249_v15  ;;  %vm6991_vm12 = vcmp.lt.f32.partialorder %v1613_v7, 0.0004427343  ;;  %3860 = vlog2.f32 %v1634_v6 }
 0x1e7   : > { %12262 = vst [vmem:[#allocation212_spill] sm:$0xff] %v6981_v44  ;;  %v12264_v50 = vmov 0  ;;  %v1646_v61 = vmul.f32 -0.5, %v12261_v33  ;;  %v12267_v47 = vld [vmem:[#allocation21_spill] sm:$0xff]  ;;  %v6997_v12 = vmul.f32 0.6931472, %v3851_v8  ;;  %v7005_v18 = vmul.f32 %v12241_v21, %v1620_v37 }
 0x1e8   : > { %v12265_v50 = vsel %vm6991_vm12, 4294967295, %v12264_v50  ;;  %v1652_v63 = vadd.f32 1.0, %v12267_v47  ;;  %vm6999_vm6 = vcmp.lt.f32.partialorder %v1622_v54, 0.0004427343  ;;  %v12269_v2 = vmov 0  ;;  %v12278_v37 = vld [vmem:[#allocation215_spill] sm:$0xff] }
 0x1e9   : > { %12266 = vst [vmem:[#allocation307_spill] sm:$0xff] %v12265_v50  ;;  %12268 = vst [vmem:[#allocation21_spill] sm:$0xff] %v6997_v12  ;;  %v12270_v2 = vsel %vm6999_vm6, 4294967295, %v12269_v2  ;;  %v1629_v32 = vadd.f32 1.0, %v1628_v49  ;;  %v1661_v48 = vadd.f32 1.0, %v12272_v53  ;;  %v1638_v7 = vadd.f32 1.0, %v1637_v56  ;;  %v3855_v51 = vpop.eup %3854 }
 0x1ea   : > { %12271 = vst [vmem:[#allocation308_spill] sm:$0xff] %v12270_v2  ;;  %12273 = vst [vmem:[#allocation214_spill] sm:$0xff] %v7005_v18  ;;  %v1640_v40 = vand.u32 2147483647, %v12259_v46  ;;  %3862 = vlog2.f32 %v1643_v10  ;;  %v7012_v8 = vmul.f32 0.6931472, %v3853_v19 }
 0x1eb   : > { %vm7014_vm1 = vcmp.lt.f32.partialorder %v1631_v30, 0.0004427343  ;;  %v12275_v54 = vmov 0  ;;  %v1655_v49 = vmul.f32 -0.5, %v12267_v47  ;;  %v1647_v21 = vadd.f32 1.0, %v1646_v61  ;;  %v12284_v23 = vld [vmem:[#allocation217_spill] sm:$0xff] }
 0x1ec   : > { %12274 = vst [vmem:[#allocation309_spill] sm:$0xff] %v7012_v8  ;;  %v12276_v54 = vsel %vm7014_vm1, 4294967295, %v12275_v54  ;;  %v1649_v56 = vand.u32 2147483647, %v12261_v33  ;;  %3864 = vlog2.f32 %v1652_v63  ;;  %v1670_v10 = vadd.f32 1.0, %v12278_v37  ;;  %v3857_v25 = vpop.eup %3856  ;;  %v12321_v62 = vld [vmem:[#allocation227_spill] sm:$0xff] }
 0x1ed   : > { %12277 = vst [vmem:[#allocation310_spill] sm:$0xff] %v12276_v54  ;;  %v7026_v30 = vmul.f32 %v12249_v15, %v1629_v32  ;;  %3866 = vlog2.f32 %v1661_v48  ;;  %v1664_v6 = vmul.f32 -0.5, %v12272_v53  ;;  %v7030_v44 = vmul.f32 %v12259_v46, %v1638_v7  ;;  %v3859_v28 = vpop.eup %3858  ;;  %v12574_v31 = vld [vmem:[#allocation36_spill] sm:$0xff] }
 0x1ee   : > { %vm7032_vm8 = vcmp.lt.f32.partialorder %v1640_v40, 0.0004427343  ;;  %v12281_v61 = vmov 0  ;;  %v1673_v63 = vmul.f32 -0.5, %v12278_v37  ;;  %v1679_v22 = vadd.f32 1.0, %v12284_v23 }
 0x1ef   : > { %12279 = vst [vmem:[#allocation215_spill] sm:$0xff] %v7026_v30  ;;  %12280 = vst [vmem:[#allocation311_spill] sm:$0xff] %v7030_v44  ;;  %v12282_v61 = vsel %vm7032_vm8, 4294967295, %v12281_v61  ;;  %v7042_v48 = vmul.f32 0.6931472, %v3855_v51  ;;  %v1656_v32 = vadd.f32 1.0, %v1655_v49  ;;  %v7048_v40 = vmul.f32 %v12261_v33, %v1647_v21 }
 0x1f0   : > { %12283 = vst [vmem:[#allocation312_spill] sm:$0xff] %v12282_v61  ;;  %v1658_v46 = vand.u32 2147483647, %v12267_v47  ;;  %v7045_v7 = vmul.f32 0.6931472, %v3857_v25  ;;  %v12288_v19 = vmov 0  ;;  %3868 = vlog2.f32 %v1670_v10  ;;  %v3861_v49 = vpop.eup %3860 }
 0x1f1   : > { %12285 = vst [vmem:[#allocation217_spill] sm:$0xff] %v7042_v48  ;;  %12287 = vst [vmem:[#allocation314_spill] sm:$0xff] %v7048_v40  ;;  %vm7050_vm2 = vcmp.lt.f32.partialorder %v1649_v56, 0.0004427343  ;;  %v1665_v12 = vadd.f32 1.0, %v1664_v6  ;;  %v12291_v51 = vld [vmem:[#allocation219_spill] sm:$0xff]  ;;  %3870 = vlog2.f32 %v1679_v22  ;;  %v7065_v6 = vmul.f32 %v12267_v47, %v1656_v32 }
 0x1f2   : > { %12286 = vst [vmem:[#allocation313_spill] sm:$0xff] %v7045_v7  ;;  %v12289_v19 = vsel %vm7050_vm2, 4294967295, %v12288_v19  ;;  %v1667_v3 = vand.u32 2147483647, %v12272_v53  ;;  %v1676_v15 = vand.u32 2147483647, %v12278_v37 }
 0x1f3   : > { %12290 = vst [vmem:[#allocation315_spill] sm:$0xff] %v12289_v19  ;;  %v1688_v8 = vadd.f32 1.0, %v12291_v51  ;;  %v7057_v29 = vmul.f32 0.6931472, %v3859_v28  ;;  %v1674_v25 = vadd.f32 1.0, %v1673_v63  ;;  %v1682_v33 = vmul.f32 -0.5, %v12284_v23 }
 0x1f4   : > { %12293 = vst [vmem:[#allocation316_spill] sm:$0xff] %v7065_v6  ;;  %vm7067_vm5 = vcmp.lt.f32.partialorder %v1658_v46, 0.0004427343  ;;  %v12294_v56 = vmov 0  ;;  %v12297_v10 = vld [vmem:[#allocation221_spill] sm:$0xff]  ;;  %v3863_v28 = vpop.eup %3862  ;;  %v1691_v50 = vmul.f32 -0.5, %v12291_v51  ;;  %v7082_v32 = vmul.f32 %v12272_v53, %v1665_v12 }
 0x1f5   : > { %12292 = vst [vmem:[#allocation219_spill] sm:$0xff] %v7057_v29  ;;  %v12295_v56 = vsel %vm7067_vm5, 4294967295, %v12294_v56  ;;  %v1697_v5 = vadd.f32 1.0, %v12297_v10  ;;  %v1685_v63 = vand.u32 2147483647, %v12284_v23  ;;  %v12298_v21 = vld [vmem:[#allocation222_spill] sm:$0xff]  ;;  %3872 = vlog2.f32 %v1688_v8 }
 0x1f6   : > { %12296 = vst [vmem:[#allocation317_spill] sm:$0xff] %v12295_v56  ;;  %v1706_v48 = vadd.f32 1.0, %v12298_v21  ;;  %v7079_v47 = vmul.f32 0.6931472, %v3861_v49  ;;  %12300 = vst [vmem:[#allocation222_spill] sm:$0xff] %v7082_v32  ;;  %v12301_v46 = vmov 0  ;;  %v3865_v4 = vpop.eup %3864  ;;  %v7093_v7 = vmul.f32 %v12278_v37, %v1674_v25 }
 0x1f7   : > { %vm7084_vm12 = vcmp.lt.f32.partialorder %v1667_v3, 0.0004427343  ;;  %vm7095_vm6 = vcmp.lt.f32.partialorder %v1676_v15, 0.0004427343  ;;  %v12305_v49 = vmov 0  ;;  %v1683_v12 = vadd.f32 1.0, %v1682_v33  ;;  %v3867_v18 = vpop.eup %3866 }
 0x1f8   : > { %12299 = vst [vmem:[#allocation221_spill] sm:$0xff] %v7079_v47  ;;  %v12302_v46 = vsel %vm7084_vm12, 4294967295, %v12301_v46  ;;  %12304 = vst [vmem:[#allocation319_spill] sm:$0xff] %v7093_v7  ;;  %v12306_v49 = vsel %vm7095_vm6, 4294967295, %v12305_v49  ;;  %v12308_v53 = vld [vmem:[#allocation223_spill] sm:$0xff]  ;;  %3874 = vlog2.f32 %v1697_v5  ;;  %v1700_v36 = vmul.f32 -0.5, %v12297_v10 }
 0x1f9   : > { %12303 = vst [vmem:[#allocation318_spill] sm:$0xff] %v12302_v46  ;;  %12307 = vst [vmem:[#allocation320_spill] sm:$0xff] %v12306_v49  ;;  %v1715_v3 = vadd.f32 1.0, %v12308_v53  ;;  %v7100_v2 = vmul.f32 0.6931472, %v3863_v28  ;;  %v12310_v22 = vmov 0  ;;  %3876 = vlog2.f32 %v1706_v48 }
 0x1fa   : > { %v1694_v8 = vand.u32 2147483647, %v12291_v51  ;;  %vm7104_vm9 = vcmp.lt.f32.partialorder %v1685_v63, 0.0004427343  ;;  %v1692_v37 = vadd.f32 1.0, %v1691_v50  ;;  %v1709_v15 = vmul.f32 -0.5, %v12298_v21  ;;  %v3869_v30 = vpop.eup %3868 }
 0x1fb   : > { %12309 = vst [vmem:[#allocation223_spill] sm:$0xff] %v7100_v2  ;;  %v12311_v22 = vsel %vm7104_vm9, 4294967295, %v12310_v22  ;;  %v7113_v33 = vmul.f32 0.6931472, %v3865_v4  ;;  %v1703_v28 = vand.u32 2147483647, %v12297_v10  ;;  %3878 = vlog2.f32 %v1715_v3 }
 0x1fc   : > { %12312 = vst [vmem:[#allocation321_spill] sm:$0xff] %v12311_v22  ;;  %v12314_v5 = vld [vmem:[#allocation225_spill] sm:$0xff]  ;;  %v7117_v63 = vmul.f32 0.6931472, %v3867_v18  ;;  %v1712_v54 = vand.u32 2147483647, %v12298_v21  ;;  %v7126_v4 = vmul.f32 %v12284_v23, %v1683_v12  ;;  %v3871_v18 = vpop.eup %3870  ;;  %v7133_v44 = vmul.f32 %v12291_v51, %v1692_v37 }
 0x1fd   : > { %12313 = vst [vmem:[#allocation322_spill] sm:$0xff] %v7113_v33  ;;  %v1724_v29 = vadd.f32 1.0, %v12314_v5  ;;  %v1718_v50 = vmul.f32 -0.5, %v12308_v53  ;;  %vm7128_vm8 = vcmp.lt.f32.partialorder %v1694_v8, 0.0004427343  ;;  %v12317_v25 = vmov 0 }
 0x1fe   : > { %12315 = vst [vmem:[#allocation225_spill] sm:$0xff] %v7117_v63  ;;  %12316 = vst [vmem:[#allocation323_spill] sm:$0xff] %v7126_v4  ;;  %v12318_v25 = vsel %vm7128_vm8, 4294967295, %v12317_v25  ;;  %v1701_v47 = vadd.f32 1.0, %v1700_v36  ;;  %v1710_v3 = vadd.f32 1.0, %v1709_v15  ;;  %v1727_v61 = vmul.f32 -0.5, %v12314_v5 }
 0x1ff   : > { %12319 = vst [vmem:[#allocation324_spill] sm:$0xff] %v12318_v25  ;;  %12320 = vst [vmem:[#allocation325_spill] sm:$0xff] %v7133_v44  ;;  %v1733_v39 = vadd.f32 1.0, %v12321_v62  ;;  %v7137_v24 = vmul.f32 0.6931472, %v3869_v30  ;;  %3880 = vlog2.f32 %v1724_v29  ;;  %v12323_v23 = vld [vmem:[#allocation228_spill] sm:$0xff]  ;;  %v3873_v37 = vpop.eup %3872 }
 0x200   : > { %v1721_v48 = vand.u32 2147483647, %v12308_v53  ;;  %v1742_v12 = vadd.f32 1.0, %v12323_v23  ;;  %vm7149_vm2 = vcmp.lt.f32.partialorder %v1703_v28, 0.0004427343  ;;  %v12324_v8 = vmov 0 }
 0x201   : > { %12322 = vst [vmem:[#allocation227_spill] sm:$0xff] %v7137_v24  ;;  %v12325_v8 = vsel %vm7149_vm2, 4294967295, %v12324_v8  ;;  %vm7153_vm1 = vcmp.lt.f32.partialorder %v1712_v54, 0.0004427343  ;;  %v12327_v30 = vmov 0  ;;  %v1719_v29 = vadd.f32 1.0, %v1718_v50 }
 0x202   : > { %12326 = vst [vmem:[#allocation228_spill] sm:$0xff] %v12325_v8  ;;  %v12328_v30 = vsel %vm7153_vm1, 4294967295, %v12327_v30  ;;  %v7157_v15 = vmul.f32 0.6931472, %v3871_v18  ;;  %v7160_v56 = vmul.f32 %v12297_v10, %v1701_v47  ;;  %v1730_v36 = vand.u32 2147483647, %v12314_v5  ;;  %v3875_v32 = vpop.eup %3874 }
 0x203   : > { %12329 = vst [vmem:[#allocation326_spill] sm:$0xff] %v12328_v30  ;;  %v1736_v46 = vmul.f32 -0.5, %v12321_v62  ;;  %v7165_v28 = vmul.f32 %v12298_v21, %v1710_v3  ;;  %v1728_v51 = vadd.f32 1.0, %v1727_v61  ;;  %3882 = vlog2.f32 %v1733_v39  ;;  %v12333_v54 = vld [vmem:[#allocation230_spill] sm:$0xff]  ;;  %v3877_v18 = vpop.eup %3876  ;;  %v12339_v3 = vld [vmem:[#allocation32_spill] sm:$0xff] }
 0x204   : > { %12330 = vst [vmem:[#allocation327_spill] sm:$0xff] %v7157_v15  ;;  %12331 = vst [vmem:[#allocation328_spill] sm:$0xff] %v7160_v56  ;;  %v1751_v63 = vadd.f32 1.0, %v12333_v54  ;;  %vm7172_vm12 = vcmp.lt.f32.partialorder %v1721_v48, 0.0004427343  ;;  %v12334_v10 = vmov 0  ;;  %3884 = vlog2.f32 %v1742_v12 }
 0x205   : > { %12332 = vst [vmem:[#allocation329_spill] sm:$0xff] %v7165_v28  ;;  %v12335_v10 = vsel %vm7172_vm12, 4294967295, %v12334_v10  ;;  %v1745_v47 = vmul.f32 -0.5, %v12323_v23  ;;  %v7177_v21 = vmul.f32 0.6931472, %v3873_v37  ;;  %v7180_v39 = vmul.f32 %v12308_v53, %v1719_v29  ;;  %v3879_v24 = vpop.eup %3878  ;;  %v12342_v7 = vld [vmem:[#allocation232_spill] sm:$0xff] }
 0x206   : > { %12336 = vst [vmem:[#allocation230_spill] sm:$0xff] %v12335_v10  ;;  %v1739_v61 = vand.u32 2147483647, %v12321_v62  ;;  %v1760_v33 = vadd.f32 1.0, %v12339_v3  ;;  %vm7188_vm6 = vcmp.lt.f32.partialorder %v1730_v36, 0.0004427343  ;;  %v7194_v53 = vmul.f32 %v12314_v5, %v1728_v51 }
 0x207   : > { %12337 = vst [vmem:[#allocation330_spill] sm:$0xff] %v7177_v21  ;;  %12338 = vst [vmem:[#allocation331_spill] sm:$0xff] %v7180_v39  ;;  %v12340_v50 = vmov 0  ;;  %v1737_v12 = vadd.f32 1.0, %v1736_v46  ;;  %v1754_v37 = vmul.f32 -0.5, %v12333_v54  ;;  %3886 = vlog2.f32 %v1751_v63  ;;  %v12353_v46 = vld [vmem:[#allocation234_spill] sm:$0xff] }
 0x208   : > { %v12341_v50 = vsel %vm7188_vm6, 4294967295, %v12340_v50  ;;  %v1748_v29 = vand.u32 2147483647, %v12323_v23  ;;  %v1769_v49 = vadd.f32 1.0, %v12342_v7  ;;  %v7198_v6 = vmul.f32 0.6931472, %v3875_v32 }
 0x209   : > { %v7200_v22 = vmul.f32 0.6931472, %v3877_v18  ;;  %v1746_v36 = vadd.f32 1.0, %v1745_v47  ;;  %v1763_v48 = vmul.f32 -0.5, %v12339_v3  ;;  %vm7207_vm9 = vcmp.lt.f32.partialorder %v1739_v61, 0.0004427343  ;;  %v3881_v51 = vpop.eup %3880 }
 0x20a   : > { %12343 = vst [vmem:[#allocation32_spill] sm:$0xff] %v7198_v6  ;;  %v12345_v5 = vmov 0  ;;  %v1757_v63 = vand.u32 2147483647, %v12333_v54  ;;  %3888 = vlog2.f32 %v1760_v33  ;;  %v7212_v32 = vmul.f32 0.6931472, %v3879_v24 }
 0x20b   : > { %12344 = vst [vmem:[#allocation232_spill] sm:$0xff] %v7200_v22  ;;  %v12346_v5 = vsel %vm7207_vm9, 4294967295, %v12345_v5  ;;  %v7215_v18 = vmul.f32 %v12321_v62, %v1737_v12  ;;  %v1755_v47 = vadd.f32 1.0, %v1754_v37  ;;  %v1772_v15 = vmul.f32 -0.5, %v12342_v7  ;;  %v12359_v6 = vld [vmem:[#allocation236_spill] sm:$0xff]  ;;  %v12365_v28 = vld [vmem:[#allocation41_spill] sm:$0xff] }
 0x20c   : > { %12347 = vst [vmem:[#allocation332_spill] sm:$0xff] %v12346_v5  ;;  %12348 = vst [vmem:[#allocation333_spill] sm:$0xff] %v7212_v32  ;;  %vm7218_vm5 = vcmp.lt.f32.partialorder %v1748_v29, 0.0004427343  ;;  %v12350_v4 = vmov 0  ;;  %3890 = vlog2.f32 %v1769_v49  ;;  %v1778_v21 = vadd.f32 1.0, %v12353_v46 }
 0x20d   : > { %12349 = vst [vmem:[#allocation334_spill] sm:$0xff] %v7215_v18  ;;  %v12351_v4 = vsel %vm7218_vm5, 4294967295, %v12350_v4  ;;  %v1766_v61 = vand.u32 2147483647, %v12339_v3  ;;  %v7233_v33 = vmul.f32 %v12323_v23, %v1746_v36  ;;  %v1764_v12 = vadd.f32 1.0, %v1763_v48  ;;  %v3883_v37 = vpop.eup %3882  ;;  %v12374_v39 = vld [vmem:[#allocation240_spill] sm:$0xff] }
 0x20e   : > { %12352 = vst [vmem:[#allocation335_spill] sm:$0xff] %v12351_v4  ;;  %v7235_v29 = vmul.f32 0.6931472, %v3881_v51  ;;  %vm7237_vm8 = vcmp.lt.f32.partialorder %v1757_v63, 0.0004427343  ;;  %v12356_v49 = vmov 0  ;;  %v3885_v8 = vpop.eup %3884  ;;  %v7249_v48 = vmul.f32 %v12333_v54, %v1755_v47 }
 0x20f   : > { %12354 = vst [vmem:[#allocation234_spill] sm:$0xff] %v7233_v33  ;;  %v12357_v49 = vsel %vm7237_vm8, 4294967295, %v12356_v49  ;;  %v1775_v44 = vand.u32 2147483647, %v12342_v7  ;;  %v1781_v24 = vmul.f32 -0.5, %v12353_v46  ;;  %v1787_v56 = vadd.f32 1.0, %v12359_v6 }
 0x210   : > { %12355 = vst [vmem:[#allocation336_spill] sm:$0xff] %v7235_v29  ;;  %12358 = vst [vmem:[#allocation337_spill] sm:$0xff] %v12357_v49  ;;  %v1773_v36 = vadd.f32 1.0, %v1772_v15  ;;  %v12361_v63 = vld [vmem:[#allocation39_spill] sm:$0xff]  ;;  %vm7252_vm1 = vcmp.lt.f32.partialorder %v1766_v61, 0.0004427343  ;;  %3892 = vlog2.f32 %v1778_v21  ;;  %v7261_v10 = vmul.f32 %v12339_v3, %v1764_v12 }
 0x211   : > { %12360 = vst [vmem:[#allocation236_spill] sm:$0xff] %v7249_v48  ;;  %v1796_v51 = vadd.f32 1.0, %v12361_v63  ;;  %v12362_v62 = vmov 0  ;;  %v1790_v22 = vmul.f32 -0.5, %v12359_v6  ;;  %v1805_v30 = vadd.f32 1.0, %v12365_v28  ;;  %v12368_v47 = vld [vmem:[#allocation238_spill] sm:$0xff]  ;;  %v3887_v23 = vpop.eup %3886 }
 0x212   : > { %v12363_v62 = vsel %vm7252_vm1, 4294967295, %v12362_v62  ;;  %v7258_v25 = vmul.f32 0.6931472, %v3883_v37  ;;  %12367 = vst [vmem:[#allocation338_spill] sm:$0xff] %v7261_v10  ;;  %v1784_v54 = vand.u32 2147483647, %v12353_v46  ;;  %3894 = vlog2.f32 %v1787_v56 }
 0x213   : > { %12364 = vst [vmem:[#allocation39_spill] sm:$0xff] %v12363_v62  ;;  %v1814_v15 = vadd.f32 1.0, %v12368_v47  ;;  %v7269_v21 = vmul.f32 0.6931472, %v3885_v8  ;;  %vm7271_vm12 = vcmp.lt.f32.partialorder %v1775_v44, 0.0004427343  ;;  %v7276_v3 = vmul.f32 %v12342_v7, %v1773_v36 }
 0x214   : > { %12366 = vst [vmem:[#allocation41_spill] sm:$0xff] %v7258_v25  ;;  %v12370_v32 = vmov 0  ;;  %v1782_v37 = vadd.f32 1.0, %v1781_v24  ;;  %3896 = vlog2.f32 %v1796_v51  ;;  %v1799_v12 = vmul.f32 -0.5, %v12361_v63  ;;  %v3889_v40 = vpop.eup %3888  ;;  %v12391_v49 = vld [vmem:[#allocation31_spill] sm:$0xff] }
 0x215   : > { %12369 = vst [vmem:[#allocation238_spill] sm:$0xff] %v7269_v21  ;;  %v12371_v32 = vsel %vm7271_vm12, 4294967295, %v12370_v32  ;;  %12373 = vst [vmem:[#allocation340_spill] sm:$0xff] %v7276_v3  ;;  %v1823_v2 = vadd.f32 1.0, %v12374_v39  ;;  %v1791_v19 = vadd.f32 1.0, %v1790_v22  ;;  %3898 = vlog2.f32 %v1805_v30 }
 0x216   : > { %12372 = vst [vmem:[#allocation339_spill] sm:$0xff] %v12371_v32  ;;  %v1793_v61 = vand.u32 2147483647, %v12359_v6  ;;  %v1808_v44 = vmul.f32 -0.5, %v12365_v28  ;;  %v7286_v8 = vmul.f32 0.6931472, %v3887_v23  ;;  %3900 = vlog2.f32 %v1814_v15  ;;  %v3891_v24 = vpop.eup %3890 }
 0x217   : > { %v1802_v7 = vand.u32 2147483647, %v12361_v63  ;;  %v7294_v30 = vmul.f32 %v12353_v46, %v1782_v37  ;;  %vm7296_vm6 = vcmp.lt.f32.partialorder %v1784_v54, 0.0004427343  ;;  %v12376_v36 = vmov 0  ;;  %v12378_v23 = vld [vmem:[#allocation241_spill] sm:$0xff] }
 0x218   : > { %12375 = vst [vmem:[#allocation240_spill] sm:$0xff] %v7286_v8  ;;  %v12377_v36 = vsel %vm7296_vm6, 4294967295, %v12376_v36  ;;  %v1817_v51 = vmul.f32 -0.5, %v12368_v47  ;;  %v1832_v56 = vadd.f32 1.0, %v12378_v23  ;;  %v7302_v25 = vmul.f32 0.6931472, %v3889_v40 }
 0x219   : > { %v1800_v15 = vadd.f32 1.0, %v1799_v12  ;;  %v1811_v18 = vand.u32 2147483647, %v12365_v28  ;;  %3902 = vlog2.f32 %v1823_v2  ;;  %v7306_v4 = vmul.f32 %v12359_v6, %v1791_v19  ;;  %v12382_v37 = vld [vmem:[#allocation30_spill] sm:$0xff] }
 0x21a   : > { %12379 = vst [vmem:[#allocation241_spill] sm:$0xff] %v7302_v25  ;;  %vm7308_vm5 = vcmp.lt.f32.partialorder %v1793_v61, 0.0004427343  ;;  %v12380_v46 = vmov 0  ;;  %v1809_v54 = vadd.f32 1.0, %v1808_v44  ;;  %v1841_v22 = vadd.f32 1.0, %v12382_v37  ;;  %v3893_v19 = vpop.eup %3892 }
 0x21b   : > { %v12381_v46 = vsel %vm7308_vm5, 4294967295, %v12380_v46  ;;  %v7317_v21 = vmul.f32 0.6931472, %v3891_v24  ;;  %vm7319_vm9 = vcmp.lt.f32.partialorder %v1802_v7, 0.0004427343  ;;  %v12384_v12 = vmov 0 }
 0x21c   : > { %v12385_v12 = vsel %vm7319_vm9, 4294967295, %v12384_v12  ;;  %v1820_v2 = vand.u32 2147483647, %v12368_v47  ;;  %v1818_v6 = vadd.f32 1.0, %v1817_v51  ;;  %v1826_v61 = vmul.f32 -0.5, %v12374_v39  ;;  %v12386_v44 = vld [vmem:[#allocation243_spill] sm:$0xff]  ;;  %v3895_v51 = vpop.eup %3894 }
 0x21d   : > { %12383 = vst [vmem:[#allocation30_spill] sm:$0xff] %v7317_v21  ;;  %3904 = vlog2.f32 %v1832_v56  ;;  %v1850_v33 = vadd.f32 1.0, %v12386_v44  ;;  %v7331_v24 = vmul.f32 %v12361_v63, %v1800_v15  ;;  %vm7333_vm8 = vcmp.lt.f32.partialorder %v1811_v18, 0.0004427343 }
 0x21e   : > { %v12387_v7 = vmov 0  ;;  %v1835_v8 = vmul.f32 -0.5, %v12378_v23  ;;  %v7339_v48 = vmul.f32 %v12365_v28, %v1809_v54  ;;  %3906 = vlog2.f32 %v1841_v22  ;;  %v3897_v62 = vpop.eup %3896 }
 0x21f   : > { %v12388_v7 = vsel %vm7333_vm8, 4294967295, %v12387_v7  ;;  %v1844_v56 = vmul.f32 -0.5, %v12382_v37  ;;  %v1859_v5 = vadd.f32 1.0, %v12391_v49  ;;  %v7347_v63 = vmul.f32 0.6931472, %v3893_v19  ;;  %v3899_v54 = vpop.eup %3898 }
 0x220   : > { %12389 = vst [vmem:[#allocation243_spill] sm:$0xff] %v12388_v7  ;;  %12390 = vst [vmem:[#allocation341_spill] sm:$0xff] %v7339_v48  ;;  %vm7349_vm1 = vcmp.lt.f32.partialorder %v1820_v2, 0.0004427343  ;;  %v12393_v15 = vmov 0  ;;  %v1853_v28 = vmul.f32 -0.5, %v12386_v44  ;;  %v7355_v22 = vmul.f32 %v12368_v47, %v1818_v6  ;;  %v3901_v10 = vpop.eup %3900 }
 0x221   : > { %12392 = vst [vmem:[#allocation31_spill] sm:$0xff] %v7347_v63  ;;  %v12394_v15 = vsel %vm7349_vm1, 4294967295, %v12393_v15  ;;  %v1827_v40 = vadd.f32 1.0, %v1826_v61  ;;  %v1829_v25 = vand.u32 2147483647, %v12374_v39  ;;  %3908 = vlog2.f32 %v1850_v33 }
 0x222   : > { %v7358_v29 = vmul.f32 0.6931472, %v3895_v51  ;;  %v1836_v18 = vadd.f32 1.0, %v1835_v8  ;;  %v1838_v19 = vand.u32 2147483647, %v12378_v23  ;;  %v1862_v2 = vmul.f32 -0.5, %v12391_v49 }
 0x223   : > { %v7362_v21 = vmul.f32 0.6931472, %v3897_v62  ;;  %v1845_v3 = vadd.f32 1.0, %v1844_v56  ;;  %v1847_v32 = vand.u32 2147483647, %v12382_v37  ;;  %3910 = vlog2.f32 %v1859_v5  ;;  %v3903_v47 = vpop.eup %3902  ;;  %v12866_v56 = vld [vmem:[#allocation34_spill] sm:$0xff] }
 0x224   : > { %v7369_v6 = vmul.f32 0.6931472, %v3899_v54  ;;  %v1854_v61 = vadd.f32 1.0, %v1853_v28  ;;  %v1856_v8 = vand.u32 2147483647, %v12386_v44  ;;  %v7375_v62 = vmul.f32 %v12374_v39, %v1827_v40  ;;  %v12564_v54 = vld [vmem:[#allocation145_spill] sm:$0xff] }
 0x225   : > { %v7372_v51 = vmul.f32 0.6931472, %v3901_v10  ;;  %vm7377_vm12 = vcmp.lt.f32.partialorder %v1829_v25, 0.0004427343  ;;  %v1865_v5 = vand.u32 2147483647, %v12391_v49  ;;  %v7387_v28 = vmul.f32 %v12378_v23, %v1836_v18 }
 0x226   : > { %12395 = vst [vmem:[#allocation342_spill] sm:$0xff] %v7369_v6  ;;  %vm7389_vm6 = vcmp.lt.f32.partialorder %v1838_v19, 0.0004427343  ;;  %v1863_v39 = vadd.f32 1.0, %v1862_v2  ;;  %v7397_v33 = vmul.f32 0.6931472, %v3903_v47  ;;  %v7400_v63 = vmul.f32 %v12382_v37, %v1845_v3 }
 0x227   : > { %v3905_v40 = vpop.eup %3904  ;;  %vm7402_vm5 = vcmp.lt.f32.partialorder %v1847_v32, 0.0004427343  ;;  %v7411_v18 = vmul.f32 %v12386_v44, %v1854_v61  ;;  %vm7413_vm2 = vcmp.lt.f32.partialorder %v1856_v8, 0.0004427343  ;;  %v12404_v2 = vld [vmem:[#allocation119_spill] sm:$0xff]  ;;  %v12406_v32 = vld [vmem:[#allocation248_spill] sm:$0xff]  ;;  %vm12423_vm1 = vnez %v11998_v42 }
 0x228   : > { %v12405_v3 = vld [vmem:[#allocation47_spill] sm:$0xff]  ;;  %v3907_v25 = vpop.eup %3906  ;;  %vm7429_vm8 = vcmp.lt.f32.partialorder %v1865_v5, 0.0004427343  ;;  %v12411_v61 = vld [vmem:[#allocation120_spill] sm:$0xff]  ;;  %v12414_v6 = vld [vmem:[#allocation118_spill] sm:$0xff] }
 0x229   : > { %v12407_v37 = vsel %vm6286_vm0, %v12405_v3, %v12406_v32  ;;  %v12412_v8 = vld [vmem:[#allocation244_spill] sm:$0xff]  ;;  %vm12419_vm0 = vnez %v11993_v52  ;;  %v7449_v5 = vmul.f32 0.6931472, %v3905_v40  ;;  %v12422_v23 = vld [vmem:[#allocation122_spill] sm:$0xff]  ;;  %v12580_v19 = vld [vmem:[#allocation283_spill] sm:$0xff] }
 0x22a   : > { %v7423_v47 = vadd.f32 %v12407_v37, %v12404_v2  ;;  %vm12413_vm9 = vnez %v12412_v8  ;;  %v12418_v2 = vld [vmem:[#allocation121_spill] sm:$0xff]  ;;  %v12420_v3 = vsel %vm12419_vm0, %v12046_v58, %v6398_v11  ;;  %v7452_v37 = vmul.f32 %v12391_v49, %v1863_v39  ;;  %v12432_v42 = vld [vmem:[#allocation124_spill] sm:$0xff]  ;;  %v12434_v39 = vld [vmem:[#allocation38_spill] sm:$0xff] }
 0x22b   : > { %v12416_v48 = vsel %vm12413_vm9, %v12414_v6, %v12415_v0  ;;  %v7447_v32 = vadd.f32 %v12420_v3, %v12418_v2  ;;  %v12424_v8 = vld [vmem:[#allocation49_spill] sm:$0xff]  ;;  %v12425_v6 = vld [vmem:[#allocation255_spill] sm:$0xff]  ;;  %vm12429_vm9 = vnez %v12003_v17  ;;  %v3909_v58 = vpop.eup %3908  ;;  %vm12433_vm0 = vnez %v12007_v57  ;;  %v12627_v44 = vld [vmem:[#allocation48_spill] sm:$0xff] }
 0x22c   : > { %12408 = vst [vmem:[#allocation119_spill] sm:$0xff] %v7423_v47  ;;  %v7439_v7 = vadd.f32 %v12416_v48, %v12411_v61  ;;  %v12426_v48 = vsel %vm12423_vm1, %v12424_v8, %v12425_v6  ;;  %v12428_v0 = vld [vmem:[#allocation123_spill] sm:$0xff]  ;;  %v12430_v52 = vsel %vm12429_vm9, %v6021_v16, %v6444_v9  ;;  %v12435_v40 = vsel %vm12433_vm0, %v12067_v13, %v12434_v39  ;;  %v12437_v17 = vld [vmem:[#allocation125_spill] sm:$0xff]  ;;  %v12440_v16 = vld [vmem:[#allocation202_spill] sm:$0xff] }
 0x22d   : > { %12421 = vst [vmem:[#allocation248_spill] sm:$0xff] %v7447_v32  ;;  %v7460_v61 = vadd.f32 %v12426_v48, %v12422_v23  ;;  %v7468_v11 = vadd.f32 %v12430_v52, %v12428_v0  ;;  %v7480_v23 = vadd.f32 %v12435_v40, %v12432_v42  ;;  %v12438_v2 = vld [vmem:[#allocation35_spill] sm:$0xff]  ;;  %v12444_v6 = vld [vmem:[#allocation126_spill] sm:$0xff]  ;;  %v12448_v52 = vld [vmem:[#allocation261_spill] sm:$0xff] }
 0x22e   : > { %12417 = vst [vmem:[#allocation47_spill] sm:$0xff] %v7439_v7  ;;  %vm12439_vm1 = vnez %v12438_v2  ;;  %v12441_v9 = vld [vmem:[#allocation43_spill] sm:$0xff]  ;;  %v12445_v48 = vld [vmem:[#allocation250_spill] sm:$0xff]  ;;  %v12454_v39 = vld [vmem:[#allocation205_spill] sm:$0xff] }
 0x22f   : > { %12427 = vst [vmem:[#allocation120_spill] sm:$0xff] %v7460_v61  ;;  %12431 = vst [vmem:[#allocation244_spill] sm:$0xff] %v7468_v11  ;;  %v12442_v3 = vsel %vm12439_vm1, %v12440_v16, %v12441_v9  ;;  %vm12446_vm9 = vnez %v12445_v48  ;;  %v12447_v0 = vld [vmem:[#allocation203_spill] sm:$0xff]  ;;  %v7498_v11 = vmul.f32 0.6931472, %v3907_v25  ;;  %v12455_v40 = vld [vmem:[#allocation262_spill] sm:$0xff] }
 0x230   : > { %12436 = vst [vmem:[#allocation118_spill] sm:$0xff] %v7480_v23  ;;  %v7488_v8 = vadd.f32 %v12442_v3, %v12437_v17  ;;  %v12449_v49 = vsel %vm12446_vm9, %v12447_v0, %v12448_v52  ;;  %v12451_v13 = vld [vmem:[#allocation127_spill] sm:$0xff]  ;;  %v12458_v17 = vld [vmem:[#allocation128_spill] sm:$0xff]  ;;  %v12461_v9 = vld [vmem:[#allocation209_spill] sm:$0xff] }
 0x231   : > { %v7496_v57 = vadd.f32 %v12449_v49, %v12444_v6  ;;  %v12452_v42 = vld [vmem:[#allocation251_spill] sm:$0xff]  ;;  %v12459_v16 = vld [vmem:[#allocation252_spill] sm:$0xff]  ;;  %v12465_v49 = vld [vmem:[#allocation129_spill] sm:$0xff] }
 0x232   : > { %12443 = vst [vmem:[#allocation249_spill] sm:$0xff] %v7488_v8  ;;  %vm12453_vm0 = vnez %v12452_v42  ;;  %vm12460_vm1 = vnez %v12459_v16  ;;  %v12462_v3 = vld [vmem:[#allocation263_spill] sm:$0xff]  ;;  %v12466_v6 = vld [vmem:[#allocation254_spill] sm:$0xff]  ;;  %v12469_v0 = vld [vmem:[#allocation264_spill] sm:$0xff] }
 0x233   : > { %12450 = vst [vmem:[#allocation121_spill] sm:$0xff] %v7496_v57  ;;  %v12456_v2 = vsel %vm12453_vm0, %v12454_v39, %v12455_v40  ;;  %v12463_v48 = vsel %vm12460_vm1, %v12461_v9, %v12462_v3  ;;  %vm12467_vm9 = vnez %v12466_v6  ;;  %v12468_v25 = vld [vmem:[#allocation211_spill] sm:$0xff]  ;;  %v3911_v57 = vpop.eup %3910  ;;  %v12472_v39 = vld [vmem:[#allocation130_spill] sm:$0xff]  ;;  %v12475_v40 = vld [vmem:[#allocation213_spill] sm:$0xff] }
 0x234   : > { %v7506_v23 = vadd.f32 %v12456_v2, %v12451_v13  ;;  %v7514_v8 = vadd.f32 %v12463_v48, %v12458_v17  ;;  %v12470_v52 = vsel %vm12467_vm9, %v12468_v25, %v12469_v0  ;;  %v12473_v13 = vld [vmem:[#allocation257_spill] sm:$0xff]  ;;  %v12476_v2 = vld [vmem:[#allocation267_spill] sm:$0xff]  ;;  %v12480_v17 = vld [vmem:[#allocation258_spill] sm:$0xff]  ;;  %vm12490_vm9 = vnez %v12055_v43 }
 0x235   : > { %v7522_v42 = vadd.f32 %v12470_v52, %v12465_v49  ;;  %vm12474_vm0 = vnez %v12473_v13  ;;  %v12479_v9 = vld [vmem:[#allocation131_spill] sm:$0xff]  ;;  %vm12481_vm1 = vnez %v12480_v17  ;;  %v12482_v3 = vld [vmem:[#allocation216_spill] sm:$0xff]  ;;  %v12487_v49 = vsel %vm6466_vm13, %v12123_v38, %v6575_v14  ;;  %v12489_v52 = vld [vmem:[#allocation133_spill] sm:$0xff] }
 0x236   : > { %12457 = vst [vmem:[#allocation122_spill] sm:$0xff] %v7506_v23  ;;  %12464 = vst [vmem:[#allocation49_spill] sm:$0xff] %v7514_v8  ;;  %v12477_v16 = vsel %vm12474_vm0, %v12475_v40, %v12476_v2  ;;  %v12483_v48 = vld [vmem:[#allocation268_spill] sm:$0xff]  ;;  %v12492_v13 = vld [vmem:[#allocation269_spill] sm:$0xff]  ;;  %vm12496_vm13 = vnez %v12058_v60 }
 0x237   : > { %12471 = vst [vmem:[#allocation255_spill] sm:$0xff] %v7522_v42  ;;  %v7530_v23 = vadd.f32 %v12477_v16, %v12472_v39  ;;  %v12484_v6 = vsel %vm12481_vm1, %v12482_v3, %v12483_v48  ;;  %v12486_v25 = vld [vmem:[#allocation132_spill] sm:$0xff]  ;;  %v12498_v38 = vld [vmem:[#allocation270_spill] sm:$0xff]  ;;  %v12501_v43 = vld [vmem:[#allocation135_spill] sm:$0xff] }
 0x238   : > { %v7538_v8 = vadd.f32 %v12484_v6, %v12479_v9  ;;  %v7546_v0 = vadd.f32 %v12487_v49, %v12486_v25  ;;  %v12491_v39 = vld [vmem:[#allocation220_spill] sm:$0xff]  ;;  %v7560_v9 = vmul.f32 0.6931472, %v3909_v58  ;;  %v12502_v48 = vld [vmem:[#allocation265_spill] sm:$0xff]  ;;  %v12504_v6 = vld [vmem:[#allocation226_spill] sm:$0xff] }
 0x239   : > { %12478 = vst [vmem:[#allocation123_spill] sm:$0xff] %v7530_v23  ;;  %v12493_v40 = vsel %vm12490_vm9, %v12491_v39, %v12492_v13  ;;  %v12497_v14 = vld [vmem:[#allocation224_spill] sm:$0xff]  ;;  %vm12503_vm0 = vnez %v12502_v48  ;;  %v12505_v25 = vld [vmem:[#allocation271_spill] sm:$0xff]  ;;  %v12510_v58 = vld [vmem:[#allocation229_spill] sm:$0xff]  ;;  %vm12522_vm9 = vnez %v12084_v27 }
 0x23a   : > { %12485 = vst [vmem:[#allocation124_spill] sm:$0xff] %v7538_v8  ;;  %12488 = vst [vmem:[#allocation38_spill] sm:$0xff] %v7546_v0  ;;  %v7554_v2 = vadd.f32 %v12493_v40, %v12489_v52  ;;  %v12499_v17 = vsel %vm12496_vm13, %v12497_v14, %v12498_v38  ;;  %v12506_v49 = vsel %vm12503_vm0, %v12504_v6, %v12505_v25  ;;  %v12508_v39 = vld [vmem:[#allocation136_spill] sm:$0xff]  ;;  %v12515_v14 = vld [vmem:[#allocation266_spill] sm:$0xff] }
 0x23b   : > { %v7568_v3 = vadd.f32 %v12499_v17, %v12495_v35  ;;  %v7576_v52 = vadd.f32 %v12506_v49, %v12501_v43  ;;  %v12511_v40 = vld [vmem:[#allocation52_spill] sm:$0xff]  ;;  %vm12516_vm1 = vnez %v12515_v14  ;;  %v12517_v35 = vld [vmem:[#allocation231_spill] sm:$0xff]  ;;  %v12523_v43 = vld [vmem:[#allocation218_spill] sm:$0xff] }
 0x23c   : > { %12494 = vst [vmem:[#allocation125_spill] sm:$0xff] %v7554_v2  ;;  %v12512_v16 = vsel %vm6517_vm4, %v12510_v58, %v12511_v40  ;;  %v12514_v2 = vld [vmem:[#allocation137_spill] sm:$0xff]  ;;  %v12518_v38 = vld [vmem:[#allocation272_spill] sm:$0xff]  ;;  %v12524_v6 = vsel %vm12522_vm9, %v12155_v55, %v12523_v43  ;;  %v12526_v49 = vld [vmem:[#allocation139_spill] sm:$0xff]  ;;  %vm12527_vm4 = vnez %v12087_v1  ;;  %v1861_v40 = vmul.f32 0.6931472, %v3911_v57 }
 0x23d   : > { %12500 = vst [vmem:[#allocation35_spill] sm:$0xff] %v7568_v3  ;;  %12507 = vst [vmem:[#allocation202_spill] sm:$0xff] %v7576_v52  ;;  %v7584_v60 = vadd.f32 %v12512_v16, %v12508_v39  ;;  %v12519_v17 = vsel %vm12516_vm1, %v12517_v35, %v12518_v38  ;;  %v12521_v3 = vld [vmem:[#allocation138_spill] sm:$0xff]  ;;  %v12528_v16 = vld [vmem:[#allocation235_spill] sm:$0xff] }
 0x23e   : > { %v7592_v48 = vadd.f32 %v12519_v17, %v12514_v2  ;;  %v7600_v25 = vadd.f32 %v12524_v6, %v12521_v3  ;;  %v12529_v39 = vld [vmem:[#allocation27_spill] sm:$0xff]  ;;  %v1849_v2 = vsel %vm7402_vm5, %v7400_v63, %v7498_v11  ;;  %v12532_v27 = vld [vmem:[#allocation140_spill] sm:$0xff]  ;;  %v12533_v14 = vld [vmem:[#allocation42_spill] sm:$0xff] }
 0x23f   : > { %12513 = vst [vmem:[#allocation43_spill] sm:$0xff] %v7584_v60  ;;  %v12530_v13 = vsel %vm12527_vm4, %v12528_v16, %v12529_v39  ;;  %vm12534_vm13 = vnez %v12533_v14  ;;  %v12535_v55 = vld [vmem:[#allocation237_spill] sm:$0xff]  ;;  %v12536_v3 = vld [vmem:[#allocation28_spill] sm:$0xff]  ;;  %v12540_v17 = vld [vmem:[#allocation23_spill] sm:$0xff] }
 0x240   : > { %12520 = vst [vmem:[#allocation126_spill] sm:$0xff] %v7592_v48  ;;  %12525 = vst [vmem:[#allocation250_spill] sm:$0xff] %v7600_v25  ;;  %v7608_v58 = vadd.f32 %v12530_v13, %v12526_v49  ;;  %v12537_v35 = vsel %vm12534_vm13, %v12535_v55, %v12536_v3  ;;  %v12539_v1 = vld [vmem:[#allocation141_spill] sm:$0xff]  ;;  %vm12541_vm0 = vnez %v12540_v17  ;;  %v12542_v43 = vld [vmem:[#allocation239_spill] sm:$0xff] }
 0x241   : > { %v7620_v38 = vadd.f32 %v12537_v35, %v12532_v27  ;;  %v12543_v6 = vld [vmem:[#allocation40_spill] sm:$0xff]  ;;  %v12546_v39 = vld [vmem:[#allocation142_spill] sm:$0xff]  ;;  %v12549_v11 = vld [vmem:[#allocation275_spill] sm:$0xff] }
 0x242   : > { %12531 = vst [vmem:[#allocation203_spill] sm:$0xff] %v7608_v58  ;;  %v12544_v49 = vsel %vm12541_vm0, %v12542_v43, %v12543_v6  ;;  %v12548_v63 = vld [vmem:[#allocation242_spill] sm:$0xff]  ;;  %v12552_v14 = vld [vmem:[#allocation143_spill] sm:$0xff]  ;;  %v12554_v27 = vld [vmem:[#allocation245_spill] sm:$0xff] }
 0x243   : > { %12538 = vst [vmem:[#allocation261_spill] sm:$0xff] %v7620_v38  ;;  %v7628_v16 = vadd.f32 %v12544_v49, %v12539_v1  ;;  %v12550_v57 = vsel %vm6598_vm10, %v12548_v63, %v12549_v11  ;;  %v12555_v3 = vld [vmem:[#allocation44_spill] sm:$0xff]  ;;  %v12559_v43 = vld [vmem:[#allocation26_spill] sm:$0xff]  ;;  %v12561_v1 = vld [vmem:[#allocation277_spill] sm:$0xff]  ;;  %vm12569_vm10 = vnez %v12133_v20 }
 0x244   : > { %v7636_v13 = vadd.f32 %v12550_v57, %v12546_v39  ;;  %v12556_v35 = vsel %vm6607_vm11, %v12554_v27, %v12555_v3  ;;  %v12558_v38 = vld [vmem:[#allocation144_spill] sm:$0xff]  ;;  %vm12560_vm5 = vnez %v12559_v43  ;;  %v1858_v57 = vsel %vm7413_vm2, %v7411_v18, %v7560_v9  ;;  %v12573_v27 = vld [vmem:[#allocation147_spill] sm:$0xff]  ;;  %v12579_v18 = vld [vmem:[#allocation253_spill] sm:$0xff] }
 0x245   : > { %12545 = vst [vmem:[#allocation127_spill] sm:$0xff] %v7628_v16  ;;  %v7644_v17 = vadd.f32 %v12556_v35, %v12552_v14  ;;  %v12562_v6 = vsel %vm12560_vm5, %v12187_v41, %v12561_v1  ;;  %v12565_v39 = vld [vmem:[#allocation280_spill] sm:$0xff]  ;;  %v12568_v14 = vld [vmem:[#allocation146_spill] sm:$0xff]  ;;  %v12570_v41 = vld [vmem:[#allocation281_spill] sm:$0xff]  ;;  %v12581_v9 = vsel %vm6672_vm14, %v12579_v18, %v12580_v19 }
 0x246   : > { %12551 = vst [vmem:[#allocation251_spill] sm:$0xff] %v7636_v13  ;;  %v7652_v49 = vadd.f32 %v12562_v6, %v12558_v38  ;;  %v12566_v63 = vsel %vm6640_vm7, %v12189_v45, %v12565_v39  ;;  %v12571_v38 = vsel %vm12569_vm10, %v12190_v59, %v12570_v41  ;;  %v12575_v45 = vld [vmem:[#allocation282_spill] sm:$0xff]  ;;  %v12578_v43 = vld [vmem:[#allocation148_spill] sm:$0xff]  ;;  %v12583_v1 = vld [vmem:[#allocation149_spill] sm:$0xff] }
 0x247   : > { %12557 = vst [vmem:[#allocation205_spill] sm:$0xff] %v7644_v17  ;;  %v7660_v11 = vadd.f32 %v12566_v63, %v12564_v54  ;;  %v7672_v55 = vadd.f32 %v12571_v38, %v12568_v14  ;;  %v12576_v3 = vsel %vm6666_vm15, %v12574_v31, %v12575_v45  ;;  %v7688_v20 = vadd.f32 %v12581_v9, %v12578_v43  ;;  %v12585_v6 = vld [vmem:[#allocation256_spill] sm:$0xff]  ;;  %v12586_v54 = vld [vmem:[#allocation246_spill] sm:$0xff]  ;;  %v12590_v14 = vld [vmem:[#allocation233_spill] sm:$0xff] }
 0x248   : > { %12563 = vst [vmem:[#allocation262_spill] sm:$0xff] %v7652_v49  ;;  %v7680_v35 = vadd.f32 %v12576_v3, %v12573_v27  ;;  %v12587_v39 = vsel %vm6689_vm3, %v12585_v6, %v12586_v54  ;;  %v12589_v63 = vld [vmem:[#allocation150_spill] sm:$0xff]  ;;  %vm12591_vm2 = vnez %v12590_v14  ;;  %v12592_v41 = vld [vmem:[#allocation259_spill] sm:$0xff]  ;;  %v12597_v45 = vld [vmem:[#allocation276_spill] sm:$0xff] }
 0x249   : > { %12567 = vst [vmem:[#allocation128_spill] sm:$0xff] %v7660_v11  ;;  %12572 = vst [vmem:[#allocation252_spill] sm:$0xff] %v7672_v55  ;;  %v7696_v26 = vadd.f32 %v12587_v39, %v12583_v1  ;;  %v12593_v38 = vld [vmem:[#allocation247_spill] sm:$0xff]  ;;  %vm12598_vm7 = vnez %v12597_v45  ;;  %v12599_v3 = vld [vmem:[#allocation260_spill] sm:$0xff] }
 0x24a   : > { %12577 = vst [vmem:[#allocation209_spill] sm:$0xff] %v7680_v35  ;;  %12582 = vst [vmem:[#allocation263_spill] sm:$0xff] %v7688_v20  ;;  %v12594_v27 = vsel %vm12591_vm2, %v12592_v41, %v12593_v38  ;;  %v12596_v31 = vld [vmem:[#allocation151_spill] sm:$0xff]  ;;  %v12600_v43 = vld [vmem:[#allocation33_spill] sm:$0xff] }
 0x24b   : > { %12588 = vst [vmem:[#allocation129_spill] sm:$0xff] %v7696_v26  ;;  %v7704_v34 = vadd.f32 %v12594_v27, %v12589_v63  ;;  %v12601_v18 = vsel %vm12598_vm7, %v12599_v3, %v12600_v43  ;;  %v12603_v9 = vld [vmem:[#allocation152_spill] sm:$0xff]  ;;  %v12604_v59 = vld [vmem:[#allocation278_spill] sm:$0xff]  ;;  %v1867_v63 = vsel %vm7429_vm8, %v7452_v37, %v1861_v40  ;;  %v12610_v14 = vld [vmem:[#allocation153_spill] sm:$0xff] }
 0x24c   : > { %v7712_v19 = vadd.f32 %v12601_v18, %v12596_v31  ;;  %vm12605_vm3 = vnez %v12604_v59  ;;  %v12606_v1 = vld [vmem:[#allocation22_spill] sm:$0xff]  ;;  %v12613_v38 = vld [vmem:[#allocation273_spill] sm:$0xff]  ;;  %v12618_v43 = vld [vmem:[#allocation284_spill] sm:$0xff] }
 0x24d   : > { %12595 = vst [vmem:[#allocation254_spill] sm:$0xff] %v7704_v34  ;;  %v12607_v6 = vld [vmem:[#allocation286_spill] sm:$0xff]  ;;  %vm12619_vm14 = vnez %v12618_v43  ;;  %v12620_v18 = vld [vmem:[#allocation279_spill] sm:$0xff]  ;;  %v12621_v59 = vld [vmem:[#allocation16_spill] sm:$0xff] }
 0x24e   : > { %12602 = vst [vmem:[#allocation211_spill] sm:$0xff] %v7712_v19  ;;  %v12608_v54 = vsel %vm12605_vm3, %v12606_v1, %v12607_v6  ;;  %v12611_v41 = vld [vmem:[#allocation46_spill] sm:$0xff]  ;;  %v12622_v1 = vsel %vm12619_vm14, %v12620_v18, %v12621_v59  ;;  %v12624_v6 = vld [vmem:[#allocation155_spill] sm:$0xff]  ;;  %v12628_v37 = vld [vmem:[#allocation17_spill] sm:$0xff] }
 0x24f   : > { %v7720_v39 = vadd.f32 %v12608_v54, %v12603_v9  ;;  %vm12612_vm11 = vnez %v12611_v41  ;;  %v12614_v27 = vld [vmem:[#allocation50_spill] sm:$0xff]  ;;  %v12625_v54 = vld [vmem:[#allocation285_spill] sm:$0xff]  ;;  %v12631_v19 = vld [vmem:[#allocation156_spill] sm:$0xff] }
 0x250   : > { %v12615_v45 = vsel %vm12612_vm11, %v12613_v38, %v12614_v27  ;;  %v12617_v3 = vld [vmem:[#allocation154_spill] sm:$0xff]  ;;  %vm12626_vm15 = vnez %v12625_v54  ;;  %v12632_v38 = vld [vmem:[#allocation288_spill] sm:$0xff]  ;;  %v12635_v27 = vld [vmem:[#allocation291_spill] sm:$0xff] }
 0x251   : > { %12609 = vst [vmem:[#allocation264_spill] sm:$0xff] %v7720_v39  ;;  %v7731_v31 = vadd.f32 %v12615_v45, %v12610_v14  ;;  %v7739_v9 = vadd.f32 %v12622_v1, %v12617_v3  ;;  %v12629_v40 = vsel %vm12626_vm15, %v12627_v44, %v12628_v37  ;;  %vm12633_vm8 = vnez %v12632_v38  ;;  %v12634_v14 = vld [vmem:[#allocation287_spill] sm:$0xff]  ;;  %v12638_v34 = vld [vmem:[#allocation157_spill] sm:$0xff]  ;;  %v12642_v59 = vld [vmem:[#allocation20_spill] sm:$0xff] }
 0x252   : > { %v7747_v41 = vadd.f32 %v12629_v40, %v12624_v6  ;;  %v12636_v45 = vsel %vm12633_vm8, %v12634_v14, %v12635_v27  ;;  %v12639_v18 = vld [vmem:[#allocation19_spill] sm:$0xff]  ;;  %v12641_v3 = vld [vmem:[#allocation289_spill] sm:$0xff]  ;;  %v12645_v26 = vld [vmem:[#allocation158_spill] sm:$0xff] }
 0x253   : > { %12616 = vst [vmem:[#allocation130_spill] sm:$0xff] %v7731_v31  ;;  %12623 = vst [vmem:[#allocation257_spill] sm:$0xff] %v7739_v9  ;;  %v7755_v43 = vadd.f32 %v12636_v45, %v12631_v19  ;;  %vm12640_vm1 = vnez %v12639_v18  ;;  %v12646_v44 = vld [vmem:[#allocation201_spill] sm:$0xff]  ;;  %v12648_v6 = vld [vmem:[#allocation290_spill] sm:$0xff] }
 0x254   : > { %12630 = vst [vmem:[#allocation213_spill] sm:$0xff] %v7747_v41  ;;  %v12643_v1 = vsel %vm12640_vm1, %v12641_v3, %v12642_v59  ;;  %vm12647_vm9 = vnez %v12646_v44  ;;  %v12649_v37 = vld [vmem:[#allocation296_spill] sm:$0xff]  ;;  %v12652_v20 = vld [vmem:[#allocation159_spill] sm:$0xff]  ;;  %v12655_v19 = vld [vmem:[#allocation293_spill] sm:$0xff] }
 0x255   : > { %12637 = vst [vmem:[#allocation267_spill] sm:$0xff] %v7755_v43  ;;  %v7763_v54 = vadd.f32 %v12643_v1, %v12638_v34  ;;  %v12650_v40 = vsel %vm12647_vm9, %v12648_v6, %v12649_v37  ;;  %v12653_v14 = vld [vmem:[#allocation292_spill] sm:$0xff]  ;;  %v12656_v27 = vld [vmem:[#allocation207_spill] sm:$0xff]  ;;  %v12660_v3 = vld [vmem:[#allocation294_spill] sm:$0xff] }
 0x256   : > { %v7771_v38 = vadd.f32 %v12650_v40, %v12645_v26  ;;  %vm12654_vm4 = vnez %v12653_v14  ;;  %v12659_v35 = vld [vmem:[#allocation160_spill] sm:$0xff]  ;;  %vm12661_vm13 = vnez %v12660_v3  ;;  %v12666_v55 = vld [vmem:[#allocation161_spill] sm:$0xff]  ;;  %v12667_v6 = vld [vmem:[#allocation295_spill] sm:$0xff] }
 0x257   : > { %12644 = vst [vmem:[#allocation131_spill] sm:$0xff] %v7763_v54  ;;  %v12657_v45 = vsel %vm12654_vm4, %v12655_v19, %v12656_v27  ;;  %v12662_v34 = vld [vmem:[#allocation204_spill] sm:$0xff]  ;;  %vm12668_vm0 = vnez %v12667_v6  ;;  %v12669_v26 = vld [vmem:[#allocation297_spill] sm:$0xff]  ;;  %v12670_v37 = vld [vmem:[#allocation302_spill] sm:$0xff] }
 0x258   : > { %12651 = vst [vmem:[#allocation258_spill] sm:$0xff] %v7771_v38  ;;  %v7779_v18 = vadd.f32 %v12657_v45, %v12652_v20  ;;  %v12663_v59 = vld [vmem:[#allocation300_spill] sm:$0xff]  ;;  %v12671_v40 = vsel %vm12668_vm0, %v12669_v26, %v12670_v37  ;;  %v12673_v11 = vld [vmem:[#allocation162_spill] sm:$0xff]  ;;  %v12680_v49 = vld [vmem:[#allocation163_spill] sm:$0xff] }
 0x259   : > { %v12664_v1 = vsel %vm12661_vm13, %v12662_v34, %v12663_v59  ;;  %v7795_v14 = vadd.f32 %v12671_v40, %v12666_v55  ;;  %v12674_v19 = vld [vmem:[#allocation206_spill] sm:$0xff]  ;;  %v12677_v27 = vld [vmem:[#allocation304_spill] sm:$0xff]  ;;  %v12681_v34 = vld [vmem:[#allocation299_spill] sm:$0xff] }
 0x25a   : > { %12658 = vst [vmem:[#allocation216_spill] sm:$0xff] %v7779_v18  ;;  %v7787_v44 = vadd.f32 %v12664_v1, %v12659_v35  ;;  %vm12675_vm5 = vnez %v12674_v19  ;;  %v12676_v20 = vld [vmem:[#allocation298_spill] sm:$0xff]  ;;  %vm12682_vm10 = vnez %v12681_v34  ;;  %v12683_v35 = vld [vmem:[#allocation301_spill] sm:$0xff]  ;;  %v12684_v59 = vld [vmem:[#allocation212_spill] sm:$0xff] }
 0x25b   : > { %12672 = vst [vmem:[#allocation132_spill] sm:$0xff] %v7795_v14  ;;  %v12678_v45 = vsel %vm12675_vm5, %v12676_v20, %v12677_v27  ;;  %v12685_v1 = vsel %vm12682_vm10, %v12683_v35, %v12684_v59  ;;  %v12687_v17 = vld [vmem:[#allocation164_spill] sm:$0xff]  ;;  %v12690_v55 = vld [vmem:[#allocation303_spill] sm:$0xff]  ;;  %v12691_v37 = vld [vmem:[#allocation21_spill] sm:$0xff] }
 0x25c   : > { %12665 = vst [vmem:[#allocation268_spill] sm:$0xff] %v7787_v44  ;;  %v7803_v3 = vadd.f32 %v12678_v45, %v12673_v11  ;;  %v7811_v6 = vadd.f32 %v12685_v1, %v12680_v49  ;;  %v12688_v26 = vld [vmem:[#allocation208_spill] sm:$0xff]  ;;  %v12694_v13 = vld [vmem:[#allocation165_spill] sm:$0xff]  ;;  %v12697_v11 = vld [vmem:[#allocation210_spill] sm:$0xff] }
 0x25d   : > { %vm12689_vm2 = vnez %v12688_v26  ;;  %v12695_v20 = vld [vmem:[#allocation305_spill] sm:$0xff]  ;;  %v12701_v16 = vld [vmem:[#allocation166_spill] sm:$0xff]  ;;  %v12702_v35 = vld [vmem:[#allocation307_spill] sm:$0xff] }
 0x25e   : > { %12679 = vst [vmem:[#allocation133_spill] sm:$0xff] %v7803_v3  ;;  %12686 = vst [vmem:[#allocation220_spill] sm:$0xff] %v7811_v6  ;;  %v12692_v40 = vsel %vm12689_vm2, %v12690_v55, %v12691_v37  ;;  %vm12696_vm7 = vnez %v12695_v20  ;;  %v12698_v27 = vld [vmem:[#allocation309_spill] sm:$0xff]  ;;  %vm12703_vm3 = vnez %v12702_v35  ;;  %v12704_v49 = vld [vmem:[#allocation306_spill] sm:$0xff] }
 0x25f   : > { %v7819_v19 = vadd.f32 %v12692_v40, %v12687_v17  ;;  %v12699_v45 = vsel %vm12696_vm7, %v12697_v11, %v12698_v27  ;;  %v12705_v59 = vld [vmem:[#allocation217_spill] sm:$0xff]  ;;  %v12708_v58 = vld [vmem:[#allocation167_spill] sm:$0xff]  ;;  %v12709_v55 = vld [vmem:[#allocation308_spill] sm:$0xff]  ;;  %vm12793_vm7 = vnez %v12341_v50 }
 0x260   : > { %v7827_v34 = vadd.f32 %v12699_v45, %v12694_v13  ;;  %v12706_v1 = vsel %vm12703_vm3, %v12704_v49, %v12705_v59  ;;  %vm12710_vm11 = vnez %v12709_v55  ;;  %v12711_v17 = vld [vmem:[#allocation214_spill] sm:$0xff]  ;;  %v12712_v37 = vld [vmem:[#allocation313_spill] sm:$0xff]  ;;  %v12715_v25 = vld [vmem:[#allocation168_spill] sm:$0xff] }
 0x261   : > { %12693 = vst [vmem:[#allocation269_spill] sm:$0xff] %v7819_v19  ;;  %v7835_v26 = vadd.f32 %v12706_v1, %v12701_v16  ;;  %v12713_v40 = vsel %vm12710_vm11, %v12711_v17, %v12712_v37  ;;  %v12716_v11 = vld [vmem:[#allocation310_spill] sm:$0xff]  ;;  %v12718_v13 = vld [vmem:[#allocation215_spill] sm:$0xff]  ;;  %v12723_v49 = vld [vmem:[#allocation312_spill] sm:$0xff] }
 0x262   : > { %12700 = vst [vmem:[#allocation134_spill] sm:$0xff] %v7827_v34  ;;  %v7843_v20 = vadd.f32 %v12713_v40, %v12708_v58  ;;  %vm12717_vm14 = vnez %v12716_v11  ;;  %v12719_v27 = vld [vmem:[#allocation219_spill] sm:$0xff]  ;;  %v12722_v34 = vld [vmem:[#allocation169_spill] sm:$0xff]  ;;  %vm12724_vm15 = vnez %v12723_v49  ;;  %v12732_v58 = vld [vmem:[#allocation314_spill] sm:$0xff] }
 0x263   : > { %12707 = vst [vmem:[#allocation224_spill] sm:$0xff] %v7835_v26  ;;  %v12720_v45 = vsel %vm12717_vm14, %v12718_v13, %v12719_v27  ;;  %v12725_v16 = vld [vmem:[#allocation311_spill] sm:$0xff]  ;;  %v12726_v59 = vld [vmem:[#allocation221_spill] sm:$0xff]  ;;  %v12729_v26 = vld [vmem:[#allocation170_spill] sm:$0xff] }
 0x264   : > { %12714 = vst [vmem:[#allocation270_spill] sm:$0xff] %v7843_v20  ;;  %v7851_v35 = vadd.f32 %v12720_v45, %v12715_v25  ;;  %v12727_v1 = vsel %vm12724_vm15, %v12725_v16, %v12726_v59  ;;  %v12730_v17 = vld [vmem:[#allocation315_spill] sm:$0xff]  ;;  %v12737_v13 = vld [vmem:[#allocation317_spill] sm:$0xff]  ;;  %v12739_v25 = vld [vmem:[#allocation316_spill] sm:$0xff] }
 0x265   : > { %v7859_v55 = vadd.f32 %v12727_v1, %v12722_v34  ;;  %vm12731_vm8 = vnez %v12730_v17  ;;  %v12733_v37 = vld [vmem:[#allocation223_spill] sm:$0xff]  ;;  %vm12738_vm1 = vnez %v12737_v13  ;;  %v12740_v27 = vld [vmem:[#allocation322_spill] sm:$0xff]  ;;  %v12747_v59 = vld [vmem:[#allocation225_spill] sm:$0xff] }
 0x266   : > { %12721 = vst [vmem:[#allocation135_spill] sm:$0xff] %v7851_v35  ;;  %v12734_v40 = vsel %vm12731_vm8, %v12732_v58, %v12733_v37  ;;  %v12736_v20 = vld [vmem:[#allocation171_spill] sm:$0xff]  ;;  %v12741_v45 = vsel %vm12738_vm1, %v12739_v25, %v12740_v27  ;;  %v12743_v35 = vld [vmem:[#allocation172_spill] sm:$0xff]  ;;  %v12744_v16 = vld [vmem:[#allocation318_spill] sm:$0xff]  ;;  %vm12833_vm1 = vnez %v12377_v36 }
 0x267   : > { %12728 = vst [vmem:[#allocation265_spill] sm:$0xff] %v7859_v55  ;;  %v7867_v11 = vadd.f32 %v12734_v40, %v12729_v26  ;;  %v7875_v49 = vadd.f32 %v12741_v45, %v12736_v20  ;;  %vm12745_vm9 = vnez %v12744_v16  ;;  %v12746_v34 = vld [vmem:[#allocation222_spill] sm:$0xff]  ;;  %v12750_v55 = vld [vmem:[#allocation173_spill] sm:$0xff]  ;;  %v12751_v58 = vld [vmem:[#allocation320_spill] sm:$0xff] }
 0x268   : > { %v12748_v1 = vsel %vm12745_vm9, %v12746_v34, %v12747_v59  ;;  %vm12752_vm4 = vnez %v12751_v58  ;;  %v12753_v26 = vld [vmem:[#allocation319_spill] sm:$0xff]  ;;  %v12758_v25 = vld [vmem:[#allocation321_spill] sm:$0xff]  ;;  %v12765_v34 = vld [vmem:[#allocation324_spill] sm:$0xff]  ;;  %vm12838_vm9 = vnez %v12381_v46 }
 0x269   : > { %12735 = vst [vmem:[#allocation226_spill] sm:$0xff] %v7867_v11  ;;  %12742 = vst [vmem:[#allocation271_spill] sm:$0xff] %v7875_v49  ;;  %v7883_v17 = vadd.f32 %v12748_v1, %v12743_v35  ;;  %v12754_v37 = vld [vmem:[#allocation227_spill] sm:$0xff]  ;;  %v12757_v11 = vld [vmem:[#allocation174_spill] sm:$0xff]  ;;  %vm12759_vm13 = vnez %v12758_v25  ;;  %vm12766_vm0 = vnez %v12765_v34 }
 0x26a   : > { %v12755_v40 = vsel %vm12752_vm4, %v12753_v26, %v12754_v37  ;;  %v12760_v20 = vld [vmem:[#allocation323_spill] sm:$0xff]  ;;  %v12764_v49 = vld [vmem:[#allocation37_spill] sm:$0xff]  ;;  %v12768_v59 = vld [vmem:[#allocation330_spill] sm:$0xff]  ;;  %vm12842_vm4 = vnez %v12385_v12 }
 0x26b   : > { %12749 = vst [vmem:[#allocation136_spill] sm:$0xff] %v7883_v17  ;;  %v7891_v13 = vadd.f32 %v12755_v40, %v12750_v55  ;;  %v12761_v27 = vld [vmem:[#allocation327_spill] sm:$0xff]  ;;  %v12767_v35 = vld [vmem:[#allocation325_spill] sm:$0xff]  ;;  %v12772_v26 = vld [vmem:[#allocation228_spill] sm:$0xff] }
 0x26c   : > { %v12762_v45 = vsel %vm12759_vm13, %v12760_v20, %v12761_v27  ;;  %v12769_v1 = vsel %vm12766_vm0, %v12767_v35, %v12768_v59  ;;  %v12771_v17 = vld [vmem:[#allocation175_spill] sm:$0xff]  ;;  %vm12773_vm5 = vnez %v12772_v26  ;;  %v12774_v55 = vld [vmem:[#allocation328_spill] sm:$0xff]  ;;  %v12779_v20 = vld [vmem:[#allocation326_spill] sm:$0xff]  ;;  %vm12853_vm0 = vnez %v12394_v15 }
 0x26d   : > { %12756 = vst [vmem:[#allocation18_spill] sm:$0xff] %v7891_v13  ;;  %v7899_v16 = vadd.f32 %v12762_v45, %v12757_v11  ;;  %v7907_v58 = vadd.f32 %v12769_v1, %v12764_v49  ;;  %v12775_v37 = vld [vmem:[#allocation32_spill] sm:$0xff]  ;;  %vm12780_vm10 = vnez %v12779_v20  ;;  %v12781_v11 = vld [vmem:[#allocation329_spill] sm:$0xff]  ;;  %v12786_v35 = vld [vmem:[#allocation230_spill] sm:$0xff] }
 0x26e   : > { %v12776_v40 = vsel %vm12773_vm5, %v12774_v55, %v12775_v37  ;;  %v12778_v13 = vld [vmem:[#allocation176_spill] sm:$0xff]  ;;  %vm12787_vm2 = vnez %v12786_v35  ;;  %v12788_v49 = vld [vmem:[#allocation331_spill] sm:$0xff]  ;;  %v12789_v59 = vld [vmem:[#allocation333_spill] sm:$0xff] }
 0x26f   : > { %12763 = vst [vmem:[#allocation229_spill] sm:$0xff] %v7899_v16  ;;  %12770 = vst [vmem:[#allocation52_spill] sm:$0xff] %v7907_v58  ;;  %v7915_v25 = vadd.f32 %v12776_v40, %v12771_v17  ;;  %v12782_v27 = vld [vmem:[#allocation232_spill] sm:$0xff]  ;;  %v12785_v16 = vld [vmem:[#allocation177_spill] sm:$0xff]  ;;  %v12790_v1 = vsel %vm12787_vm2, %v12788_v49, %v12789_v59 }
 0x270   : > { %v12783_v45 = vsel %vm12780_vm10, %v12781_v11, %v12782_v27  ;;  %v7931_v26 = vadd.f32 %v12790_v1, %v12785_v16  ;;  %v12792_v58 = vld [vmem:[#allocation178_spill] sm:$0xff]  ;;  %v12794_v17 = vld [vmem:[#allocation336_spill] sm:$0xff]  ;;  %v12797_v40 = vld [vmem:[#allocation179_spill] sm:$0xff] }
 0x271   : > { %12777 = vst [vmem:[#allocation137_spill] sm:$0xff] %v7915_v25  ;;  %v7923_v34 = vadd.f32 %v12783_v45, %v12778_v13  ;;  %v12795_v55 = vsel %vm12793_vm7, %v7194_v53, %v12794_v17  ;;  %v12798_v20 = vld [vmem:[#allocation332_spill] sm:$0xff]  ;;  %v12800_v13 = vld [vmem:[#allocation334_spill] sm:$0xff]  ;;  %v12801_v11 = vld [vmem:[#allocation41_spill] sm:$0xff] }
 0x272   : > { %12791 = vst [vmem:[#allocation231_spill] sm:$0xff] %v7931_v26  ;;  %v7939_v37 = vadd.f32 %v12795_v55, %v12792_v58  ;;  %vm12799_vm3 = vnez %v12798_v20  ;;  %v12804_v35 = vld [vmem:[#allocation180_spill] sm:$0xff]  ;;  %v12805_v49 = vld [vmem:[#allocation335_spill] sm:$0xff]  ;;  %v12807_v16 = vld [vmem:[#allocation234_spill] sm:$0xff] }
 0x273   : > { %12784 = vst [vmem:[#allocation266_spill] sm:$0xff] %v7923_v34  ;;  %v12802_v27 = vsel %vm12799_vm3, %v12800_v13, %v12801_v11  ;;  %vm12806_vm11 = vnez %v12805_v49  ;;  %v12808_v59 = vld [vmem:[#allocation238_spill] sm:$0xff]  ;;  %v12811_v26 = vld [vmem:[#allocation181_spill] sm:$0xff]  ;;  %v12814_v58 = vld [vmem:[#allocation236_spill] sm:$0xff] }
 0x274   : > { %12796 = vst [vmem:[#allocation272_spill] sm:$0xff] %v7939_v37  ;;  %v7947_v45 = vadd.f32 %v12802_v27, %v12797_v40  ;;  %v12809_v1 = vsel %vm12806_vm11, %v12807_v16, %v12808_v59  ;;  %v12812_v53 = vld [vmem:[#allocation337_spill] sm:$0xff]  ;;  %v12815_v17 = vld [vmem:[#allocation240_spill] sm:$0xff]  ;;  %v12819_v13 = vld [vmem:[#allocation39_spill] sm:$0xff] }
 0x275   : > { %v7955_v50 = vadd.f32 %v12809_v1, %v12804_v35  ;;  %vm12813_vm14 = vnez %v12812_v53  ;;  %v12818_v37 = vld [vmem:[#allocation45_spill] sm:$0xff]  ;;  %vm12820_vm15 = vnez %v12819_v13  ;;  %v12821_v40 = vld [vmem:[#allocation338_spill] sm:$0xff]  ;;  %v12826_v16 = vld [vmem:[#allocation339_spill] sm:$0xff] }
 0x276   : > { %12803 = vst [vmem:[#allocation138_spill] sm:$0xff] %v7947_v45  ;;  %v12816_v55 = vsel %vm12813_vm14, %v12814_v58, %v12815_v17  ;;  %v12822_v11 = vld [vmem:[#allocation241_spill] sm:$0xff]  ;;  %v12825_v45 = vld [vmem:[#allocation183_spill] sm:$0xff]  ;;  %vm12827_vm8 = vnez %v12826_v16  ;;  %v12828_v35 = vld [vmem:[#allocation340_spill] sm:$0xff] }
 0x277   : > { %12810 = vst [vmem:[#allocation218_spill] sm:$0xff] %v7955_v50  ;;  %v7963_v20 = vadd.f32 %v12816_v55, %v12811_v26  ;;  %v12823_v27 = vsel %vm12820_vm15, %v12821_v40, %v12822_v11  ;;  %v12829_v59 = vld [vmem:[#allocation30_spill] sm:$0xff]  ;;  %v12832_v50 = vld [vmem:[#allocation184_spill] sm:$0xff]  ;;  %v12834_v26 = vld [vmem:[#allocation31_spill] sm:$0xff] }
 0x278   : > { %v7971_v49 = vadd.f32 %v12823_v27, %v12818_v37  ;;  %v12830_v1 = vsel %vm12827_vm8, %v12828_v35, %v12829_v59  ;;  %v12835_v58 = vsel %vm12833_vm1, %v7294_v30, %v12834_v26  ;;  %v12837_v55 = vld [vmem:[#allocation185_spill] sm:$0xff]  ;;  %v12839_v37 = vsel %vm12838_vm9, %v7306_v4, %v7358_v29  ;;  %v12841_v40 = vld [vmem:[#allocation186_spill] sm:$0xff]  ;;  %v12845_v11 = vld [vmem:[#allocation188_spill] sm:$0xff] }
 0x279   : > { %12817 = vst [vmem:[#allocation139_spill] sm:$0xff] %v7963_v20  ;;  %v7979_v53 = vadd.f32 %v12830_v1, %v12825_v45  ;;  %v7987_v17 = vadd.f32 %v12835_v58, %v12832_v50  ;;  %v7995_v13 = vadd.f32 %v12839_v37, %v12837_v55  ;;  %v12843_v45 = vsel %vm12842_vm4, %v7331_v24, %v7362_v21  ;;  %v12846_v30 = vld [vmem:[#allocation243_spill] sm:$0xff]  ;;  %v12848_v50 = vld [vmem:[#allocation341_spill] sm:$0xff]  ;;  %v12849_v27 = vld [vmem:[#allocation342_spill] sm:$0xff] }
 0x27a   : > { %12824 = vst [vmem:[#allocation235_spill] sm:$0xff] %v7971_v49  ;;  %v8003_v36 = vadd.f32 %v12843_v45, %v12841_v40  ;;  %vm12847_vm13 = vnez %v12846_v30  ;;  %v12852_v35 = vld [vmem:[#allocation189_spill] sm:$0xff]  ;;  %v12854_v4 = vsel %vm12853_vm0, %v7355_v22, %v7372_v51  ;;  %v12856_v12 = vld [vmem:[#allocation190_spill] sm:$0xff]  ;;  %v12857_v21 = vsel %vm7377_vm12, %v7375_v62, %v7397_v33  ;;  %v12859_v59 = vld [vmem:[#allocation51_spill] sm:$0xff] }
 0x27b   : > { %12831 = vst [vmem:[#allocation27_spill] sm:$0xff] %v7979_v53  ;;  %12836 = vst [vmem:[#allocation140_spill] sm:$0xff] %v7987_v17  ;;  %v12850_v16 = vsel %vm12847_vm13, %v12848_v50, %v12849_v27  ;;  %v8019_v29 = vadd.f32 %v12854_v4, %v12852_v35  ;;  %v8027_v24 = vadd.f32 %v12857_v21, %v12856_v12  ;;  %v12862_v26 = vld [vmem:[#allocation192_spill] sm:$0xff]  ;;  %v12864_v51 = vld [vmem:[#allocation54_spill] sm:$0xff] }
 0x27c   : > { %12840 = vst [vmem:[#allocation42_spill] sm:$0xff] %v7995_v13  ;;  %12844 = vst [vmem:[#allocation237_spill] sm:$0xff] %v8003_v36  ;;  %v8011_v46 = vadd.f32 %v12850_v16, %v12845_v11  ;;  %v12860_v1 = vsel %vm7389_vm6, %v7387_v28, %v7449_v5  ;;  %v8038_v22 = vadd.f32 %v1849_v2, %v12862_v26  ;;  %v12868_v33 = vld [vmem:[#allocation53_spill] sm:$0xff]  ;;  %v12871_v28 = vld [vmem:[#allocation55_spill] sm:$0xff] }
 0x27d   : > { %12855 = vst [vmem:[#allocation141_spill] sm:$0xff] %v8019_v29  ;;  %12858 = vst [vmem:[#allocation23_spill] sm:$0xff] %v8027_v24  ;;  %v8035_v15 = vadd.f32 %v12860_v1, %v12859_v59  ;;  %v8041_v58 = vadd.f32 %v1858_v57, %v12864_v51  ;;  %v8044_v55 = vadd.f32 %v1867_v63, %v12866_v56  ;;  %v12869_v62 = vunpack.c.l.bf16 %v12868_v33  ;;  %v12874_v57 = vld [vmem:[#allocation56_spill] sm:$0xff]  ;;  %v12877_v16 = vld [vmem:[#allocation57_spill] sm:$0xff] }
 0x27e   : > { %12851 = vst [vmem:[#allocation28_spill] sm:$0xff] %v8011_v46  ;;  %12863 = vst [vmem:[#allocation40_spill] sm:$0xff] %v8038_v22  ;;  %v12870_v10 = vunpack.c.h.bf16 %v12868_v33  ;;  %v12872_v5 = vunpack.c.l.bf16 %v12871_v28  ;;  %v12873_v2 = vunpack.c.h.bf16 %v12871_v28  ;;  %v12875_v30 = vunpack.c.l.bf16 %v12874_v57  ;;  %v12880_v59 = vld [vmem:[#allocation58_spill] sm:$0xff]  ;;  %v12895_v36 = vld [vmem:[#allocation63_spill] sm:$0xff] }
 0x27f   : > { %12861 = vst [vmem:[#allocation239_spill] sm:$0xff] %v8035_v15  ;;  %12865 = vst [vmem:[#allocation142_spill] sm:$0xff] %v8041_v58  ;;  %v8048_v37 = vsub.f32 1.0, %v12869_v62  ;;  %v12876_v50 = vunpack.c.h.bf16 %v12874_v57  ;;  %v12878_v35 = vunpack.c.l.bf16 %v12877_v16  ;;  %v12879_v12 = vunpack.c.h.bf16 %v12877_v16  ;;  %v12883_v62 = vld [vmem:[#allocation59_spill] sm:$0xff]  ;;  %v12889_v58 = vld [vmem:[#allocation61_spill] sm:$0xff] }
 0x280   : > { %12867 = vst [vmem:[#allocation24_spill] sm:$0xff] %v8044_v55  ;;  %v8052_v40 = vsub.f32 1.0, %v12870_v10  ;;  %v8056_v45 = vsub.f32 1.0, %v12872_v5  ;;  %v8060_v11 = vsub.f32 1.0, %v12873_v2  ;;  %v8064_v63 = vsub.f32 1.0, %v12875_v30  ;;  %v12892_v24 = vld [vmem:[#allocation62_spill] sm:$0xff] }
 0x281   : > { %v8068_v27 = vsub.f32 1.0, %v12876_v50  ;;  %v8072_v4 = vsub.f32 1.0, %v12878_v35  ;;  %v8076_v21 = vsub.f32 1.0, %v12879_v12  ;;  %v12881_v1 = vunpack.c.l.bf16 %v12880_v59  ;;  %v12886_v50 = vld [vmem:[#allocation60_spill] sm:$0xff]  ;;  %v12901_v34 = vld [vmem:[#allocation65_spill] sm:$0xff]  ;;  %v12904_v6 = vld [vmem:[#allocation66_spill] sm:$0xff] }
 0x282   : > { %v12882_v51 = vunpack.c.h.bf16 %v12880_v59  ;;  %v12884_v10 = vunpack.c.l.bf16 %v12883_v62  ;;  %v12885_v2 = vunpack.c.h.bf16 %v12883_v62  ;;  %v12887_v35 = vunpack.c.l.bf16 %v12886_v50  ;;  %v12898_v53 = vld [vmem:[#allocation64_spill] sm:$0xff]  ;;  %v12907_v44 = vld [vmem:[#allocation67_spill] sm:$0xff]  ;;  %v12913_v9 = vld [vmem:[#allocation69_spill] sm:$0xff] }
 0x283   : > { %v8080_v26 = vsub.f32 1.0, %v12881_v1  ;;  %v12888_v55 = vunpack.c.h.bf16 %v12886_v50  ;;  %v12890_v22 = vunpack.c.l.bf16 %v12889_v58  ;;  %v12891_v15 = vunpack.c.h.bf16 %v12889_v58  ;;  %v12910_v54 = vld [vmem:[#allocation68_spill] sm:$0xff]  ;;  %v12916_v48 = vld [vmem:[#allocation70_spill] sm:$0xff]  ;;  %v12919_v0 = vld [vmem:[#allocation71_spill] sm:$0xff] }
 0x284   : > { %v8084_v56 = vsub.f32 1.0, %v12882_v51  ;;  %v8088_v5 = vsub.f32 1.0, %v12884_v10  ;;  %v8092_v30 = vsub.f32 1.0, %v12885_v2  ;;  %v8096_v12 = vsub.f32 1.0, %v12887_v35  ;;  %v12922_v42 = vld [vmem:[#allocation72_spill] sm:$0xff]  ;;  %v12925_v7 = vld [vmem:[#allocation73_spill] sm:$0xff] }
 0x285   : > { %v8100_v1 = vsub.f32 1.0, %v12888_v55  ;;  %v8104_v51 = vsub.f32 1.0, %v12890_v22  ;;  %v8108_v10 = vsub.f32 1.0, %v12891_v15  ;;  %v12893_v29 = vunpack.c.l.bf16 %v12892_v24  ;;  %v12940_v58 = vld [vmem:[#allocation78_spill] sm:$0xff]  ;;  %v12943_v62 = vld [vmem:[#allocation79_spill] sm:$0xff]  ;;  %v12948_v16 = vld [vmem:[#allocation80_spill] sm:$0xff] }
 0x286   : > { %v12894_v46 = vunpack.c.h.bf16 %v12892_v24  ;;  %v12896_v13 = vunpack.c.l.bf16 %v12895_v36  ;;  %v12897_v17 = vunpack.c.h.bf16 %v12895_v36  ;;  %v12899_v49 = vunpack.c.l.bf16 %v12898_v53  ;;  %v12937_v36 = vld [vmem:[#allocation77_spill] sm:$0xff] }
 0x287   : > { %v8112_v2 = vsub.f32 1.0, %v12893_v29  ;;  %v12900_v20 = vunpack.c.h.bf16 %v12898_v53  ;;  %v12902_v25 = vunpack.c.l.bf16 %v12901_v34  ;;  %v12903_v19 = vunpack.c.h.bf16 %v12901_v34  ;;  %v12934_v34 = vld [vmem:[#allocation76_spill] sm:$0xff]  ;;  %v12953_v28 = vld [vmem:[#allocation81_spill] sm:$0xff] }
 0x288   : > { %v8116_v35 = vsub.f32 1.0, %v12894_v46  ;;  %v8120_v55 = vsub.f32 1.0, %v12896_v13  ;;  %v8124_v22 = vsub.f32 1.0, %v12897_v17  ;;  %v8128_v15 = vsub.f32 1.0, %v12899_v49 }
 0x289   : > { %v8132_v29 = vsub.f32 1.0, %v12900_v20  ;;  %v8136_v46 = vsub.f32 1.0, %v12902_v25  ;;  %v8140_v13 = vsub.f32 1.0, %v12903_v19  ;;  %v12905_v3 = vunpack.c.l.bf16 %v12904_v6 }
 0x28a   : > { %v12906_v14 = vunpack.c.h.bf16 %v12904_v6  ;;  %v12908_v18 = vunpack.c.l.bf16 %v12907_v44  ;;  %v12909_v38 = vunpack.c.h.bf16 %v12907_v44  ;;  %v12911_v43 = vunpack.c.l.bf16 %v12910_v54  ;;  %v12931_v44 = vld [vmem:[#allocation75_spill] sm:$0xff] }
 0x28b   : > { %v8144_v17 = vsub.f32 1.0, %v12905_v3  ;;  %v12912_v41 = vunpack.c.h.bf16 %v12910_v54  ;;  %v12914_v31 = vunpack.c.l.bf16 %v12913_v9  ;;  %v12915_v39 = vunpack.c.h.bf16 %v12913_v9  ;;  %v12928_v9 = vld [vmem:[#allocation74_spill] sm:$0xff] }
 0x28c   : > { %v8148_v49 = vsub.f32 1.0, %v12906_v14  ;;  %v8152_v20 = vsub.f32 1.0, %v12908_v18  ;;  %v8156_v25 = vsub.f32 1.0, %v12909_v38  ;;  %v8160_v19 = vsub.f32 1.0, %v12911_v43 }
 0x28d   : > { %v8164_v3 = vsub.f32 1.0, %v12912_v41  ;;  %v8168_v14 = vsub.f32 1.0, %v12914_v31  ;;  %v8172_v18 = vsub.f32 1.0, %v12915_v39  ;;  %v12917_v60 = vunpack.c.l.bf16 %v12916_v48 }
 0x28e   : > { %v12918_v52 = vunpack.c.h.bf16 %v12916_v48  ;;  %v12920_v8 = vunpack.c.l.bf16 %v12919_v0  ;;  %v12921_v23 = vunpack.c.h.bf16 %v12919_v0  ;;  %v12923_v61 = vunpack.c.l.bf16 %v12922_v42 }
 0x28f   : > { %v8176_v38 = vsub.f32 1.0, %v12917_v60  ;;  %v12924_v32 = vunpack.c.h.bf16 %v12922_v42  ;;  %v12926_v47 = vunpack.c.l.bf16 %v12925_v7  ;;  %v12927_v48 = vunpack.c.h.bf16 %v12925_v7 }
 0x290   : > { %v8180_v43 = vsub.f32 1.0, %v12918_v52  ;;  %v8184_v41 = vsub.f32 1.0, %v12920_v8  ;;  %v8188_v31 = vsub.f32 1.0, %v12921_v23  ;;  %v8192_v39 = vsub.f32 1.0, %v12923_v61 }
 0x291   : > { %v8196_v60 = vsub.f32 1.0, %v12924_v32  ;;  %v8200_v52 = vsub.f32 1.0, %v12926_v47  ;;  %v8204_v8 = vsub.f32 1.0, %v12927_v48  ;;  %v12929_v0 = vunpack.c.l.bf16 %v12928_v9 }
 0x292   : > { %v12930_v54 = vunpack.c.h.bf16 %v12928_v9  ;;  %v12932_v42 = vunpack.c.l.bf16 %v12931_v44  ;;  %v12933_v6 = vunpack.c.h.bf16 %v12931_v44  ;;  %v12935_v7 = vunpack.c.l.bf16 %v12934_v34 }
 0x293   : > { %v8208_v23 = vsub.f32 1.0, %v12929_v0  ;;  %v12936_v53 = vunpack.c.h.bf16 %v12934_v34  ;;  %v12938_v9 = vunpack.c.l.bf16 %v12937_v36  ;;  %v12939_v24 = vunpack.c.h.bf16 %v12937_v36 }
 0x294   : > { %v8212_v61 = vsub.f32 1.0, %v12930_v54  ;;  %v8216_v32 = vsub.f32 1.0, %v12932_v42  ;;  %v8220_v47 = vsub.f32 1.0, %v12933_v6  ;;  %v8224_v48 = vsub.f32 1.0, %v12935_v7 }
 0x295   : > { %v8228_v0 = vsub.f32 1.0, %v12936_v53  ;;  %v8232_v54 = vsub.f32 1.0, %v12938_v9  ;;  %v8236_v42 = vsub.f32 1.0, %v12939_v24  ;;  %v12941_v44 = vunpack.c.l.bf16 %v12940_v58 }
 0x296   : > { %v12942_v50 = vunpack.c.h.bf16 %v12940_v58  ;;  %v12944_v34 = vunpack.c.l.bf16 %v12943_v62  ;;  %v12946_v59 = vunpack.c.h.bf16 %v12943_v62  ;;  %v12949_v36 = vunpack.c.l.bf16 %v12948_v16 }
 0x297   : > { %v8240_v6 = vsub.f32 1.0, %v12941_v44  ;;  %v12951_v57 = vunpack.c.h.bf16 %v12948_v16  ;;  %v12954_v58 = vunpack.c.l.bf16 %v12953_v28  ;;  %v12956_v33 = vunpack.c.h.bf16 %v12953_v28 }
 0x298   : > { %v8244_v7 = vsub.f32 1.0, %v12942_v50  ;;  %v8248_v53 = vsub.f32 1.0, %v12944_v34  ;;  %v8252_v9 = vsub.f32 1.0, %v12946_v59  ;;  %v8256_v24 = vsub.f32 1.0, %v12949_v36 }
 0x299   : > { %v8260_v44 = vsub.f32 1.0, %v12951_v57  ;;  %v8264_v50 = vsub.f32 1.0, %v12954_v58  ;;  %v8268_v34 = vsub.f32 1.0, %v12956_v33 }
 0x29a   : > { %12945 = vst [vmem:[#allocation242_spill] sm:$0xff] %v8248_v53  ;;  %12947 = vst [vmem:[#allocation275_spill] sm:$0xff] %v8252_v9  ;;  %v12958_v53 = vld [vmem:[#allocation82_spill] sm:$0xff] }
 0x29b   : > { %12950 = vst [vmem:[#allocation143_spill] sm:$0xff] %v8256_v24  ;;  %12952 = vst [vmem:[#allocation25_spill] sm:$0xff] %v8260_v44  ;;  %v12959_v62 = vunpack.c.l.bf16 %v12958_v53  ;;  %v12960_v9 = vunpack.c.h.bf16 %v12958_v53  ;;  %v12962_v24 = vld [vmem:[#allocation83_spill] sm:$0xff]  ;;  %v12972_v53 = vld [vmem:[#allocation85_spill] sm:$0xff] }
 0x29c   : > { %12955 = vst [vmem:[#allocation245_spill] sm:$0xff] %v8264_v50  ;;  %12957 = vst [vmem:[#allocation44_spill] sm:$0xff] %v8268_v34  ;;  %v12963_v16 = vunpack.c.l.bf16 %v12962_v24  ;;  %v12965_v44 = vunpack.c.h.bf16 %v12962_v24  ;;  %v12967_v50 = vld [vmem:[#allocation84_spill] sm:$0xff] }
 0x29d   : > { %v8272_v59 = vsub.f32 1.0, %v12959_v62  ;;  %v8276_v36 = vsub.f32 1.0, %v12960_v9  ;;  %v12968_v28 = vunpack.c.l.bf16 %v12967_v50  ;;  %v12970_v34 = vunpack.c.h.bf16 %v12967_v50 }
 0x29e   : > { %v8280_v57 = vsub.f32 1.0, %v12963_v16  ;;  %v8284_v58 = vsub.f32 1.0, %v12965_v44  ;;  %v12973_v9 = vunpack.c.l.bf16 %v12972_v53  ;;  %v12975_v16 = vunpack.c.h.bf16 %v12972_v53  ;;  %v12977_v44 = vld [vmem:[#allocation86_spill] sm:$0xff] }
 0x29f   : > { %12961 = vst [vmem:[#allocation144_spill] sm:$0xff] %v8276_v36  ;;  %v8288_v33 = vsub.f32 1.0, %v12968_v28  ;;  %v8292_v62 = vsub.f32 1.0, %v12970_v34  ;;  %v12978_v24 = vunpack.c.l.bf16 %v12977_v44  ;;  %v12980_v28 = vunpack.c.h.bf16 %v12977_v44  ;;  %v12982_v34 = vld [vmem:[#allocation87_spill] sm:$0xff] }
 0x2a0   : > { %12964 = vst [vmem:[#allocation26_spill] sm:$0xff] %v8280_v57  ;;  %12966 = vst [vmem:[#allocation277_spill] sm:$0xff] %v8284_v58  ;;  %v8296_v36 = vsub.f32 1.0, %v12973_v9  ;;  %v8300_v57 = vsub.f32 1.0, %v12975_v16  ;;  %v12985_v9 = vunpack.c.h.bf16 %v12982_v34  ;;  %v12987_v16 = vld [vmem:[#allocation88_spill] sm:$0xff] }
 0x2a1   : > { %12969 = vst [vmem:[#allocation145_spill] sm:$0xff] %v8288_v33  ;;  %12971 = vst [vmem:[#allocation280_spill] sm:$0xff] %v8292_v62  ;;  %v8304_v58 = vsub.f32 1.0, %v12978_v24  ;;  %v8308_v50 = vsub.f32 1.0, %v12980_v28  ;;  %v12983_v62 = vunpack.c.l.bf16 %v12982_v34  ;;  %v12990_v24 = vunpack.c.h.bf16 %v12987_v16  ;;  %v12992_v28 = vld [vmem:[#allocation89_spill] sm:$0xff] }
 0x2a2   : > { %12974 = vst [vmem:[#allocation146_spill] sm:$0xff] %v8296_v36  ;;  %12976 = vst [vmem:[#allocation281_spill] sm:$0xff] %v8300_v57  ;;  %v8316_v53 = vsub.f32 1.0, %v12985_v9  ;;  %v12988_v57 = vunpack.c.l.bf16 %v12987_v16  ;;  %v12996_v9 = vld [vmem:[#allocation90_spill] sm:$0xff] }
 0x2a3   : > { %12979 = vst [vmem:[#allocation147_spill] sm:$0xff] %v8304_v58  ;;  %12981 = vst [vmem:[#allocation36_spill] sm:$0xff] %v8308_v50  ;;  %v8312_v33 = vsub.f32 1.0, %v12983_v62  ;;  %v8324_v44 = vsub.f32 1.0, %v12990_v24  ;;  %v12993_v50 = vunpack.c.l.bf16 %v12992_v28  ;;  %v12994_v62 = vunpack.c.h.bf16 %v12992_v28  ;;  %v12999_v24 = vld [vmem:[#allocation91_spill] sm:$0xff] }
 0x2a4   : > { %12986 = vst [vmem:[#allocation148_spill] sm:$0xff] %v8316_v53  ;;  %v8320_v36 = vsub.f32 1.0, %v12988_v57  ;;  %v12997_v53 = vunpack.c.l.bf16 %v12996_v9  ;;  %v12998_v57 = vunpack.c.h.bf16 %v12996_v9 }
 0x2a5   : > { %12984 = vst [vmem:[#allocation282_spill] sm:$0xff] %v8312_v33  ;;  %12991 = vst [vmem:[#allocation283_spill] sm:$0xff] %v8324_v44  ;;  %v8328_v58 = vsub.f32 1.0, %v12993_v50  ;;  %v8332_v34 = vsub.f32 1.0, %v12994_v62  ;;  %v13000_v44 = vunpack.c.l.bf16 %v12999_v24  ;;  %v13002_v50 = vunpack.c.h.bf16 %v12999_v24  ;;  %v3912_v62 = vld [vmem:[%s4398_s19] sm:$0xff] }
 0x2a6   : > { %12989 = vst [vmem:[#allocation253_spill] sm:$0xff] %v8320_v36  ;;  %v8336_v33 = vsub.f32 1.0, %v12997_v53  ;;  %v8340_v16 = vsub.f32 1.0, %v12998_v57  ;;  %v3913_v53 = vld [vmem:[%s4398_s19 + $0x8] sm:$0xff]  ;;  %v3914_v57 = vld [vmem:[%s4398_s19 + $0x10] sm:$0xff]  ;;  %v3916_v24 = vld [vmem:[%s4398_s19 + $0x20] sm:$0xff] }
 0x2a7   : > { %12995 = vst [vmem:[#allocation149_spill] sm:$0xff] %v8332_v34  ;;  %v8344_v36 = vsub.f32 1.0, %v13000_v44  ;;  %v8348_v28 = vsub.f32 1.0, %v13002_v50  ;;  %v8352_v34 = vmul.f32 %v3912_v62, %v8048_v37  ;;  %v8356_v9 = vmul.f32 %v3913_v53, %v8052_v40  ;;  %v3917_v62 = vld [vmem:[%s4398_s19 + $0x28] sm:$0xff]  ;;  %v3918_v53 = vld [vmem:[%s4398_s19 + $0x30] sm:$0xff] }
 0x2a8   : > { %v8360_v44 = vmul.f32 %v3914_v57, %v8056_v45  ;;  %v8368_v37 = vmul.f32 %v3916_v24, %v8064_v63  ;;  %v8372_v40 = vmul.f32 %v3917_v62, %v8068_v27  ;;  %v8376_v45 = vmul.f32 %v3918_v53, %v8072_v4  ;;  %v3919_v57 = vld [vmem:[%s4398_s19 + $0x38] sm:$0xff]  ;;  %v3921_v24 = vld [vmem:[%s4398_s19 + $0x48] sm:$0xff]  ;;  %v3922_v27 = vld [vmem:[%s4398_s19 + $0x50] sm:$0xff] }
 0x2a9   : > { %13001 = vst [vmem:[#allocation274_spill] sm:$0xff] %v8344_v36  ;;  %13003 = vst [vmem:[#allocation256_spill] sm:$0xff] %v8352_v34  ;;  %v3915_v36 = vld [vmem:[%s4398_s19 + $0x18] sm:$0xff]  ;;  %v8392_v62 = vmul.f32 %v3922_v27, %v8088_v5  ;;  %v3928_v27 = vld [vmem:[%s4398_s19 + $0x80] sm:$0xff] }
 0x2aa   : > { %13004 = vst [vmem:[#allocation246_spill] sm:$0xff] %v8356_v9  ;;  %13005 = vst [vmem:[#allocation150_spill] sm:$0xff] %v8360_v44  ;;  %v8364_v50 = vmul.f32 %v3915_v36, %v8060_v11  ;;  %v8380_v11 = vmul.f32 %v3919_v57, %v8076_v21  ;;  %v3920_v36 = vld [vmem:[%s4398_s19 + $0x40] sm:$0xff]  ;;  %v3923_v4 = vld [vmem:[%s4398_s19 + $0x58] sm:$0xff] }
 0x2ab   : > { %13007 = vst [vmem:[#allocation259_spill] sm:$0xff] %v8368_v37  ;;  %13008 = vst [vmem:[#allocation247_spill] sm:$0xff] %v8372_v40  ;;  %v8384_v63 = vmul.f32 %v3920_v36, %v8080_v26  ;;  %v8388_v37 = vmul.f32 %v3921_v24, %v8084_v56  ;;  %v8396_v53 = vmul.f32 %v3923_v4, %v8092_v30  ;;  %v3924_v21 = vld [vmem:[%s4398_s19 + $0x60] sm:$0xff]  ;;  %v3925_v26 = vld [vmem:[%s4398_s19 + $0x68] sm:$0xff] }
 0x2ac   : > { %13006 = vst [vmem:[#allocation233_spill] sm:$0xff] %v8364_v50  ;;  %13009 = vst [vmem:[#allocation151_spill] sm:$0xff] %v8376_v45  ;;  %v8400_v57 = vmul.f32 %v3924_v21, %v8096_v12  ;;  %v8404_v56 = vmul.f32 %v3925_v26, %v8100_v1  ;;  %v3926_v36 = vld [vmem:[%s4398_s19 + $0x70] sm:$0xff]  ;;  %v3927_v24 = vld [vmem:[%s4398_s19 + $0x78] sm:$0xff]  ;;  %v8416_v12 = vmul.f32 %v3928_v27, %v8112_v2 }
 0x2ad   : > { %13010 = vst [vmem:[#allocation276_spill] sm:$0xff] %v8380_v11  ;;  %13011 = vst [vmem:[#allocation260_spill] sm:$0xff] %v8384_v63  ;;  %v8408_v5 = vmul.f32 %v3926_v36, %v8104_v51  ;;  %v8412_v30 = vmul.f32 %v3927_v24, %v8108_v10  ;;  %v3929_v1 = vld [vmem:[%s4398_s19 + $0x88] sm:$0xff]  ;;  %v3930_v51 = vld [vmem:[%s4398_s19 + $0x90] sm:$0xff] }
 0x2ae   : > { %13012 = vst [vmem:[#allocation33_spill] sm:$0xff] %v8388_v37  ;;  %13013 = vst [vmem:[#allocation152_spill] sm:$0xff] %v8392_v62  ;;  %v8422_v4 = vmul.f32 %v3929_v1, %v8116_v35  ;;  %v8426_v21 = vmul.f32 %v3930_v51, %v8120_v55  ;;  %v3931_v10 = vld [vmem:[%s4398_s19 + $0x98] sm:$0xff]  ;;  %v3932_v2 = vld [vmem:[%s4398_s19 + $0xa0] sm:$0xff] }
 0x2af   : > { %13014 = vst [vmem:[#allocation278_spill] sm:$0xff] %v8396_v53  ;;  %13015 = vst [vmem:[#allocation22_spill] sm:$0xff] %v8400_v57  ;;  %v8430_v26 = vmul.f32 %v3931_v10, %v8124_v22  ;;  %v8434_v36 = vmul.f32 %v3932_v2, %v8128_v15  ;;  %v3933_v24 = vld [vmem:[%s4398_s19 + $0xa8] sm:$0xff]  ;;  %v3934_v27 = vld [vmem:[%s4398_s19 + $0xb0] sm:$0xff] }
 0x2b0   : > { %13016 = vst [vmem:[#allocation286_spill] sm:$0xff] %v8404_v56  ;;  %13017 = vst [vmem:[#allocation153_spill] sm:$0xff] %v8408_v5  ;;  %v8438_v35 = vmul.f32 %v3933_v24, %v8132_v29  ;;  %v8442_v55 = vmul.f32 %v3934_v27, %v8136_v46  ;;  %v3935_v1 = vld [vmem:[%s4398_s19 + $0xb8] sm:$0xff]  ;;  %v3936_v51 = vld [vmem:[%s4398_s19 + $0xc0] sm:$0xff] }
 0x2b1   : > { %13018 = vst [vmem:[#allocation46_spill] sm:$0xff] %v8412_v30  ;;  %13019 = vst [vmem:[#allocation273_spill] sm:$0xff] %v8416_v12  ;;  %v8446_v22 = vmul.f32 %v3935_v1, %v8140_v13  ;;  %v8450_v15 = vmul.f32 %v3936_v51, %v8144_v17  ;;  %v3937_v10 = vld [vmem:[%s4398_s19 + $0xc8] sm:$0xff]  ;;  %v3938_v2 = vld [vmem:[%s4398_s19 + $0xd0] sm:$0xff] }
 0x2b2   : > { %13020 = vst [vmem:[#allocation50_spill] sm:$0xff] %v8422_v4  ;;  %13021 = vst [vmem:[#allocation154_spill] sm:$0xff] %v8426_v21  ;;  %v8454_v29 = vmul.f32 %v3937_v10, %v8148_v49  ;;  %v8458_v46 = vmul.f32 %v3938_v2, %v8152_v20  ;;  %v3939_v24 = vld [vmem:[%s4398_s19 + $0xd8] sm:$0xff]  ;;  %v3940_v27 = vld [vmem:[%s4398_s19 + $0xe0] sm:$0xff] }
 0x2b3   : > { %13022 = vst [vmem:[#allocation284_spill] sm:$0xff] %v8430_v26  ;;  %13023 = vst [vmem:[#allocation279_spill] sm:$0xff] %v8434_v36  ;;  %v8462_v13 = vmul.f32 %v3939_v24, %v8156_v25  ;;  %v8466_v17 = vmul.f32 %v3940_v27, %v8160_v19  ;;  %v3941_v1 = vld [vmem:[%s4398_s19 + $0xe8] sm:$0xff]  ;;  %v3942_v51 = vld [vmem:[%s4398_s19 + $0xf0] sm:$0xff] }
 0x2b4   : > { %13024 = vst [vmem:[#allocation16_spill] sm:$0xff] %v8438_v35  ;;  %13025 = vst [vmem:[#allocation155_spill] sm:$0xff] %v8442_v55  ;;  %v8470_v49 = vmul.f32 %v3941_v1, %v8164_v3  ;;  %v8474_v20 = vmul.f32 %v3942_v51, %v8168_v14  ;;  %v3943_v10 = vld [vmem:[%s4398_s19 + $0xf8] sm:$0xff]  ;;  %v3944_v2 = vld [vmem:[%s4398_s19 + $0x100] sm:$0xff] }
 0x2b5   : > { %13026 = vst [vmem:[#allocation285_spill] sm:$0xff] %v8446_v22  ;;  %13027 = vst [vmem:[#allocation48_spill] sm:$0xff] %v8450_v15  ;;  %v8478_v25 = vmul.f32 %v3943_v10, %v8172_v18  ;;  %v8482_v19 = vmul.f32 %v3944_v2, %v8176_v38  ;;  %v3945_v24 = vld [vmem:[%s4398_s19 + $0x108] sm:$0xff]  ;;  %v3946_v27 = vld [vmem:[%s4398_s19 + $0x110] sm:$0xff] }
 0x2b6   : > { %13028 = vst [vmem:[#allocation17_spill] sm:$0xff] %v8454_v29  ;;  %13029 = vst [vmem:[#allocation156_spill] sm:$0xff] %v8458_v46  ;;  %v8486_v3 = vmul.f32 %v3945_v24, %v8180_v43  ;;  %v8490_v14 = vmul.f32 %v3946_v27, %v8184_v41  ;;  %v3947_v1 = vld [vmem:[%s4398_s19 + $0x118] sm:$0xff]  ;;  %v3948_v51 = vld [vmem:[%s4398_s19 + $0x120] sm:$0xff] }
 0x2b7   : > { %13030 = vst [vmem:[#allocation288_spill] sm:$0xff] %v8462_v13  ;;  %13031 = vst [vmem:[#allocation287_spill] sm:$0xff] %v8466_v17  ;;  %v8494_v18 = vmul.f32 %v3947_v1, %v8188_v31  ;;  %v8498_v38 = vmul.f32 %v3948_v51, %v8192_v39  ;;  %v3949_v10 = vld [vmem:[%s4398_s19 + $0x128] sm:$0xff]  ;;  %v3950_v2 = vld [vmem:[%s4398_s19 + $0x130] sm:$0xff] }
 0x2b8   : > { %13032 = vst [vmem:[#allocation291_spill] sm:$0xff] %v8470_v49  ;;  %13033 = vst [vmem:[#allocation157_spill] sm:$0xff] %v8474_v20  ;;  %v8502_v43 = vmul.f32 %v3949_v10, %v8196_v60  ;;  %v8506_v41 = vmul.f32 %v3950_v2, %v8200_v52  ;;  %v3951_v24 = vld [vmem:[%s4398_s19 + $0x138] sm:$0xff]  ;;  %v3952_v27 = vld [vmem:[%s4398_s19 + $0x140] sm:$0xff] }
 0x2b9   : > { %13034 = vst [vmem:[#allocation19_spill] sm:$0xff] %v8478_v25  ;;  %13035 = vst [vmem:[#allocation289_spill] sm:$0xff] %v8482_v19  ;;  %v8510_v31 = vmul.f32 %v3951_v24, %v8204_v8  ;;  %v8514_v39 = vmul.f32 %v3952_v27, %v8208_v23  ;;  %v3953_v1 = vld [vmem:[%s4398_s19 + $0x148] sm:$0xff]  ;;  %v3954_v51 = vld [vmem:[%s4398_s19 + $0x150] sm:$0xff] }
 0x2ba   : > { %13036 = vst [vmem:[#allocation20_spill] sm:$0xff] %v8486_v3  ;;  %13037 = vst [vmem:[#allocation158_spill] sm:$0xff] %v8490_v14  ;;  %v8518_v60 = vmul.f32 %v3953_v1, %v8212_v61  ;;  %v8522_v52 = vmul.f32 %v3954_v51, %v8216_v32  ;;  %v3955_v10 = vld [vmem:[%s4398_s19 + $0x158] sm:$0xff]  ;;  %v3956_v2 = vld [vmem:[%s4398_s19 + $0x160] sm:$0xff] }
 0x2bb   : > { %13038 = vst [vmem:[#allocation201_spill] sm:$0xff] %v8494_v18  ;;  %13039 = vst [vmem:[#allocation290_spill] sm:$0xff] %v8498_v38  ;;  %v8526_v8 = vmul.f32 %v3955_v10, %v8220_v47  ;;  %v8530_v23 = vmul.f32 %v3956_v2, %v8224_v48  ;;  %v3957_v24 = vld [vmem:[%s4398_s19 + $0x168] sm:$0xff]  ;;  %v3958_v27 = vld [vmem:[%s4398_s19 + $0x170] sm:$0xff] }
 0x2bc   : > { %13040 = vst [vmem:[#allocation296_spill] sm:$0xff] %v8502_v43  ;;  %13041 = vst [vmem:[#allocation159_spill] sm:$0xff] %v8506_v41  ;;  %v8534_v61 = vmul.f32 %v3957_v24, %v8228_v0  ;;  %v8538_v32 = vmul.f32 %v3958_v27, %v8232_v54  ;;  %v3959_v1 = vld [vmem:[%s4398_s19 + $0x178] sm:$0xff]  ;;  %v3960_v51 = vld [vmem:[%s4398_s19 + $0x180] sm:$0xff] }
 0x2bd   : > { %13042 = vst [vmem:[#allocation292_spill] sm:$0xff] %v8510_v31  ;;  %13043 = vst [vmem:[#allocation293_spill] sm:$0xff] %v8514_v39  ;;  %v8542_v47 = vmul.f32 %v3959_v1, %v8236_v42  ;;  %v8546_v48 = vmul.f32 %v3960_v51, %v8240_v6  ;;  %v3961_v10 = vld [vmem:[%s4398_s19 + $0x188] sm:$0xff]  ;;  %v3962_v2 = vld [vmem:[%s4398_s19 + $0x190] sm:$0xff] }
 0x2be   : > { %13044 = vst [vmem:[#allocation207_spill] sm:$0xff] %v8518_v60  ;;  %13045 = vst [vmem:[#allocation160_spill] sm:$0xff] %v8522_v52  ;;  %v8550_v0 = vmul.f32 %v3961_v10, %v8244_v7  ;;  %v13053_v24 = vld [vmem:[#allocation242_spill] sm:$0xff]  ;;  %v3963_v27 = vld [vmem:[%s4398_s19 + $0x198] sm:$0xff] }
 0x2bf   : > { %13046 = vst [vmem:[#allocation294_spill] sm:$0xff] %v8526_v8  ;;  %13047 = vst [vmem:[#allocation204_spill] sm:$0xff] %v8530_v23  ;;  %v8554_v54 = vmul.f32 %v3962_v2, %v13053_v24  ;;  %v13055_v19 = vld [vmem:[#allocation275_spill] sm:$0xff]  ;;  %v3964_v1 = vld [vmem:[%s4398_s19 + $0x1a0] sm:$0xff] }
 0x2c0   : > { %13048 = vst [vmem:[#allocation300_spill] sm:$0xff] %v8534_v61  ;;  %13049 = vst [vmem:[#allocation161_spill] sm:$0xff] %v8538_v32  ;;  %v8558_v42 = vmul.f32 %v3963_v27, %v13055_v19  ;;  %v13057_v25 = vld [vmem:[#allocation143_spill] sm:$0xff]  ;;  %v13059_v7 = vld [vmem:[#allocation25_spill] sm:$0xff] }
 0x2c1   : > { %13050 = vst [vmem:[#allocation295_spill] sm:$0xff] %v8542_v47  ;;  %13051 = vst [vmem:[#allocation297_spill] sm:$0xff] %v8546_v48  ;;  %v8562_v6 = vmul.f32 %v3964_v1, %v13057_v25  ;;  %v3965_v51 = vld [vmem:[%s4398_s19 + $0x1a8] sm:$0xff]  ;;  %v3966_v20 = vld [vmem:[%s4398_s19 + $0x1b0] sm:$0xff] }
 0x2c2   : > { %13052 = vst [vmem:[#allocation302_spill] sm:$0xff] %v8550_v0  ;;  %13054 = vst [vmem:[#allocation162_spill] sm:$0xff] %v8554_v54  ;;  %v8567_v10 = vmul.f32 %v3965_v51, %v13059_v7  ;;  %v13061_v2 = vld [vmem:[#allocation245_spill] sm:$0xff]  ;;  %v13063_v19 = vld [vmem:[#allocation44_spill] sm:$0xff] }
 0x2c3   : > { %13056 = vst [vmem:[#allocation206_spill] sm:$0xff] %v8558_v42  ;;  %13058 = vst [vmem:[#allocation298_spill] sm:$0xff] %v8562_v6  ;;  %v8571_v24 = vmul.f32 %v3966_v20, %v13061_v2  ;;  %v3967_v49 = vld [vmem:[%s4398_s19 + $0x1b8] sm:$0xff]  ;;  %v3968_v17 = vld [vmem:[%s4398_s19 + $0x1c0] sm:$0xff] }
 0x2c4   : > { %13060 = vst [vmem:[#allocation304_spill] sm:$0xff] %v8567_v10  ;;  %v8575_v27 = vmul.f32 %v3967_v49, %v13063_v19  ;;  %v8579_v25 = vmul.f32 %v3968_v17, %v8272_v59  ;;  %v3969_v1 = vld [vmem:[%s4398_s19 + $0x1c8] sm:$0xff]  ;;  %v13066_v13 = vld [vmem:[#allocation144_spill] sm:$0xff]  ;;  %v13068_v46 = vld [vmem:[#allocation26_spill] sm:$0xff] }
 0x2c5   : > { %13062 = vst [vmem:[#allocation163_spill] sm:$0xff] %v8571_v24  ;;  %v8583_v51 = vmul.f32 %v3969_v1, %v13066_v13  ;;  %v3970_v7 = vld [vmem:[%s4398_s19 + $0x1d0] sm:$0xff]  ;;  %v3971_v2 = vld [vmem:[%s4398_s19 + $0x1d8] sm:$0xff]  ;;  %v3972_v19 = vld [vmem:[%s4398_s19 + $0x1e0] sm:$0xff] }
 0x2c6   : > { %13064 = vst [vmem:[#allocation299_spill] sm:$0xff] %v8575_v27  ;;  %13065 = vst [vmem:[#allocation301_spill] sm:$0xff] %v8579_v25  ;;  %v8587_v20 = vmul.f32 %v3970_v7, %v13068_v46  ;;  %v13070_v29 = vld [vmem:[#allocation277_spill] sm:$0xff]  ;;  %v3973_v17 = vld [vmem:[%s4398_s19 + $0x1e8] sm:$0xff] }
 0x2c7   : > { %13067 = vst [vmem:[#allocation212_spill] sm:$0xff] %v8583_v51  ;;  %v8591_v49 = vmul.f32 %v3971_v2, %v13070_v29  ;;  %v13072_v15 = vld [vmem:[#allocation145_spill] sm:$0xff]  ;;  %v13074_v22 = vld [vmem:[#allocation280_spill] sm:$0xff]  ;;  %v13076_v55 = vld [vmem:[#allocation146_spill] sm:$0xff] }
 0x2c8   : > { %13069 = vst [vmem:[#allocation164_spill] sm:$0xff] %v8587_v20  ;;  %v8595_v59 = vmul.f32 %v3972_v19, %v13072_v15  ;;  %v8599_v13 = vmul.f32 %v3973_v17, %v13074_v22  ;;  %v3974_v1 = vld [vmem:[%s4398_s19 + $0x1f0] sm:$0xff]  ;;  %v3975_v7 = vld [vmem:[%s4398_s19 + $0x1f8] sm:$0xff]  ;;  %v3976_v2 = vld [vmem:[%s4398_s19 + $0x200] sm:$0xff] }
 0x2c9   : > { %13071 = vst [vmem:[#allocation208_spill] sm:$0xff] %v8591_v49  ;;  %v8603_v46 = vmul.f32 %v3974_v1, %v13076_v55  ;;  %v13078_v35 = vld [vmem:[#allocation281_spill] sm:$0xff]  ;;  %v13080_v36 = vld [vmem:[#allocation147_spill] sm:$0xff]  ;;  %v13082_v26 = vld [vmem:[#allocation36_spill] sm:$0xff] }
 0x2ca   : > { %13073 = vst [vmem:[#allocation303_spill] sm:$0xff] %v8595_v59  ;;  %13075 = vst [vmem:[#allocation21_spill] sm:$0xff] %v8599_v13  ;;  %v8607_v29 = vmul.f32 %v3975_v7, %v13078_v35  ;;  %v8611_v15 = vmul.f32 %v3976_v2, %v13080_v36  ;;  %v3977_v19 = vld [vmem:[%s4398_s19 + $0x208] sm:$0xff]  ;;  %v3978_v17 = vld [vmem:[%s4398_s19 + $0x210] sm:$0xff]  ;;  %v8627_v7 = vstv %s3159_s20 }
 0x2cb   : > { %13077 = vst [vmem:[#allocation165_spill] sm:$0xff] %v8603_v46  ;;  %v8615_v22 = vmul.f32 %v3977_v19, %v13082_v26  ;;  %v13084_v21 = vld [vmem:[#allocation282_spill] sm:$0xff]  ;;  %v3979_v1 = vld [vmem:[%s4398_s19 + $0x218] sm:$0xff]  ;;  %v13086_v4 = vld [vmem:[#allocation148_spill] sm:$0xff] }
 0x2cc   : > { %13079 = vst [vmem:[#allocation305_spill] sm:$0xff] %v8607_v29  ;;  %13081 = vst [vmem:[#allocation210_spill] sm:$0xff] %v8611_v15  ;;  %v8619_v55 = vmul.f32 %v3978_v17, %v13084_v21  ;;  %v8623_v35 = vmul.f32 %v3979_v1, %v13086_v4  ;;  %v3980_v36 = vld [vmem:[%s4398_s19 + $0x220] sm:$0xff]  ;;  %v13088_v2 = vld [vmem:[#allocation253_spill] sm:$0xff] }
 0x2cd   : > { %13083 = vst [vmem:[#allocation309_spill] sm:$0xff] %v8615_v22  ;;  %v8631_v12 = vmul.f32 %v3980_v36, %v13088_v2  ;;  %v3981_v26 = vld [vmem:[%s4398_s19 + $0x228] sm:$0xff]  ;;  %v3982_v5 = vld [vmem:[%s4398_s19 + $0x230] sm:$0xff]  ;;  %v3983_v17 = vld [vmem:[%s4398_s19 + $0x238] sm:$0xff] }
 0x2ce   : > { %13085 = vst [vmem:[#allocation166_spill] sm:$0xff] %v8619_v55  ;;  %13087 = vst [vmem:[#allocation307_spill] sm:$0xff] %v8623_v35  ;;  %v13090_v19 = vld [vmem:[#allocation283_spill] sm:$0xff]  ;;  %v8639_v21 = vmul.f32 %v3982_v5, %v8328_v58  ;;  %v13093_v56 = vld [vmem:[#allocation149_spill] sm:$0xff] }
 0x2cf   : > { %13089 = vst [vmem:[#allocation306_spill] sm:$0xff] %v8631_v12  ;;  %v8635_v30 = vmul.f32 %v3981_v26, %v13090_v19  ;;  %v8643_v4 = vmul.f32 %v3983_v17, %v13093_v56  ;;  %v3984_v1 = vld [vmem:[%s4398_s19 + $0x240] sm:$0xff]  ;;  %v3985_v53 = vld [vmem:[%s4398_s19 + $0x248] sm:$0xff]  ;;  %v3986_v2 = vld [vmem:[%s4398_s19 + $0x250] sm:$0xff] }
 0x2d0   : > { %13092 = vst [vmem:[#allocation167_spill] sm:$0xff] %v8639_v21  ;;  %v8647_v57 = vmul.f32 %v3984_v1, %v8336_v33  ;;  %v8651_v36 = vmul.f32 %v3985_v53, %v8340_v16  ;;  %v13097_v62 = vld [vmem:[#allocation274_spill] sm:$0xff]  ;;  %v3987_v19 = vld [vmem:[%s4398_s19 + $0x258] sm:$0xff]  ;;  %v13103_v16 = vld [vmem:[#allocation55_spill] sm:$0xff] }
 0x2d1   : > { %13091 = vst [vmem:[#allocation217_spill] sm:$0xff] %v8635_v30  ;;  %13094 = vst [vmem:[#allocation308_spill] sm:$0xff] %v8643_v4  ;;  %v8655_v26 = vmul.f32 %v3986_v2, %v13097_v62  ;;  %v8659_v58 = vmul.f32 %v3987_v19, %v8348_v28  ;;  %v13100_v5 = vld [vmem:[#allocation53_spill] sm:$0xff]  ;;  %v13104_v53 = vunpack.c.l.bf16 %v13103_v16  ;;  %v13105_v62 = vunpack.c.h.bf16 %v13103_v16  ;;  %v13106_v2 = vld [vmem:[#allocation56_spill] sm:$0xff] }
 0x2d2   : > { %13095 = vst [vmem:[#allocation214_spill] sm:$0xff] %v8647_v57  ;;  %13096 = vst [vmem:[#allocation313_spill] sm:$0xff] %v8651_v36  ;;  %v13101_v56 = vunpack.c.l.bf16 %v13100_v5  ;;  %v13102_v33 = vunpack.c.h.bf16 %v13100_v5  ;;  %v13107_v19 = vunpack.c.l.bf16 %v13106_v2  ;;  %v13108_v5 = vunpack.c.h.bf16 %v13106_v2  ;;  %v13109_v63 = vld [vmem:[#allocation57_spill] sm:$0xff]  ;;  %v13112_v45 = vld [vmem:[#allocation58_spill] sm:$0xff] }
 0x2d3   : > { %13098 = vst [vmem:[#allocation168_spill] sm:$0xff] %v8655_v26  ;;  %13099 = vst [vmem:[#allocation310_spill] sm:$0xff] %v8659_v58  ;;  %v8674_v37 = vmul.f32 %v13104_v53, %v8627_v7  ;;  %v8679_v28 = vmul.f32 %v13105_v62, %v8627_v7  ;;  %v13110_v11 = vunpack.c.l.bf16 %v13109_v63  ;;  %v13111_v16 = vunpack.c.h.bf16 %v13109_v63  ;;  %v13115_v50 = vld [vmem:[#allocation59_spill] sm:$0xff]  ;;  %v13118_v9 = vld [vmem:[#allocation60_spill] sm:$0xff] }
 0x2d4   : > { %v8664_v17 = vmul.f32 %v13101_v56, %v8627_v7  ;;  %v8669_v1 = vmul.f32 %v13102_v33, %v8627_v7  ;;  %v8684_v56 = vmul.f32 %v13107_v19, %v8627_v7  ;;  %v8689_v33 = vmul.f32 %v13108_v5, %v8627_v7  ;;  %v13121_v58 = vld [vmem:[#allocation61_spill] sm:$0xff]  ;;  %v13124_v36 = vld [vmem:[#allocation62_spill] sm:$0xff]  ;;  %v13127_v4 = vld [vmem:[#allocation63_spill] sm:$0xff] }
 0x2d5   : > { %v8694_v53 = vmul.f32 %v13110_v11, %v8627_v7  ;;  %v8699_v62 = vmul.f32 %v13111_v16, %v8627_v7  ;;  %v13113_v40 = vunpack.c.l.bf16 %v13112_v45  ;;  %v13114_v2 = vunpack.c.h.bf16 %v13112_v45  ;;  %v13130_v30 = vld [vmem:[#allocation64_spill] sm:$0xff]  ;;  %v13133_v35 = vld [vmem:[#allocation65_spill] sm:$0xff]  ;;  %v13136_v22 = vld [vmem:[#allocation66_spill] sm:$0xff] }
 0x2d6   : > { %v13116_v44 = vunpack.c.l.bf16 %v13115_v50  ;;  %v13117_v63 = vunpack.c.h.bf16 %v13115_v50  ;;  %v13119_v34 = vunpack.c.l.bf16 %v13118_v9  ;;  %v13120_v45 = vunpack.c.h.bf16 %v13118_v9  ;;  %v13139_v29 = vld [vmem:[#allocation67_spill] sm:$0xff]  ;;  %v13142_v13 = vld [vmem:[#allocation68_spill] sm:$0xff]  ;;  %v13145_v49 = vld [vmem:[#allocation69_spill] sm:$0xff] }
 0x2d7   : > { %v8704_v19 = vmul.f32 %v13113_v40, %v8627_v7  ;;  %v8709_v5 = vmul.f32 %v13114_v2, %v8627_v7  ;;  %v13122_v26 = vunpack.c.l.bf16 %v13121_v58  ;;  %v13123_v50 = vunpack.c.h.bf16 %v13121_v58  ;;  %v13148_v51 = vld [vmem:[#allocation70_spill] sm:$0xff]  ;;  %v13151_v27 = vld [vmem:[#allocation71_spill] sm:$0xff]  ;;  %v13154_v10 = vld [vmem:[#allocation72_spill] sm:$0xff] }
 0x2d8   : > { %v8714_v11 = vmul.f32 %v13116_v44, %v8627_v7  ;;  %v8719_v16 = vmul.f32 %v13117_v63, %v8627_v7  ;;  %v8724_v40 = vmul.f32 %v13119_v34, %v8627_v7  ;;  %v8729_v2 = vmul.f32 %v13120_v45, %v8627_v7  ;;  %v13157_v42 = vld [vmem:[#allocation73_spill] sm:$0xff]  ;;  %v13160_v0 = vld [vmem:[#allocation74_spill] sm:$0xff]  ;;  %v13163_v47 = vld [vmem:[#allocation75_spill] sm:$0xff] }
 0x2d9   : > { %v8734_v44 = vmul.f32 %v13122_v26, %v8627_v7  ;;  %v8739_v63 = vmul.f32 %v13123_v50, %v8627_v7  ;;  %v13125_v57 = vunpack.c.l.bf16 %v13124_v36  ;;  %v13126_v9 = vunpack.c.h.bf16 %v13124_v36  ;;  %v13166_v61 = vld [vmem:[#allocation76_spill] sm:$0xff]  ;;  %v13169_v8 = vld [vmem:[#allocation77_spill] sm:$0xff]  ;;  %v13172_v60 = vld [vmem:[#allocation78_spill] sm:$0xff] }
 0x2da   : > { %v13128_v21 = vunpack.c.l.bf16 %v13127_v4  ;;  %v13129_v58 = vunpack.c.h.bf16 %v13127_v4  ;;  %v13131_v12 = vunpack.c.l.bf16 %v13130_v30  ;;  %v13132_v36 = vunpack.c.h.bf16 %v13130_v30  ;;  %v13175_v31 = vld [vmem:[#allocation79_spill] sm:$0xff]  ;;  %v13179_v43 = vld [vmem:[#allocation80_spill] sm:$0xff]  ;;  %v13184_v18 = vld [vmem:[#allocation81_spill] sm:$0xff] }
 0x2db   : > { %v8744_v34 = vmul.f32 %v13125_v57, %v8627_v7  ;;  %v8749_v45 = vmul.f32 %v13126_v9, %v8627_v7  ;;  %v13134_v55 = vunpack.c.l.bf16 %v13133_v35  ;;  %v13135_v4 = vunpack.c.h.bf16 %v13133_v35  ;;  %v13189_v3 = vld [vmem:[#allocation82_spill] sm:$0xff] }
 0x2dc   : > { %v8754_v26 = vmul.f32 %v13128_v21, %v8627_v7  ;;  %v8759_v50 = vmul.f32 %v13129_v58, %v8627_v7  ;;  %v8764_v57 = vmul.f32 %v13131_v12, %v8627_v7  ;;  %v8769_v9 = vmul.f32 %v13132_v36, %v8627_v7 }
 0x2dd   : > { %v8774_v21 = vmul.f32 %v13134_v55, %v8627_v7  ;;  %v8779_v58 = vmul.f32 %v13135_v4, %v8627_v7  ;;  %v13137_v15 = vunpack.c.l.bf16 %v13136_v22  ;;  %v13138_v30 = vunpack.c.h.bf16 %v13136_v22 }
 0x2de   : > { %v13140_v46 = vunpack.c.l.bf16 %v13139_v29  ;;  %v13141_v35 = vunpack.c.h.bf16 %v13139_v29  ;;  %v13143_v59 = vunpack.c.l.bf16 %v13142_v13  ;;  %v13144_v22 = vunpack.c.h.bf16 %v13142_v13 }
 0x2df   : > { %v8784_v12 = vmul.f32 %v13137_v15, %v8627_v7  ;;  %v8789_v36 = vmul.f32 %v13138_v30, %v8627_v7  ;;  %v13146_v20 = vunpack.c.l.bf16 %v13145_v49  ;;  %v13147_v29 = vunpack.c.h.bf16 %v13145_v49 }
 0x2e0   : > { %v8794_v55 = vmul.f32 %v13140_v46, %v8627_v7  ;;  %v8799_v4 = vmul.f32 %v13141_v35, %v8627_v7  ;;  %v8804_v15 = vmul.f32 %v13143_v59, %v8627_v7  ;;  %v8809_v30 = vmul.f32 %v13144_v22, %v8627_v7 }
 0x2e1   : > { %v8814_v46 = vmul.f32 %v13146_v20, %v8627_v7  ;;  %v8819_v35 = vmul.f32 %v13147_v29, %v8627_v7  ;;  %v13149_v25 = vunpack.c.l.bf16 %v13148_v51  ;;  %v13150_v13 = vunpack.c.h.bf16 %v13148_v51 }
 0x2e2   : > { %v13152_v24 = vunpack.c.l.bf16 %v13151_v27  ;;  %v13153_v49 = vunpack.c.h.bf16 %v13151_v27  ;;  %v13155_v6 = vunpack.c.l.bf16 %v13154_v10  ;;  %v13156_v51 = vunpack.c.h.bf16 %v13154_v10 }
 0x2e3   : > { %v8824_v59 = vmul.f32 %v13149_v25, %v8627_v7  ;;  %v8829_v22 = vmul.f32 %v13150_v13, %v8627_v7  ;;  %v13158_v54 = vunpack.c.l.bf16 %v13157_v42  ;;  %v13159_v27 = vunpack.c.h.bf16 %v13157_v42 }
 0x2e4   : > { %v8834_v20 = vmul.f32 %v13152_v24, %v8627_v7  ;;  %v8839_v29 = vmul.f32 %v13153_v49, %v8627_v7  ;;  %v8844_v25 = vmul.f32 %v13155_v6, %v8627_v7  ;;  %v8849_v13 = vmul.f32 %v13156_v51, %v8627_v7 }
 0x2e5   : > { %v8854_v24 = vmul.f32 %v13158_v54, %v8627_v7  ;;  %v8859_v49 = vmul.f32 %v13159_v27, %v8627_v7  ;;  %v13161_v48 = vunpack.c.l.bf16 %v13160_v0  ;;  %v13162_v10 = vunpack.c.h.bf16 %v13160_v0 }
 0x2e6   : > { %v13164_v32 = vunpack.c.l.bf16 %v13163_v47  ;;  %v13165_v42 = vunpack.c.h.bf16 %v13163_v47  ;;  %v13167_v23 = vunpack.c.l.bf16 %v13166_v61  ;;  %v13168_v0 = vunpack.c.h.bf16 %v13166_v61 }
 0x2e7   : > { %v8864_v6 = vmul.f32 %v13161_v48, %v8627_v7  ;;  %v8869_v51 = vmul.f32 %v13162_v10, %v8627_v7  ;;  %v13170_v52 = vunpack.c.l.bf16 %v13169_v8  ;;  %v13171_v47 = vunpack.c.h.bf16 %v13169_v8 }
 0x2e8   : > { %v8874_v54 = vmul.f32 %v13164_v32, %v8627_v7  ;;  %v8879_v27 = vmul.f32 %v13165_v42, %v8627_v7  ;;  %v8884_v48 = vmul.f32 %v13167_v23, %v8627_v7  ;;  %v8889_v10 = vmul.f32 %v13168_v0, %v8627_v7 }
 0x2e9   : > { %v8894_v32 = vmul.f32 %v13170_v52, %v8627_v7  ;;  %v8899_v42 = vmul.f32 %v13171_v47, %v8627_v7  ;;  %v13173_v39 = vunpack.c.l.bf16 %v13172_v60  ;;  %v13174_v61 = vunpack.c.h.bf16 %v13172_v60 }
 0x2ea   : > { %v13176_v41 = vunpack.c.l.bf16 %v13175_v31  ;;  %v13177_v8 = vunpack.c.h.bf16 %v13175_v31  ;;  %v13180_v38 = vunpack.c.l.bf16 %v13179_v43  ;;  %v13182_v60 = vunpack.c.h.bf16 %v13179_v43 }
 0x2eb   : > { %v8904_v23 = vmul.f32 %v13173_v39, %v8627_v7  ;;  %v8909_v0 = vmul.f32 %v13174_v61, %v8627_v7  ;;  %v13185_v14 = vunpack.c.l.bf16 %v13184_v18  ;;  %v13187_v31 = vunpack.c.h.bf16 %v13184_v18 }
 0x2ec   : > { %v8914_v52 = vmul.f32 %v13176_v41, %v8627_v7  ;;  %v8919_v47 = vmul.f32 %v13177_v8, %v8627_v7  ;;  %v8924_v39 = vmul.f32 %v13180_v38, %v8627_v7  ;;  %v8929_v61 = vmul.f32 %v13182_v60, %v8627_v7 }
 0x2ed   : > { %v8934_v41 = vmul.f32 %v13185_v14, %v8627_v7  ;;  %v8939_v8 = vmul.f32 %v13187_v31, %v8627_v7  ;;  %v13192_v43 = vunpack.c.h.bf16 %v13189_v3 }
 0x2ee   : > { %13178 = vst [vmem:[#allocation215_spill] sm:$0xff] %v8919_v47  ;;  %13181 = vst [vmem:[#allocation219_spill] sm:$0xff] %v8924_v39  ;;  %v13190_v47 = vunpack.c.l.bf16 %v13189_v3 }
 0x2ef   : > { %13183 = vst [vmem:[#allocation169_spill] sm:$0xff] %v8929_v61  ;;  %13186 = vst [vmem:[#allocation312_spill] sm:$0xff] %v8934_v41  ;;  %v8949_v60 = vmul.f32 %v13192_v43, %v8627_v7  ;;  %v13194_v61 = vld [vmem:[#allocation83_spill] sm:$0xff] }
 0x2f0   : > { %13188 = vst [vmem:[#allocation311_spill] sm:$0xff] %v8939_v8  ;;  %v8944_v38 = vmul.f32 %v13190_v47, %v8627_v7  ;;  %v13195_v39 = vunpack.c.l.bf16 %v13194_v61  ;;  %v13197_v18 = vunpack.c.h.bf16 %v13194_v61  ;;  %v13199_v8 = vld [vmem:[#allocation84_spill] sm:$0xff] }
 0x2f1   : > { %13193 = vst [vmem:[#allocation170_spill] sm:$0xff] %v8949_v60  ;;  %v13200_v41 = vunpack.c.l.bf16 %v13199_v8  ;;  %v13202_v3 = vunpack.c.h.bf16 %v13199_v8  ;;  %v13204_v60 = vld [vmem:[#allocation85_spill] sm:$0xff] }
 0x2f2   : > { %13191 = vst [vmem:[#allocation221_spill] sm:$0xff] %v8944_v38  ;;  %v8954_v14 = vmul.f32 %v13195_v39, %v8627_v7  ;;  %v8959_v31 = vmul.f32 %v13197_v18, %v8627_v7  ;;  %v13205_v38 = vunpack.c.l.bf16 %v13204_v60  ;;  %v13207_v61 = vunpack.c.h.bf16 %v13204_v60 }
 0x2f3   : > { %v8964_v47 = vmul.f32 %v13200_v41, %v8627_v7  ;;  %v8969_v43 = vmul.f32 %v13202_v3, %v8627_v7 }
 0x2f4   : > { %13196 = vst [vmem:[#allocation315_spill] sm:$0xff] %v8954_v14  ;;  %13198 = vst [vmem:[#allocation314_spill] sm:$0xff] %v8959_v31  ;;  %v8974_v39 = vmul.f32 %v13205_v38, %v8627_v7  ;;  %v8979_v18 = vmul.f32 %v13207_v61, %v8627_v7  ;;  %v13209_v31 = vld [vmem:[#allocation86_spill] sm:$0xff] }
 0x2f5   : > { %13201 = vst [vmem:[#allocation223_spill] sm:$0xff] %v8964_v47  ;;  %13203 = vst [vmem:[#allocation171_spill] sm:$0xff] %v8969_v43  ;;  %v13210_v14 = vunpack.c.l.bf16 %v13209_v31  ;;  %v13212_v8 = vunpack.c.h.bf16 %v13209_v31  ;;  %v13214_v43 = vld [vmem:[#allocation87_spill] sm:$0xff] }
 0x2f6   : > { %13206 = vst [vmem:[#allocation317_spill] sm:$0xff] %v8974_v39  ;;  %13208 = vst [vmem:[#allocation316_spill] sm:$0xff] %v8979_v18  ;;  %v13215_v47 = vunpack.c.l.bf16 %v13214_v43  ;;  %v13217_v60 = vunpack.c.h.bf16 %v13214_v43  ;;  %v13219_v18 = vld [vmem:[#allocation88_spill] sm:$0xff] }
 0x2f7   : > { %v8984_v41 = vmul.f32 %v13210_v14, %v8627_v7  ;;  %v8989_v3 = vmul.f32 %v13212_v8, %v8627_v7  ;;  %v13220_v39 = vunpack.c.l.bf16 %v13219_v18  ;;  %v13222_v31 = vunpack.c.h.bf16 %v13219_v18 }
 0x2f8   : > { %v8994_v38 = vmul.f32 %v13215_v47, %v8627_v7  ;;  %v8999_v61 = vmul.f32 %v13217_v60, %v8627_v7 }
 0x2f9   : > { %13211 = vst [vmem:[#allocation322_spill] sm:$0xff] %v8984_v41  ;;  %13213 = vst [vmem:[#allocation172_spill] sm:$0xff] %v8989_v3  ;;  %v9004_v14 = vmul.f32 %v13220_v39, %v8627_v7  ;;  %v9009_v8 = vmul.f32 %v13222_v31, %v8627_v7  ;;  %v13224_v3 = vld [vmem:[#allocation89_spill] sm:$0xff] }
 0x2fa   : > { %13216 = vst [vmem:[#allocation318_spill] sm:$0xff] %v8994_v38  ;;  %13218 = vst [vmem:[#allocation222_spill] sm:$0xff] %v8999_v61  ;;  %v13225_v41 = vunpack.c.l.bf16 %v13224_v3  ;;  %v13226_v43 = vunpack.c.h.bf16 %v13224_v3  ;;  %v13228_v61 = vld [vmem:[#allocation90_spill] sm:$0xff] }
 0x2fb   : > { %13221 = vst [vmem:[#allocation225_spill] sm:$0xff] %v9004_v14  ;;  %13223 = vst [vmem:[#allocation173_spill] sm:$0xff] %v9009_v8  ;;  %v13229_v38 = vunpack.c.l.bf16 %v13228_v61  ;;  %v13230_v18 = vunpack.c.h.bf16 %v13228_v61  ;;  %v13231_v8 = vld [vmem:[#allocation91_spill] sm:$0xff]  ;;  %v9048_v61 = vadd.f32 1.0, %v8674_v37  ;;  %v9069_v37 = vadd.f32 1.0, %v8709_v5 }
 0x2fc   : > { %v9014_v47 = vmul.f32 %v13225_v41, %v8627_v7  ;;  %v9019_v60 = vmul.f32 %v13226_v43, %v8627_v7  ;;  %v13232_v14 = vunpack.c.l.bf16 %v13231_v8  ;;  %v13234_v3 = vunpack.c.h.bf16 %v13231_v8 }
 0x2fd   : > { %v9024_v39 = vmul.f32 %v13229_v38, %v8627_v7  ;;  %v9029_v31 = vmul.f32 %v13230_v18, %v8627_v7  ;;  %v9045_v38 = vadd.f32 1.0, %v8669_v1  ;;  %v9051_v18 = vadd.f32 1.0, %v8679_v28 }
 0x2fe   : > { %13227 = vst [vmem:[#allocation320_spill] sm:$0xff] %v9019_v60  ;;  %v9034_v41 = vmul.f32 %v13232_v14, %v8627_v7  ;;  %v9039_v43 = vmul.f32 %v13234_v3, %v8627_v7  ;;  %v9042_v60 = vadd.f32 1.0, %v8664_v17  ;;  %v9054_v14 = vadd.f32 1.0, %v8684_v56 }
 0x2ff   : > { %v9060_v7 = vadd.f32 1.0, %v8694_v53  ;;  %v9063_v17 = vadd.f32 1.0, %v8699_v62  ;;  %v9066_v1 = vadd.f32 1.0, %v8704_v19  ;;  %v9072_v28 = vadd.f32 1.0, %v8714_v11 }
 0x300   : > { %13233 = vst [vmem:[#allocation319_spill] sm:$0xff] %v9034_v41  ;;  %v9057_v41 = vadd.f32 1.0, %v8689_v33  ;;  %v9075_v56 = vadd.f32 1.0, %v8719_v16  ;;  %v9078_v33 = vadd.f32 1.0, %v8724_v40  ;;  %v9081_v53 = vadd.f32 1.0, %v8729_v2 }
 0x301   : > { %13235 = vst [vmem:[#allocation227_spill] sm:$0xff] %v9072_v28  ;;  %v9084_v62 = vadd.f32 1.0, %v8734_v44  ;;  %v9087_v19 = vadd.f32 1.0, %v8739_v63  ;;  %v9090_v5 = vadd.f32 1.0, %v8744_v34  ;;  %v9093_v11 = vadd.f32 1.0, %v8749_v45  ;;  %v13279_v28 = vld [vmem:[#allocation119_spill] sm:$0xff] }
 0x302   : > { %13236 = vst [vmem:[#allocation174_spill] sm:$0xff] %v9075_v56  ;;  %13237 = vst [vmem:[#allocation321_spill] sm:$0xff] %v9078_v33  ;;  %v9096_v16 = vadd.f32 1.0, %v8754_v26  ;;  %v9099_v40 = vadd.f32 1.0, %v8759_v50  ;;  %v9102_v2 = vadd.f32 1.0, %v8764_v57  ;;  %v9105_v44 = vadd.f32 1.0, %v8769_v9 }
 0x303   : > { %13238 = vst [vmem:[#allocation323_spill] sm:$0xff] %v9081_v53  ;;  %13239 = vst [vmem:[#allocation327_spill] sm:$0xff] %v9084_v62  ;;  %v9108_v63 = vadd.f32 1.0, %v8774_v21  ;;  %v9111_v34 = vadd.f32 1.0, %v8779_v58  ;;  %v9114_v45 = vadd.f32 1.0, %v8784_v12  ;;  %v9117_v26 = vadd.f32 1.0, %v8789_v36 }
 0x304   : > { %13240 = vst [vmem:[#allocation37_spill] sm:$0xff] %v9087_v19  ;;  %13241 = vst [vmem:[#allocation324_spill] sm:$0xff] %v9090_v5  ;;  %v9120_v50 = vadd.f32 1.0, %v8794_v55  ;;  %v9123_v57 = vadd.f32 1.0, %v8799_v4  ;;  %v9126_v9 = vadd.f32 1.0, %v8804_v15  ;;  %v9129_v21 = vadd.f32 1.0, %v8809_v30 }
 0x305   : > { %13242 = vst [vmem:[#allocation325_spill] sm:$0xff] %v9093_v11  ;;  %13243 = vst [vmem:[#allocation330_spill] sm:$0xff] %v9096_v16  ;;  %v9132_v58 = vadd.f32 1.0, %v8814_v46  ;;  %v9135_v12 = vadd.f32 1.0, %v8819_v35  ;;  %v9138_v36 = vadd.f32 1.0, %v8824_v59  ;;  %v2207_v55 = vadd.f32 1.0, %v8829_v22 }
 0x306   : > { %13244 = vst [vmem:[#allocation175_spill] sm:$0xff] %v9099_v40  ;;  %13245 = vst [vmem:[#allocation228_spill] sm:$0xff] %v9102_v2  ;;  %v2208_v4 = vadd.f32 1.0, %v8834_v20  ;;  %v2209_v8 = vadd.f32 1.0, %v8839_v29  ;;  %v2210_v15 = vadd.f32 1.0, %v8844_v25  ;;  %v2211_v30 = vadd.f32 1.0, %v8849_v13 }
 0x307   : > { %13246 = vst [vmem:[#allocation328_spill] sm:$0xff] %v9105_v44  ;;  %13247 = vst [vmem:[#allocation32_spill] sm:$0xff] %v9108_v63  ;;  %v2212_v3 = vadd.f32 1.0, %v8854_v24  ;;  %v2213_v46 = vadd.f32 1.0, %v8859_v49  ;;  %v2214_v35 = vadd.f32 1.0, %v8864_v6  ;;  %v2216_v59 = vadd.f32 1.0, %v8874_v54 }
 0x308   : > { %13248 = vst [vmem:[#allocation176_spill] sm:$0xff] %v9111_v34  ;;  %13249 = vst [vmem:[#allocation326_spill] sm:$0xff] %v9114_v45  ;;  %v2217_v22 = vadd.f32 1.0, %v8879_v27  ;;  %v2218_v20 = vadd.f32 1.0, %v8884_v48  ;;  %v2219_v29 = vadd.f32 1.0, %v8889_v10  ;;  %v2220_v25 = vadd.f32 1.0, %v8894_v32 }
 0x309   : > { %13250 = vst [vmem:[#allocation329_spill] sm:$0xff] %v9117_v26  ;;  %13251 = vst [vmem:[#allocation232_spill] sm:$0xff] %v9120_v50  ;;  %v2221_v13 = vadd.f32 1.0, %v8899_v42  ;;  %v2222_v24 = vadd.f32 1.0, %v8904_v23  ;;  %v2223_v49 = vadd.f32 1.0, %v8909_v0  ;;  %v2224_v6 = vadd.f32 1.0, %v8914_v52 }
 0x30a   : > { %13252 = vst [vmem:[#allocation177_spill] sm:$0xff] %v9123_v57  ;;  %13253 = vst [vmem:[#allocation230_spill] sm:$0xff] %v9126_v9  ;;  %v13261_v9 = vld [vmem:[#allocation312_spill] sm:$0xff]  ;;  %v13262_v57 = vld [vmem:[#allocation311_spill] sm:$0xff] }
 0x30b   : > { %13254 = vst [vmem:[#allocation331_spill] sm:$0xff] %v9129_v21  ;;  %13255 = vst [vmem:[#allocation333_spill] sm:$0xff] %v9132_v58  ;;  %v13259_v58 = vld [vmem:[#allocation219_spill] sm:$0xff]  ;;  %v13260_v21 = vld [vmem:[#allocation169_spill] sm:$0xff]  ;;  %v2228_v48 = vadd.f32 1.0, %v13261_v9  ;;  %v2229_v10 = vadd.f32 1.0, %v13262_v57 }
 0x30c   : > { %13256 = vst [vmem:[#allocation178_spill] sm:$0xff] %v9135_v12  ;;  %13257 = vst [vmem:[#allocation336_spill] sm:$0xff] %v9138_v36  ;;  %v2215_v12 = vadd.f32 1.0, %v8869_v51  ;;  %v13258_v36 = vld [vmem:[#allocation215_spill] sm:$0xff]  ;;  %v2226_v54 = vadd.f32 1.0, %v13259_v58  ;;  %v2227_v27 = vadd.f32 1.0, %v13260_v21 }
 0x30d   : > { %v2225_v51 = vadd.f32 1.0, %v13258_v36  ;;  %v13263_v50 = vld [vmem:[#allocation221_spill] sm:$0xff]  ;;  %v13264_v26 = vld [vmem:[#allocation170_spill] sm:$0xff]  ;;  %v13265_v45 = vld [vmem:[#allocation315_spill] sm:$0xff] }
 0x30e   : > { %v2230_v32 = vadd.f32 1.0, %v13263_v50  ;;  %v2231_v42 = vadd.f32 1.0, %v13264_v26  ;;  %v2232_v23 = vadd.f32 1.0, %v13265_v45  ;;  %v13266_v34 = vld [vmem:[#allocation314_spill] sm:$0xff]  ;;  %v13267_v63 = vld [vmem:[#allocation223_spill] sm:$0xff]  ;;  %v13269_v2 = vld [vmem:[#allocation317_spill] sm:$0xff] }
 0x30f   : > { %v2233_v0 = vadd.f32 1.0, %v13266_v34  ;;  %v2234_v52 = vadd.f32 1.0, %v13267_v63  ;;  %v13268_v44 = vld [vmem:[#allocation171_spill] sm:$0xff]  ;;  %v2236_v58 = vadd.f32 1.0, %v13269_v2  ;;  %v13270_v40 = vld [vmem:[#allocation316_spill] sm:$0xff]  ;;  %v13271_v16 = vld [vmem:[#allocation322_spill] sm:$0xff] }
 0x310   : > { %v2235_v36 = vadd.f32 1.0, %v13268_v44  ;;  %v2237_v21 = vadd.f32 1.0, %v13270_v40  ;;  %v2238_v9 = vadd.f32 1.0, %v13271_v16  ;;  %v13272_v11 = vld [vmem:[#allocation172_spill] sm:$0xff]  ;;  %v13273_v5 = vld [vmem:[#allocation318_spill] sm:$0xff]  ;;  %v13275_v62 = vld [vmem:[#allocation225_spill] sm:$0xff] }
 0x311   : > { %v2239_v57 = vadd.f32 1.0, %v13272_v11  ;;  %v2240_v50 = vadd.f32 1.0, %v13273_v5  ;;  %v13274_v19 = vld [vmem:[#allocation222_spill] sm:$0xff]  ;;  %v2242_v45 = vadd.f32 1.0, %v13275_v62  ;;  %v13276_v53 = vld [vmem:[#allocation173_spill] sm:$0xff]  ;;  %v2244_v63 = vadd.f32 1.0, %v9014_v47 }
 0x312   : > { %v2241_v26 = vadd.f32 1.0, %v13274_v19  ;;  %v2243_v34 = vadd.f32 1.0, %v13276_v53  ;;  %v13277_v33 = vld [vmem:[#allocation320_spill] sm:$0xff]  ;;  %v2246_v2 = vadd.f32 1.0, %v9024_v39  ;;  %v2247_v40 = vadd.f32 1.0, %v9029_v31  ;;  %v13278_v56 = vld [vmem:[#allocation319_spill] sm:$0xff] }
 0x313   : > { %v2245_v44 = vadd.f32 1.0, %v13277_v33  ;;  %v2248_v16 = vadd.f32 1.0, %v13278_v56  ;;  %v2249_v11 = vadd.f32 1.0, %v9039_v43  ;;  %v9185_v5 = vmul.f32 %v9042_v60, %v13279_v28  ;;  %v13281_v19 = vld [vmem:[#allocation47_spill] sm:$0xff]  ;;  %v13283_v53 = vld [vmem:[#allocation248_spill] sm:$0xff]  ;;  %v13289_v43 = vld [vmem:[#allocation118_spill] sm:$0xff] }
 0x314   : > { %v9189_v62 = vmul.f32 %v9045_v38, %v13281_v19  ;;  %v9193_v47 = vmul.f32 %v9048_v61, %v13283_v53  ;;  %v13285_v33 = vld [vmem:[#allocation120_spill] sm:$0xff]  ;;  %v9205_v60 = vmul.f32 %v9057_v41, %v13289_v43  ;;  %v13291_v28 = vld [vmem:[#allocation249_spill] sm:$0xff]  ;;  %v13295_v53 = vld [vmem:[#allocation122_spill] sm:$0xff] }
 0x315   : > { %13280 = vst [vmem:[#allocation179_spill] sm:$0xff] %v9185_v5  ;;  %v9197_v39 = vmul.f32 %v9051_v18, %v13285_v33  ;;  %v13287_v31 = vld [vmem:[#allocation244_spill] sm:$0xff]  ;;  %v9209_v38 = vmul.f32 %v9060_v7, %v13291_v28  ;;  %v13293_v19 = vld [vmem:[#allocation121_spill] sm:$0xff]  ;;  %v9217_v18 = vmul.f32 %v9066_v1, %v13295_v53  ;;  %v13302_v43 = vld [vmem:[#allocation123_spill] sm:$0xff] }
 0x316   : > { %13282 = vst [vmem:[#allocation332_spill] sm:$0xff] %v9189_v62  ;;  %13284 = vst [vmem:[#allocation334_spill] sm:$0xff] %v9193_v47  ;;  %v9201_v56 = vmul.f32 %v9054_v14, %v13287_v31  ;;  %v9213_v61 = vmul.f32 %v9063_v17, %v13293_v19  ;;  %v13297_v33 = vld [vmem:[#allocation49_spill] sm:$0xff]  ;;  %v13299_v31 = vld [vmem:[#allocation255_spill] sm:$0xff] }
 0x317   : > { %13286 = vst [vmem:[#allocation41_spill] sm:$0xff] %v9197_v39  ;;  %13290 = vst [vmem:[#allocation335_spill] sm:$0xff] %v9205_v60  ;;  %v9221_v14 = vmul.f32 %v9069_v37, %v13297_v33  ;;  %v13303_v60 = vld [vmem:[#allocation174_spill] sm:$0xff]  ;;  %v13305_v28 = vld [vmem:[#allocation124_spill] sm:$0xff] }
 0x318   : > { %13288 = vst [vmem:[#allocation180_spill] sm:$0xff] %v9201_v56  ;;  %13292 = vst [vmem:[#allocation234_spill] sm:$0xff] %v9209_v38  ;;  %v13300_v56 = vld [vmem:[#allocation227_spill] sm:$0xff]  ;;  %v9229_v7 = vmul.f32 %v13303_v60, %v13302_v43  ;;  %v13306_v38 = vld [vmem:[#allocation321_spill] sm:$0xff] }
 0x319   : > { %13294 = vst [vmem:[#allocation238_spill] sm:$0xff] %v9213_v61  ;;  %13296 = vst [vmem:[#allocation181_spill] sm:$0xff] %v9217_v18  ;;  %v9225_v41 = vmul.f32 %v13300_v56, %v13299_v31  ;;  %v9233_v17 = vmul.f32 %v13306_v38, %v13305_v28  ;;  %v13308_v19 = vld [vmem:[#allocation38_spill] sm:$0xff]  ;;  %v13309_v61 = vld [vmem:[#allocation323_spill] sm:$0xff] }
 0x31a   : > { %13298 = vst [vmem:[#allocation337_spill] sm:$0xff] %v9221_v14  ;;  %13304 = vst [vmem:[#allocation240_spill] sm:$0xff] %v9229_v7  ;;  %v9237_v1 = vmul.f32 %v13309_v61, %v13308_v19  ;;  %v13311_v53 = vld [vmem:[#allocation125_spill] sm:$0xff]  ;;  %v13312_v18 = vld [vmem:[#allocation327_spill] sm:$0xff] }
 0x31b   : > { %13301 = vst [vmem:[#allocation236_spill] sm:$0xff] %v9225_v41  ;;  %13307 = vst [vmem:[#allocation45_spill] sm:$0xff] %v9233_v17  ;;  %v9241_v37 = vmul.f32 %v13312_v18, %v13311_v53  ;;  %v13314_v33 = vld [vmem:[#allocation35_spill] sm:$0xff]  ;;  %v13315_v14 = vld [vmem:[#allocation37_spill] sm:$0xff] }
 0x31c   : > { %13310 = vst [vmem:[#allocation39_spill] sm:$0xff] %v9237_v1  ;;  %v9245_v56 = vmul.f32 %v13315_v14, %v13314_v33  ;;  %v13317_v31 = vld [vmem:[#allocation202_spill] sm:$0xff]  ;;  %v13318_v41 = vld [vmem:[#allocation324_spill] sm:$0xff]  ;;  %v13320_v43 = vld [vmem:[#allocation43_spill] sm:$0xff] }
 0x31d   : > { %13313 = vst [vmem:[#allocation338_spill] sm:$0xff] %v9241_v37  ;;  %v9249_v60 = vmul.f32 %v13318_v41, %v13317_v31  ;;  %v13321_v7 = vld [vmem:[#allocation325_spill] sm:$0xff]  ;;  %v13323_v28 = vld [vmem:[#allocation126_spill] sm:$0xff]  ;;  %v13326_v19 = vld [vmem:[#allocation264_spill] sm:$0xff] }
 0x31e   : > { %13316 = vst [vmem:[#allocation241_spill] sm:$0xff] %v9245_v56  ;;  %v9253_v38 = vmul.f32 %v13321_v7, %v13320_v43  ;;  %v13324_v17 = vld [vmem:[#allocation330_spill] sm:$0xff]  ;;  %v2283_v1 = vmul.f32 %v2207_v55, %v13326_v19  ;;  %v13328_v37 = vld [vmem:[#allocation257_spill] sm:$0xff]  ;;  %v13330_v56 = vld [vmem:[#allocation267_spill] sm:$0xff] }
 0x31f   : > { %13319 = vst [vmem:[#allocation183_spill] sm:$0xff] %v9249_v60  ;;  %v9257_v61 = vmul.f32 %v13324_v17, %v13323_v28  ;;  %v13327_v18 = vld [vmem:[#allocation130_spill] sm:$0xff]  ;;  %v2285_v39 = vmul.f32 %v2209_v8, %v13328_v37  ;;  %v13329_v14 = vld [vmem:[#allocation213_spill] sm:$0xff]  ;;  %v2287_v47 = vmul.f32 %v2211_v30, %v13330_v56  ;;  %v13331_v41 = vld [vmem:[#allocation131_spill] sm:$0xff] }
 0x320   : > { %13322 = vst [vmem:[#allocation339_spill] sm:$0xff] %v9253_v38  ;;  %v2284_v53 = vmul.f32 %v2208_v4, %v13327_v18  ;;  %v2286_v33 = vmul.f32 %v2210_v15, %v13329_v14  ;;  %v2288_v31 = vmul.f32 %v2212_v3, %v13331_v41  ;;  %v13332_v60 = vld [vmem:[#allocation258_spill] sm:$0xff]  ;;  %v13333_v7 = vld [vmem:[#allocation216_spill] sm:$0xff]  ;;  %v13338_v18 = vld [vmem:[#allocation269_spill] sm:$0xff] }
 0x321   : > { %13325 = vst [vmem:[#allocation340_spill] sm:$0xff] %v9257_v61  ;;  %v2289_v62 = vmul.f32 %v2213_v46, %v13332_v60  ;;  %v2290_v43 = vmul.f32 %v2214_v35, %v13333_v7  ;;  %v13334_v38 = vld [vmem:[#allocation268_spill] sm:$0xff]  ;;  %v13336_v61 = vld [vmem:[#allocation133_spill] sm:$0xff]  ;;  %v2295_v8 = vmul.f32 %v2219_v29, %v13338_v18  ;;  %v13339_v37 = vld [vmem:[#allocation134_spill] sm:$0xff] }
 0x322   : > { %v2291_v5 = vmul.f32 %v2215_v12, %v13334_v38  ;;  %v13335_v17 = vld [vmem:[#allocation132_spill] sm:$0xff]  ;;  %v2293_v55 = vmul.f32 %v2217_v22, %v13336_v61  ;;  %v2296_v15 = vmul.f32 %v2220_v25, %v13339_v37  ;;  %v13341_v56 = vld [vmem:[#allocation270_spill] sm:$0xff]  ;;  %v13342_v41 = vld [vmem:[#allocation135_spill] sm:$0xff] }
 0x323   : > { %v2292_v28 = vmul.f32 %v2216_v59, %v13335_v17  ;;  %v13337_v19 = vld [vmem:[#allocation220_spill] sm:$0xff]  ;;  %v2298_v3 = vmul.f32 %v2222_v24, %v13341_v56  ;;  %v2299_v46 = vmul.f32 %v2223_v49, %v13342_v41  ;;  %v13343_v60 = vld [vmem:[#allocation265_spill] sm:$0xff]  ;;  %v13344_v7 = vld [vmem:[#allocation226_spill] sm:$0xff] }
 0x324   : > { %v2294_v4 = vmul.f32 %v2218_v20, %v13337_v19  ;;  %v13340_v14 = vld [vmem:[#allocation224_spill] sm:$0xff]  ;;  %v2300_v35 = vmul.f32 %v2224_v6, %v13343_v60  ;;  %v2301_v12 = vmul.f32 %v2225_v51, %v13344_v7  ;;  %v13345_v38 = vld [vmem:[#allocation271_spill] sm:$0xff]  ;;  %v13347_v20 = vld [vmem:[#allocation18_spill] sm:$0xff] }
 0x325   : > { %v2297_v30 = vmul.f32 %v2221_v13, %v13340_v14  ;;  %v2302_v59 = vmul.f32 %v2226_v54, %v13345_v38  ;;  %v13346_v17 = vld [vmem:[#allocation136_spill] sm:$0xff]  ;;  %v9283_v61 = vmul.f32 %v2228_v48, %v13347_v20  ;;  %v13348_v29 = vld [vmem:[#allocation229_spill] sm:$0xff]  ;;  %v13351_v6 = vld [vmem:[#allocation266_spill] sm:$0xff] }
 0x326   : > { %v9280_v22 = vmul.f32 %v2227_v27, %v13346_v17  ;;  %v9286_v25 = vmul.f32 %v2229_v10, %v13348_v29  ;;  %v13349_v13 = vld [vmem:[#allocation52_spill] sm:$0xff]  ;;  %v13350_v24 = vld [vmem:[#allocation137_spill] sm:$0xff]  ;;  %v9295_v18 = vmul.f32 %v2232_v23, %v13351_v6  ;;  %v13352_v51 = vld [vmem:[#allocation231_spill] sm:$0xff] }
 0x327   : > { %v9289_v19 = vmul.f32 %v2230_v32, %v13349_v13  ;;  %v9292_v49 = vmul.f32 %v2231_v42, %v13350_v24  ;;  %v9298_v54 = vmul.f32 %v2233_v0, %v13352_v51  ;;  %v13353_v27 = vld [vmem:[#allocation272_spill] sm:$0xff]  ;;  %v13354_v48 = vld [vmem:[#allocation138_spill] sm:$0xff]  ;;  %v13356_v32 = vld [vmem:[#allocation139_spill] sm:$0xff] }
 0x328   : > { %v9301_v37 = vmul.f32 %v2234_v52, %v13353_v27  ;;  %v9304_v14 = vmul.f32 %v2235_v36, %v13354_v48  ;;  %v13355_v10 = vld [vmem:[#allocation218_spill] sm:$0xff]  ;;  %v9310_v41 = vmul.f32 %v2237_v21, %v13356_v32  ;;  %v13357_v42 = vld [vmem:[#allocation235_spill] sm:$0xff]  ;;  %v13359_v0 = vld [vmem:[#allocation140_spill] sm:$0xff] }
 0x329   : > { %v9307_v56 = vmul.f32 %v2236_v58, %v13355_v10  ;;  %v9313_v60 = vmul.f32 %v2238_v9, %v13357_v42  ;;  %v13358_v23 = vld [vmem:[#allocation27_spill] sm:$0xff]  ;;  %v9319_v38 = vmul.f32 %v2240_v50, %v13359_v0  ;;  %v13361_v52 = vld [vmem:[#allocation42_spill] sm:$0xff]  ;;  %v13363_v36 = vld [vmem:[#allocation237_spill] sm:$0xff] }
 0x32a   : > { %v9316_v7 = vmul.f32 %v2239_v57, %v13358_v23  ;;  %v9322_v17 = vmul.f32 %v2241_v26, %v13361_v52  ;;  %v9325_v20 = vmul.f32 %v2242_v45, %v13363_v36  ;;  %v13365_v58 = vld [vmem:[#allocation28_spill] sm:$0xff]  ;;  %v13367_v21 = vld [vmem:[#allocation141_spill] sm:$0xff]  ;;  %v13369_v9 = vld [vmem:[#allocation23_spill] sm:$0xff] }
 0x32b   : > { %13360 = vst [vmem:[#allocation30_spill] sm:$0xff] %v9319_v38  ;;  %v9328_v29 = vmul.f32 %v2243_v34, %v13365_v58  ;;  %v9331_v13 = vmul.f32 %v2244_v63, %v13367_v21  ;;  %v9334_v24 = vmul.f32 %v2245_v44, %v13369_v9  ;;  %v13371_v57 = vld [vmem:[#allocation239_spill] sm:$0xff]  ;;  %v13373_v50 = vld [vmem:[#allocation40_spill] sm:$0xff]  ;;  %v13375_v26 = vld [vmem:[#allocation142_spill] sm:$0xff]  ;;  %v2478_v63 = vlaneseq }
 0x32c   : > { %13362 = vst [vmem:[#allocation184_spill] sm:$0xff] %v9322_v17  ;;  %13364 = vst [vmem:[#allocation31_spill] sm:$0xff] %v9325_v20  ;;  %v9337_v6 = vmul.f32 %v2246_v2, %v13371_v57  ;;  %v9340_v51 = vmul.f32 %v2247_v40, %v13373_v50  ;;  %v9343_v27 = vmul.f32 %v2248_v16, %v13375_v26  ;;  %v13377_v45 = vld [vmem:[#allocation24_spill] sm:$0xff]  ;;  %v13381_v32 = vld [vmem:[#allocation158_spill] sm:$0xff] }
 0x32d   : > { %13366 = vst [vmem:[#allocation185_spill] sm:$0xff] %v9328_v29  ;;  %13368 = vst [vmem:[#allocation186_spill] sm:$0xff] %v9331_v13  ;;  %v9346_v48 = vmul.f32 %v2249_v11, %v13377_v45  ;;  %v13379_v34 = vld [vmem:[#allocation20_spill] sm:$0xff]  ;;  %v9352_v42 = vadd.f32 %v2284_v53, %v13381_v32  ;;  %v13383_v44 = vld [vmem:[#allocation201_spill] sm:$0xff] }
 0x32e   : > { %13370 = vst [vmem:[#allocation188_spill] sm:$0xff] %v9334_v24  ;;  %13372 = vst [vmem:[#allocation243_spill] sm:$0xff] %v9337_v6  ;;  %v9349_v10 = vadd.f32 %v2283_v1, %v13379_v34  ;;  %v9355_v23 = vadd.f32 %v2285_v39, %v13383_v44  ;;  %v13385_v2 = vld [vmem:[#allocation290_spill] sm:$0xff]  ;;  %v13387_v40 = vld [vmem:[#allocation296_spill] sm:$0xff] }
 0x32f   : > { %13374 = vst [vmem:[#allocation341_spill] sm:$0xff] %v9340_v51  ;;  %13376 = vst [vmem:[#allocation342_spill] sm:$0xff] %v9343_v27  ;;  %v9358_v0 = vadd.f32 %v2286_v33, %v13385_v2  ;;  %v9361_v52 = vadd.f32 %v2287_v47, %v13387_v40  ;;  %v13389_v16 = vld [vmem:[#allocation159_spill] sm:$0xff]  ;;  %v13391_v11 = vld [vmem:[#allocation292_spill] sm:$0xff] }
 0x330   : > { %13378 = vst [vmem:[#allocation189_spill] sm:$0xff] %v9346_v48  ;;  %13380 = vst [vmem:[#allocation190_spill] sm:$0xff] %v9349_v10  ;;  %v9364_v36 = vadd.f32 %v2288_v31, %v13389_v16  ;;  %v9367_v58 = vadd.f32 %v2289_v62, %v13391_v11  ;;  %v13393_v1 = vld [vmem:[#allocation293_spill] sm:$0xff]  ;;  %v13395_v53 = vld [vmem:[#allocation207_spill] sm:$0xff] }
 0x331   : > { %13382 = vst [vmem:[#allocation51_spill] sm:$0xff] %v9352_v42  ;;  %13384 = vst [vmem:[#allocation192_spill] sm:$0xff] %v9355_v23  ;;  %v9370_v21 = vadd.f32 %v2290_v43, %v13393_v1  ;;  %v9373_v9 = vadd.f32 %v2291_v5, %v13395_v53  ;;  %v13397_v39 = vld [vmem:[#allocation160_spill] sm:$0xff]  ;;  %v13399_v33 = vld [vmem:[#allocation294_spill] sm:$0xff] }
 0x332   : > { %13386 = vst [vmem:[#allocation54_spill] sm:$0xff] %v9358_v0  ;;  %13388 = vst [vmem:[#allocation34_spill] sm:$0xff] %v9361_v52  ;;  %v9377_v57 = vadd.f32 %v2292_v28, %v13397_v39  ;;  %v9380_v50 = vadd.f32 %v2293_v55, %v13399_v33  ;;  %v13401_v47 = vld [vmem:[#allocation204_spill] sm:$0xff]  ;;  %v13405_v62 = vld [vmem:[#allocation161_spill] sm:$0xff]  ;;  %v9397_v28 = vshrl.u32 %v2478_v63, 7  ;;  %v9414_v63 = vstv %s2555_s26 }
 0x333   : > { %13390 = vst [vmem:[#allocation242_spill] sm:$0xff] %v9364_v36  ;;  %13392 = vst [vmem:[#allocation275_spill] sm:$0xff] %v9367_v58  ;;  %v9383_v26 = vadd.f32 %v2294_v4, %v13401_v47  ;;  %v13403_v31 = vld [vmem:[#allocation300_spill] sm:$0xff]  ;;  %v9389_v34 = vadd.f32 %v2296_v15, %v13405_v62  ;;  %v13407_v43 = vld [vmem:[#allocation295_spill] sm:$0xff] }
 0x334   : > { %13394 = vst [vmem:[#allocation143_spill] sm:$0xff] %v9370_v21  ;;  %13396 = vst [vmem:[#allocation25_spill] sm:$0xff] %v9373_v9  ;;  %v9386_v45 = vadd.f32 %v2295_v8, %v13403_v31  ;;  %v9392_v32 = vadd.f32 %v2297_v30, %v13407_v43  ;;  %v13409_v5 = vld [vmem:[#allocation297_spill] sm:$0xff]  ;;  %v13412_v2 = vld [vmem:[#allocation302_spill] sm:$0xff]  ;;  %v2512_v30 = vadd.s32 264, %v9397_v28  ;;  %v2513_v1 = vadd.s32 272, %v9397_v28 }
 0x335   : > { %13398 = vst [vmem:[#allocation245_spill] sm:$0xff] %v9377_v57  ;;  %13400 = vst [vmem:[#allocation44_spill] sm:$0xff] %v9380_v50  ;;  %v9395_v44 = vadd.f32 %v2298_v3, %v13409_v5  ;;  %v9400_v55 = vadd.f32 %v2299_v46, %v13412_v2  ;;  %v13414_v40 = vld [vmem:[#allocation162_spill] sm:$0xff]  ;;  %v2514_v3 = vadd.s32 280, %v9397_v28  ;;  %v2515_v46 = vadd.s32 288, %v9397_v28 }
 0x336   : > { %13402 = vst [vmem:[#allocation144_spill] sm:$0xff] %v9383_v26  ;;  %13404 = vst [vmem:[#allocation26_spill] sm:$0xff] %v9386_v45  ;;  %v9403_v4 = vadd.f32 %v2300_v35, %v13414_v40  ;;  %v13416_v16 = vld [vmem:[#allocation206_spill] sm:$0xff]  ;;  %v2516_v53 = vadd.s32 296, %v9397_v28  ;;  %v2517_v35 = vadd.s32 304, %v9397_v28  ;;  %v2519_v39 = vadd.s32 320, %v9397_v28 }
 0x337   : > { %13406 = vst [vmem:[#allocation277_spill] sm:$0xff] %v9389_v34  ;;  %13408 = vst [vmem:[#allocation145_spill] sm:$0xff] %v9392_v32  ;;  %v9406_v8 = vadd.f32 %v2301_v12, %v13416_v16  ;;  %v13418_v11 = vld [vmem:[#allocation298_spill] sm:$0xff]  ;;  %v2518_v12 = vadd.s32 312, %v9397_v28  ;;  %v2521_v33 = vadd.s32 336, %v9397_v28  ;;  %v2522_v47 = vadd.s32 344, %v9397_v28 }
 0x338   : > { %13410 = vst [vmem:[#allocation280_spill] sm:$0xff] %v9395_v44  ;;  %13411 = vst [vmem:[#allocation146_spill] sm:$0xff] %v9397_v28  ;;  %v9409_v15 = vadd.f32 %v2302_v59, %v13418_v11  ;;  %v2520_v59 = vadd.s32 328, %v9397_v28  ;;  %v2523_v31 = vadd.s32 352, %v9397_v28  ;;  %v2524_v62 = vadd.s32 360, %v9397_v28 }
 0x339   : > { %13413 = vst [vmem:[#allocation281_spill] sm:$0xff] %v9400_v55  ;;  %13415 = vst [vmem:[#allocation147_spill] sm:$0xff] %v9403_v4  ;;  %v2525_v43 = vadd.s32 368, %v9397_v28  ;;  %v2526_v5 = vadd.s32 376, %v9397_v28  ;;  %v2527_v2 = vadd.s32 384, %v9397_v28  ;;  %v2528_v40 = vadd.s32 392, %v9397_v28 }
 0x33a   : > { %13417 = vst [vmem:[#allocation36_spill] sm:$0xff] %v9406_v8  ;;  %13419 = vst [vmem:[#allocation282_spill] sm:$0xff] %v9409_v15  ;;  %v2529_v16 = vadd.s32 400, %v9397_v28  ;;  %v2530_v11 = vadd.s32 408, %v9397_v28  ;;  %v2531_v15 = vadd.s32 416, %v9397_v28  ;;  %v2532_v8 = vadd.s32 424, %v9397_v28 }
 0x33b   : > { %13420 = vst [vmem:[#allocation148_spill] sm:$0xff] %v9414_v63  ;;  %v2533_v4 = vadd.s32 432, %v9397_v28  ;;  %v2534_v55 = vadd.s32 440, %v9397_v28  ;;  %v2535_v44 = vadd.s32 448, %v9397_v28  ;;  %v2536_v32 = vadd.s32 456, %v9397_v28 }
 0x33c   : > { %v2537_v34 = vadd.s32 464, %v9397_v28  ;;  %v2538_v45 = vadd.s32 472, %v9397_v28  ;;  %v2539_v26 = vadd.s32 480, %v9397_v28  ;;  %v2540_v50 = vadd.s32 488, %v9397_v28 }
 0x33d   : > { %v2541_v57 = vadd.s32 496, %v9397_v28  ;;  %v2542_v9 = vadd.s32 504, %v9397_v28  ;;  %v2543_v21 = vadd.s32 512, %v9397_v28  ;;  %v2544_v58 = vadd.s32 520, %v9397_v28 }
 0x33e   : > { %v2545_v36 = vadd.s32 528, %v9397_v28  ;;  %v2546_v52 = vadd.s32 536, %v9397_v28  ;;  %v2547_v0 = vadd.s32 544, %v9397_v28  ;;  %v2548_v23 = vadd.s32 552, %v9397_v28 }
 0x33f   : > { %v2549_v42 = vadd.s32 560, %v9397_v28  ;;  %v2550_v10 = vadd.s32 568, %v9397_v28  ;;  %v2551_v48 = vadd.s32 576, %v9397_v28  ;;  %v2552_v27 = vadd.s32 584, %v9397_v28 }
 0x340   : > { %v2553_v51 = vadd.s32 592, %v9397_v28  ;;  %v2554_v6 = vadd.s32 600, %v9397_v28  ;;  %v9457_v24 = vadd.s32 %v9414_v63, %v2512_v30  ;;  %v9460_v13 = vadd.s32 %v9414_v63, %v2513_v1 }
 0x341   : > { %v9463_v29 = vadd.s32 %v9414_v63, %v2514_v3  ;;  %v9466_v20 = vadd.s32 %v9414_v63, %v2515_v46  ;;  %v9469_v17 = vadd.s32 %v9414_v63, %v2516_v53  ;;  %v9472_v38 = vadd.s32 %v9414_v63, %v2517_v35 }
 0x342   : > { %v9475_v28 = vadd.s32 %v9414_v63, %v2518_v12  ;;  %v9478_v30 = vadd.s32 %v9414_v63, %v2519_v39  ;;  %v9481_v1 = vadd.s32 %v9414_v63, %v2520_v59  ;;  %v9484_v3 = vadd.s32 %v9414_v63, %v2521_v33 }
 0x343   : > { %v9487_v46 = vadd.s32 %v9414_v63, %v2522_v47  ;;  %v9490_v53 = vadd.s32 %v9414_v63, %v2523_v31  ;;  %v9493_v35 = vadd.s32 %v9414_v63, %v2524_v62  ;;  %v9496_v12 = vadd.s32 %v9414_v63, %v2525_v43 }
 0x344   : > { %13421 = vst [vmem:[#allocation253_spill] sm:$0xff] %v9475_v28  ;;  %13422 = vst [vmem:[#allocation283_spill] sm:$0xff] %v9478_v30  ;;  %v9499_v39 = vadd.s32 %v9414_v63, %v2526_v5  ;;  %v9502_v59 = vadd.s32 %v9414_v63, %v2527_v2  ;;  %v9505_v33 = vadd.s32 %v9414_v63, %v2528_v40  ;;  %vm2666_vm6 = vcmp.lt.s32.totalorder %v9457_v24, 625  ;;  %v13893_v24 = vld [vmem:[#allocation110_spill] sm:$0xff] }
 0x345   : > { %13423 = vst [vmem:[#allocation149_spill] sm:$0xff] %v9481_v1  ;;  %13424 = vst [vmem:[#allocation274_spill] sm:$0xff] %v9484_v3  ;;  %v9508_v47 = vadd.s32 %v9414_v63, %v2529_v16  ;;  %v9511_v31 = vadd.s32 %v9414_v63, %v2530_v11  ;;  %v9514_v62 = vadd.s32 %v9414_v63, %v2531_v15  ;;  %vm11405_vm12 = vcmp.lt.s32.totalorder %v9460_v13, 625 }
 0x346   : > { %13425 = vst [vmem:[#allocation53_spill] sm:$0xff] %v9487_v46  ;;  %13426 = vst [vmem:[#allocation55_spill] sm:$0xff] %v9490_v53  ;;  %v9517_v43 = vadd.s32 %v9414_v63, %v2532_v8  ;;  %v9520_v5 = vadd.s32 %v9414_v63, %v2533_v4  ;;  %v9523_v2 = vadd.s32 %v9414_v63, %v2534_v55  ;;  %vm11406_vm5 = vcmp.lt.s32.totalorder %v9463_v29, 625 }
 0x347   : > { %13427 = vst [vmem:[#allocation56_spill] sm:$0xff] %v9493_v35  ;;  %13428 = vst [vmem:[#allocation57_spill] sm:$0xff] %v9496_v12  ;;  %v9526_v40 = vadd.s32 %v9414_v63, %v2535_v44  ;;  %v9529_v16 = vadd.s32 %v9414_v63, %v2536_v32  ;;  %v9532_v11 = vadd.s32 %v9414_v63, %v2537_v34  ;;  %vm11407_vm10 = vcmp.lt.s32.totalorder %v9466_v20, 625 }
 0x348   : > { %13429 = vst [vmem:[#allocation58_spill] sm:$0xff] %v9499_v39  ;;  %13430 = vst [vmem:[#allocation59_spill] sm:$0xff] %v9502_v59  ;;  %v9535_v15 = vadd.s32 %v9414_v63, %v2538_v45  ;;  %v9538_v8 = vadd.s32 %v9414_v63, %v2539_v26  ;;  %v9541_v4 = vadd.s32 %v9414_v63, %v2540_v50  ;;  %vm11408_vm2 = vcmp.lt.s32.totalorder %v9469_v17, 625 }
 0x349   : > { %13431 = vst [vmem:[#allocation60_spill] sm:$0xff] %v9505_v33  ;;  %13432 = vst [vmem:[#allocation61_spill] sm:$0xff] %v9508_v47  ;;  %v9544_v55 = vadd.s32 %v9414_v63, %v2541_v57  ;;  %v9547_v44 = vadd.s32 %v9414_v63, %v2542_v9  ;;  %v9550_v32 = vadd.s32 %v9414_v63, %v2543_v21  ;;  %vm11409_vm7 = vcmp.lt.s32.totalorder %v9472_v38, 625 }
 0x34a   : > { %13433 = vst [vmem:[#allocation62_spill] sm:$0xff] %v9511_v31  ;;  %13434 = vst [vmem:[#allocation63_spill] sm:$0xff] %v9514_v62  ;;  %v9553_v34 = vadd.s32 %v9414_v63, %v2544_v58  ;;  %v9556_v45 = vadd.s32 %v9414_v63, %v2545_v36  ;;  %v9559_v26 = vadd.s32 %v9414_v63, %v2546_v52  ;;  %v13455_v36 = vld [vmem:[#allocation304_spill] sm:$0xff] }
 0x34b   : > { %13435 = vst [vmem:[#allocation64_spill] sm:$0xff] %v9517_v43  ;;  %13436 = vst [vmem:[#allocation65_spill] sm:$0xff] %v9520_v5  ;;  %v9562_v50 = vadd.s32 %v9414_v63, %v2547_v0  ;;  %v9565_v57 = vadd.s32 %v9414_v63, %v2548_v23  ;;  %v9568_v9 = vadd.s32 %v9414_v63, %v2549_v42  ;;  %v13459_v42 = vld [vmem:[#allocation163_spill] sm:$0xff] }
 0x34c   : > { %13437 = vst [vmem:[#allocation66_spill] sm:$0xff] %v9523_v2  ;;  %13438 = vst [vmem:[#allocation67_spill] sm:$0xff] %v9526_v40  ;;  %v9571_v21 = vadd.s32 %v9414_v63, %v2550_v10  ;;  %v9574_v58 = vadd.s32 %v9414_v63, %v2551_v48  ;;  %v9579_v52 = vadd.s32 %v9414_v63, %v2552_v27  ;;  %v13460_v10 = vld [vmem:[#allocation299_spill] sm:$0xff]  ;;  %v13461_v48 = vld [vmem:[#allocation301_spill] sm:$0xff] }
 0x34d   : > { %13439 = vst [vmem:[#allocation68_spill] sm:$0xff] %v9529_v16  ;;  %13440 = vst [vmem:[#allocation69_spill] sm:$0xff] %v9532_v11  ;;  %v9582_v0 = vadd.s32 %v9414_v63, %v2553_v51  ;;  %v9585_v23 = vadd.s32 %v9414_v63, %v2554_v6  ;;  %v13463_v27 = vld [vmem:[#allocation164_spill] sm:$0xff]  ;;  %v13465_v6 = vld [vmem:[#allocation303_spill] sm:$0xff] }
 0x34e   : > { %13441 = vst [vmem:[#allocation70_spill] sm:$0xff] %v9535_v15  ;;  %13442 = vst [vmem:[#allocation71_spill] sm:$0xff] %v9538_v8  ;;  %v13464_v51 = vld [vmem:[#allocation208_spill] sm:$0xff]  ;;  %v2386_v63 = vadd.f32 %v9301_v37, %v13465_v6  ;;  %v13489_v8 = vld [vmem:[#allocation310_spill] sm:$0xff] }
 0x34f   : > { %13443 = vst [vmem:[#allocation72_spill] sm:$0xff] %v9541_v4  ;;  %13444 = vst [vmem:[#allocation73_spill] sm:$0xff] %v9544_v55  ;;  %v13474_v37 = vld [vmem:[#allocation184_spill] sm:$0xff]  ;;  %v13485_v55 = vld [vmem:[#allocation313_spill] sm:$0xff] }
 0x350   : > { %13445 = vst [vmem:[#allocation74_spill] sm:$0xff] %v9547_v44  ;;  %13446 = vst [vmem:[#allocation75_spill] sm:$0xff] %v9550_v32  ;;  %v13481_v32 = vld [vmem:[#allocation308_spill] sm:$0xff]  ;;  %v13483_v44 = vld [vmem:[#allocation214_spill] sm:$0xff] }
 0x351   : > { %13447 = vst [vmem:[#allocation76_spill] sm:$0xff] %v9553_v34  ;;  %13448 = vst [vmem:[#allocation77_spill] sm:$0xff] %v9556_v45  ;;  %v2379_v45 = vadd.f32 %v9280_v22, %v13455_v36  ;;  %v2384_v36 = vadd.f32 %v9295_v18, %v13463_v27  ;;  %v13471_v27 = vld [vmem:[#allocation166_spill] sm:$0xff]  ;;  %v13479_v34 = vld [vmem:[#allocation167_spill] sm:$0xff] }
 0x352   : > { %13449 = vst [vmem:[#allocation78_spill] sm:$0xff] %v9559_v26  ;;  %13450 = vst [vmem:[#allocation79_spill] sm:$0xff] %v9562_v50  ;;  %v13475_v50 = vld [vmem:[#allocation306_spill] sm:$0xff]  ;;  %v13477_v26 = vld [vmem:[#allocation217_spill] sm:$0xff] }
 0x353   : > { %13451 = vst [vmem:[#allocation80_spill] sm:$0xff] %v9565_v57  ;;  %13452 = vst [vmem:[#allocation81_spill] sm:$0xff] %v9568_v9  ;;  %v2380_v9 = vadd.f32 %v9283_v61, %v13459_v42  ;;  %v13462_v57 = vld [vmem:[#allocation212_spill] sm:$0xff]  ;;  %v13467_v42 = vld [vmem:[#allocation165_spill] sm:$0xff] }
 0x354   : > { %13453 = vst [vmem:[#allocation82_spill] sm:$0xff] %v9571_v21  ;;  %13454 = vst [vmem:[#allocation83_spill] sm:$0xff] %v9574_v58  ;;  %v2381_v21 = vadd.f32 %v9286_v25, %v13460_v10  ;;  %v2382_v58 = vadd.f32 %v9289_v19, %v13461_v48  ;;  %v2383_v22 = vadd.f32 %v9292_v49, %v13462_v57  ;;  %v13468_v10 = vld [vmem:[#allocation305_spill] sm:$0xff]  ;;  %v13469_v48 = vld [vmem:[#allocation210_spill] sm:$0xff] }
 0x355   : > { %13456 = vst [vmem:[#allocation84_spill] sm:$0xff] %v9579_v52  ;;  %13457 = vst [vmem:[#allocation85_spill] sm:$0xff] %v9582_v0  ;;  %v2385_v0 = vadd.f32 %v9298_v54, %v13464_v51  ;;  %v2388_v25 = vadd.f32 %v9307_v56, %v13467_v42  ;;  %v2389_v19 = vadd.f32 %v9310_v41, %v13468_v10  ;;  %v13470_v57 = vld [vmem:[#allocation309_spill] sm:$0xff]  ;;  %v13472_v54 = vld [vmem:[#allocation30_spill] sm:$0xff] }
 0x356   : > { %13458 = vst [vmem:[#allocation86_spill] sm:$0xff] %v9585_v23  ;;  %v13466_v23 = vld [vmem:[#allocation21_spill] sm:$0xff]  ;;  %v2390_v49 = vadd.f32 %v9313_v60, %v13469_v48  ;;  %v2391_v18 = vadd.f32 %v9316_v7, %v13470_v57  ;;  %v2392_v51 = vadd.f32 %v13472_v54, %v13471_v27  ;;  %v13473_v52 = vld [vmem:[#allocation307_spill] sm:$0xff]  ;;  %v13480_v41 = vld [vmem:[#allocation186_spill] sm:$0xff] }
 0x357   : > { %v2387_v61 = vadd.f32 %v9304_v14, %v13466_v23  ;;  %v2393_v6 = vadd.f32 %v13474_v37, %v13473_v52  ;;  %v13476_v14 = vld [vmem:[#allocation31_spill] sm:$0xff]  ;;  %v13478_v56 = vld [vmem:[#allocation185_spill] sm:$0xff]  ;;  %v2396_v10 = vadd.f32 %v13480_v41, %v13479_v34  ;;  %v13482_v60 = vld [vmem:[#allocation188_spill] sm:$0xff] }
 0x358   : > { %v2394_v23 = vadd.f32 %v13476_v14, %v13475_v50  ;;  %v2395_v42 = vadd.f32 %v13478_v56, %v13477_v26  ;;  %v2397_v48 = vadd.f32 %v13482_v60, %v13481_v32  ;;  %v13484_v7 = vld [vmem:[#allocation243_spill] sm:$0xff]  ;;  %v13486_v27 = vld [vmem:[#allocation341_spill] sm:$0xff]  ;;  %v13487_v4 = vld [vmem:[#allocation168_spill] sm:$0xff] }
 0x359   : > { %v2398_v57 = vadd.f32 %v13484_v7, %v13483_v44  ;;  %v2399_v54 = vadd.f32 %v13486_v27, %v13485_v55  ;;  %v13488_v52 = vld [vmem:[#allocation342_spill] sm:$0xff]  ;;  %v13490_v50 = vld [vmem:[#allocation189_spill] sm:$0xff]  ;;  %v13492_v26 = vld [vmem:[#allocation108_spill] sm:$0xff] }
 0x35a   : > { %v2400_v37 = vadd.f32 %v13488_v52, %v13487_v4  ;;  %v2401_v14 = vadd.f32 %v13490_v50, %v13489_v8  ;;  %v13491_v15 = vld [vmem:[#allocation190_spill] sm:$0xff]  ;;  %v13493_v56 = vunpack.c.h.bf16 %v13492_v26  ;;  %v13495_v34 = vld [vmem:[#allocation51_spill] sm:$0xff]  ;;  %v13496_v41 = vld [vmem:[#allocation109_spill] sm:$0xff] }
 0x35b   : > { %v13497_v32 = vunpack.c.l.bf16 %v13496_v41  ;;  %v13499_v44 = vld [vmem:[#allocation192_spill] sm:$0xff]  ;;  %v13500_v7 = vunpack.c.h.bf16 %v13496_v41  ;;  %v13502_v27 = vld [vmem:[#allocation54_spill] sm:$0xff]  ;;  %v13510_v26 = vld [vmem:[#allocation111_spill] sm:$0xff] }
 0x35c   : > { %v9634_v11 = vmul.f32 %v13493_v56, %v13491_v15  ;;  %v13503_v4 = vld [vmem:[#allocation110_spill] sm:$0xff]  ;;  %v13514_v41 = vunpack.c.h.bf16 %v13510_v26 }
 0x35d   : > { %v9639_v60 = vmul.f32 %v13497_v32, %v13495_v34  ;;  %v9644_v55 = vmul.f32 %v13500_v7, %v13499_v44  ;;  %v13504_v52 = vunpack.c.l.bf16 %v13503_v4  ;;  %v13506_v8 = vld [vmem:[#allocation34_spill] sm:$0xff]  ;;  %v13507_v50 = vunpack.c.h.bf16 %v13503_v4  ;;  %v13513_v32 = vld [vmem:[#allocation275_spill] sm:$0xff] }
 0x35e   : > { %13494 = vst [vmem:[#allocation87_spill] sm:$0xff] %v9634_v11  ;;  %v13509_v56 = vld [vmem:[#allocation242_spill] sm:$0xff]  ;;  %v13511_v11 = vunpack.c.l.bf16 %v13510_v26  ;;  %v9664_v44 = vmul.f32 %v13514_v41, %v13513_v32  ;;  %v13516_v7 = vld [vmem:[#allocation143_spill] sm:$0xff]  ;;  %v13530_v32 = vld [vmem:[#allocation144_spill] sm:$0xff] }
 0x35f   : > { %13498 = vst [vmem:[#allocation88_spill] sm:$0xff] %v9639_v60  ;;  %13501 = vst [vmem:[#allocation89_spill] sm:$0xff] %v9644_v55  ;;  %v9649_v16 = vmul.f32 %v13504_v52, %v13502_v27  ;;  %v9654_v15 = vmul.f32 %v13507_v50, %v13506_v8  ;;  %v13517_v55 = vld [vmem:[#allocation112_spill] sm:$0xff]  ;;  %v13520_v52 = vld [vmem:[#allocation25_spill] sm:$0xff] }
 0x360   : > { %v9659_v34 = vmul.f32 %v13511_v11, %v13509_v56  ;;  %13515 = vst [vmem:[#allocation219_spill] sm:$0xff] %v9664_v44  ;;  %v13518_v60 = vunpack.c.l.bf16 %v13517_v55  ;;  %v13521_v4 = vunpack.c.h.bf16 %v13517_v55  ;;  %v13523_v50 = vld [vmem:[#allocation245_spill] sm:$0xff]  ;;  %v13527_v56 = vld [vmem:[#allocation44_spill] sm:$0xff]  ;;  %v13531_v44 = vld [vmem:[#allocation114_spill] sm:$0xff] }
 0x361   : > { %13505 = vst [vmem:[#allocation90_spill] sm:$0xff] %v9649_v16  ;;  %13508 = vst [vmem:[#allocation91_spill] sm:$0xff] %v9654_v15  ;;  %v13524_v15 = vld [vmem:[#allocation113_spill] sm:$0xff]  ;;  %v13535_v55 = vunpack.c.h.bf16 %v13531_v44 }
 0x362   : > { %13512 = vst [vmem:[#allocation215_spill] sm:$0xff] %v9659_v34  ;;  %v9669_v27 = vmul.f32 %v13518_v60, %v13516_v7  ;;  %v9674_v8 = vmul.f32 %v13521_v4, %v13520_v52  ;;  %v13525_v16 = vunpack.c.l.bf16 %v13524_v15  ;;  %v13528_v26 = vunpack.c.h.bf16 %v13524_v15  ;;  %v13534_v7 = vld [vmem:[#allocation26_spill] sm:$0xff]  ;;  %v13537_v52 = vld [vmem:[#allocation277_spill] sm:$0xff] }
 0x363   : > { %v13532_v34 = vunpack.c.l.bf16 %v13531_v44  ;;  %v9694_v4 = vmul.f32 %v13535_v55, %v13534_v7  ;;  %v13550_v7 = vld [vmem:[#allocation147_spill] sm:$0xff] }
 0x364   : > { %13519 = vst [vmem:[#allocation169_spill] sm:$0xff] %v9669_v27  ;;  %13522 = vst [vmem:[#allocation312_spill] sm:$0xff] %v9674_v8  ;;  %v9679_v11 = vmul.f32 %v13525_v16, %v13523_v50  ;;  %v9684_v41 = vmul.f32 %v13528_v26, %v13527_v56  ;;  %v13538_v8 = vld [vmem:[#allocation115_spill] sm:$0xff]  ;;  %v13541_v50 = vld [vmem:[#allocation145_spill] sm:$0xff] }
 0x365   : > { %v9689_v60 = vmul.f32 %v13532_v34, %v13530_v32  ;;  %13536 = vst [vmem:[#allocation315_spill] sm:$0xff] %v9694_v4  ;;  %v13539_v27 = vunpack.c.l.bf16 %v13538_v8  ;;  %v13542_v15 = vunpack.c.h.bf16 %v13538_v8  ;;  %v13544_v56 = vld [vmem:[#allocation280_spill] sm:$0xff]  ;;  %v13547_v32 = vld [vmem:[#allocation281_spill] sm:$0xff] }
 0x366   : > { %13526 = vst [vmem:[#allocation311_spill] sm:$0xff] %v9679_v11  ;;  %13529 = vst [vmem:[#allocation221_spill] sm:$0xff] %v9684_v41  ;;  %v13545_v41 = vld [vmem:[#allocation116_spill] sm:$0xff]  ;;  %v13551_v4 = vld [vmem:[#allocation117_spill] sm:$0xff] }
 0x367   : > { %13533 = vst [vmem:[#allocation170_spill] sm:$0xff] %v9689_v60  ;;  %v9699_v16 = vmul.f32 %v13539_v27, %v13537_v52  ;;  %v9704_v26 = vmul.f32 %v13542_v15, %v13541_v50  ;;  %v13546_v11 = vunpack.c.l.bf16 %v13545_v41  ;;  %v13548_v44 = vunpack.c.h.bf16 %v13545_v41  ;;  %v13553_v52 = vld [vmem:[#allocation36_spill] sm:$0xff]  ;;  %v13556_v50 = vld [vmem:[#allocation282_spill] sm:$0xff] }
 0x368   : > { %v13552_v60 = vunpack.c.l.bf16 %v13551_v4  ;;  %v13554_v8 = vunpack.c.h.bf16 %v13551_v4  ;;  %v13563_v4 = vld [vmem:[#allocation191_spill] sm:$0xff] }
 0x369   : > { %13540 = vst [vmem:[#allocation314_spill] sm:$0xff] %v9699_v16  ;;  %13543 = vst [vmem:[#allocation223_spill] sm:$0xff] %v9704_v26  ;;  %v9709_v34 = vmul.f32 %v13546_v11, %v13544_v56  ;;  %v9714_v55 = vmul.f32 %v13548_v44, %v13547_v32  ;;  %v13557_v26 = vld [vmem:[#allocation182_spill] sm:$0xff]  ;;  %v13560_v44 = vld [vmem:[#allocation187_spill] sm:$0xff] }
 0x36a   : > { %v9719_v27 = vmul.f32 %v13552_v60, %v13550_v7  ;;  %v9724_v15 = vmul.f32 %v13554_v8, %v13553_v52  ;;  %v13558_v16 = vunpack.c.l.bf16 %v13557_v26  ;;  %v13559_v56 = vunpack.c.h.bf16 %v13557_v26 }
 0x36b   : > { %13549 = vst [vmem:[#allocation171_spill] sm:$0xff] %v9714_v55  ;;  %v13561_v32 = vunpack.c.l.bf16 %v13560_v44  ;;  %v13562_v60 = vunpack.c.h.bf16 %v13560_v44  ;;  %v13564_v8 = vunpack.c.l.bf16 %v13563_v4 }
 0x36c   : > { %13555 = vst [vmem:[#allocation317_spill] sm:$0xff] %v9724_v15  ;;  %v9729_v11 = vmul.f32 %v13558_v16, %v13556_v50  ;;  %v9733_v41 = vmul.f32 %v13559_v56, %v2379_v45  ;;  %v13565_v15 = vunpack.c.h.bf16 %v13563_v4  ;;  %v13566_v50 = vld [vmem:[#allocation193_spill] sm:$0xff] }
 0x36d   : > { %v9737_v55 = vmul.f32 %v13561_v32, %v2380_v9  ;;  %v9741_v7 = vmul.f32 %v13562_v60, %v2381_v21  ;;  %v9745_v52 = vmul.f32 %v13564_v8, %v2382_v58  ;;  %v13567_v26 = vunpack.c.l.bf16 %v13566_v50  ;;  %v13569_v32 = vld [vmem:[#allocation194_spill] sm:$0xff]  ;;  %v13572_v8 = vld [vmem:[#allocation195_spill] sm:$0xff] }
 0x36e   : > { %v9749_v16 = vmul.f32 %v13565_v15, %v2383_v22  ;;  %v13568_v56 = vunpack.c.h.bf16 %v13566_v50  ;;  %v13570_v44 = vunpack.c.l.bf16 %v13569_v32  ;;  %v13571_v60 = vunpack.c.h.bf16 %v13569_v32 }
 0x36f   : > { %v9753_v45 = vmul.f32 %v13567_v26, %v2384_v36  ;;  %v13573_v4 = vunpack.c.l.bf16 %v13572_v8  ;;  %v13574_v15 = vunpack.c.h.bf16 %v13572_v8  ;;  %v13575_v26 = vld [vmem:[#allocation196_spill] sm:$0xff] }
 0x370   : > { %v9757_v9 = vmul.f32 %v13568_v56, %v2385_v0  ;;  %v9761_v21 = vmul.f32 %v13570_v44, %v2386_v63  ;;  %v9765_v58 = vmul.f32 %v13571_v60, %v2387_v61  ;;  %v13576_v50 = vunpack.c.l.bf16 %v13575_v26  ;;  %v13578_v44 = vld [vmem:[#allocation197_spill] sm:$0xff] }
 0x371   : > { %v9769_v22 = vmul.f32 %v13573_v4, %v2388_v25  ;;  %v9773_v36 = vmul.f32 %v13574_v15, %v2389_v19  ;;  %v13577_v56 = vunpack.c.h.bf16 %v13575_v26  ;;  %v13579_v32 = vunpack.c.l.bf16 %v13578_v44  ;;  %v13581_v4 = vld [vmem:[#allocation198_spill] sm:$0xff] }
 0x372   : > { %v9777_v0 = vmul.f32 %v13576_v50, %v2390_v49  ;;  %v13580_v60 = vunpack.c.h.bf16 %v13578_v44  ;;  %v13582_v8 = vunpack.c.l.bf16 %v13581_v4  ;;  %v13583_v15 = vunpack.c.h.bf16 %v13581_v4  ;;  %v13585_v50 = vld [vmem:[#allocation199_spill] sm:$0xff] }
 0x373   : > { %v9781_v63 = vmul.f32 %v13577_v56, %v2391_v18  ;;  %v9785_v61 = vmul.f32 %v13579_v32, %v2392_v51  ;;  %v13586_v26 = vunpack.c.l.bf16 %v13585_v50  ;;  %v13588_v56 = vunpack.c.h.bf16 %v13585_v50  ;;  %v13590_v32 = vld [vmem:[#allocation200_spill] sm:$0xff]  ;;  %v13613_v50 = vld [vmem:[#allocation81_spill] sm:$0xff] }
 0x374   : > { %v9789_v25 = vmul.f32 %v13580_v60, %v2393_v6  ;;  %v9793_v19 = vmul.f32 %v13582_v8, %v2394_v23  ;;  %v9797_v49 = vmul.f32 %v13583_v15, %v2395_v42  ;;  %v13591_v44 = vunpack.c.l.bf16 %v13590_v32  ;;  %v13595_v8 = vld [vmem:[#allocation29_spill] sm:$0xff] }
 0x375   : > { %v9801_v18 = vmul.f32 %v13586_v26, %v2396_v10  ;;  %v9805_v51 = vmul.f32 %v13588_v56, %v2397_v48  ;;  %v13593_v60 = vunpack.c.h.bf16 %v13590_v32  ;;  %v13596_v4 = vunpack.c.l.bf16 %v13595_v8  ;;  %v13600_v48 = vld [vmem:[#allocation68_spill] sm:$0xff]  ;;  %v13605_v26 = vld [vmem:[#allocation73_spill] sm:$0xff] }
 0x376   : > { %13584 = vst [vmem:[#allocation316_spill] sm:$0xff] %v9797_v49  ;;  %v9809_v6 = vmul.f32 %v13591_v44, %v2398_v57  ;;  %v13598_v15 = vunpack.c.h.bf16 %v13595_v8  ;;  %v13601_v57 = vld [vmem:[#allocation69_spill] sm:$0xff]  ;;  %v13606_v44 = vld [vmem:[#allocation74_spill] sm:$0xff]  ;;  %v13608_v56 = vld [vmem:[#allocation76_spill] sm:$0xff]  ;;  %vm2703_vm11 = vcmp.lt.s32.totalorder %v13613_v50, 625 }
 0x377   : > { %13587 = vst [vmem:[#allocation322_spill] sm:$0xff] %v9801_v18  ;;  %13589 = vst [vmem:[#allocation172_spill] sm:$0xff] %v9805_v51  ;;  %v9813_v23 = vmul.f32 %v13593_v60, %v2399_v54  ;;  %v9817_v42 = vmul.f32 %v13596_v4, %v2400_v37  ;;  %v13602_v54 = vld [vmem:[#allocation70_spill] sm:$0xff]  ;;  %v13603_v37 = vld [vmem:[#allocation71_spill] sm:$0xff] }
 0x378   : > { %13592 = vst [vmem:[#allocation318_spill] sm:$0xff] %v9809_v6  ;;  %v9821_v10 = vmul.f32 %v13598_v15, %v2401_v14  ;;  %v13604_v14 = vld [vmem:[#allocation72_spill] sm:$0xff]  ;;  %v13607_v4 = vld [vmem:[#allocation75_spill] sm:$0xff]  ;;  %v13609_v60 = vld [vmem:[#allocation77_spill] sm:$0xff] }
 0x379   : > { %13594 = vst [vmem:[#allocation222_spill] sm:$0xff] %v9813_v23  ;;  %13597 = vst [vmem:[#allocation225_spill] sm:$0xff] %v9817_v42  ;;  %vm2699_vm4 = vcmp.lt.s32.totalorder %v13609_v60, 625  ;;  %v13610_v15 = vld [vmem:[#allocation78_spill] sm:$0xff]  ;;  %v13611_v8 = vld [vmem:[#allocation79_spill] sm:$0xff] }
 0x37a   : > { %13599 = vst [vmem:[#allocation173_spill] sm:$0xff] %v9821_v10  ;;  %vm2700_vm13 = vcmp.lt.s32.totalorder %v13610_v15, 625  ;;  %vm2701_vm0 = vcmp.lt.s32.totalorder %v13611_v8, 625  ;;  %v13612_v32 = vld [vmem:[#allocation80_spill] sm:$0xff]  ;;  %v13614_v10 = vld [vmem:[#allocation82_spill] sm:$0xff]  ;;  %v13615_v42 = vld [vmem:[#allocation83_spill] sm:$0xff] }
 0x37b   : > { %vm2702_vm3 = vcmp.lt.s32.totalorder %v13612_v32, 625  ;;  %vm2704_vm14 = vcmp.lt.s32.totalorder %v13614_v10, 625  ;;  %vm2705_vm15 = vcmp.lt.s32.totalorder %v13615_v42, 625  ;;  %v13616_v23 = vld [vmem:[#allocation84_spill] sm:$0xff]  ;;  %v13617_v6 = vld [vmem:[#allocation85_spill] sm:$0xff]  ;;  %v13618_v51 = vld [vmem:[#allocation86_spill] sm:$0xff] }
 0x37c   : > { %vm2706_vm8 = vcmp.lt.s32.totalorder %v13616_v23, 625  ;;  %vm2707_vm1 = vcmp.lt.s32.totalorder %v13617_v6, 625  ;;  %vm2708_vm9 = vcmp.lt.s32.totalorder %v13618_v51, 625  ;;  %v13619_v18 = vld [vmem:[#allocation87_spill] sm:$0xff]  ;;  %v13621_v8 = vld [vmem:[#allocation88_spill] sm:$0xff]  ;;  %v13623_v50 = vld [vmem:[#allocation89_spill] sm:$0xff] }
 0x37d   : > { %v9869_v49 = vsel %vm2666_vm6, %v13619_v18, 0.0  ;;  %v9874_v32 = vsel %vm11405_vm12, %v13621_v8, 0.0  ;;  %v9879_v42 = vsel %vm11406_vm5, %v13623_v50, 0.0  ;;  %v13625_v23 = vld [vmem:[#allocation90_spill] sm:$0xff]  ;;  %v13627_v51 = vld [vmem:[#allocation91_spill] sm:$0xff]  ;;  %vm13632_vm12 = vcmp.lt.s32.totalorder %v9475_v28, 625 }
 0x37e   : > { %13620 = vst [vmem:[#allocation320_spill] sm:$0xff] %v9869_v49  ;;  %13622 = vst [vmem:[#allocation319_spill] sm:$0xff] %v9874_v32  ;;  %v9884_v6 = vsel %vm11407_vm10, %v13625_v23, 0.0  ;;  %v9889_v18 = vsel %vm11408_vm2, %v13627_v51, 0.0  ;;  %v13629_v49 = vld [vmem:[#allocation215_spill] sm:$0xff]  ;;  %vm13635_vm5 = vcmp.lt.s32.totalorder %v9478_v30, 625 }
 0x37f   : > { %13624 = vst [vmem:[#allocation119_spill] sm:$0xff] %v9879_v42  ;;  %13626 = vst [vmem:[#allocation47_spill] sm:$0xff] %v9884_v6  ;;  %v9894_v8 = vsel %vm11409_vm7, %v13629_v49, 0.0  ;;  %v13631_v32 = vld [vmem:[#allocation219_spill] sm:$0xff]  ;;  %v13634_v42 = vld [vmem:[#allocation169_spill] sm:$0xff]  ;;  %vm13638_vm10 = vcmp.lt.s32.totalorder %v9481_v1, 625 }
 0x380   : > { %13628 = vst [vmem:[#allocation248_spill] sm:$0xff] %v9889_v18  ;;  %13630 = vst [vmem:[#allocation120_spill] sm:$0xff] %v9894_v8  ;;  %v9899_v50 = vsel %vm13632_vm12, %v13631_v32, 0.0  ;;  %v9904_v23 = vsel %vm13635_vm5, %v13634_v42, 0.0  ;;  %v13637_v6 = vld [vmem:[#allocation312_spill] sm:$0xff]  ;;  %v13640_v18 = vld [vmem:[#allocation311_spill] sm:$0xff] }
 0x381   : > { %13633 = vst [vmem:[#allocation244_spill] sm:$0xff] %v9899_v50  ;;  %13636 = vst [vmem:[#allocation118_spill] sm:$0xff] %v9904_v23  ;;  %v9909_v51 = vsel %vm13638_vm10, %v13637_v6, 0.0  ;;  %vm13641_vm2 = vcmp.lt.s32.totalorder %v9484_v3, 625  ;;  %v13643_v8 = vld [vmem:[#allocation221_spill] sm:$0xff]  ;;  %vm13644_vm7 = vcmp.lt.s32.totalorder %v9487_v46, 625 }
 0x382   : > { %13639 = vst [vmem:[#allocation249_spill] sm:$0xff] %v9909_v51  ;;  %v9914_v49 = vsel %vm13641_vm2, %v13640_v18, 0.0  ;;  %v9919_v32 = vsel %vm13644_vm7, %v13643_v8, 0.0  ;;  %v13646_v50 = vld [vmem:[#allocation170_spill] sm:$0xff]  ;;  %vm13647_vm12 = vcmp.lt.s32.totalorder %v9490_v53, 625  ;;  %v13649_v23 = vld [vmem:[#allocation315_spill] sm:$0xff] }
 0x383   : > { %13642 = vst [vmem:[#allocation121_spill] sm:$0xff] %v9914_v49  ;;  %13645 = vst [vmem:[#allocation122_spill] sm:$0xff] %v9919_v32  ;;  %v9924_v42 = vsel %vm13647_vm12, %v13646_v50, 0.0  ;;  %vm13650_vm5 = vcmp.lt.s32.totalorder %v9493_v35, 625  ;;  %v13652_v51 = vld [vmem:[#allocation314_spill] sm:$0xff]  ;;  %vm13653_vm10 = vcmp.lt.s32.totalorder %v9496_v12, 625 }
 0x384   : > { %13648 = vst [vmem:[#allocation49_spill] sm:$0xff] %v9924_v42  ;;  %v9929_v6 = vsel %vm13650_vm5, %v13649_v23, 0.0  ;;  %v9934_v18 = vsel %vm13653_vm10, %v13652_v51, 0.0  ;;  %v13655_v49 = vld [vmem:[#allocation223_spill] sm:$0xff]  ;;  %vm13656_vm2 = vcmp.lt.s32.totalorder %v9499_v39, 625  ;;  %vm13658_vm7 = vcmp.lt.s32.totalorder %v9502_v59, 625 }
 0x385   : > { %13651 = vst [vmem:[#allocation255_spill] sm:$0xff] %v9929_v6  ;;  %13654 = vst [vmem:[#allocation227_spill] sm:$0xff] %v9934_v18  ;;  %v9939_v8 = vsel %vm13656_vm2, %v13655_v49, 0.0  ;;  %v9944_v50 = vsel %vm13658_vm7, %v9709_v34, 0.0  ;;  %v13660_v42 = vld [vmem:[#allocation171_spill] sm:$0xff]  ;;  %vm13661_vm12 = vcmp.lt.s32.totalorder %v9505_v33, 625 }
 0x386   : > { %13657 = vst [vmem:[#allocation123_spill] sm:$0xff] %v9939_v8  ;;  %13659 = vst [vmem:[#allocation174_spill] sm:$0xff] %v9944_v50  ;;  %v9949_v23 = vsel %vm13661_vm12, %v13660_v42, 0.0  ;;  %vm13663_vm5 = vcmp.lt.s32.totalorder %v9508_v47, 625  ;;  %v13665_v18 = vld [vmem:[#allocation317_spill] sm:$0xff]  ;;  %vm13666_vm10 = vcmp.lt.s32.totalorder %v9511_v31, 625 }
 0x387   : > { %13662 = vst [vmem:[#allocation124_spill] sm:$0xff] %v9949_v23  ;;  %v9954_v51 = vsel %vm13663_vm5, %v9719_v27, 0.0  ;;  %v9959_v49 = vsel %vm13666_vm10, %v13665_v18, 0.0  ;;  %vm13668_vm2 = vcmp.lt.s32.totalorder %v9514_v62, 625  ;;  %vm13670_vm7 = vcmp.lt.s32.totalorder %v9517_v43, 625  ;;  %v13772_v62 = vld [vmem:[#allocation240_spill] sm:$0xff] }
 0x388   : > { %13664 = vst [vmem:[#allocation321_spill] sm:$0xff] %v9954_v51  ;;  %13667 = vst [vmem:[#allocation38_spill] sm:$0xff] %v9959_v49  ;;  %v9964_v34 = vsel %vm13668_vm2, %v9729_v11, 0.0  ;;  %v9969_v42 = vsel %vm13670_vm7, %v9733_v41, 0.0  ;;  %vm13672_vm12 = vcmp.lt.s32.totalorder %v9520_v5, 625  ;;  %vm13674_vm5 = vcmp.lt.s32.totalorder %v9523_v2, 625 }
 0x389   : > { %13669 = vst [vmem:[#allocation323_spill] sm:$0xff] %v9964_v34  ;;  %13671 = vst [vmem:[#allocation125_spill] sm:$0xff] %v9969_v42  ;;  %v9974_v27 = vsel %vm13672_vm12, %v9737_v55, 0.0  ;;  %v9979_v18 = vsel %vm13674_vm5, %v9741_v7, 0.0  ;;  %vm13676_vm10 = vcmp.lt.s32.totalorder %v9526_v40, 625  ;;  %vm13678_vm2 = vcmp.lt.s32.totalorder %v13600_v48, 625 }
 0x38a   : > { %13673 = vst [vmem:[#allocation327_spill] sm:$0xff] %v9974_v27  ;;  %13675 = vst [vmem:[#allocation35_spill] sm:$0xff] %v9979_v18  ;;  %v9984_v11 = vsel %vm13676_vm10, %v9745_v52, 0.0  ;;  %v9989_v41 = vsel %vm13678_vm2, %v9749_v16, 0.0  ;;  %vm13680_vm7 = vcmp.lt.s32.totalorder %v13601_v57, 625  ;;  %vm13682_vm12 = vcmp.lt.s32.totalorder %v13602_v54, 625 }
 0x38b   : > { %13677 = vst [vmem:[#allocation37_spill] sm:$0xff] %v9984_v11  ;;  %13679 = vst [vmem:[#allocation202_spill] sm:$0xff] %v9989_v41  ;;  %v9994_v55 = vsel %vm13680_vm7, %v9753_v45, 0.0  ;;  %v9999_v7 = vsel %vm13682_vm12, %v9757_v9, 0.0  ;;  %vm13684_vm5 = vcmp.lt.s32.totalorder %v13603_v37, 625  ;;  %vm13686_vm10 = vcmp.lt.s32.totalorder %v13604_v14, 625 }
 0x38c   : > { %13681 = vst [vmem:[#allocation324_spill] sm:$0xff] %v9994_v55  ;;  %13683 = vst [vmem:[#allocation43_spill] sm:$0xff] %v9999_v7  ;;  %v10004_v52 = vsel %vm13684_vm5, %v9761_v21, 0.0  ;;  %v10009_v16 = vsel %vm13686_vm10, %v9765_v58, 0.0  ;;  %vm13688_vm2 = vcmp.lt.s32.totalorder %v13605_v26, 625  ;;  %vm13690_vm7 = vcmp.lt.s32.totalorder %v13606_v44, 625 }
 0x38d   : > { %13685 = vst [vmem:[#allocation325_spill] sm:$0xff] %v10004_v52  ;;  %13687 = vst [vmem:[#allocation126_spill] sm:$0xff] %v10009_v16  ;;  %v10014_v45 = vsel %vm13688_vm2, %v9769_v22, 0.0  ;;  %v10019_v9 = vsel %vm13690_vm7, %v9773_v36, 0.0  ;;  %vm13692_vm12 = vcmp.lt.s32.totalorder %v13607_v4, 625  ;;  %vm13694_vm5 = vcmp.lt.s32.totalorder %v13608_v56, 625 }
 0x38e   : > { %13689 = vst [vmem:[#allocation330_spill] sm:$0xff] %v10014_v45  ;;  %13691 = vst [vmem:[#allocation264_spill] sm:$0xff] %v10019_v9  ;;  %v10024_v21 = vsel %vm13692_vm12, %v9777_v0, 0.0  ;;  %v10029_v58 = vsel %vm13694_vm5, %v9781_v63, 0.0  ;;  %v10034_v22 = vsel %vm2699_vm4, %v9785_v61, 0.0  ;;  %v10039_v36 = vsel %vm2700_vm13, %v9789_v25, 0.0 }
 0x38f   : > { %13693 = vst [vmem:[#allocation130_spill] sm:$0xff] %v10024_v21  ;;  %13695 = vst [vmem:[#allocation257_spill] sm:$0xff] %v10029_v58  ;;  %v10044_v0 = vsel %vm2701_vm0, %v9793_v19, 0.0  ;;  %v13700_v21 = vld [vmem:[#allocation316_spill] sm:$0xff]  ;;  %v13703_v58 = vld [vmem:[#allocation322_spill] sm:$0xff] }
 0x390   : > { %13696 = vst [vmem:[#allocation213_spill] sm:$0xff] %v10034_v22  ;;  %13697 = vst [vmem:[#allocation267_spill] sm:$0xff] %v10039_v36  ;;  %v10049_v63 = vsel %vm2702_vm3, %v13700_v21, 0.0  ;;  %v10054_v61 = vsel %vm2703_vm11, %v13703_v58, 0.0  ;;  %v13706_v22 = vld [vmem:[#allocation172_spill] sm:$0xff]  ;;  %v13708_v36 = vld [vmem:[#allocation318_spill] sm:$0xff] }
 0x391   : > { %13699 = vst [vmem:[#allocation131_spill] sm:$0xff] %v10044_v0  ;;  %13702 = vst [vmem:[#allocation258_spill] sm:$0xff] %v10049_v63  ;;  %v10059_v25 = vsel %vm2704_vm14, %v13706_v22, 0.0  ;;  %v10064_v19 = vsel %vm2705_vm15, %v13708_v36, 0.0  ;;  %v13711_v0 = vld [vmem:[#allocation250_spill] sm:$0xff]  ;;  %v13712_v9 = vld [vmem:[#allocation175_spill] sm:$0xff] }
 0x392   : > { %13705 = vst [vmem:[#allocation216_spill] sm:$0xff] %v10054_v61  ;;  %13707 = vst [vmem:[#allocation268_spill] sm:$0xff] %v10059_v25  ;;  %v2269_v4 = vmul.f32 %v13712_v9, %v13711_v0  ;;  %v13713_v21 = vld [vmem:[#allocation222_spill] sm:$0xff]  ;;  %v13716_v58 = vld [vmem:[#allocation225_spill] sm:$0xff] }
 0x393   : > { %13710 = vst [vmem:[#allocation132_spill] sm:$0xff] %v10064_v19  ;;  %v10071_v60 = vsel %vm2706_vm8, %v13713_v21, 0.0  ;;  %v10076_v56 = vsel %vm2707_vm1, %v13716_v58, 0.0  ;;  %v13719_v22 = vld [vmem:[#allocation173_spill] sm:$0xff]  ;;  %v13722_v36 = vld [vmem:[#allocation203_spill] sm:$0xff]  ;;  %v13723_v19 = vld [vmem:[#allocation228_spill] sm:$0xff] }
 0x394   : > { %13715 = vst [vmem:[#allocation133_spill] sm:$0xff] %v10071_v60  ;;  %13718 = vst [vmem:[#allocation220_spill] sm:$0xff] %v10076_v56  ;;  %v10081_v10 = vsel %vm2708_vm9, %v13719_v22, 0.0  ;;  %v2270_v15 = vmul.f32 %v13723_v19, %v13722_v36  ;;  %v13724_v45 = vld [vmem:[#allocation261_spill] sm:$0xff]  ;;  %v13725_v9 = vld [vmem:[#allocation328_spill] sm:$0xff] }
 0x395   : > { %13721 = vst [vmem:[#allocation269_spill] sm:$0xff] %v10081_v10  ;;  %v2271_v0 = vmul.f32 %v13725_v9, %v13724_v45  ;;  %v13726_v44 = vld [vmem:[#allocation127_spill] sm:$0xff]  ;;  %v13727_v63 = vld [vmem:[#allocation32_spill] sm:$0xff]  ;;  %v13730_v61 = vld [vmem:[#allocation205_spill] sm:$0xff] }
 0x396   : > { %v2272_v21 = vmul.f32 %v13727_v63, %v13726_v44  ;;  %v13728_v60 = vld [vmem:[#allocation251_spill] sm:$0xff]  ;;  %v13729_v16 = vld [vmem:[#allocation176_spill] sm:$0xff]  ;;  %v13731_v58 = vld [vmem:[#allocation326_spill] sm:$0xff] }
 0x397   : > { %v2273_v26 = vmul.f32 %v13729_v16, %v13728_v60  ;;  %v2274_v56 = vmul.f32 %v13731_v58, %v13730_v61  ;;  %v13732_v52 = vld [vmem:[#allocation262_spill] sm:$0xff]  ;;  %v13733_v14 = vld [vmem:[#allocation329_spill] sm:$0xff]  ;;  %v13734_v22 = vld [vmem:[#allocation128_spill] sm:$0xff] }
 0x398   : > { %v2275_v25 = vmul.f32 %v13733_v14, %v13732_v52  ;;  %v13735_v10 = vld [vmem:[#allocation232_spill] sm:$0xff]  ;;  %v13737_v19 = vld [vmem:[#allocation177_spill] sm:$0xff]  ;;  %v13739_v45 = vld [vmem:[#allocation230_spill] sm:$0xff] }
 0x399   : > { %v2276_v7 = vmul.f32 %v13735_v10, %v13734_v22  ;;  %v13736_v37 = vld [vmem:[#allocation252_spill] sm:$0xff]  ;;  %v13738_v55 = vld [vmem:[#allocation209_spill] sm:$0xff]  ;;  %v13740_v54 = vld [vmem:[#allocation263_spill] sm:$0xff] }
 0x39a   : > { %v2277_v36 = vmul.f32 %v13737_v19, %v13736_v37  ;;  %v2278_v9 = vmul.f32 %v13739_v45, %v13738_v55  ;;  %v13741_v44 = vld [vmem:[#allocation331_spill] sm:$0xff]  ;;  %v13742_v41 = vld [vmem:[#allocation129_spill] sm:$0xff]  ;;  %v13744_v57 = vld [vmem:[#allocation254_spill] sm:$0xff] }
 0x39b   : > { %v2279_v63 = vmul.f32 %v13741_v44, %v13740_v54  ;;  %v13743_v60 = vld [vmem:[#allocation333_spill] sm:$0xff]  ;;  %v13745_v61 = vld [vmem:[#allocation178_spill] sm:$0xff]  ;;  %v13746_v14 = vld [vmem:[#allocation211_spill] sm:$0xff] }
 0x39c   : > { %v2280_v16 = vmul.f32 %v13743_v60, %v13742_v41  ;;  %v10107_v58 = vmul.f32 %v13745_v61, %v13744_v57  ;;  %v13747_v52 = vld [vmem:[#allocation336_spill] sm:$0xff]  ;;  %v13749_v22 = vld [vmem:[#allocation179_spill] sm:$0xff]  ;;  %v13750_v19 = vld [vmem:[#allocation246_spill] sm:$0xff] }
 0x39d   : > { %v10111_v11 = vmul.f32 %v13747_v52, %v13746_v14  ;;  %v13748_v10 = vld [vmem:[#allocation256_spill] sm:$0xff]  ;;  %v13752_v45 = vld [vmem:[#allocation150_spill] sm:$0xff]  ;;  %v13754_v44 = vld [vmem:[#allocation233_spill] sm:$0xff] }
 0x39e   : > { %v2326_v37 = vadd.f32 %v13749_v22, %v13748_v10  ;;  %v13751_v48 = vld [vmem:[#allocation332_spill] sm:$0xff]  ;;  %v13753_v18 = vld [vmem:[#allocation334_spill] sm:$0xff]  ;;  %v13755_v40 = vld [vmem:[#allocation41_spill] sm:$0xff] }
 0x39f   : > { %v2327_v55 = vadd.f32 %v13751_v48, %v13750_v19  ;;  %v2328_v54 = vadd.f32 %v13753_v18, %v13752_v45  ;;  %v2329_v41 = vadd.f32 %v13755_v40, %v13754_v44  ;;  %v13756_v60 = vld [vmem:[#allocation259_spill] sm:$0xff]  ;;  %v13757_v27 = vld [vmem:[#allocation180_spill] sm:$0xff]  ;;  %v13760_v14 = vld [vmem:[#allocation146_spill] sm:$0xff] }
 0x3a0   : > { %v2330_v57 = vadd.f32 %v13757_v27, %v13756_v60  ;;  %v13758_v61 = vld [vmem:[#allocation247_spill] sm:$0xff]  ;;  %v2480_v52 = vadd.s32 8, %v13760_v14  ;;  %v13762_v34 = vld [vmem:[#allocation234_spill] sm:$0xff]  ;;  %v13763_v22 = vld [vmem:[#allocation276_spill] sm:$0xff]  ;;  %v2482_v8 = vadd.s32 24, %v13760_v14 }
 0x3a1   : > { %v13759_v2 = vld [vmem:[#allocation335_spill] sm:$0xff]  ;;  %v13764_v48 = vld [vmem:[#allocation238_spill] sm:$0xff]  ;;  %v13765_v18 = vld [vmem:[#allocation260_spill] sm:$0xff] }
 0x3a2   : > { %v2331_v42 = vadd.f32 %v13759_v2, %v13758_v61  ;;  %v13761_v5 = vld [vmem:[#allocation151_spill] sm:$0xff]  ;;  %v10132_v19 = vadd.f32 %v13764_v48, %v13763_v22  ;;  %v13766_v45 = vld [vmem:[#allocation181_spill] sm:$0xff]  ;;  %v13769_v60 = vld [vmem:[#allocation152_spill] sm:$0xff]  ;;  %v2481_v48 = vadd.s32 16, %v13760_v14 }
 0x3a3   : > { %v10128_v10 = vadd.f32 %v13762_v34, %v13761_v5  ;;  %v10136_v43 = vadd.f32 %v13766_v45, %v13765_v18  ;;  %v13767_v40 = vld [vmem:[#allocation33_spill] sm:$0xff]  ;;  %v13770_v2 = vld [vmem:[#allocation236_spill] sm:$0xff]  ;;  %v13771_v49 = vld [vmem:[#allocation278_spill] sm:$0xff] }
 0x3a4   : > { %v13768_v44 = vld [vmem:[#allocation337_spill] sm:$0xff]  ;;  %v10144_v61 = vadd.f32 %v13770_v2, %v13769_v60  ;;  %v10148_v5 = vadd.f32 %v13772_v62, %v13771_v49  ;;  %v13773_v34 = vld [vmem:[#allocation22_spill] sm:$0xff]  ;;  %v13776_v45 = vld [vmem:[#allocation39_spill] sm:$0xff] }
 0x3a5   : > { %v10140_v27 = vadd.f32 %v13768_v44, %v13767_v40  ;;  %v13774_v51 = vld [vmem:[#allocation45_spill] sm:$0xff]  ;;  %v13775_v18 = vld [vmem:[#allocation286_spill] sm:$0xff]  ;;  %v13782_v49 = vld [vmem:[#allocation183_spill] sm:$0xff] }
 0x3a6   : > { %v10152_v22 = vadd.f32 %v13774_v51, %v13773_v34  ;;  %v10157_v31 = vadd.f32 %v13776_v45, %v13775_v18  ;;  %v13777_v40 = vld [vmem:[#allocation153_spill] sm:$0xff]  ;;  %v13778_v44 = vld [vmem:[#allocation338_spill] sm:$0xff]  ;;  %v13784_v34 = vld [vmem:[#allocation339_spill] sm:$0xff] }
 0x3a7   : > { %v10161_v23 = vadd.f32 %v13778_v44, %v13777_v40  ;;  %v13779_v60 = vld [vmem:[#allocation46_spill] sm:$0xff]  ;;  %v13780_v2 = vld [vmem:[#allocation241_spill] sm:$0xff]  ;;  %v13785_v18 = vld [vmem:[#allocation148_spill] sm:$0xff] }
 0x3a8   : > { %v10165_v47 = vadd.f32 %v13780_v2, %v13779_v60  ;;  %v13781_v62 = vld [vmem:[#allocation273_spill] sm:$0xff]  ;;  %v13783_v51 = vld [vmem:[#allocation50_spill] sm:$0xff]  ;;  %v2557_v45 = vadd.s32 %v13785_v18, %v13760_v14  ;;  %v2558_v40 = vadd.s32 %v13785_v18, %v2480_v52  ;;  %v13787_v59 = vld [vmem:[#allocation340_spill] sm:$0xff]  ;;  %v2483_v52 = vadd.s32 32, %v13760_v14 }
 0x3a9   : > { %v10169_v50 = vadd.f32 %v13782_v49, %v13781_v62  ;;  %v10173_v33 = vadd.f32 %v13784_v34, %v13783_v51  ;;  %v13786_v44 = vld [vmem:[#allocation154_spill] sm:$0xff]  ;;  %v13788_v60 = vld [vmem:[#allocation284_spill] sm:$0xff]  ;;  %v13789_v62 = vld [vmem:[#allocation279_spill] sm:$0xff] }
 0x3aa   : > { %v10181_v39 = vadd.f32 %v13787_v59, %v13786_v44  ;;  %v10184_v2 = vadd.f32 %v2269_v4, %v13788_v60  ;;  %v10187_v49 = vadd.f32 %v2270_v15, %v13789_v62  ;;  %v13790_v6 = vld [vmem:[#allocation16_spill] sm:$0xff]  ;;  %v13791_v34 = vld [vmem:[#allocation155_spill] sm:$0xff]  ;;  %v13792_v35 = vld [vmem:[#allocation285_spill] sm:$0xff]  ;;  %v2559_v59 = vadd.s32 %v13785_v18, %v2481_v48 }
 0x3ab   : > { %v10190_v51 = vadd.f32 %v2271_v0, %v13790_v6  ;;  %v10193_v12 = vadd.f32 %v2272_v21, %v13791_v34  ;;  %v10196_v32 = vadd.f32 %v2273_v26, %v13792_v35  ;;  %v13793_v44 = vld [vmem:[#allocation48_spill] sm:$0xff]  ;;  %v13794_v4 = vld [vmem:[#allocation17_spill] sm:$0xff]  ;;  %v2484_v34 = vadd.s32 40, %v13760_v14  ;;  %v13803_v3 = vld [vmem:[#allocation291_spill] sm:$0xff] }
 0x3ac   : > { %v10201_v53 = vadd.f32 %v2274_v56, %v13793_v44  ;;  %v10204_v60 = vadd.f32 %v2275_v25, %v13794_v4  ;;  %v13795_v15 = vld [vmem:[#allocation92_spill] sm:$0xff]  ;;  %v2560_v35 = vadd.s32 %v13785_v18, %v2482_v8  ;;  %vm2633_vm10 = vcmp.lt.s32.totalorder %v2557_v45, 625  ;;  %v13800_v25 = vld [vmem:[#allocation287_spill] sm:$0xff]  ;;  %v13801_v46 = vld [vmem:[#allocation93_spill] sm:$0xff] }
 0x3ad   : > { %v13796_v62 = vunpack.c.l.bf16 %v13795_v15  ;;  %v13797_v0 = vunpack.c.h.bf16 %v13795_v15  ;;  %vm2634_vm2 = vcmp.lt.s32.totalorder %v2558_v40, 625  ;;  %v13798_v26 = vld [vmem:[#allocation156_spill] sm:$0xff]  ;;  %v10219_v4 = vadd.f32 %v2278_v9, %v13800_v25  ;;  %v13813_v28 = vld [vmem:[#allocation95_spill] sm:$0xff] }
 0x3ae   : > { %v10213_v48 = vadd.f32 %v2276_v7, %v13798_v26  ;;  %v13799_v56 = vld [vmem:[#allocation288_spill] sm:$0xff]  ;;  %v2561_v8 = vadd.s32 %v13785_v18, %v2483_v52  ;;  %vm2635_vm7 = vcmp.lt.s32.totalorder %v2559_v59, 625  ;;  %v13804_v7 = vunpack.c.h.bf16 %v13801_v46  ;;  %v13807_v59 = vld [vmem:[#allocation157_spill] sm:$0xff] }
 0x3af   : > { %v2402_v6 = vmul.f32 %v13796_v62, %v2326_v37  ;;  %v2403_v21 = vmul.f32 %v13797_v0, %v2327_v55  ;;  %v10216_v44 = vadd.f32 %v2277_v36, %v13799_v56  ;;  %v13802_v37 = vunpack.c.l.bf16 %v13801_v46 }
 0x3b0   : > { %v10224_v55 = vadd.f32 %v2279_v63, %v13803_v3  ;;  %v2485_v0 = vadd.s32 48, %v13760_v14  ;;  %v2405_v26 = vmul.f32 %v13804_v7, %v2329_v41  ;;  %v2486_v36 = vadd.s32 56, %v13760_v14  ;;  %v13808_v41 = vld [vmem:[#allocation94_spill] sm:$0xff] }
 0x3b1   : > { %v2404_v62 = vmul.f32 %v13802_v37, %v2328_v54  ;;  %v2709_v56 = vsel %vm2633_vm10, %v2402_v6, 0.0  ;;  %v2710_v9 = vsel %vm2634_vm2, %v2403_v21, 0.0  ;;  %v2562_v25 = vadd.s32 %v13785_v18, %v2484_v34 }
 0x3b2   : > { %vm2636_vm12 = vcmp.lt.s32.totalorder %v2560_v35, 625  ;;  %v13805_v3 = vunpack.c.l.bf16 %v13795_v15  ;;  %v13806_v54 = vunpack.c.h.bf16 %v13795_v15  ;;  %v10241_v37 = vadd.f32 %v2280_v16, %v13807_v59 }
 0x3b3   : > { %v13809_v7 = vunpack.c.l.bf16 %v13808_v41  ;;  %v2487_v6 = vadd.s32 64, %v13760_v14  ;;  %v2711_v21 = vsel %vm2635_vm7, %v2404_v62, 0.0  ;;  %v2563_v34 = vadd.s32 %v13785_v18, %v2485_v0 }
 0x3b4   : > { %v2785_v63 = vsel %vm2633_vm10, %v13805_v3, 0.0  ;;  %v2786_v52 = vsel %vm2634_vm2, %v13806_v54, 0.0  ;;  %vm2637_vm5 = vcmp.lt.s32.totalorder %v2561_v8, 625  ;;  %v13810_v30 = vunpack.c.l.bf16 %v13801_v46  ;;  %v13818_v8 = vld [vmem:[#allocation96_spill] sm:$0xff] }
 0x3b5   : > { %v2406_v1 = vmul.f32 %v13809_v7, %v2330_v57  ;;  %v2862_v3 = vadd.f32 %v2710_v9, %v2709_v56  ;;  %v13811_v15 = vunpack.c.h.bf16 %v13808_v41  ;;  %v2488_v54 = vadd.s32 72, %v13760_v14 }
 0x3b6   : > { %v2787_v45 = vsel %vm2635_vm7, %v13810_v30, 0.0  ;;  %v2712_v16 = vsel %vm2636_vm12, %v2405_v26, 0.0  ;;  %v2940_v59 = vadd.f32 %v2786_v52, %v2785_v63  ;;  %v2564_v57 = vadd.s32 %v13785_v18, %v2486_v36 }
 0x3b7   : > { %v2407_v40 = vmul.f32 %v13811_v15, %v2331_v42  ;;  %vm2638_vm10 = vcmp.lt.s32.totalorder %v2562_v25, 625  ;;  %v13812_v62 = vunpack.c.h.bf16 %v13801_v46  ;;  %v2863_v7 = vadd.f32 %v2862_v3, %v2711_v21 }
 0x3b8   : > { %v13814_v30 = vunpack.c.l.bf16 %v13813_v28  ;;  %v2489_v9 = vadd.s32 80, %v13760_v14  ;;  %v2713_v42 = vsel %vm2637_vm5, %v2406_v1, 0.0  ;;  %v2941_v15 = vadd.f32 %v2940_v59, %v2787_v45 }
 0x3b9   : > { %v2788_v0 = vsel %vm2636_vm12, %v13812_v62, 0.0  ;;  %v2565_v26 = vadd.s32 %v13785_v18, %v2487_v6  ;;  %vm2639_vm2 = vcmp.lt.s32.totalorder %v2563_v34, 625  ;;  %v13815_v36 = vunpack.c.l.bf16 %v13808_v41  ;;  %v13823_v34 = vld [vmem:[#allocation97_spill] sm:$0xff] }
 0x3ba   : > { %v2408_v56 = vmul.f32 %v13814_v30, %v10128_v10  ;;  %v2864_v46 = vadd.f32 %v2863_v7, %v2712_v16  ;;  %v13816_v35 = vunpack.c.h.bf16 %v13813_v28  ;;  %v2490_v21 = vadd.s32 88, %v13760_v14 }
 0x3bb   : > { %v2789_v63 = vsel %vm2637_vm5, %v13815_v36, 0.0  ;;  %v2714_v10 = vsel %vm2638_vm10, %v2407_v40, 0.0  ;;  %v2942_v3 = vadd.f32 %v2941_v15, %v2788_v0  ;;  %v2566_v1 = vadd.s32 %v13785_v18, %v2488_v54 }
 0x3bc   : > { %v2409_v52 = vmul.f32 %v13816_v35, %v10132_v19  ;;  %vm2640_vm7 = vcmp.lt.s32.totalorder %v2564_v57, 625  ;;  %v13817_v6 = vunpack.c.h.bf16 %v13808_v41  ;;  %v2865_v59 = vadd.f32 %v2864_v46, %v2713_v42 }
 0x3bd   : > { %v13819_v16 = vunpack.c.l.bf16 %v13818_v8  ;;  %v2491_v7 = vadd.s32 96, %v13760_v14  ;;  %v2715_v19 = vsel %vm2639_vm2, %v2408_v56, 0.0  ;;  %v2943_v30 = vadd.f32 %v2942_v3, %v2789_v63 }
 0x3be   : > { %v2790_v45 = vsel %vm2638_vm10, %v13817_v6, 0.0  ;;  %v2567_v40 = vadd.s32 %v13785_v18, %v2489_v9  ;;  %vm2641_vm12 = vcmp.lt.s32.totalorder %v2565_v26, 625  ;;  %v13820_v54 = vunpack.c.l.bf16 %v13813_v28  ;;  %v13828_v26 = vld [vmem:[#allocation98_spill] sm:$0xff] }
 0x3bf   : > { %v2410_v62 = vmul.f32 %v13819_v16, %v10136_v43  ;;  %v2866_v41 = vadd.f32 %v2865_v59, %v2714_v10  ;;  %v13821_v25 = vunpack.c.h.bf16 %v13818_v8  ;;  %v2492_v15 = vadd.s32 104, %v13760_v14 }
 0x3c0   : > { %v2791_v0 = vsel %vm2639_vm2, %v13820_v54, 0.0  ;;  %v2716_v43 = vsel %vm2640_vm7, %v2409_v52, 0.0  ;;  %v2944_v36 = vadd.f32 %v2943_v30, %v2790_v45  ;;  %v2568_v56 = vadd.s32 %v13785_v18, %v2490_v21 }
 0x3c1   : > { %v2411_v42 = vmul.f32 %v13821_v25, %v10140_v27  ;;  %vm2642_vm5 = vcmp.lt.s32.totalorder %v2566_v1, 625  ;;  %v13822_v9 = vmov %v13816_v35  ;;  %v2867_v46 = vadd.f32 %v2866_v41, %v2715_v19 }
 0x3c2   : > { %v2792_v63 = vsel %vm2640_vm7, %v13822_v9, 0.0  ;;  %v13824_v35 = vunpack.c.l.bf16 %v13823_v34  ;;  %v2493_v3 = vadd.s32 112, %v13760_v14  ;;  %v2717_v27 = vsel %vm2641_vm12, %v2410_v62, 0.0 }
 0x3c3   : > { %v2945_v6 = vadd.f32 %v2944_v36, %v2791_v0  ;;  %v2569_v52 = vadd.s32 %v13785_v18, %v2491_v7  ;;  %vm2643_vm10 = vcmp.lt.s32.totalorder %v2567_v40, 625  ;;  %v13825_v21 = vmov %v13819_v16  ;;  %v13833_v40 = vld [vmem:[#allocation99_spill] sm:$0xff] }
 0x3c4   : > { %v2412_v10 = vmul.f32 %v13824_v35, %v10144_v61  ;;  %v2793_v45 = vsel %vm2641_vm12, %v13825_v21, 0.0  ;;  %v2868_v28 = vadd.f32 %v2867_v46, %v2716_v43  ;;  %v13826_v57 = vunpack.c.h.bf16 %v13823_v34 }
 0x3c5   : > { %v2494_v16 = vadd.s32 120, %v13760_v14  ;;  %v2718_v61 = vsel %vm2642_vm5, %v2411_v42, 0.0  ;;  %v2946_v19 = vadd.f32 %v2945_v6, %v2792_v63  ;;  %v2570_v62 = vadd.s32 %v13785_v18, %v2492_v15 }
 0x3c6   : > { %v2413_v59 = vmul.f32 %v13826_v57, %v10148_v5  ;;  %vm2644_vm2 = vcmp.lt.s32.totalorder %v2568_v56, 625  ;;  %v13827_v7 = vmov %v13821_v25  ;;  %v2869_v54 = vadd.f32 %v2868_v28, %v2717_v27 }
 0x3c7   : > { %v2794_v30 = vsel %vm2642_vm5, %v13827_v7, 0.0  ;;  %v13829_v0 = vunpack.c.l.bf16 %v13828_v26  ;;  %v2495_v25 = vadd.s32 128, %v13760_v14  ;;  %v2719_v5 = vsel %vm2643_vm10, %v2412_v10, 0.0 }
 0x3c8   : > { %v2947_v43 = vadd.f32 %v2946_v19, %v2793_v45  ;;  %v2571_v42 = vadd.s32 %v13785_v18, %v2493_v3  ;;  %vm2645_vm7 = vcmp.lt.s32.totalorder %v2569_v52, 625  ;;  %v13830_v15 = vmov %v13824_v35  ;;  %v13838_v52 = vld [vmem:[#allocation100_spill] sm:$0xff] }
 0x3c9   : > { %v2414_v41 = vmul.f32 %v13829_v0, %v10152_v22  ;;  %v2795_v36 = vsel %vm2643_vm10, %v13830_v15, 0.0  ;;  %v2870_v8 = vadd.f32 %v2869_v54, %v2718_v61  ;;  %v13831_v1 = vunpack.c.h.bf16 %v13828_v26 }
 0x3ca   : > { %v2496_v63 = vadd.s32 136, %v13760_v14  ;;  %v2720_v22 = vsel %vm2644_vm2, %v2413_v59, 0.0  ;;  %v2948_v46 = vadd.f32 %v2947_v43, %v2794_v30  ;;  %v2572_v35 = vadd.s32 %v13785_v18, %v2494_v16 }
 0x3cb   : > { %v2415_v9 = vmul.f32 %v13831_v1, %v10157_v31  ;;  %vm2646_vm12 = vcmp.lt.s32.totalorder %v2570_v62, 625  ;;  %v13832_v10 = vmov %v13826_v57  ;;  %v2871_v27 = vadd.f32 %v2870_v8, %v2719_v5 }
 0x3cc   : > { %v2796_v3 = vsel %vm2644_vm2, %v13832_v10, 0.0  ;;  %v13834_v6 = vunpack.c.l.bf16 %v13833_v40  ;;  %v2497_v45 = vadd.s32 144, %v13760_v14  ;;  %v2721_v31 = vsel %vm2645_vm7, %v2414_v41, 0.0 }
 0x3cd   : > { %v2949_v28 = vadd.f32 %v2948_v46, %v2795_v36  ;;  %v2573_v57 = vadd.s32 %v13785_v18, %v2495_v25  ;;  %vm2647_vm5 = vcmp.lt.s32.totalorder %v2571_v42, 625  ;;  %v13835_v59 = vmov %v13829_v0  ;;  %v13843_v42 = vld [vmem:[#allocation101_spill] sm:$0xff] }
 0x3ce   : > { %v2416_v21 = vmul.f32 %v13834_v6, %v10161_v23  ;;  %v2797_v16 = vsel %vm2645_vm7, %v13835_v59, 0.0  ;;  %v2872_v34 = vadd.f32 %v2871_v27, %v2720_v22  ;;  %v13836_v56 = vunpack.c.h.bf16 %v13833_v40 }
 0x3cf   : > { %v2498_v19 = vadd.s32 152, %v13760_v14  ;;  %v2722_v23 = vsel %vm2646_vm12, %v2415_v9, 0.0  ;;  %v2950_v7 = vadd.f32 %v2949_v28, %v2796_v3  ;;  %v2574_v30 = vadd.s32 %v13785_v18, %v2496_v63 }
 0x3d0   : > { %v2417_v61 = vmul.f32 %v13836_v56, %v10165_v47  ;;  %vm2648_vm10 = vcmp.lt.s32.totalorder %v2572_v35, 625  ;;  %v13837_v54 = vmov %v13831_v1  ;;  %v2873_v41 = vadd.f32 %v2872_v34, %v2721_v31 }
 0x3d1   : > { %v2798_v0 = vsel %vm2646_vm12, %v13837_v54, 0.0  ;;  %v13839_v25 = vunpack.c.l.bf16 %v13838_v52  ;;  %v2499_v43 = vadd.s32 160, %v13760_v14  ;;  %v2723_v47 = vsel %vm2647_vm5, %v2416_v21, 0.0 }
 0x3d2   : > { %v2951_v15 = vadd.f32 %v2950_v7, %v2797_v16  ;;  %v2575_v36 = vadd.s32 %v13785_v18, %v2497_v45  ;;  %vm2649_vm2 = vcmp.lt.s32.totalorder %v2573_v57, 625  ;;  %v13840_v8 = vmov %v13834_v6  ;;  %v13848_v57 = vld [vmem:[#allocation102_spill] sm:$0xff] }
 0x3d3   : > { %v2418_v5 = vmul.f32 %v13839_v25, %v10169_v50  ;;  %v2799_v1 = vsel %vm2647_vm5, %v13840_v8, 0.0  ;;  %v2874_v26 = vadd.f32 %v2873_v41, %v2722_v23  ;;  %v13841_v62 = vunpack.c.h.bf16 %v13838_v52 }
 0x3d4   : > { %v2500_v63 = vadd.s32 168, %v13760_v14  ;;  %v2724_v50 = vsel %vm2648_vm10, %v2417_v61, 0.0  ;;  %v2952_v22 = vadd.f32 %v2951_v15, %v2798_v0  ;;  %v2576_v46 = vadd.s32 %v13785_v18, %v2498_v19 }
 0x3d5   : > { %v2419_v9 = vmul.f32 %v13841_v62, %v10173_v33  ;;  %vm2650_vm7 = vcmp.lt.s32.totalorder %v2574_v30, 625  ;;  %v13842_v10 = vmov %v13836_v56  ;;  %v2875_v27 = vadd.f32 %v2874_v26, %v2723_v47 }
 0x3d6   : > { %v2800_v3 = vsel %vm2648_vm10, %v13842_v10, 0.0  ;;  %v13844_v6 = vunpack.c.l.bf16 %v13843_v42  ;;  %v2501_v45 = vadd.s32 176, %v13760_v14  ;;  %v2725_v33 = vsel %vm2649_vm2, %v2418_v5, 0.0 }
 0x3d7   : > { %v2953_v31 = vadd.f32 %v2952_v22, %v2799_v1  ;;  %v2577_v28 = vadd.s32 %v13785_v18, %v2499_v43  ;;  %vm2651_vm12 = vcmp.lt.s32.totalorder %v2575_v36, 625  ;;  %v13845_v59 = vmov %v13839_v25  ;;  %v13853_v36 = vld [vmem:[#allocation103_spill] sm:$0xff] }
 0x3d8   : > { %v2420_v21 = vmul.f32 %v13844_v6, %v10181_v39  ;;  %v2801_v16 = vsel %vm2649_vm2, %v13845_v59, 0.0  ;;  %v2876_v40 = vadd.f32 %v2875_v27, %v2724_v50  ;;  %v13846_v35 = vunpack.c.h.bf16 %v13843_v42 }
 0x3d9   : > { %v2502_v56 = vadd.s32 184, %v13760_v14  ;;  %v2726_v39 = vsel %vm2650_vm7, %v2419_v9, 0.0  ;;  %v2954_v61 = vadd.f32 %v2953_v31, %v2800_v3  ;;  %v2578_v19 = vadd.s32 %v13785_v18, %v2500_v63 }
 0x3da   : > { %v2421_v34 = vmul.f32 %v13846_v35, %v10184_v2  ;;  %vm2652_vm5 = vcmp.lt.s32.totalorder %v2576_v46, 625  ;;  %v13847_v23 = vmov %v13841_v62  ;;  %v2877_v54 = vadd.f32 %v2876_v40, %v2725_v33 }
 0x3db   : > { %v2802_v7 = vsel %vm2650_vm7, %v13847_v23, 0.0  ;;  %v13849_v0 = vunpack.c.l.bf16 %v13848_v57  ;;  %v2503_v25 = vadd.s32 192, %v13760_v14  ;;  %v2727_v2 = vsel %vm2651_vm12, %v2420_v21, 0.0 }
 0x3dc   : > { %v2955_v5 = vadd.f32 %v2954_v61, %v2801_v16  ;;  %v2579_v43 = vadd.s32 %v13785_v18, %v2501_v45  ;;  %vm2653_vm10 = vcmp.lt.s32.totalorder %v2577_v28, 625  ;;  %v13850_v47 = vmov %v13844_v6  ;;  %v13858_v28 = vld [vmem:[#allocation104_spill] sm:$0xff] }
 0x3dd   : > { %v2422_v41 = vmul.f32 %v13849_v0, %v10187_v49  ;;  %v2803_v15 = vsel %vm2651_vm12, %v13850_v47, 0.0  ;;  %v2878_v52 = vadd.f32 %v2877_v54, %v2726_v39  ;;  %v13851_v30 = vunpack.c.h.bf16 %v13848_v57 }
 0x3de   : > { %v2504_v1 = vadd.s32 200, %v13760_v14  ;;  %v2728_v49 = vsel %vm2652_vm5, %v2421_v34, 0.0  ;;  %v2956_v26 = vadd.f32 %v2955_v5, %v2802_v7  ;;  %v2580_v62 = vadd.s32 %v13785_v18, %v2502_v56 }
 0x3df   : > { %v2423_v8 = vmul.f32 %v13851_v30, %v10190_v51  ;;  %vm2654_vm2 = vcmp.lt.s32.totalorder %v2578_v19, 625  ;;  %v13852_v9 = vmov %v13846_v35  ;;  %v2879_v50 = vadd.f32 %v2878_v52, %v2727_v2 }
 0x3e0   : > { %v2804_v63 = vsel %vm2652_vm5, %v13852_v9, 0.0  ;;  %v13854_v22 = vunpack.c.l.bf16 %v13853_v36  ;;  %v2505_v3 = vadd.s32 208, %v13760_v14  ;;  %v2729_v51 = vsel %vm2653_vm10, %v2422_v41, 0.0 }
 0x3e1   : > { %v2957_v27 = vadd.f32 %v2956_v26, %v2803_v15  ;;  %v2581_v6 = vadd.s32 %v13785_v18, %v2503_v25  ;;  %vm2655_vm7 = vcmp.lt.s32.totalorder %v2579_v43, 625  ;;  %v13855_v21 = vmov %v13849_v0  ;;  %v13863_v43 = vld [vmem:[#allocation105_spill] sm:$0xff] }
 0x3e2   : > { %v2424_v10 = vmul.f32 %v13854_v22, %v10193_v12  ;;  %v2805_v45 = vsel %vm2653_vm10, %v13855_v21, 0.0  ;;  %v2880_v42 = vadd.f32 %v2879_v50, %v2728_v49  ;;  %v13856_v46 = vunpack.c.h.bf16 %v13853_v36 }
 0x3e3   : > { %v2506_v31 = vadd.s32 216, %v13760_v14  ;;  %v2730_v12 = vsel %vm2654_vm2, %v2423_v8, 0.0  ;;  %v2958_v59 = vadd.f32 %v2957_v27, %v2804_v63  ;;  %v2582_v16 = vadd.s32 %v13785_v18, %v2504_v1 }
 0x3e4   : > { %v2425_v33 = vmul.f32 %v13856_v46, %v10196_v32  ;;  %vm2656_vm12 = vcmp.lt.s32.totalorder %v2580_v62, 625  ;;  %v13857_v40 = vmov %v13851_v30  ;;  %v2881_v34 = vadd.f32 %v2880_v42, %v2729_v51 }
 0x3e5   : > { %v2806_v35 = vsel %vm2654_vm2, %v13857_v40, 0.0  ;;  %v13859_v56 = vunpack.c.l.bf16 %v13858_v28  ;;  %v2507_v61 = vadd.s32 224, %v13760_v14  ;;  %v2731_v32 = vsel %vm2655_vm7, %v2424_v10, 0.0 }
 0x3e6   : > { %v2959_v23 = vadd.f32 %v2958_v59, %v2805_v45  ;;  %v2583_v7 = vadd.s32 %v13785_v18, %v2505_v3  ;;  %vm2657_vm5 = vcmp.lt.s32.totalorder %v2581_v6, 625  ;;  %v13860_v54 = vmov %v13854_v22  ;;  %v13868_v6 = vld [vmem:[#allocation106_spill] sm:$0xff] }
 0x3e7   : > { %v2426_v39 = vmul.f32 %v13859_v56, %v10201_v53  ;;  %v2807_v0 = vsel %vm2655_vm7, %v13860_v54, 0.0  ;;  %v2882_v57 = vadd.f32 %v2881_v34, %v2730_v12  ;;  %v13861_v19 = vunpack.c.h.bf16 %v13858_v28 }
 0x3e8   : > { %v2508_v25 = vadd.s32 232, %v13760_v14  ;;  %v2732_v53 = vsel %vm2656_vm12, %v2425_v33, 0.0  ;;  %v2960_v2 = vadd.f32 %v2959_v23, %v2806_v35  ;;  %v2584_v5 = vadd.s32 %v13785_v18, %v2506_v31  ;;  %v13874_v23 = vld [vmem:[#allocation289_spill] sm:$0xff] }
 0x3e9   : > { %v2427_v41 = vmul.f32 %v13861_v19, %v10204_v60  ;;  %vm2658_vm10 = vcmp.lt.s32.totalorder %v2582_v16, 625  ;;  %v13862_v47 = vmov %v13856_v46  ;;  %v2883_v52 = vadd.f32 %v2882_v57, %v2731_v32  ;;  %v13871_v16 = vld [vmem:[#allocation19_spill] sm:$0xff] }
 0x3ea   : > { %v2808_v15 = vsel %vm2656_vm12, %v13862_v47, 0.0  ;;  %v13864_v30 = vunpack.c.l.bf16 %v13863_v43  ;;  %v2509_v1 = vadd.s32 240, %v13760_v14  ;;  %v2733_v60 = vsel %vm2657_vm5, %v2426_v39, 0.0 }
 0x3eb   : > { %v2961_v49 = vadd.f32 %v2960_v2, %v2807_v0  ;;  %v2585_v26 = vadd.s32 %v13785_v18, %v2507_v61  ;;  %vm2659_vm2 = vcmp.lt.s32.totalorder %v2583_v7, 625  ;;  %v13865_v9 = vmov %v13859_v56 }
 0x3ec   : > { %v2428_v8 = vmul.f32 %v13864_v30, %v10213_v48  ;;  %v2809_v63 = vsel %vm2657_vm5, %v13865_v9, 0.0  ;;  %v2884_v50 = vadd.f32 %v2883_v52, %v2732_v53  ;;  %v13866_v62 = vunpack.c.h.bf16 %v13863_v43  ;;  %v13880_v43 = vld [vmem:[#allocation108_spill] sm:$0xff] }
 0x3ed   : > { %v2510_v22 = vadd.s32 248, %v13760_v14  ;;  %v2734_v48 = vsel %vm2658_vm10, %v2427_v41, 0.0  ;;  %v2962_v10 = vadd.f32 %v2961_v49, %v2808_v15  ;;  %v2586_v3 = vadd.s32 %v13785_v18, %v2508_v25 }
 0x3ee   : > { %v2429_v36 = vmul.f32 %v13866_v62, %v10216_v44  ;;  %vm2660_vm7 = vcmp.lt.s32.totalorder %v2584_v5, 625  ;;  %v13867_v51 = vmov %v13861_v19  ;;  %v2885_v21 = vadd.f32 %v2884_v50, %v2733_v60 }
 0x3ef   : > { %v2810_v27 = vsel %vm2658_vm10, %v13867_v51, 0.0  ;;  %v13869_v45 = vunpack.c.l.bf16 %v13868_v6  ;;  %v2511_v46 = vadd.s32 256, %v13760_v14  ;;  %v2735_v44 = vsel %vm2659_vm2, %v2428_v8, 0.0 }
 0x3f0   : > { %v2963_v33 = vadd.f32 %v2962_v10, %v2809_v63  ;;  %v2587_v31 = vadd.s32 %v13785_v18, %v2509_v1  ;;  %vm2661_vm12 = vcmp.lt.s32.totalorder %v2585_v26, 625  ;;  %v13870_v12 = vmov %v13864_v30 }
 0x3f1   : > { %v2430_v42 = vmul.f32 %v13869_v45, %v10219_v4  ;;  %v2811_v59 = vsel %vm2659_vm2, %v13870_v12, 0.0  ;;  %v2886_v40 = vadd.f32 %v2885_v21, %v2734_v48  ;;  %v2357_v35 = vadd.f32 %v10107_v58, %v13871_v16  ;;  %v13875_v58 = vld [vmem:[#allocation107_spill] sm:$0xff] }
 0x3f2   : > { %v13872_v34 = vunpack.c.h.bf16 %v13868_v6  ;;  %v2736_v14 = vsel %vm2660_vm7, %v2429_v36, 0.0  ;;  %v2964_v28 = vadd.f32 %v2963_v33, %v2810_v27  ;;  %v2588_v56 = vadd.s32 %v13785_v18, %v2510_v22 }
 0x3f3   : > { %vm2662_vm5 = vcmp.lt.s32.totalorder %v2586_v3, 625  ;;  %v13873_v39 = vmov %v13866_v62  ;;  %v2887_v32 = vadd.f32 %v2886_v40, %v2735_v44  ;;  %v2358_v7 = vadd.f32 %v10111_v11, %v13874_v23  ;;  %v13899_v23 = vld [vmem:[#allocation47_spill] sm:$0xff] }
 0x3f4   : > { %v2431_v4 = vmul.f32 %v13872_v34, %v10224_v55  ;;  %v2812_v61 = vsel %vm2660_vm7, %v13873_v39, 0.0  ;;  %v13876_v54 = vunpack.c.l.bf16 %v13875_v58  ;;  %v2737_v55 = vsel %vm2661_vm12, %v2430_v42, 0.0 }
 0x3f5   : > { %v2965_v57 = vadd.f32 %v2964_v28, %v2811_v59  ;;  %v2589_v19 = vadd.s32 %v13785_v18, %v2511_v46  ;;  %vm2663_vm10 = vcmp.lt.s32.totalorder %v2587_v31, 625  ;;  %v13877_v41 = vmov %v13869_v45  ;;  %v13886_v46 = vld [vmem:[#allocation109_spill] sm:$0xff]  ;;  %v13889_v31 = vld [vmem:[#allocation320_spill] sm:$0xff] }
 0x3f6   : > { %v2432_v0 = vmul.f32 %v13876_v54, %v10241_v37  ;;  %v2813_v25 = vsel %vm2661_vm12, %v13877_v41, 0.0  ;;  %v2888_v53 = vadd.f32 %v2887_v32, %v2736_v14  ;;  %v13878_v2 = vunpack.c.h.bf16 %v13875_v58  ;;  %v13900_v58 = vld [vmem:[#allocation111_spill] sm:$0xff]  ;;  %v13905_v41 = vld [vmem:[#allocation253_spill] sm:$0xff] }
 0x3f7   : > { %v2738_v47 = vsel %vm2662_vm5, %v2431_v4, 0.0  ;;  %v2966_v11 = vadd.f32 %v2965_v57, %v2812_v61  ;;  %vm2664_vm2 = vcmp.lt.s32.totalorder %v2588_v56, 625  ;;  %v13879_v15 = vmov %v13872_v34  ;;  %v13896_v56 = vld [vmem:[#allocation119_spill] sm:$0xff] }
 0x3f8   : > { %v2433_v5 = vmul.f32 %v13878_v2, %v2357_v35  ;;  %v2814_v37 = vsel %vm2662_vm5, %v13879_v15, 0.0  ;;  %v2889_v52 = vadd.f32 %v2888_v53, %v2737_v55  ;;  %v13881_v30 = vunpack.c.l.bf16 %v13880_v43  ;;  %v13892_v35 = vld [vmem:[#allocation319_spill] sm:$0xff]  ;;  %v13903_v55 = vld [vmem:[#allocation248_spill] sm:$0xff] }
 0x3f9   : > { %v2739_v18 = vsel %vm2663_vm10, %v2432_v0, 0.0  ;;  %v2967_v1 = vadd.f32 %v2966_v11, %v2813_v25  ;;  %vm2665_vm7 = vcmp.lt.s32.totalorder %v2589_v19, 625  ;;  %v13882_v60 = vmov %v13876_v54  ;;  %v13907_v53 = vld [vmem:[#allocation120_spill] sm:$0xff]  ;;  %v13910_v11 = vld [vmem:[#allocation283_spill] sm:$0xff] }
 0x3fa   : > { %v2434_v8 = vmul.f32 %v13881_v30, %v2358_v7  ;;  %v2815_v49 = vsel %vm2663_vm10, %v13882_v60, 0.0  ;;  %v2890_v26 = vadd.f32 %v2889_v52, %v2738_v47  ;;  %v2740_v9 = vsel %vm2664_vm2, %v2433_v5, 0.0  ;;  %v13908_v5 = vld [vmem:[#allocation112_spill] sm:$0xff] }
 0x3fb   : > { %v2968_v63 = vadd.f32 %v2967_v1, %v2814_v37  ;;  %v13883_v50 = vmov %v13878_v2  ;;  %v13884_v10 = vmov %v13881_v30  ;;  %v13885_v21 = vunpack.c.h.bf16 %v13880_v43  ;;  %v13912_v37 = vld [vmem:[#allocation244_spill] sm:$0xff]  ;;  %v13914_v30 = vld [vmem:[#allocation149_spill] sm:$0xff] }
 0x3fc   : > { %v2816_v62 = vsel %vm2664_vm2, %v13883_v50, 0.0  ;;  %v2891_v36 = vadd.f32 %v2890_v26, %v2739_v18  ;;  %v2741_v22 = vsel %vm2665_vm7, %v2434_v8, 0.0  ;;  %v2817_v3 = vsel %vm2665_vm7, %v13884_v10, 0.0  ;;  %v13916_v18 = vld [vmem:[#allocation118_spill] sm:$0xff]  ;;  %v13921_v50 = vld [vmem:[#allocation249_spill] sm:$0xff] }
 0x3fd   : > { %v2969_v48 = vadd.f32 %v2968_v63, %v2815_v49  ;;  %v2818_v6 = vsel %vm2666_vm6, %v13885_v21, 0.0  ;;  %v13887_v44 = vunpack.c.l.bf16 %v13886_v46  ;;  %vm13888_vm12 = vcmp.lt.s32.totalorder %v9460_v13, 625  ;;  %v13917_v49 = vld [vmem:[#allocation113_spill] sm:$0xff]  ;;  %v13926_v21 = vld [vmem:[#allocation114_spill] sm:$0xff] }
 0x3fe   : > { %v2892_v51 = vadd.f32 %v2891_v36, %v2740_v9  ;;  %v13890_v40 = vunpack.c.h.bf16 %v13886_v46  ;;  %vm13891_vm5 = vcmp.lt.s32.totalorder %v9463_v29, 625  ;;  %v13894_v14 = vunpack.c.l.bf16 %v13893_v24  ;;  %v13919_v9 = vld [vmem:[#allocation274_spill] sm:$0xff] }
 0x3ff   : > { %v2970_v27 = vadd.f32 %v2969_v48, %v2816_v62  ;;  %v2819_v33 = vsel %vm13888_vm12, %v13887_v44, 0.0  ;;  %vm13895_vm6 = vcmp.lt.s32.totalorder %v9466_v20, 625  ;;  %v13897_v61 = vunpack.c.h.bf16 %v13893_v24  ;;  %v13923_v48 = vld [vmem:[#allocation53_spill] sm:$0xff]  ;;  %v13930_v46 = vld [vmem:[#allocation122_spill] sm:$0xff] }
 0x400   : > { %v2893_v45 = vadd.f32 %v2892_v51, %v2741_v22  ;;  %v2820_v16 = vsel %vm13891_vm5, %v13890_v40, 0.0  ;;  %v2821_v28 = vsel %vm13895_vm6, %v13894_v14, 0.0  ;;  %vm13898_vm10 = vcmp.lt.s32.totalorder %v9469_v17, 625  ;;  %v13934_v40 = vld [vmem:[#allocation49_spill] sm:$0xff] }
 0x401   : > { %v2971_v42 = vadd.f32 %v2970_v27, %v2817_v3  ;;  %v2822_v32 = vsel %vm13898_vm10, %v13897_v61, 0.0  ;;  %v13901_v54 = vunpack.c.l.bf16 %v13900_v58  ;;  %vm13902_vm2 = vcmp.lt.s32.totalorder %v9472_v38, 625  ;;  %v13925_v3 = vld [vmem:[#allocation121_spill] sm:$0xff]  ;;  %v13941_v61 = vld [vmem:[#allocation58_spill] sm:$0xff] }
 0x402   : > { %v2894_v12 = vadd.f32 %v2893_v45, %v13889_v31  ;;  %v13904_v19 = vunpack.c.h.bf16 %v13900_v58  ;;  %vm13906_vm7 = vcmp.lt.s32.totalorder %v13905_v41, 625  ;;  %v13909_v47 = vunpack.c.l.bf16 %v13908_v5  ;;  %v13928_v45 = vld [vmem:[#allocation55_spill] sm:$0xff]  ;;  %v13937_v24 = vld [vmem:[#allocation57_spill] sm:$0xff]  ;;  %v13944_v58 = vld [vmem:[#allocation116_spill] sm:$0xff] }
 0x403   : > { %v2972_v59 = vadd.f32 %v2971_v42, %v2818_v6  ;;  %v2823_v0 = vsel %vm13902_vm2, %v13901_v54, 0.0  ;;  %vm13911_vm12 = vcmp.lt.s32.totalorder %v13910_v11, 625  ;;  %v13913_v43 = vunpack.c.h.bf16 %v13908_v5 }
 0x404   : > { %v2895_v34 = vadd.f32 %v2894_v12, %v13892_v35  ;;  %v2824_v25 = vsel %vm13906_vm7, %v13904_v19, 0.0  ;;  %v2825_v15 = vsel %vm13911_vm12, %v13909_v47, 0.0  ;;  %vm13915_vm5 = vcmp.lt.s32.totalorder %v13914_v30, 625  ;;  %v13932_v12 = vld [vmem:[#allocation56_spill] sm:$0xff]  ;;  %v13953_v47 = vld [vmem:[#allocation117_spill] sm:$0xff] }
 0x405   : > { %v2973_v4 = vadd.f32 %v2972_v59, %v2819_v33  ;;  %v2826_v8 = vsel %vm13915_vm5, %v13913_v43, 0.0  ;;  %v13918_v26 = vunpack.c.l.bf16 %v13917_v49  ;;  %vm13920_vm6 = vcmp.lt.s32.totalorder %v13919_v9, 625 }
 0x406   : > { %v2896_v39 = vadd.f32 %v2895_v34, %v13896_v56  ;;  %v13922_v22 = vunpack.c.h.bf16 %v13917_v49  ;;  %vm13924_vm10 = vcmp.lt.s32.totalorder %v13923_v48, 625  ;;  %v13927_v6 = vunpack.c.l.bf16 %v13926_v21  ;;  %v13935_v34 = vld [vmem:[#allocation115_spill] sm:$0xff] }
 0x407   : > { %v2974_v13 = vadd.f32 %v2973_v4, %v2820_v16  ;;  %v2827_v63 = vsel %vm13920_vm6, %v13918_v26, 0.0  ;;  %vm13929_vm2 = vcmp.lt.s32.totalorder %v13928_v45, 625  ;;  %v13931_v31 = vunpack.c.h.bf16 %v13926_v21  ;;  %v13962_v26 = vld [vmem:[#allocation182_spill] sm:$0xff] }
 0x408   : > { %v2897_v7 = vadd.f32 %v2896_v39, %v13899_v23  ;;  %v2828_v10 = vsel %vm13924_vm10, %v13922_v22, 0.0  ;;  %v2829_v42 = vsel %vm13929_vm2, %v13927_v6, 0.0  ;;  %vm13933_vm7 = vcmp.lt.s32.totalorder %v13932_v12, 625  ;;  %v13943_v23 = vld [vmem:[#allocation227_spill] sm:$0xff] }
 0x409   : > { %v2975_v29 = vadd.f32 %v2974_v13, %v2821_v28  ;;  %v2830_v59 = vsel %vm13933_vm7, %v13931_v31, 0.0  ;;  %v13936_v4 = vunpack.c.l.bf16 %v13935_v34  ;;  %vm13938_vm12 = vcmp.lt.s32.totalorder %v13937_v24, 625  ;;  %v13939_v28 = vld [vmem:[#allocation255_spill] sm:$0xff] }
 0x40a   : > { %v2898_v57 = vadd.f32 %v2897_v7, %v13903_v55  ;;  %v13940_v13 = vunpack.c.h.bf16 %v13935_v34  ;;  %vm13942_vm5 = vcmp.lt.s32.totalorder %v13941_v61, 625  ;;  %v13945_v54 = vunpack.c.l.bf16 %v13944_v58  ;;  %v13971_v6 = vld [vmem:[#allocation187_spill] sm:$0xff] }
 0x40b   : > { %v2976_v20 = vadd.f32 %v2975_v29, %v2822_v32  ;;  %v2831_v14 = vsel %vm13938_vm12, %v13936_v4, 0.0  ;;  %v13949_v41 = vunpack.c.h.bf16 %v13944_v58  ;;  %v13954_v11 = vunpack.c.l.bf16 %v13953_v47  ;;  %v13980_v4 = vld [vmem:[#allocation191_spill] sm:$0xff] }
 0x40c   : > { %v2899_v2 = vadd.f32 %v2898_v57, %v13907_v53  ;;  %v2832_v32 = vsel %vm13942_vm5, %v13940_v13, 0.0  ;;  %v13948_v57 = vld [vmem:[#allocation123_spill] sm:$0xff]  ;;  %v13958_v30 = vunpack.c.h.bf16 %v13953_v47  ;;  %v13963_v9 = vunpack.c.l.bf16 %v13962_v26 }
 0x40d   : > { %v2977_v17 = vadd.f32 %v2976_v20, %v2823_v0  ;;  %v13946_v0 = vld [vmem:[#allocation59_spill] sm:$0xff]  ;;  %v13967_v48 = vunpack.c.h.bf16 %v13962_v26  ;;  %v13972_v45 = vunpack.c.l.bf16 %v13971_v6  ;;  %v13976_v12 = vunpack.c.h.bf16 %v13971_v6 }
 0x40e   : > { %v2900_v52 = vadd.f32 %v2899_v2, %v13912_v37  ;;  %vm13947_vm6 = vcmp.lt.s32.totalorder %v13946_v0, 625  ;;  %v13952_v2 = vld [vmem:[#allocation174_spill] sm:$0xff]  ;;  %v13981_v24 = vunpack.c.l.bf16 %v13980_v4  ;;  %v13985_v61 = vunpack.c.h.bf16 %v13980_v4 }
 0x40f   : > { %v2978_v38 = vadd.f32 %v2977_v17, %v2824_v25  ;;  %v2833_v55 = vsel %vm13947_vm6, %v13945_v54, 0.0  ;;  %v13950_v25 = vld [vmem:[#allocation60_spill] sm:$0xff]  ;;  %v13989_v54 = vld [vmem:[#allocation193_spill] sm:$0xff] }
 0x410   : > { %v2901_v1 = vadd.f32 %v2900_v52, %v13916_v18  ;;  %vm13951_vm10 = vcmp.lt.s32.totalorder %v13950_v25, 625  ;;  %v13957_v52 = vld [vmem:[#allocation124_spill] sm:$0xff]  ;;  %v13990_v0 = vunpack.c.l.bf16 %v13989_v54  ;;  %v13994_v25 = vunpack.c.h.bf16 %v13989_v54 }
 0x411   : > { %v2979_v60 = vadd.f32 %v2978_v38, %v2825_v15  ;;  %v2834_v53 = vsel %vm13951_vm10, %v13949_v41, 0.0  ;;  %v13955_v15 = vld [vmem:[#allocation61_spill] sm:$0xff] }
 0x412   : > { %v2902_v62 = vadd.f32 %v2901_v1, %v13921_v50  ;;  %vm13956_vm2 = vcmp.lt.s32.totalorder %v13955_v15, 625  ;;  %v13961_v1 = vld [vmem:[#allocation321_spill] sm:$0xff] }
 0x413   : > { %v2980_v36 = vadd.f32 %v2979_v60, %v2826_v8  ;;  %v2835_v37 = vsel %vm13956_vm2, %v13954_v11, 0.0  ;;  %v13959_v8 = vld [vmem:[#allocation62_spill] sm:$0xff] }
 0x414   : > { %v2903_v51 = vadd.f32 %v2902_v62, %v13925_v3  ;;  %vm13960_vm7 = vcmp.lt.s32.totalorder %v13959_v8, 625  ;;  %v13966_v62 = vld [vmem:[#allocation38_spill] sm:$0xff] }
 0x415   : > { %v2981_v27 = vadd.f32 %v2980_v36, %v2827_v63  ;;  %v2836_v18 = vsel %vm13960_vm7, %v13958_v30, 0.0  ;;  %v13964_v63 = vld [vmem:[#allocation63_spill] sm:$0xff]  ;;  %v13998_v11 = vld [vmem:[#allocation194_spill] sm:$0xff] }
 0x416   : > { %v2904_v44 = vadd.f32 %v2903_v51, %v13930_v46  ;;  %vm13965_vm12 = vcmp.lt.s32.totalorder %v13964_v63, 625  ;;  %v13970_v51 = vld [vmem:[#allocation323_spill] sm:$0xff]  ;;  %v13999_v15 = vunpack.c.l.bf16 %v13998_v11  ;;  %v14003_v8 = vunpack.c.h.bf16 %v13998_v11 }
 0x417   : > { %v2982_v33 = vadd.f32 %v2981_v27, %v2828_v10  ;;  %v2837_v50 = vsel %vm13965_vm12, %v13963_v9, 0.0  ;;  %v13968_v10 = vld [vmem:[#allocation64_spill] sm:$0xff]  ;;  %v14007_v9 = vld [vmem:[#allocation195_spill] sm:$0xff] }
 0x418   : > { %v2905_v16 = vadd.f32 %v2904_v44, %v13934_v40  ;;  %vm13969_vm5 = vcmp.lt.s32.totalorder %v13968_v10, 625  ;;  %v13975_v44 = vld [vmem:[#allocation125_spill] sm:$0xff]  ;;  %v14008_v63 = vunpack.c.l.bf16 %v14007_v9  ;;  %v14012_v10 = vunpack.c.h.bf16 %v14007_v9 }
 0x419   : > { %v2983_v35 = vadd.f32 %v2982_v33, %v2829_v42  ;;  %v2838_v3 = vsel %vm13969_vm5, %v13967_v48, 0.0  ;;  %v13973_v42 = vld [vmem:[#allocation65_spill] sm:$0xff] }
 0x41a   : > { %v2906_v56 = vadd.f32 %v2905_v16, %v13939_v28  ;;  %vm13974_vm6 = vcmp.lt.s32.totalorder %v13973_v42, 625  ;;  %v13979_v16 = vld [vmem:[#allocation327_spill] sm:$0xff] }
 0x41b   : > { %v2984_v39 = vadd.f32 %v2983_v35, %v2830_v59  ;;  %v2839_v46 = vsel %vm13974_vm6, %v13972_v45, 0.0  ;;  %v13977_v59 = vld [vmem:[#allocation66_spill] sm:$0xff]  ;;  %v14016_v45 = vld [vmem:[#allocation196_spill] sm:$0xff] }
 0x41c   : > { %v2907_v7 = vadd.f32 %v2906_v56, %v13943_v23  ;;  %vm13978_vm10 = vcmp.lt.s32.totalorder %v13977_v59, 625  ;;  %v13984_v56 = vld [vmem:[#allocation35_spill] sm:$0xff]  ;;  %v14017_v42 = vunpack.c.l.bf16 %v14016_v45  ;;  %v14021_v59 = vunpack.c.h.bf16 %v14016_v45 }
 0x41d   : > { %v2985_v29 = vadd.f32 %v2984_v39, %v2831_v14  ;;  %v2840_v40 = vsel %vm13978_vm10, %v13976_v12, 0.0  ;;  %v13982_v14 = vld [vmem:[#allocation67_spill] sm:$0xff] }
 0x41e   : > { %v2908_v20 = vadd.f32 %v2907_v7, %v13948_v57  ;;  %vm13983_vm2 = vcmp.lt.s32.totalorder %v13982_v14, 625  ;;  %v13988_v7 = vld [vmem:[#allocation37_spill] sm:$0xff] }
 0x41f   : > { %v2986_v19 = vadd.f32 %v2985_v29, %v2832_v32  ;;  %v2841_v28 = vsel %vm13983_vm2, %v13981_v24, 0.0  ;;  %v13986_v32 = vld [vmem:[#allocation68_spill] sm:$0xff]  ;;  %v14025_v24 = vld [vmem:[#allocation197_spill] sm:$0xff] }
 0x420   : > { %v2909_v17 = vadd.f32 %v2908_v20, %v13952_v2  ;;  %vm13987_vm7 = vcmp.lt.s32.totalorder %v13986_v32, 625  ;;  %v13993_v20 = vld [vmem:[#allocation202_spill] sm:$0xff]  ;;  %v14026_v14 = vunpack.c.l.bf16 %v14025_v24  ;;  %v14029_v32 = vunpack.c.h.bf16 %v14025_v24 }
 0x421   : > { %v2987_v5 = vadd.f32 %v2986_v19, %v2833_v55  ;;  %v2842_v23 = vsel %vm13987_vm7, %v13985_v61, 0.0  ;;  %v13991_v55 = vld [vmem:[#allocation69_spill] sm:$0xff]  ;;  %v2861_v24 = vld [vmem:[#allocation9] sm:$0xff] }
 0x422   : > { %v2910_v38 = vadd.f32 %v2909_v17, %v13957_v52  ;;  %vm13992_vm12 = vcmp.lt.s32.totalorder %v13991_v55, 625  ;;  %v13997_v17 = vld [vmem:[#allocation324_spill] sm:$0xff] }
 0x423   : > { %v2988_v43 = vadd.f32 %v2987_v5, %v2834_v53  ;;  %v2843_v57 = vsel %vm13992_vm12, %v13990_v0, 0.0  ;;  %v13995_v53 = vld [vmem:[#allocation70_spill] sm:$0xff] }
 0x424   : > { %v2911_v60 = vadd.f32 %v2910_v38, %v13961_v1  ;;  %vm13996_vm5 = vcmp.lt.s32.totalorder %v13995_v53, 625  ;;  %v14002_v38 = vld [vmem:[#allocation43_spill] sm:$0xff]  ;;  %v14032_v0 = vld [vmem:[#allocation198_spill] sm:$0xff] }
 0x425   : > { %v2989_v49 = vadd.f32 %v2988_v43, %v2835_v37  ;;  %v2844_v2 = vsel %vm13996_vm5, %v13994_v25, 0.0  ;;  %v14000_v37 = vld [vmem:[#allocation71_spill] sm:$0xff]  ;;  %v14033_v55 = vunpack.c.l.bf16 %v14032_v0  ;;  %v14036_v53 = vunpack.c.h.bf16 %v14032_v0 }
 0x426   : > { %v2912_v36 = vadd.f32 %v2911_v60, %v13966_v62  ;;  %vm14001_vm6 = vcmp.lt.s32.totalorder %v14000_v37, 625  ;;  %v14006_v60 = vld [vmem:[#allocation325_spill] sm:$0xff] }
 0x427   : > { %v2990_v22 = vadd.f32 %v2989_v49, %v2836_v18  ;;  %v2845_v52 = vsel %vm14001_vm6, %v13999_v15, 0.0  ;;  %v14004_v18 = vld [vmem:[#allocation72_spill] sm:$0xff]  ;;  %v14039_v15 = vld [vmem:[#allocation199_spill] sm:$0xff] }
 0x428   : > { %v2913_v27 = vadd.f32 %v2912_v36, %v13970_v51  ;;  %vm14005_vm10 = vcmp.lt.s32.totalorder %v14004_v18, 625  ;;  %v14011_v36 = vld [vmem:[#allocation126_spill] sm:$0xff]  ;;  %v14040_v37 = vunpack.c.l.bf16 %v14039_v15  ;;  %v14043_v18 = vunpack.c.h.bf16 %v14039_v15 }
 0x429   : > { %v2991_v21 = vadd.f32 %v2990_v22, %v2837_v50  ;;  %v2846_v1 = vsel %vm14005_vm10, %v14003_v8, 0.0  ;;  %v14009_v50 = vld [vmem:[#allocation73_spill] sm:$0xff] }
 0x42a   : > { %v2914_v33 = vadd.f32 %v2913_v27, %v13975_v44  ;;  %vm14010_vm2 = vcmp.lt.s32.totalorder %v14009_v50, 625  ;;  %v14015_v27 = vld [vmem:[#allocation330_spill] sm:$0xff] }
 0x42b   : > { %v2992_v31 = vadd.f32 %v2991_v21, %v2838_v3  ;;  %v2847_v62 = vsel %vm14010_vm2, %v14008_v63, 0.0  ;;  %v14013_v3 = vld [vmem:[#allocation74_spill] sm:$0xff]  ;;  %v14046_v63 = vld [vmem:[#allocation200_spill] sm:$0xff] }
 0x42c   : > { %v2915_v35 = vadd.f32 %v2914_v33, %v13979_v16  ;;  %vm14014_vm7 = vcmp.lt.s32.totalorder %v14013_v3, 625  ;;  %v14020_v33 = vld [vmem:[#allocation264_spill] sm:$0xff]  ;;  %v14047_v50 = vunpack.c.l.bf16 %v14046_v63  ;;  %v14050_v3 = vunpack.c.h.bf16 %v14046_v63 }
 0x42d   : > { %v2993_v34 = vadd.f32 %v2992_v31, %v2839_v46  ;;  %v2848_v51 = vsel %vm14014_vm7, %v14012_v10, 0.0  ;;  %v14018_v46 = vld [vmem:[#allocation75_spill] sm:$0xff] }
 0x42e   : > { %v2916_v39 = vadd.f32 %v2915_v35, %v13984_v56  ;;  %vm14019_vm12 = vcmp.lt.s32.totalorder %v14018_v46, 625  ;;  %v14024_v35 = vld [vmem:[#allocation130_spill] sm:$0xff]  ;;  %v2851_v56 = vsel %vm2699_vm4, %v14026_v14, 0.0 }
 0x42f   : > { %v2994_v13 = vadd.f32 %v2993_v34, %v2840_v40  ;;  %v2849_v44 = vsel %vm14019_vm12, %v14017_v42, 0.0  ;;  %v14022_v40 = vld [vmem:[#allocation76_spill] sm:$0xff]  ;;  %v14053_v42 = vld [vmem:[#allocation29_spill] sm:$0xff] }
 0x430   : > { %v2917_v29 = vadd.f32 %v2916_v39, %v13988_v7  ;;  %vm14023_vm5 = vcmp.lt.s32.totalorder %v14022_v40, 625  ;;  %v14028_v39 = vld [vmem:[#allocation257_spill] sm:$0xff]  ;;  %v2852_v7 = vsel %vm2700_vm13, %v14029_v32, 0.0  ;;  %v14054_v46 = vunpack.c.l.bf16 %v14053_v42 }
 0x431   : > { %v2995_v58 = vadd.f32 %v2994_v13, %v2841_v28  ;;  %v2850_v16 = vsel %vm14023_vm5, %v14021_v59, 0.0  ;;  %v14057_v40 = vunpack.c.h.bf16 %v14053_v42  ;;  %v14060_v28 = vld [vmem:[#allocation269_spill] sm:$0xff] }
 0x432   : > { %v2918_v19 = vadd.f32 %v2917_v29, %v13993_v20  ;;  %v14031_v29 = vld [vmem:[#allocation213_spill] sm:$0xff]  ;;  %v2853_v20 = vsel %vm2701_vm0, %v14033_v55, 0.0 }
 0x433   : > { %v2996_v41 = vadd.f32 %v2995_v58, %v2842_v23 }
 0x434   : > { %v2919_v5 = vadd.f32 %v2918_v19, %v13997_v17  ;;  %v14035_v19 = vld [vmem:[#allocation267_spill] sm:$0xff]  ;;  %v2854_v17 = vsel %vm2702_vm3, %v14036_v53, 0.0 }
 0x435   : > { %v2997_v47 = vadd.f32 %v2996_v41, %v2843_v57 }
 0x436   : > { %v2920_v43 = vadd.f32 %v2919_v5, %v14002_v38  ;;  %v14038_v5 = vld [vmem:[#allocation131_spill] sm:$0xff]  ;;  %v2855_v38 = vsel %vm2703_vm11, %v14040_v37, 0.0 }
 0x437   : > { %v2998_v30 = vadd.f32 %v2997_v47, %v2844_v2 }
 0x438   : > { %v2921_v49 = vadd.f32 %v2920_v43, %v14006_v60  ;;  %v14042_v43 = vld [vmem:[#allocation258_spill] sm:$0xff]  ;;  %v2856_v60 = vsel %vm2704_vm14, %v14043_v18, 0.0 }
 0x439   : > { %v2999_v26 = vadd.f32 %v2998_v30, %v2845_v52 }
 0x43a   : > { %v2922_v22 = vadd.f32 %v2921_v49, %v14011_v36  ;;  %v14045_v49 = vld [vmem:[#allocation216_spill] sm:$0xff]  ;;  %v2857_v36 = vsel %vm2705_vm15, %v14047_v50, 0.0 }
 0x43b   : > { %v3000_v48 = vadd.f32 %v2999_v26, %v2846_v1 }
 0x43c   : > { %v2923_v21 = vadd.f32 %v2922_v22, %v14015_v27  ;;  %v14049_v22 = vld [vmem:[#allocation268_spill] sm:$0xff]  ;;  %v2858_v27 = vsel %vm2706_vm8, %v14050_v3, 0.0 }
 0x43d   : > { %v3001_v6 = vadd.f32 %v3000_v48, %v2847_v62 }
 0x43e   : > { %v2924_v31 = vadd.f32 %v2923_v21, %v14020_v33  ;;  %v14052_v21 = vld [vmem:[#allocation132_spill] sm:$0xff]  ;;  %v2859_v33 = vsel %vm2707_vm1, %v14054_v46, 0.0 }
 0x43f   : > { %v3002_v12 = vadd.f32 %v3001_v6, %v2848_v51 }
 0x440   : > { %v2925_v34 = vadd.f32 %v2924_v31, %v14024_v35  ;;  %v14056_v31 = vld [vmem:[#allocation133_spill] sm:$0xff]  ;;  %v2860_v35 = vsel %vm2708_vm9, %v14057_v40, 0.0 }
 0x441   : > { %v3003_v4 = vadd.f32 %v3002_v12, %v2849_v44 }
 0x442   : > { %v2926_v13 = vadd.f32 %v2925_v34, %v14028_v39  ;;  %v14059_v34 = vld [vmem:[#allocation220_spill] sm:$0xff]  ;;  %v2939_v39 = vld [vmem:[#allocation10] sm:$0xff] }
 0x443   : > { %v3004_v61 = vadd.f32 %v3003_v4, %v2850_v16 }
 0x444   : > { %v2927_v58 = vadd.f32 %v2926_v13, %v14031_v29 }
 0x445   : > { %v3005_v54 = vadd.f32 %v3004_v61, %v2851_v56 }
 0x446   : > { %v2928_v41 = vadd.f32 %v2927_v58, %v14035_v19 }
 0x447   : > { %v3006_v25 = vadd.f32 %v3005_v54, %v2852_v7 }
 0x448   : > { %v2929_v47 = vadd.f32 %v2928_v41, %v14038_v5 }
 0x449   : > { %v3007_v11 = vadd.f32 %v3006_v25, %v2853_v20 }
 0x44a   : > { %v2930_v30 = vadd.f32 %v2929_v47, %v14042_v43 }
 0x44b   : > { %v3008_v8 = vadd.f32 %v3007_v11, %v2854_v17 }
 0x44c   : > { %v2931_v26 = vadd.f32 %v2930_v30, %v14045_v49 }
 0x44d   : > { %v3009_v9 = vadd.f32 %v3008_v8, %v2855_v38 }
 0x44e   : > { %v2932_v48 = vadd.f32 %v2931_v26, %v14049_v22 }
 0x44f   : > { %v3010_v10 = vadd.f32 %v3009_v9, %v2856_v60 }
 0x450   : > { %v2933_v6 = vadd.f32 %v2932_v48, %v14052_v21 }
 0x451   : > { %v3011_v45 = vadd.f32 %v3010_v10, %v2857_v36 }
 0x452   : > { %v2934_v12 = vadd.f32 %v2933_v6, %v14056_v31 }
 0x453   : > { %v3012_v59 = vadd.f32 %v3011_v45, %v2858_v27 }
 0x454   : > { %v2935_v4 = vadd.f32 %v2934_v12, %v14059_v34 }
 0x455   : > { %v3013_v14 = vadd.f32 %v3012_v59, %v2859_v33 }
 0x456   : > { %v2936_v56 = vadd.f32 %v2935_v4, %v14060_v28 }
 0x457   : > { %v3014_v13 = vadd.f32 %v3013_v14, %v2860_v35 }
 0x458   : > { %v2937_v61 = vadd.f32 %v2936_v56, %v2861_v24 }
 0x459   : > { %v3015_v32 = vadd.f32 %v3014_v13, %v2939_v39 }
 0x45a   : > { %2938 = vst [vmem:[#allocation9] sm:$0xff] %v2937_v61 }
 0x45b   : > { %3016 = vst [vmem:[#allocation10] sm:$0xff] %v3015_v32 }
 0x45c   : > { %4085 = shalt.err (!%p4082_p11)
}
 0x45d   : > { %s4086_s15 = scalar_lea.hbm %s10780_s4, 128 }
 0x45e   : > { %p4087_p0 = scmp.ne.s32.totalorder %s10780_s4, %s4086_s15  ;;  %p4092_p12 = scmp.lt.u32.totalorder %s4086_s15, %s10780_s4 }
 0x460   : > { %p4088_p1 = pnand %p4087_p0, %p3563_p6 }
 0x462   : > { %p4089_p13 = pneg %p4088_p1 }
 0x464   : > { %p4094_p2 = pnand %p4092_p12, %p4089_p13 }
 0x466   : > { %4097 = shalt.err (!%p4094_p2)
}
 0x467   : > { %3556 = dma.vmem_to_hbm [thread:$0]  (%p3563_p6), %s3025_s11, 128, %s10780_s4, [#allocation5]  }
 0x468   : > { %s4098_s16 = scalar_lea.vmem %s10712_s6, 128  ;;  %p4105_p8 = scmp.lt.s32.totalorder %s10712_s6, %s10712_s6 }
 0x469   : > { %p4099_p4 = scmp.ne.s32.totalorder %s10712_s6, %s4098_s16  ;;  %p4106_p10 = scmp.lt.s32.totalorder %s4098_s16, %s4098_s16 }
 0x46b   : > { %p4100_p3 = pnand %p4099_p4, %p3563_p6  ;;  %p4107_p5 = por %p4106_p10, %p4105_p8 }
 0x46d   : > { %p4101_p7 = pneg %p4100_p3 }
 0x46f   : > { %p4108_p9 = pnand %p4107_p5, %p4101_p7 }
 0x471   : > { %4111 = shalt.err (!%p4108_p9)
}
 0x472   : > { %s4112_s18 = scalar_lea.hbm %s10781_s5, 128 }
 0x473   : > { %p4113_p11 = scmp.ne.s32.totalorder %s10781_s5, %s4112_s18  ;;  %p4118_p13 = scmp.lt.u32.totalorder %s4112_s18, %s10781_s5 }
 0x475   : > { %p4114_p0 = pnand %p4113_p11, %p3563_p6 }
 0x477   : > { %p4115_p1 = pneg %p4114_p0 }
 0x479   : > { %p4120_p12 = pnand %p4118_p13, %p4115_p1 }
 0x47b   : > { %4123 = shalt.err (!%p4120_p12)
}
 0x47c   : > { %3558 = dma.vmem_to_hbm [thread:$0]  (%p3563_p6), %s10712_s6, 128, %s10781_s5, [#allocation11]  }
 0x47d   : > { %4149 = dma.done.wait (%p3563_p6), [#allocation5], 128  }
 0x47e   : > { %4151 = vsyncadd (%p3563_p6), [#allocation5], 4294967168 }
 0x47f   : > { %4153 = dma.done.wait (%p3563_p6), [#allocation11], 128  }
 0x480   : > { %4155 = vsyncadd (%p3563_p6), [#allocation11], 4294967168 }
 0x481 PF: > { %p22_p2 = scmp.ge.s32.totalorder %s4239_s24, 4   ;;  %s14061_s20 = smov %s4162_s21 }
 0x482   : > { %s14062_s21 = smov %s4166_s22  ;;  %s14063_s22 = smov %s4249_s27 }
 0x483   : > { %s14064_s23 = smov %s4239_s24  ;;  %24 = sbr.rel (!%p22_p2) target bundleno = 9 (0x9), region = 109 }
 0x48a   :  { %3052 = vsyncpa [#allocation4], 1 }
 0x48b   :  { %3054 = vsyncpa [#allocation4 + $0x1], 1 }
 0x48c   :  { %3055 = vsyncpa [#allocation7], 1 }
 0x48d   :  { %3057 = vsyncpa [#allocation7 + $0x1], 1 }
 0x48e   :  { %3058 = vsyncpa [#allocation5], 1 }
 0x48f   :  { %3060 = vsyncpa [#allocation5 + $0x1], 1 }
 0x490   :  { %3061 = vsyncpa [#allocation11], 1 }

</bundles_post_ra>
